<compile_context>
chip_gen: v7x
topology: tpu7x:2x2x1
jax: 0.10.0
libtpu: 0.0.40
codegen_flags: <defaults>
</compile_context>

<pallas_src>
import functools

import jax
import jax.numpy as jnp
from jax.experimental import pallas as pl
from jax.experimental.pallas import tpu as pltpu

LEAKY_SLOPE = 0.2


def _ch_pad(c):
    """Round a channel count up to a multiple of 8 (sublane-friendly)."""
    return max(8, ((c + 7) // 8) * 8)


# ----------------------------------------------------------------------------
# In-kernel 3x3 conv helper: reads a zero-padded (H+2, W+2, Cin) VMEM scratch,
# returns the (H, W, Cout) f32 result (bias + optional LeakyReLU fused).
# ----------------------------------------------------------------------------
def _conv3x3_from_padded(src_ref, w_ref, b_ref, *, H, W, cin, cout, activate):
    acc = jnp.zeros((H * W, cout), jnp.float32)
    for dy in range(3):
        for dx in range(3):
            tap = src_ref[dy:dy + H, dx:dx + W, :]              # (H, W, cin)
            lhs = tap.reshape(H * W, cin).astype(jnp.bfloat16)
            acc = acc + jnp.dot(lhs, w_ref[dy, dx],
                                preferred_element_type=jnp.float32)
    z = acc + b_ref[...]                                        # (1, cout) bcast
    if activate:
        z = jnp.where(z > 0, z, LEAKY_SLOPE * z)
    return z.reshape(H, W, cout)


# ----------------------------------------------------------------------------
# Kernel A: single conv layer (initial / final conv; no activation).
# ----------------------------------------------------------------------------
def _conv_layer_kernel(x_ref, w_ref, b_ref, o_ref, xpad,
                       *, H, W, cin, cout, activate):
    xpad[...] = jnp.zeros_like(xpad)                 # zero-padded border
    xpad[1:H + 1, 1:W + 1, :] = x_ref[0]
    z = _conv3x3_from_padded(xpad, w_ref, b_ref,
                             H=H, W=W, cin=cin, cout=cout, activate=activate)
    o_ref[0] = z.astype(o_ref.dtype)


def conv3x3_layer(x_nhwc, w, b, *, activate=False):
    """x: (N,H,W,Cin) f32, w: (3,3,Cin,Cout) bf16, b: (1,Cout) f32."""
    N, H, W, cin = x_nhwc.shape
    cout = w.shape[-1]
    kernel = functools.partial(_conv_layer_kernel, H=H, W=W, cin=cin,
                               cout=cout, activate=activate)
    return pl.pallas_call(
        kernel,
        out_shape=jax.ShapeDtypeStruct((N, H, W, cout), jnp.float32),
        grid=(N,),
        in_specs=[
            pl.BlockSpec((1, H, W, cin), lambda n: (n, 0, 0, 0)),
            pl.BlockSpec((3, 3, cin, cout), lambda n: (0, 0, 0, 0)),
            pl.BlockSpec((1, cout), lambda n: (0, 0)),
        ],
        out_specs=pl.BlockSpec((1, H, W, cout), lambda n: (n, 0, 0, 0)),
        scratch_shapes=[pltpu.VMEM((H + 2, W + 2, cin), jnp.float32)],
        compiler_params=pltpu.CompilerParams(
            dimension_semantics=("parallel",)),
    )(x_nhwc, w, b)


# ----------------------------------------------------------------------------
# Kernel B: one fused RRDB block.
#   out = x + conv3(lrelu(conv2(lrelu(conv1(x)))))
# Intermediate feature maps live only in the two padded VMEM scratches.
# ----------------------------------------------------------------------------
def _rrdb_kernel(x_ref, w1_ref, b1_ref, w2_ref, b2_ref, w3_ref, b3_ref,
                 o_ref, s1, s2, *, H, W, C):
    s1[...] = jnp.zeros_like(s1)
    s2[...] = jnp.zeros_like(s2)
    x = x_ref[0]                                                 # (H, W, C)
    s1[1:H + 1, 1:W + 1, :] = x
    f1 = _conv3x3_from_padded(s1, w1_ref, b1_ref, H=H, W=W, cin=C, cout=C,
                              activate=True)
    s2[1:H + 1, 1:W + 1, :] = f1
    f2 = _conv3x3_from_padded(s2, w2_ref, b2_ref, H=H, W=W, cin=C, cout=C,
                              activate=True)
    s1[1:H + 1, 1:W + 1, :] = f2
    f3 = _conv3x3_from_padded(s1, w3_ref, b3_ref, H=H, W=W, cin=C, cout=C,
                              activate=False)
    o_ref[0] = (x + f3).astype(o_ref.dtype)


def rrdb_block(x_nhwc, block_params):
    N, H, W, C = x_nhwc.shape
    w1, b1, w2, b2, w3, b3 = block_params
    kernel = functools.partial(_rrdb_kernel, H=H, W=W, C=C)
    wspec = pl.BlockSpec((3, 3, C, C), lambda n: (0, 0, 0, 0))
    bspec = pl.BlockSpec((1, C), lambda n: (0, 0))
    iospec = pl.BlockSpec((1, H, W, C), lambda n: (n, 0, 0, 0))
    return pl.pallas_call(
        kernel,
        out_shape=jax.ShapeDtypeStruct((N, H, W, C), jnp.float32),
        grid=(N,),
        in_specs=[iospec, wspec, bspec, wspec, bspec, wspec, bspec],
        out_specs=iospec,
        scratch_shapes=[
            pltpu.VMEM((H + 2, W + 2, C), jnp.float32),
            pltpu.VMEM((H + 2, W + 2, C), jnp.float32),
        ],
        compiler_params=pltpu.CompilerParams(
            dimension_semantics=("parallel",)),
    )(x_nhwc, w1, b1, w2, b2, w3, b3)


# ----------------------------------------------------------------------------
# Parameters (PyTorch-style uniform fan-in init) and kernel-ready conversion.
# ----------------------------------------------------------------------------
def init_params(key, in_channels=3, num_rrdb=3):
    def conv_init(k, cout, cin, ksz=3):
        kw, kb = jax.random.split(k)
        bound = 1.0 / (cin * ksz * ksz) ** 0.5
        w = jax.random.uniform(kw, (cout, cin, ksz, ksz), jnp.float32,
                               -bound, bound)
        b = jax.random.uniform(kb, (cout,), jnp.float32, -bound, bound)
        return w, b

    keys = jax.random.split(key, 2 + 3 * num_rrdb)
    params = {"initial": conv_init(keys[0], 64, in_channels), "rrdb": []}
    for i in range(num_rrdb):
        params["rrdb"].append(
            [conv_init(keys[1 + 3 * i + j], 64, 64) for j in range(3)])
    params["final"] = conv_init(keys[-1], in_channels, 64)
    return params


def _prep_conv(w_torch, b, cin_pad=None, cout_pad=None):
    """(Cout,Cin,3,3) f32 -> (3,3,Cin',Cout') bf16; bias -> (1,Cout') f32."""
    w = jnp.transpose(w_torch, (2, 3, 1, 0))          # (kh, kw, Cin, Cout)
    if cin_pad is not None and cin_pad > w.shape[2]:
        w = jnp.pad(w, ((0, 0), (0, 0), (0, cin_pad - w.shape[2]), (0, 0)))
    if cout_pad is not None and cout_pad > w.shape[3]:
        b = jnp.pad(b, (0, cout_pad - w.shape[3]))
        w = jnp.pad(w, ((0, 0), (0, 0), (0, 0), (0, cout_pad - w.shape[3])))
    return w.astype(jnp.bfloat16), b.reshape(1, -1).astype(jnp.float32)


def prepare_params(params, in_channels=3):
    cpad = _ch_pad(in_channels)
    kp = {"initial": _prep_conv(*params["initial"], cin_pad=cpad), "rrdb": []}
    for block in params["rrdb"]:
        flat = []
        for (w, b) in block:
            wp, bp = _prep_conv(w, b)
            flat += [wp, bp]
        kp["rrdb"].append(tuple(flat))
    kp["final"] = _prep_conv(*params["final"], cout_pad=cpad)
    return kp


def generator_forward(kparams, img_nchw):
    in_channels = img_nchw.shape[1]
    cpad = _ch_pad(in_channels)
    x = jnp.transpose(img_nchw, (0, 2, 3, 1))              # NCHW -> NHWC
    x = jnp.pad(x, ((0, 0), (0, 0), (0, 0), (0, cpad - in_channels)))

    feat = conv3x3_layer(x, *kparams["initial"], activate=False)
    for block in kparams["rrdb"]:
        feat = rrdb_block(feat, block)
    out = conv3x3_layer(feat, *kparams["final"], activate=False)

    out = out[..., :in_channels]
    return jnp.transpose(out, (0, 3, 1, 2))                # NHWC -> NCHW


if __name__ == "__main__":
    key = jax.random.PRNGKey(0)
    pkey, xkey = jax.random.split(key)

    # Module defaults are in_channels=3, num_rrdb=23; use a small num_rrdb for
    # the smoke test (all RRDB calls share one compiled kernel anyway).
    params = init_params(pkey, in_channels=3, num_rrdb=3)
    kparams = prepare_params(params, in_channels=3)

    img = jax.random.normal(xkey, (2, 3, 16, 16), jnp.float32)

    fwd = jax.jit(functools.partial(generator_forward, kparams))
    out = fwd(img)
    jax.block_until_ready(out)

    # 3x3, stride-1, pad-1 convs preserve spatial size; channels back to 3.
    assert out.shape == (2, 3, 16, 16), out.shape
    assert bool(jnp.all(jnp.isfinite(out)))
    print("KERNEL_OK")
</pallas_src>

<mosaic_0001>
module attributes {stable_mosaic.version = 11 : i64} {
  func.func @_conv_layer_kernel(%arg0: i32, %arg1: memref<1x16x16x8xf32, #tpu.memory_space<vmem>>, %arg2: memref<3x3x8x64xbf16, #tpu.memory_space<vmem>>, %arg3: memref<1x64xf32, #tpu.memory_space<vmem>>, %arg4: memref<1x16x16x64xf32, #tpu.memory_space<vmem>>, %arg5: memref<18x18x8xf32, #tpu.memory_space<vmem>>) attributes {dimension_semantics = [#tpu.dimension_semantics<parallel>], iteration_bounds = array<i64: 2>, scalar_prefetch = 0 : i64, scratch_operands = 1 : i64, tpu.core_type = #tpu.core_type<tc>, window_params = [{transform_indices = @transform_0, window_bounds = array<i64: 1, 16, 16, 8>}, {pipeline_mode = #tpu.pipeline_mode<synchronous>, transform_indices = @transform_1, window_bounds = array<i64: 3, 3, 8, 64>}, {pipeline_mode = #tpu.pipeline_mode<synchronous>, transform_indices = @transform_2, window_bounds = array<i64: 1, 64>}, {transform_indices = @transform_3, window_bounds = array<i64: 1, 16, 16, 64>}]} {
    %cst = arith.constant 0.000000e+00 : f32
    %0 = vector.broadcast %cst : f32 to vector<18x18x8xf32>
    %c0 = arith.constant 0 : index
    %c0_0 = arith.constant 0 : index
    %c0_1 = arith.constant 0 : index
    %1 = vector.load %arg5[%c0, %c0_0, %c0_1] : memref<18x18x8xf32, #tpu.memory_space<vmem>>, vector<18x18x8xf32>
    tpu.vector_store %arg5[%c0, %c0_0, %c0_1], %0 {strides = array<i32>} : memref<18x18x8xf32, #tpu.memory_space<vmem>>, vector<18x18x8xf32>,
    %c0_2 = arith.constant 0 : index
    %c0_3 = arith.constant 0 : index
    %c0_4 = arith.constant 0 : index
    %c0_5 = arith.constant 0 : index
    %2 = vector.load %arg1[%c0_2, %c0_3, %c0_4, %c0_5] : memref<1x16x16x8xf32, #tpu.memory_space<vmem>>, vector<1x16x16x8xf32>
    %3 = vector.shape_cast %2 : vector<1x16x16x8xf32> to vector<16x16x8xf32>
    %c1 = arith.constant 1 : index
    %c1_6 = arith.constant 1 : index
    %c0_7 = arith.constant 0 : index
    %4 = vector.load %arg5[%c1, %c1_6, %c0_7] : memref<18x18x8xf32, #tpu.memory_space<vmem>>, vector<16x16x8xf32>
    tpu.vector_store %arg5[%c1, %c1_6, %c0_7], %3 {strides = array<i32>} : memref<18x18x8xf32, #tpu.memory_space<vmem>>, vector<16x16x8xf32>,
    %cst_8 = arith.constant 0.000000e+00 : f32
    %5 = vector.broadcast %cst_8 : f32 to vector<256x64xf32>
    %c0_9 = arith.constant 0 : index
    %c0_10 = arith.constant 0 : index
    %c0_11 = arith.constant 0 : index
    %6 = vector.load %arg5[%c0_9, %c0_10, %c0_11] : memref<18x18x8xf32, #tpu.memory_space<vmem>>, vector<16x16x8xf32>
    %7 = vector.shape_cast %6 : vector<16x16x8xf32> to vector<256x8xf32>
    %8 = arith.truncf %7 : vector<256x8xf32> to vector<256x8xbf16>
    %c0_12 = arith.constant 0 : index
    %c0_13 = arith.constant 0 : index
    %c0_14 = arith.constant 0 : index
    %c0_15 = arith.constant 0 : index
    %9 = vector.load %arg2[%c0_12, %c0_13, %c0_14, %c0_15] : memref<3x3x8x64xbf16, #tpu.memory_space<vmem>>, vector<1x1x8x64xbf16>
    %10 = vector.shape_cast %9 : vector<1x1x8x64xbf16> to vector<8x64xbf16>
    %cst_16 = arith.constant dense<0.000000e+00> : vector<256x64xf32>
    %11 = tpu.matmul %8, %10, %cst_16 {dimension_numbers = #tpu.dot_dimension_numbers<[1], [0], [0], [1], [0, 0, 1, 1], [], []>} : vector<256x8xbf16>, vector<8x64xbf16>, vector<256x64xf32> -> vector<256x64xf32>
    %12 = arith.addf %5, %11 : vector<256x64xf32>
    %c0_17 = arith.constant 0 : index
    %c1_18 = arith.constant 1 : index
    %c0_19 = arith.constant 0 : index
    %13 = vector.load %arg5[%c0_17, %c1_18, %c0_19] : memref<18x18x8xf32, #tpu.memory_space<vmem>>, vector<16x16x8xf32>
    %14 = vector.shape_cast %13 : vector<16x16x8xf32> to vector<256x8xf32>
    %15 = arith.truncf %14 : vector<256x8xf32> to vector<256x8xbf16>
    %c0_20 = arith.constant 0 : index
    %c1_21 = arith.constant 1 : index
    %c0_22 = arith.constant 0 : index
    %c0_23 = arith.constant 0 : index
    %16 = vector.load %arg2[%c0_20, %c1_21, %c0_22, %c0_23] : memref<3x3x8x64xbf16, #tpu.memory_space<vmem>>, vector<1x1x8x64xbf16>
    %17 = vector.shape_cast %16 : vector<1x1x8x64xbf16> to vector<8x64xbf16>
    %cst_24 = arith.constant dense<0.000000e+00> : vector<256x64xf32>
    %18 = tpu.matmul %15, %17, %cst_24 {dimension_numbers = #tpu.dot_dimension_numbers<[1], [0], [0], [1], [0, 0, 1, 1], [], []>} : vector<256x8xbf16>, vector<8x64xbf16>, vector<256x64xf32> -> vector<256x64xf32>
    %19 = arith.addf %12, %18 : vector<256x64xf32>
    %c0_25 = arith.constant 0 : index
    %c2 = arith.constant 2 : index
    %c0_26 = arith.constant 0 : index
    %20 = vector.load %arg5[%c0_25, %c2, %c0_26] : memref<18x18x8xf32, #tpu.memory_space<vmem>>, vector<16x16x8xf32>
    %21 = vector.shape_cast %20 : vector<16x16x8xf32> to vector<256x8xf32>
    %22 = arith.truncf %21 : vector<256x8xf32> to vector<256x8xbf16>
    %c0_27 = arith.constant 0 : index
    %c2_28 = arith.constant 2 : index
    %c0_29 = arith.constant 0 : index
    %c0_30 = arith.constant 0 : index
    %23 = vector.load %arg2[%c0_27, %c2_28, %c0_29, %c0_30] : memref<3x3x8x64xbf16, #tpu.memory_space<vmem>>, vector<1x1x8x64xbf16>
    %24 = vector.shape_cast %23 : vector<1x1x8x64xbf16> to vector<8x64xbf16>
    %cst_31 = arith.constant dense<0.000000e+00> : vector<256x64xf32>
    %25 = tpu.matmul %22, %24, %cst_31 {dimension_numbers = #tpu.dot_dimension_numbers<[1], [0], [0], [1], [0, 0, 1, 1], [], []>} : vector<256x8xbf16>, vector<8x64xbf16>, vector<256x64xf32> -> vector<256x64xf32>
    %26 = arith.addf %19, %25 : vector<256x64xf32>
    %c1_32 = arith.constant 1 : index
    %c0_33 = arith.constant 0 : index
    %c0_34 = arith.constant 0 : index
    %27 = vector.load %arg5[%c1_32, %c0_33, %c0_34] : memref<18x18x8xf32, #tpu.memory_space<vmem>>, vector<16x16x8xf32>
    %28 = vector.shape_cast %27 : vector<16x16x8xf32> to vector<256x8xf32>
    %29 = arith.truncf %28 : vector<256x8xf32> to vector<256x8xbf16>
    %c1_35 = arith.constant 1 : index
    %c0_36 = arith.constant 0 : index
    %c0_37 = arith.constant 0 : index
    %c0_38 = arith.constant 0 : index
    %30 = vector.load %arg2[%c1_35, %c0_36, %c0_37, %c0_38] : memref<3x3x8x64xbf16, #tpu.memory_space<vmem>>, vector<1x1x8x64xbf16>
    %31 = vector.shape_cast %30 : vector<1x1x8x64xbf16> to vector<8x64xbf16>
    %cst_39 = arith.constant dense<0.000000e+00> : vector<256x64xf32>
    %32 = tpu.matmul %29, %31, %cst_39 {dimension_numbers = #tpu.dot_dimension_numbers<[1], [0], [0], [1], [0, 0, 1, 1], [], []>} : vector<256x8xbf16>, vector<8x64xbf16>, vector<256x64xf32> -> vector<256x64xf32>
    %33 = arith.addf %26, %32 : vector<256x64xf32>
    %c1_40 = arith.constant 1 : index
    %c1_41 = arith.constant 1 : index
    %c0_42 = arith.constant 0 : index
    %34 = vector.load %arg5[%c1_40, %c1_41, %c0_42] : memref<18x18x8xf32, #tpu.memory_space<vmem>>, vector<16x16x8xf32>
    %35 = vector.shape_cast %34 : vector<16x16x8xf32> to vector<256x8xf32>
    %36 = arith.truncf %35 : vector<256x8xf32> to vector<256x8xbf16>
    %c1_43 = arith.constant 1 : index
    %c1_44 = arith.constant 1 : index
    %c0_45 = arith.constant 0 : index
    %c0_46 = arith.constant 0 : index
    %37 = vector.load %arg2[%c1_43, %c1_44, %c0_45, %c0_46] : memref<3x3x8x64xbf16, #tpu.memory_space<vmem>>, vector<1x1x8x64xbf16>
    %38 = vector.shape_cast %37 : vector<1x1x8x64xbf16> to vector<8x64xbf16>
    %cst_47 = arith.constant dense<0.000000e+00> : vector<256x64xf32>
    %39 = tpu.matmul %36, %38, %cst_47 {dimension_numbers = #tpu.dot_dimension_numbers<[1], [0], [0], [1], [0, 0, 1, 1], [], []>} : vector<256x8xbf16>, vector<8x64xbf16>, vector<256x64xf32> -> vector<256x64xf32>
    %40 = arith.addf %33, %39 : vector<256x64xf32>
    %c1_48 = arith.constant 1 : index
    %c2_49 = arith.constant 2 : index
    %c0_50 = arith.constant 0 : index
    %41 = vector.load %arg5[%c1_48, %c2_49, %c0_50] : memref<18x18x8xf32, #tpu.memory_space<vmem>>, vector<16x16x8xf32>
    %42 = vector.shape_cast %41 : vector<16x16x8xf32> to vector<256x8xf32>
    %43 = arith.truncf %42 : vector<256x8xf32> to vector<256x8xbf16>
    %c1_51 = arith.constant 1 : index
    %c2_52 = arith.constant 2 : index
    %c0_53 = arith.constant 0 : index
    %c0_54 = arith.constant 0 : index
    %44 = vector.load %arg2[%c1_51, %c2_52, %c0_53, %c0_54] : memref<3x3x8x64xbf16, #tpu.memory_space<vmem>>, vector<1x1x8x64xbf16>
    %45 = vector.shape_cast %44 : vector<1x1x8x64xbf16> to vector<8x64xbf16>
    %cst_55 = arith.constant dense<0.000000e+00> : vector<256x64xf32>
    %46 = tpu.matmul %43, %45, %cst_55 {dimension_numbers = #tpu.dot_dimension_numbers<[1], [0], [0], [1], [0, 0, 1, 1], [], []>} : vector<256x8xbf16>, vector<8x64xbf16>, vector<256x64xf32> -> vector<256x64xf32>
    %47 = arith.addf %40, %46 : vector<256x64xf32>
    %c2_56 = arith.constant 2 : index
    %c0_57 = arith.constant 0 : index
    %c0_58 = arith.constant 0 : index
    %48 = vector.load %arg5[%c2_56, %c0_57, %c0_58] : memref<18x18x8xf32, #tpu.memory_space<vmem>>, vector<16x16x8xf32>
    %49 = vector.shape_cast %48 : vector<16x16x8xf32> to vector<256x8xf32>
    %50 = arith.truncf %49 : vector<256x8xf32> to vector<256x8xbf16>
    %c2_59 = arith.constant 2 : index
    %c0_60 = arith.constant 0 : index
    %c0_61 = arith.constant 0 : index
    %c0_62 = arith.constant 0 : index
    %51 = vector.load %arg2[%c2_59, %c0_60, %c0_61, %c0_62] : memref<3x3x8x64xbf16, #tpu.memory_space<vmem>>, vector<1x1x8x64xbf16>
    %52 = vector.shape_cast %51 : vector<1x1x8x64xbf16> to vector<8x64xbf16>
    %cst_63 = arith.constant dense<0.000000e+00> : vector<256x64xf32>
    %53 = tpu.matmul %50, %52, %cst_63 {dimension_numbers = #tpu.dot_dimension_numbers<[1], [0], [0], [1], [0, 0, 1, 1], [], []>} : vector<256x8xbf16>, vector<8x64xbf16>, vector<256x64xf32> -> vector<256x64xf32>
    %54 = arith.addf %47, %53 : vector<256x64xf32>
    %c2_64 = arith.constant 2 : index
    %c1_65 = arith.constant 1 : index
    %c0_66 = arith.constant 0 : index
    %55 = vector.load %arg5[%c2_64, %c1_65, %c0_66] : memref<18x18x8xf32, #tpu.memory_space<vmem>>, vector<16x16x8xf32>
    %56 = vector.shape_cast %55 : vector<16x16x8xf32> to vector<256x8xf32>
    %57 = arith.truncf %56 : vector<256x8xf32> to vector<256x8xbf16>
    %c2_67 = arith.constant 2 : index
    %c1_68 = arith.constant 1 : index
    %c0_69 = arith.constant 0 : index
    %c0_70 = arith.constant 0 : index
    %58 = vector.load %arg2[%c2_67, %c1_68, %c0_69, %c0_70] : memref<3x3x8x64xbf16, #tpu.memory_space<vmem>>, vector<1x1x8x64xbf16>
    %59 = vector.shape_cast %58 : vector<1x1x8x64xbf16> to vector<8x64xbf16>
    %cst_71 = arith.constant dense<0.000000e+00> : vector<256x64xf32>
    %60 = tpu.matmul %57, %59, %cst_71 {dimension_numbers = #tpu.dot_dimension_numbers<[1], [0], [0], [1], [0, 0, 1, 1], [], []>} : vector<256x8xbf16>, vector<8x64xbf16>, vector<256x64xf32> -> vector<256x64xf32>
    %61 = arith.addf %54, %60 : vector<256x64xf32>
    %c2_72 = arith.constant 2 : index
    %c2_73 = arith.constant 2 : index
    %c0_74 = arith.constant 0 : index
    %62 = vector.load %arg5[%c2_72, %c2_73, %c0_74] : memref<18x18x8xf32, #tpu.memory_space<vmem>>, vector<16x16x8xf32>
    %63 = vector.shape_cast %62 : vector<16x16x8xf32> to vector<256x8xf32>
    %64 = arith.truncf %63 : vector<256x8xf32> to vector<256x8xbf16>
    %c2_75 = arith.constant 2 : index
    %c2_76 = arith.constant 2 : index
    %c0_77 = arith.constant 0 : index
    %c0_78 = arith.constant 0 : index
    %65 = vector.load %arg2[%c2_75, %c2_76, %c0_77, %c0_78] : memref<3x3x8x64xbf16, #tpu.memory_space<vmem>>, vector<1x1x8x64xbf16>
    %66 = vector.shape_cast %65 : vector<1x1x8x64xbf16> to vector<8x64xbf16>
    %cst_79 = arith.constant dense<0.000000e+00> : vector<256x64xf32>
    %67 = tpu.matmul %64, %66, %cst_79 {dimension_numbers = #tpu.dot_dimension_numbers<[1], [0], [0], [1], [0, 0, 1, 1], [], []>} : vector<256x8xbf16>, vector<8x64xbf16>, vector<256x64xf32> -> vector<256x64xf32>
    %68 = arith.addf %61, %67 : vector<256x64xf32>
    %c0_80 = arith.constant 0 : index
    %c0_81 = arith.constant 0 : index
    %69 = vector.load %arg3[%c0_80, %c0_81] : memref<1x64xf32, #tpu.memory_space<vmem>>, vector<1x64xf32>
    %70 = vector.broadcast %69 : vector<1x64xf32> to vector<256x64xf32>
    %71 = arith.addf %68, %70 : vector<256x64xf32>
    %72 = vector.shape_cast %71 : vector<256x64xf32> to vector<16x16x64xf32>
    %c0_82 = arith.constant 0 : index
    %c0_83 = arith.constant 0 : index
    %c0_84 = arith.constant 0 : index
    %c0_85 = arith.constant 0 : index
    %73 = vector.load %arg4[%c0_82, %c0_83, %c0_84, %c0_85] : memref<1x16x16x64xf32, #tpu.memory_space<vmem>>, vector<1x16x16x64xf32>
    %74 = vector.shape_cast %73 : vector<1x16x16x64xf32> to vector<16x16x64xf32>
    %75 = vector.shape_cast %72 : vector<16x16x64xf32> to vector<1x16x16x64xf32>
    tpu.vector_store %arg4[%c0_82, %c0_83, %c0_84, %c0_85], %75 {strides = array<i32>} : memref<1x16x16x64xf32, #tpu.memory_space<vmem>>, vector<1x16x16x64xf32>,
    return
  }
  func.func @transform_0(%arg0: i32) -> (i32, i32, i32, i32) {
    %c0_i32 = arith.constant 0 : i32
    %c0_i32_0 = arith.constant 0 : i32
    %c0_i32_1 = arith.constant 0 : i32
    %c0_i32_2 = arith.constant 0 : i32
    return %arg0, %c0_i32, %c0_i32_0, %c0_i32_1 : i32, i32, i32, i32
  }
  func.func @transform_1(%arg0: i32) -> (i32, i32, i32, i32) {
    %c0_i32 = arith.constant 0 : i32
    %c0_i32_0 = arith.constant 0 : i32
    %c0_i32_1 = arith.constant 0 : i32
    %c0_i32_2 = arith.constant 0 : i32
    %c0_i32_3 = arith.constant 0 : i32
    return %c0_i32, %c0_i32_0, %c0_i32_1, %c0_i32_2 : i32, i32, i32, i32
  }
  func.func @transform_2(%arg0: i32) -> (i32, i32) {
    %c0_i32 = arith.constant 0 : i32
    %c0_i32_0 = arith.constant 0 : i32
    %c0_i32_1 = arith.constant 0 : i32
    return %c0_i32, %c0_i32_0 : i32, i32
  }
  func.func @transform_3(%arg0: i32) -> (i32, i32, i32, i32) {
    %c0_i32 = arith.constant 0 : i32
    %c0_i32_0 = arith.constant 0 : i32
    %c0_i32_1 = arith.constant 0 : i32
    %c0_i32_2 = arith.constant 0 : i32
    return %arg0, %c0_i32, %c0_i32_0, %c0_i32_1 : i32, i32, i32, i32
  }
}

module attributes {stable_mosaic.version = 11 : i64} {
  func.func @_rrdb_kernel(%arg0: i32, %arg1: memref<1x16x16x64xf32, #tpu.memory_space<vmem>>, %arg2: memref<3x3x64x64xbf16, #tpu.memory_space<vmem>>, %arg3: memref<1x64xf32, #tpu.memory_space<vmem>>, %arg4: memref<3x3x64x64xbf16, #tpu.memory_space<vmem>>, %arg5: memref<1x64xf32, #tpu.memory_space<vmem>>, %arg6: memref<3x3x64x64xbf16, #tpu.memory_space<vmem>>, %arg7: memref<1x64xf32, #tpu.memory_space<vmem>>, %arg8: memref<1x16x16x64xf32, #tpu.memory_space<vmem>>, %arg9: memref<18x18x64xf32, #tpu.memory_space<vmem>>, %arg10: memref<18x18x64xf32, #tpu.memory_space<vmem>>) attributes {dimension_semantics = [#tpu.dimension_semantics<parallel>], iteration_bounds = array<i64: 2>, scalar_prefetch = 0 : i64, scratch_operands = 2 : i64, tpu.core_type = #tpu.core_type<tc>, window_params = [{transform_indices = @transform_0, window_bounds = array<i64: 1, 16, 16, 64>}, {pipeline_mode = #tpu.pipeline_mode<synchronous>, transform_indices = @transform_1, window_bounds = array<i64: 3, 3, 64, 64>}, {pipeline_mode = #tpu.pipeline_mode<synchronous>, transform_indices = @transform_2, window_bounds = array<i64: 1, 64>}, {pipeline_mode = #tpu.pipeline_mode<synchronous>, transform_indices = @transform_3, window_bounds = array<i64: 3, 3, 64, 64>}, {pipeline_mode = #tpu.pipeline_mode<synchronous>, transform_indices = @transform_4, window_bounds = array<i64: 1, 64>}, {pipeline_mode = #tpu.pipeline_mode<synchronous>, transform_indices = @transform_5, window_bounds = array<i64: 3, 3, 64, 64>}, {pipeline_mode = #tpu.pipeline_mode<synchronous>, transform_indices = @transform_6, window_bounds = array<i64: 1, 64>}, {transform_indices = @transform_7, window_bounds = array<i64: 1, 16, 16, 64>}]} {
    %cst = arith.constant 0.000000e+00 : f32
    %0 = vector.broadcast %cst : f32 to vector<18x18x64xf32>
    %c0 = arith.constant 0 : index
    %c0_0 = arith.constant 0 : index
    %c0_1 = arith.constant 0 : index
    %1 = vector.load %arg9[%c0, %c0_0, %c0_1] : memref<18x18x64xf32, #tpu.memory_space<vmem>>, vector<18x18x64xf32>
    tpu.vector_store %arg9[%c0, %c0_0, %c0_1], %0 {strides = array<i32>} : memref<18x18x64xf32, #tpu.memory_space<vmem>>, vector<18x18x64xf32>,
    %cst_2 = arith.constant 0.000000e+00 : f32
    %2 = vector.broadcast %cst_2 : f32 to vector<18x18x64xf32>
    %c0_3 = arith.constant 0 : index
    %c0_4 = arith.constant 0 : index
    %c0_5 = arith.constant 0 : index
    %3 = vector.load %arg10[%c0_3, %c0_4, %c0_5] : memref<18x18x64xf32, #tpu.memory_space<vmem>>, vector<18x18x64xf32>
    tpu.vector_store %arg10[%c0_3, %c0_4, %c0_5], %2 {strides = array<i32>} : memref<18x18x64xf32, #tpu.memory_space<vmem>>, vector<18x18x64xf32>,
    %c0_6 = arith.constant 0 : index
    %c0_7 = arith.constant 0 : index
    %c0_8 = arith.constant 0 : index
    %c0_9 = arith.constant 0 : index
    %4 = vector.load %arg1[%c0_6, %c0_7, %c0_8, %c0_9] : memref<1x16x16x64xf32, #tpu.memory_space<vmem>>, vector<1x16x16x64xf32>
    %5 = vector.shape_cast %4 : vector<1x16x16x64xf32> to vector<16x16x64xf32>
    %c1 = arith.constant 1 : index
    %c1_10 = arith.constant 1 : index
    %c0_11 = arith.constant 0 : index
    %6 = vector.load %arg9[%c1, %c1_10, %c0_11] : memref<18x18x64xf32, #tpu.memory_space<vmem>>, vector<16x16x64xf32>
    tpu.vector_store %arg9[%c1, %c1_10, %c0_11], %5 {strides = array<i32>} : memref<18x18x64xf32, #tpu.memory_space<vmem>>, vector<16x16x64xf32>,
    %cst_12 = arith.constant 0.000000e+00 : f32
    %7 = vector.broadcast %cst_12 : f32 to vector<256x64xf32>
    %c0_13 = arith.constant 0 : index
    %c0_14 = arith.constant 0 : index
    %c0_15 = arith.constant 0 : index
    %8 = vector.load %arg9[%c0_13, %c0_14, %c0_15] : memref<18x18x64xf32, #tpu.memory_space<vmem>>, vector<16x16x64xf32>
    %9 = vector.shape_cast %8 : vector<16x16x64xf32> to vector<256x64xf32>
    %10 = arith.truncf %9 : vector<256x64xf32> to vector<256x64xbf16>
    %c0_16 = arith.constant 0 : index
    %c0_17 = arith.constant 0 : index
    %c0_18 = arith.constant 0 : index
    %c0_19 = arith.constant 0 : index
    %11 = vector.load %arg2[%c0_16, %c0_17, %c0_18, %c0_19] : memref<3x3x64x64xbf16, #tpu.memory_space<vmem>>, vector<1x1x64x64xbf16>
    %12 = vector.shape_cast %11 : vector<1x1x64x64xbf16> to vector<64x64xbf16>
    %cst_20 = arith.constant dense<0.000000e+00> : vector<256x64xf32>
    %13 = tpu.matmul %10, %12, %cst_20 {dimension_numbers = #tpu.dot_dimension_numbers<[1], [0], [0], [1], [0, 0, 1, 1], [], []>} : vector<256x64xbf16>, vector<64x64xbf16>, vector<256x64xf32> -> vector<256x64xf32>
    %14 = arith.addf %7, %13 : vector<256x64xf32>
    %c0_21 = arith.constant 0 : index
    %c1_22 = arith.constant 1 : index
    %c0_23 = arith.constant 0 : index
    %15 = vector.load %arg9[%c0_21, %c1_22, %c0_23] : memref<18x18x64xf32, #tpu.memory_space<vmem>>, vector<16x16x64xf32>
    %16 = vector.shape_cast %15 : vector<16x16x64xf32> to vector<256x64xf32>
    %17 = arith.truncf %16 : vector<256x64xf32> to vector<256x64xbf16>
    %c0_24 = arith.constant 0 : index
    %c1_25 = arith.constant 1 : index
    %c0_26 = arith.constant 0 : index
    %c0_27 = arith.constant 0 : index
    %18 = vector.load %arg2[%c0_24, %c1_25, %c0_26, %c0_27] : memref<3x3x64x64xbf16, #tpu.memory_space<vmem>>, vector<1x1x64x64xbf16>
    %19 = vector.shape_cast %18 : vector<1x1x64x64xbf16> to vector<64x64xbf16>
    %cst_28 = arith.constant dense<0.000000e+00> : vector<256x64xf32>
    %20 = tpu.matmul %17, %19, %cst_28 {dimension_numbers = #tpu.dot_dimension_numbers<[1], [0], [0], [1], [0, 0, 1, 1], [], []>} : vector<256x64xbf16>, vector<64x64xbf16>, vector<256x64xf32> -> vector<256x64xf32>
    %21 = arith.addf %14, %20 : vector<256x64xf32>
    %c0_29 = arith.constant 0 : index
    %c2 = arith.constant 2 : index
    %c0_30 = arith.constant 0 : index
    %22 = vector.load %arg9[%c0_29, %c2, %c0_30] : memref<18x18x64xf32, #tpu.memory_space<vmem>>, vector<16x16x64xf32>
    %23 = vector.shape_cast %22 : vector<16x16x64xf32> to vector<256x64xf32>
    %24 = arith.truncf %23 : vector<256x64xf32> to vector<256x64xbf16>
    %c0_31 = arith.constant 0 : index
    %c2_32 = arith.constant 2 : index
    %c0_33 = arith.constant 0 : index
    %c0_34 = arith.constant 0 : index
    %25 = vector.load %arg2[%c0_31, %c2_32, %c0_33, %c0_34] : memref<3x3x64x64xbf16, #tpu.memory_space<vmem>>, vector<1x1x64x64xbf16>
    %26 = vector.shape_cast %25 : vector<1x1x64x64xbf16> to vector<64x64xbf16>
    %cst_35 = arith.constant dense<0.000000e+00> : vector<256x64xf32>
    %27 = tpu.matmul %24, %26, %cst_35 {dimension_numbers = #tpu.dot_dimension_numbers<[1], [0], [0], [1], [0, 0, 1, 1], [], []>} : vector<256x64xbf16>, vector<64x64xbf16>, vector<256x64xf32> -> vector<256x64xf32>
    %28 = arith.addf %21, %27 : vector<256x64xf32>
    %c1_36 = arith.constant 1 : index
    %c0_37 = arith.constant 0 : index
    %c0_38 = arith.constant 0 : index
    %29 = vector.load %arg9[%c1_36, %c0_37, %c0_38] : memref<18x18x64xf32, #tpu.memory_space<vmem>>, vector<16x16x64xf32>
    %30 = vector.shape_cast %29 : vector<16x16x64xf32> to vector<256x64xf32>
    %31 = arith.truncf %30 : vector<256x64xf32> to vector<256x64xbf16>
    %c1_39 = arith.constant 1 : index
    %c0_40 = arith.constant 0 : index
    %c0_41 = arith.constant 0 : index
    %c0_42 = arith.constant 0 : index
    %32 = vector.load %arg2[%c1_39, %c0_40, %c0_41, %c0_42] : memref<3x3x64x64xbf16, #tpu.memory_space<vmem>>, vector<1x1x64x64xbf16>
    %33 = vector.shape_cast %32 : vector<1x1x64x64xbf16> to vector<64x64xbf16>
    %cst_43 = arith.constant dense<0.000000e+00> : vector<256x64xf32>
    %34 = tpu.matmul %31, %33, %cst_43 {dimension_numbers = #tpu.dot_dimension_numbers<[1], [0], [0], [1], [0, 0, 1, 1], [], []>} : vector<256x64xbf16>, vector<64x64xbf16>, vector<256x64xf32> -> vector<256x64xf32>
    %35 = arith.addf %28, %34 : vector<256x64xf32>
    %c1_44 = arith.constant 1 : index
    %c1_45 = arith.constant 1 : index
    %c0_46 = arith.constant 0 : index
    %36 = vector.load %arg9[%c1_44, %c1_45, %c0_46] : memref<18x18x64xf32, #tpu.memory_space<vmem>>, vector<16x16x64xf32>
    %37 = vector.shape_cast %36 : vector<16x16x64xf32> to vector<256x64xf32>
    %38 = arith.truncf %37 : vector<256x64xf32> to vector<256x64xbf16>
    %c1_47 = arith.constant 1 : index
    %c1_48 = arith.constant 1 : index
    %c0_49 = arith.constant 0 : index
    %c0_50 = arith.constant 0 : index
    %39 = vector.load %arg2[%c1_47, %c1_48, %c0_49, %c0_50] : memref<3x3x64x64xbf16, #tpu.memory_space<vmem>>, vector<1x1x64x64xbf16>
    %40 = vector.shape_cast %39 : vector<1x1x64x64xbf16> to vector<64x64xbf16>
    %cst_51 = arith.constant dense<0.000000e+00> : vector<256x64xf32>
    %41 = tpu.matmul %38, %40, %cst_51 {dimension_numbers = #tpu.dot_dimension_numbers<[1], [0], [0], [1], [0, 0, 1, 1], [], []>} : vector<256x64xbf16>, vector<64x64xbf16>, vector<256x64xf32> -> vector<256x64xf32>
    %42 = arith.addf %35, %41 : vector<256x64xf32>
    %c1_52 = arith.constant 1 : index
    %c2_53 = arith.constant 2 : index
    %c0_54 = arith.constant 0 : index
    %43 = vector.load %arg9[%c1_52, %c2_53, %c0_54] : memref<18x18x64xf32, #tpu.memory_space<vmem>>, vector<16x16x64xf32>
    %44 = vector.shape_cast %43 : vector<16x16x64xf32> to vector<256x64xf32>
    %45 = arith.truncf %44 : vector<256x64xf32> to vector<256x64xbf16>
    %c1_55 = arith.constant 1 : index
    %c2_56 = arith.constant 2 : index
    %c0_57 = arith.constant 0 : index
    %c0_58 = arith.constant 0 : index
    %46 = vector.load %arg2[%c1_55, %c2_56, %c0_57, %c0_58] : memref<3x3x64x64xbf16, #tpu.memory_space<vmem>>, vector<1x1x64x64xbf16>
    %47 = vector.shape_cast %46 : vector<1x1x64x64xbf16> to vector<64x64xbf16>
    %cst_59 = arith.constant dense<0.000000e+00> : vector<256x64xf32>
    %48 = tpu.matmul %45, %47, %cst_59 {dimension_numbers = #tpu.dot_dimension_numbers<[1], [0], [0], [1], [0, 0, 1, 1], [], []>} : vector<256x64xbf16>, vector<64x64xbf16>, vector<256x64xf32> -> vector<256x64xf32>
    %49 = arith.addf %42, %48 : vector<256x64xf32>
    %c2_60 = arith.constant 2 : index
    %c0_61 = arith.constant 0 : index
    %c0_62 = arith.constant 0 : index
    %50 = vector.load %arg9[%c2_60, %c0_61, %c0_62] : memref<18x18x64xf32, #tpu.memory_space<vmem>>, vector<16x16x64xf32>
    %51 = vector.shape_cast %50 : vector<16x16x64xf32> to vector<256x64xf32>
    %52 = arith.truncf %51 : vector<256x64xf32> to vector<256x64xbf16>
    %c2_63 = arith.constant 2 : index
    %c0_64 = arith.constant 0 : index
    %c0_65 = arith.constant 0 : index
    %c0_66 = arith.constant 0 : index
    %53 = vector.load %arg2[%c2_63, %c0_64, %c0_65, %c0_66] : memref<3x3x64x64xbf16, #tpu.memory_space<vmem>>, vector<1x1x64x64xbf16>
    %54 = vector.shape_cast %53 : vector<1x1x64x64xbf16> to vector<64x64xbf16>
    %cst_67 = arith.constant dense<0.000000e+00> : vector<256x64xf32>
    %55 = tpu.matmul %52, %54, %cst_67 {dimension_numbers = #tpu.dot_dimension_numbers<[1], [0], [0], [1], [0, 0, 1, 1], [], []>} : vector<256x64xbf16>, vector<64x64xbf16>, vector<256x64xf32> -> vector<256x64xf32>
    %56 = arith.addf %49, %55 : vector<256x64xf32>
    %c2_68 = arith.constant 2 : index
    %c1_69 = arith.constant 1 : index
    %c0_70 = arith.constant 0 : index
    %57 = vector.load %arg9[%c2_68, %c1_69, %c0_70] : memref<18x18x64xf32, #tpu.memory_space<vmem>>, vector<16x16x64xf32>
    %58 = vector.shape_cast %57 : vector<16x16x64xf32> to vector<256x64xf32>
    %59 = arith.truncf %58 : vector<256x64xf32> to vector<256x64xbf16>
    %c2_71 = arith.constant 2 : index
    %c1_72 = arith.constant 1 : index
    %c0_73 = arith.constant 0 : index
    %c0_74 = arith.constant 0 : index
    %60 = vector.load %arg2[%c2_71, %c1_72, %c0_73, %c0_74] : memref<3x3x64x64xbf16, #tpu.memory_space<vmem>>, vector<1x1x64x64xbf16>
    %61 = vector.shape_cast %60 : vector<1x1x64x64xbf16> to vector<64x64xbf16>
    %cst_75 = arith.constant dense<0.000000e+00> : vector<256x64xf32>
    %62 = tpu.matmul %59, %61, %cst_75 {dimension_numbers = #tpu.dot_dimension_numbers<[1], [0], [0], [1], [0, 0, 1, 1], [], []>} : vector<256x64xbf16>, vector<64x64xbf16>, vector<256x64xf32> -> vector<256x64xf32>
    %63 = arith.addf %56, %62 : vector<256x64xf32>
    %c2_76 = arith.constant 2 : index
    %c2_77 = arith.constant 2 : index
    %c0_78 = arith.constant 0 : index
    %64 = vector.load %arg9[%c2_76, %c2_77, %c0_78] : memref<18x18x64xf32, #tpu.memory_space<vmem>>, vector<16x16x64xf32>
    %65 = vector.shape_cast %64 : vector<16x16x64xf32> to vector<256x64xf32>
    %66 = arith.truncf %65 : vector<256x64xf32> to vector<256x64xbf16>
    %c2_79 = arith.constant 2 : index
    %c2_80 = arith.constant 2 : index
    %c0_81 = arith.constant 0 : index
    %c0_82 = arith.constant 0 : index
    %67 = vector.load %arg2[%c2_79, %c2_80, %c0_81, %c0_82] : memref<3x3x64x64xbf16, #tpu.memory_space<vmem>>, vector<1x1x64x64xbf16>
    %68 = vector.shape_cast %67 : vector<1x1x64x64xbf16> to vector<64x64xbf16>
    %cst_83 = arith.constant dense<0.000000e+00> : vector<256x64xf32>
    %69 = tpu.matmul %66, %68, %cst_83 {dimension_numbers = #tpu.dot_dimension_numbers<[1], [0], [0], [1], [0, 0, 1, 1], [], []>} : vector<256x64xbf16>, vector<64x64xbf16>, vector<256x64xf32> -> vector<256x64xf32>
    %70 = arith.addf %63, %69 : vector<256x64xf32>
    %c0_84 = arith.constant 0 : index
    %c0_85 = arith.constant 0 : index
    %71 = vector.load %arg3[%c0_84, %c0_85] : memref<1x64xf32, #tpu.memory_space<vmem>>, vector<1x64xf32>
    %72 = vector.broadcast %71 : vector<1x64xf32> to vector<256x64xf32>
    %73 = arith.addf %70, %72 : vector<256x64xf32>
    %cst_86 = arith.constant 0.000000e+00 : f32
    %74 = vector.broadcast %cst_86 : f32 to vector<256x64xf32>
    %75 = arith.cmpf ogt, %73, %74 : vector<256x64xf32>
    %cst_87 = arith.constant 2.000000e-01 : f32
    %76 = vector.broadcast %cst_87 : f32 to vector<256x64xf32>
    %77 = arith.mulf %76, %73 : vector<256x64xf32>
    %78 = arith.select %75, %73, %77 : vector<256x64xi1>, vector<256x64xf32>
    %79 = vector.shape_cast %78 : vector<256x64xf32> to vector<16x16x64xf32>
    %c1_88 = arith.constant 1 : index
    %c1_89 = arith.constant 1 : index
    %c0_90 = arith.constant 0 : index
    %80 = vector.load %arg10[%c1_88, %c1_89, %c0_90] : memref<18x18x64xf32, #tpu.memory_space<vmem>>, vector<16x16x64xf32>
    tpu.vector_store %arg10[%c1_88, %c1_89, %c0_90], %79 {strides = array<i32>} : memref<18x18x64xf32, #tpu.memory_space<vmem>>, vector<16x16x64xf32>,
    %cst_91 = arith.constant 0.000000e+00 : f32
    %81 = vector.broadcast %cst_91 : f32 to vector<256x64xf32>
    %c0_92 = arith.constant 0 : index
    %c0_93 = arith.constant 0 : index
    %c0_94 = arith.constant 0 : index
    %82 = vector.load %arg10[%c0_92, %c0_93, %c0_94] : memref<18x18x64xf32, #tpu.memory_space<vmem>>, vector<16x16x64xf32>
    %83 = vector.shape_cast %82 : vector<16x16x64xf32> to vector<256x64xf32>
    %84 = arith.truncf %83 : vector<256x64xf32> to vector<256x64xbf16>
    %c0_95 = arith.constant 0 : index
    %c0_96 = arith.constant 0 : index
    %c0_97 = arith.constant 0 : index
    %c0_98 = arith.constant 0 : index
    %85 = vector.load %arg4[%c0_95, %c0_96, %c0_97, %c0_98] : memref<3x3x64x64xbf16, #tpu.memory_space<vmem>>, vector<1x1x64x64xbf16>
    %86 = vector.shape_cast %85 : vector<1x1x64x64xbf16> to vector<64x64xbf16>
    %cst_99 = arith.constant dense<0.000000e+00> : vector<256x64xf32>
    %87 = tpu.matmul %84, %86, %cst_99 {dimension_numbers = #tpu.dot_dimension_numbers<[1], [0], [0], [1], [0, 0, 1, 1], [], []>} : vector<256x64xbf16>, vector<64x64xbf16>, vector<256x64xf32> -> vector<256x64xf32>
    %88 = arith.addf %81, %87 : vector<256x64xf32>
    %c0_100 = arith.constant 0 : index
    %c1_101 = arith.constant 1 : index
    %c0_102 = arith.constant 0 : index
    %89 = vector.load %arg10[%c0_100, %c1_101, %c0_102] : memref<18x18x64xf32, #tpu.memory_space<vmem>>, vector<16x16x64xf32>
    %90 = vector.shape_cast %89 : vector<16x16x64xf32> to vector<256x64xf32>
    %91 = arith.truncf %90 : vector<256x64xf32> to vector<256x64xbf16>
    %c0_103 = arith.constant 0 : index
    %c1_104 = arith.constant 1 : index
    %c0_105 = arith.constant 0 : index
    %c0_106 = arith.constant 0 : index
    %92 = vector.load %arg4[%c0_103, %c1_104, %c0_105, %c0_106] : memref<3x3x64x64xbf16, #tpu.memory_space<vmem>>, vector<1x1x64x64xbf16>
    %93 = vector.shape_cast %92 : vector<1x1x64x64xbf16> to vector<64x64xbf16>
    %cst_107 = arith.constant dense<0.000000e+00> : vector<256x64xf32>
    %94 = tpu.matmul %91, %93, %cst_107 {dimension_numbers = #tpu.dot_dimension_numbers<[1], [0], [0], [1], [0, 0, 1, 1], [], []>} : vector<256x64xbf16>, vector<64x64xbf16>, vector<256x64xf32> -> vector<256x64xf32>
    %95 = arith.addf %88, %94 : vector<256x64xf32>
    %c0_108 = arith.constant 0 : index
    %c2_109 = arith.constant 2 : index
    %c0_110 = arith.constant 0 : index
    %96 = vector.load %arg10[%c0_108, %c2_109, %c0_110] : memref<18x18x64xf32, #tpu.memory_space<vmem>>, vector<16x16x64xf32>
    %97 = vector.shape_cast %96 : vector<16x16x64xf32> to vector<256x64xf32>
    %98 = arith.truncf %97 : vector<256x64xf32> to vector<256x64xbf16>
    %c0_111 = arith.constant 0 : index
    %c2_112 = arith.constant 2 : index
    %c0_113 = arith.constant 0 : index
    %c0_114 = arith.constant 0 : index
    %99 = vector.load %arg4[%c0_111, %c2_112, %c0_113, %c0_114] : memref<3x3x64x64xbf16, #tpu.memory_space<vmem>>, vector<1x1x64x64xbf16>
    %100 = vector.shape_cast %99 : vector<1x1x64x64xbf16> to vector<64x64xbf16>
    %cst_115 = arith.constant dense<0.000000e+00> : vector<256x64xf32>
    %101 = tpu.matmul %98, %100, %cst_115 {dimension_numbers = #tpu.dot_dimension_numbers<[1], [0], [0], [1], [0, 0, 1, 1], [], []>} : vector<256x64xbf16>, vector<64x64xbf16>, vector<256x64xf32> -> vector<256x64xf32>
    %102 = arith.addf %95, %101 : vector<256x64xf32>
    %c1_116 = arith.constant 1 : index
    %c0_117 = arith.constant 0 : index
    %c0_118 = arith.constant 0 : index
    %103 = vector.load %arg10[%c1_116, %c0_117, %c0_118] : memref<18x18x64xf32, #tpu.memory_space<vmem>>, vector<16x16x64xf32>
    %104 = vector.shape_cast %103 : vector<16x16x64xf32> to vector<256x64xf32>
    %105 = arith.truncf %104 : vector<256x64xf32> to vector<256x64xbf16>
    %c1_119 = arith.constant 1 : index
    %c0_120 = arith.constant 0 : index
    %c0_121 = arith.constant 0 : index
    %c0_122 = arith.constant 0 : index
    %106 = vector.load %arg4[%c1_119, %c0_120, %c0_121, %c0_122] : memref<3x3x64x64xbf16, #tpu.memory_space<vmem>>, vector<1x1x64x64xbf16>
    %107 = vector.shape_cast %106 : vector<1x1x64x64xbf16> to vector<64x64xbf16>
    %cst_123 = arith.constant dense<0.000000e+00> : vector<256x64xf32>
    %108 = tpu.matmul %105, %107, %cst_123 {dimension_numbers = #tpu.dot_dimension_numbers<[1], [0], [0], [1], [0, 0, 1, 1], [], []>} : vector<256x64xbf16>, vector<64x64xbf16>, vector<256x64xf32> -> vector<256x64xf32>
    %109 = arith.addf %102, %108 : vector<256x64xf32>
    %c1_124 = arith.constant 1 : index
    %c1_125 = arith.constant 1 : index
    %c0_126 = arith.constant 0 : index
    %110 = vector.load %arg10[%c1_124, %c1_125, %c0_126] : memref<18x18x64xf32, #tpu.memory_space<vmem>>, vector<16x16x64xf32>
    %111 = vector.shape_cast %110 : vector<16x16x64xf32> to vector<256x64xf32>
    %112 = arith.truncf %111 : vector<256x64xf32> to vector<256x64xbf16>
    %c1_127 = arith.constant 1 : index
    %c1_128 = arith.constant 1 : index
    %c0_129 = arith.constant 0 : index
    %c0_130 = arith.constant 0 : index
    %113 = vector.load %arg4[%c1_127, %c1_128, %c0_129, %c0_130] : memref<3x3x64x64xbf16, #tpu.memory_space<vmem>>, vector<1x1x64x64xbf16>
    %114 = vector.shape_cast %113 : vector<1x1x64x64xbf16> to vector<64x64xbf16>
    %cst_131 = arith.constant dense<0.000000e+00> : vector<256x64xf32>
    %115 = tpu.matmul %112, %114, %cst_131 {dimension_numbers = #tpu.dot_dimension_numbers<[1], [0], [0], [1], [0, 0, 1, 1], [], []>} : vector<256x64xbf16>, vector<64x64xbf16>, vector<256x64xf32> -> vector<256x64xf32>
    %116 = arith.addf %109, %115 : vector<256x64xf32>
    %c1_132 = arith.constant 1 : index
    %c2_133 = arith.constant 2 : index
    %c0_134 = arith.constant 0 : index
    %117 = vector.load %arg10[%c1_132, %c2_133, %c0_134] : memref<18x18x64xf32, #tpu.memory_space<vmem>>, vector<16x16x64xf32>
    %118 = vector.shape_cast %117 : vector<16x16x64xf32> to vector<256x64xf32>
    %119 = arith.truncf %118 : vector<256x64xf32> to vector<256x64xbf16>
    %c1_135 = arith.constant 1 : index
    %c2_136 = arith.constant 2 : index
    %c0_137 = arith.constant 0 : index
    %c0_138 = arith.constant 0 : index
    %120 = vector.load %arg4[%c1_135, %c2_136, %c0_137, %c0_138] : memref<3x3x64x64xbf16, #tpu.memory_space<vmem>>, vector<1x1x64x64xbf16>
    %121 = vector.shape_cast %120 : vector<1x1x64x64xbf16> to vector<64x64xbf16>
    %cst_139 = arith.constant dense<0.000000e+00> : vector<256x64xf32>
    %122 = tpu.matmul %119, %121, %cst_139 {dimension_numbers = #tpu.dot_dimension_numbers<[1], [0], [0], [1], [0, 0, 1, 1], [], []>} : vector<256x64xbf16>, vector<64x64xbf16>, vector<256x64xf32> -> vector<256x64xf32>
    %123 = arith.addf %116, %122 : vector<256x64xf32>
    %c2_140 = arith.constant 2 : index
    %c0_141 = arith.constant 0 : index
    %c0_142 = arith.constant 0 : index
    %124 = vector.load %arg10[%c2_140, %c0_141, %c0_142] : memref<18x18x64xf32, #tpu.memory_space<vmem>>, vector<16x16x64xf32>
    %125 = vector.shape_cast %124 : vector<16x16x64xf32> to vector<256x64xf32>
    %126 = arith.truncf %125 : vector<256x64xf32> to vector<256x64xbf16>
    %c2_143 = arith.constant 2 : index
    %c0_144 = arith.constant 0 : index
    %c0_145 = arith.constant 0 : index
    %c0_146 = arith.constant 0 : index
    %127 = vector.load %arg4[%c2_143, %c0_144, %c0_145, %c0_146] : memref<3x3x64x64xbf16, #tpu.memory_space<vmem>>, vector<1x1x64x64xbf16>
    %128 = vector.shape_cast %127 : vector<1x1x64x64xbf16> to vector<64x64xbf16>
    %cst_147 = arith.constant dense<0.000000e+00> : vector<256x64xf32>
    %129 = tpu.matmul %126, %128, %cst_147 {dimension_numbers = #tpu.dot_dimension_numbers<[1], [0], [0], [1], [0, 0, 1, 1], [], []>} : vector<256x64xbf16>, vector<64x64xbf16>, vector<256x64xf32> -> vector<256x64xf32>
    %130 = arith.addf %123, %129 : vector<256x64xf32>
    %c2_148 = arith.constant 2 : index
    %c1_149 = arith.constant 1 : index
    %c0_150 = arith.constant 0 : index
    %131 = vector.load %arg10[%c2_148, %c1_149, %c0_150] : memref<18x18x64xf32, #tpu.memory_space<vmem>>, vector<16x16x64xf32>
    %132 = vector.shape_cast %131 : vector<16x16x64xf32> to vector<256x64xf32>
    %133 = arith.truncf %132 : vector<256x64xf32> to vector<256x64xbf16>
    %c2_151 = arith.constant 2 : index
    %c1_152 = arith.constant 1 : index
    %c0_153 = arith.constant 0 : index
    %c0_154 = arith.constant 0 : index
    %134 = vector.load %arg4[%c2_151, %c1_152, %c0_153, %c0_154] : memref<3x3x64x64xbf16, #tpu.memory_space<vmem>>, vector<1x1x64x64xbf16>
    %135 = vector.shape_cast %134 : vector<1x1x64x64xbf16> to vector<64x64xbf16>
    %cst_155 = arith.constant dense<0.000000e+00> : vector<256x64xf32>
    %136 = tpu.matmul %133, %135, %cst_155 {dimension_numbers = #tpu.dot_dimension_numbers<[1], [0], [0], [1], [0, 0, 1, 1], [], []>} : vector<256x64xbf16>, vector<64x64xbf16>, vector<256x64xf32> -> vector<256x64xf32>
    %137 = arith.addf %130, %136 : vector<256x64xf32>
    %c2_156 = arith.constant 2 : index
    %c2_157 = arith.constant 2 : index
    %c0_158 = arith.constant 0 : index
    %138 = vector.load %arg10[%c2_156, %c2_157, %c0_158] : memref<18x18x64xf32, #tpu.memory_space<vmem>>, vector<16x16x64xf32>
    %139 = vector.shape_cast %138 : vector<16x16x64xf32> to vector<256x64xf32>
    %140 = arith.truncf %139 : vector<256x64xf32> to vector<256x64xbf16>
    %c2_159 = arith.constant 2 : index
    %c2_160 = arith.constant 2 : index
    %c0_161 = arith.constant 0 : index
    %c0_162 = arith.constant 0 : index
    %141 = vector.load %arg4[%c2_159, %c2_160, %c0_161, %c0_162] : memref<3x3x64x64xbf16, #tpu.memory_space<vmem>>, vector<1x1x64x64xbf16>
    %142 = vector.shape_cast %141 : vector<1x1x64x64xbf16> to vector<64x64xbf16>
    %cst_163 = arith.constant dense<0.000000e+00> : vector<256x64xf32>
    %143 = tpu.matmul %140, %142, %cst_163 {dimension_numbers = #tpu.dot_dimension_numbers<[1], [0], [0], [1], [0, 0, 1, 1], [], []>} : vector<256x64xbf16>, vector<64x64xbf16>, vector<256x64xf32> -> vector<256x64xf32>
    %144 = arith.addf %137, %143 : vector<256x64xf32>
    %c0_164 = arith.constant 0 : index
    %c0_165 = arith.constant 0 : index
    %145 = vector.load %arg5[%c0_164, %c0_165] : memref<1x64xf32, #tpu.memory_space<vmem>>, vector<1x64xf32>
    %146 = vector.broadcast %145 : vector<1x64xf32> to vector<256x64xf32>
    %147 = arith.addf %144, %146 : vector<256x64xf32>
    %cst_166 = arith.constant 0.000000e+00 : f32
    %148 = vector.broadcast %cst_166 : f32 to vector<256x64xf32>
    %149 = arith.cmpf ogt, %147, %148 : vector<256x64xf32>
    %cst_167 = arith.constant 2.000000e-01 : f32
    %150 = vector.broadcast %cst_167 : f32 to vector<256x64xf32>
    %151 = arith.mulf %150, %147 : vector<256x64xf32>
    %152 = arith.select %149, %147, %151 : vector<256x64xi1>, vector<256x64xf32>
    %153 = vector.shape_cast %152 : vector<256x64xf32> to vector<16x16x64xf32>
    %c1_168 = arith.constant 1 : index
    %c1_169 = arith.constant 1 : index
    %c0_170 = arith.constant 0 : index
    %154 = vector.load %arg9[%c1_168, %c1_169, %c0_170] : memref<18x18x64xf32, #tpu.memory_space<vmem>>, vector<16x16x64xf32>
    tpu.vector_store %arg9[%c1_168, %c1_169, %c0_170], %153 {strides = array<i32>} : memref<18x18x64xf32, #tpu.memory_space<vmem>>, vector<16x16x64xf32>,
    %cst_171 = arith.constant 0.000000e+00 : f32
    %155 = vector.broadcast %cst_171 : f32 to vector<256x64xf32>
    %c0_172 = arith.constant 0 : index
    %c0_173 = arith.constant 0 : index
    %c0_174 = arith.constant 0 : index
    %156 = vector.load %arg9[%c0_172, %c0_173, %c0_174] : memref<18x18x64xf32, #tpu.memory_space<vmem>>, vector<16x16x64xf32>
    %157 = vector.shape_cast %156 : vector<16x16x64xf32> to vector<256x64xf32>
    %158 = arith.truncf %157 : vector<256x64xf32> to vector<256x64xbf16>
    %c0_175 = arith.constant 0 : index
    %c0_176 = arith.constant 0 : index
    %c0_177 = arith.constant 0 : index
    %c0_178 = arith.constant 0 : index
    %159 = vector.load %arg6[%c0_175, %c0_176, %c0_177, %c0_178] : memref<3x3x64x64xbf16, #tpu.memory_space<vmem>>, vector<1x1x64x64xbf16>
    %160 = vector.shape_cast %159 : vector<1x1x64x64xbf16> to vector<64x64xbf16>
    %cst_179 = arith.constant dense<0.000000e+00> : vector<256x64xf32>
    %161 = tpu.matmul %158, %160, %cst_179 {dimension_numbers = #tpu.dot_dimension_numbers<[1], [0], [0], [1], [0, 0, 1, 1], [], []>} : vector<256x64xbf16>, vector<64x64xbf16>, vector<256x64xf32> -> vector<256x64xf32>
    %162 = arith.addf %155, %161 : vector<256x64xf32>
    %c0_180 = arith.constant 0 : index
    %c1_181 = arith.constant 1 : index
    %c0_182 = arith.constant 0 : index
    %163 = vector.load %arg9[%c0_180, %c1_181, %c0_182] : memref<18x18x64xf32, #tpu.memory_space<vmem>>, vector<16x16x64xf32>
    %164 = vector.shape_cast %163 : vector<16x16x64xf32> to vector<256x64xf32>
    %165 = arith.truncf %164 : vector<256x64xf32> to vector<256x64xbf16>
    %c0_183 = arith.constant 0 : index
    %c1_184 = arith.constant 1 : index
    %c0_185 = arith.constant 0 : index
    %c0_186 = arith.constant 0 : index
    %166 = vector.load %arg6[%c0_183, %c1_184, %c0_185, %c0_186] : memref<3x3x64x64xbf16, #tpu.memory_space<vmem>>, vector<1x1x64x64xbf16>
    %167 = vector.shape_cast %166 : vector<1x1x64x64xbf16> to vector<64x64xbf16>
    %cst_187 = arith.constant dense<0.000000e+00> : vector<256x64xf32>
    %168 = tpu.matmul %165, %167, %cst_187 {dimension_numbers = #tpu.dot_dimension_numbers<[1], [0], [0], [1], [0, 0, 1, 1], [], []>} : vector<256x64xbf16>, vector<64x64xbf16>, vector<256x64xf32> -> vector<256x64xf32>
    %169 = arith.addf %162, %168 : vector<256x64xf32>
    %c0_188 = arith.constant 0 : index
    %c2_189 = arith.constant 2 : index
    %c0_190 = arith.constant 0 : index
    %170 = vector.load %arg9[%c0_188, %c2_189, %c0_190] : memref<18x18x64xf32, #tpu.memory_space<vmem>>, vector<16x16x64xf32>
    %171 = vector.shape_cast %170 : vector<16x16x64xf32> to vector<256x64xf32>
    %172 = arith.truncf %171 : vector<256x64xf32> to vector<256x64xbf16>
    %c0_191 = arith.constant 0 : index
    %c2_192 = arith.constant 2 : index
    %c0_193 = arith.constant 0 : index
    %c0_194 = arith.constant 0 : index
    %173 = vector.load %arg6[%c0_191, %c2_192, %c0_193, %c0_194] : memref<3x3x64x64xbf16, #tpu.memory_space<vmem>>, vector<1x1x64x64xbf16>
    %174 = vector.shape_cast %173 : vector<1x1x64x64xbf16> to vector<64x64xbf16>
    %cst_195 = arith.constant dense<0.000000e+00> : vector<256x64xf32>
    %175 = tpu.matmul %172, %174, %cst_195 {dimension_numbers = #tpu.dot_dimension_numbers<[1], [0], [0], [1], [0, 0, 1, 1], [], []>} : vector<256x64xbf16>, vector<64x64xbf16>, vector<256x64xf32> -> vector<256x64xf32>
    %176 = arith.addf %169, %175 : vector<256x64xf32>
    %c1_196 = arith.constant 1 : index
    %c0_197 = arith.constant 0 : index
    %c0_198 = arith.constant 0 : index
    %177 = vector.load %arg9[%c1_196, %c0_197, %c0_198] : memref<18x18x64xf32, #tpu.memory_space<vmem>>, vector<16x16x64xf32>
    %178 = vector.shape_cast %177 : vector<16x16x64xf32> to vector<256x64xf32>
    %179 = arith.truncf %178 : vector<256x64xf32> to vector<256x64xbf16>
    %c1_199 = arith.constant 1 : index
    %c0_200 = arith.constant 0 : index
    %c0_201 = arith.constant 0 : index
    %c0_202 = arith.constant 0 : index
    %180 = vector.load %arg6[%c1_199, %c0_200, %c0_201, %c0_202] : memref<3x3x64x64xbf16, #tpu.memory_space<vmem>>, vector<1x1x64x64xbf16>
    %181 = vector.shape_cast %180 : vector<1x1x64x64xbf16> to vector<64x64xbf16>
    %cst_203 = arith.constant dense<0.000000e+00> : vector<256x64xf32>
    %182 = tpu.matmul %179, %181, %cst_203 {dimension_numbers = #tpu.dot_dimension_numbers<[1], [0], [0], [1], [0, 0, 1, 1], [], []>} : vector<256x64xbf16>, vector<64x64xbf16>, vector<256x64xf32> -> vector<256x64xf32>
    %183 = arith.addf %176, %182 : vector<256x64xf32>
    %c1_204 = arith.constant 1 : index
    %c1_205 = arith.constant 1 : index
    %c0_206 = arith.constant 0 : index
    %184 = vector.load %arg9[%c1_204, %c1_205, %c0_206] : memref<18x18x64xf32, #tpu.memory_space<vmem>>, vector<16x16x64xf32>
    %185 = vector.shape_cast %184 : vector<16x16x64xf32> to vector<256x64xf32>
    %186 = arith.truncf %185 : vector<256x64xf32> to vector<256x64xbf16>
    %c1_207 = arith.constant 1 : index
    %c1_208 = arith.constant 1 : index
    %c0_209 = arith.constant 0 : index
    %c0_210 = arith.constant 0 : index
    %187 = vector.load %arg6[%c1_207, %c1_208, %c0_209, %c0_210] : memref<3x3x64x64xbf16, #tpu.memory_space<vmem>>, vector<1x1x64x64xbf16>
    %188 = vector.shape_cast %187 : vector<1x1x64x64xbf16> to vector<64x64xbf16>
    %cst_211 = arith.constant dense<0.000000e+00> : vector<256x64xf32>
    %189 = tpu.matmul %186, %188, %cst_211 {dimension_numbers = #tpu.dot_dimension_numbers<[1], [0], [0], [1], [0, 0, 1, 1], [], []>} : vector<256x64xbf16>, vector<64x64xbf16>, vector<256x64xf32> -> vector<256x64xf32>
    %190 = arith.addf %183, %189 : vector<256x64xf32>
    %c1_212 = arith.constant 1 : index
    %c2_213 = arith.constant 2 : index
    %c0_214 = arith.constant 0 : index
    %191 = vector.load %arg9[%c1_212, %c2_213, %c0_214] : memref<18x18x64xf32, #tpu.memory_space<vmem>>, vector<16x16x64xf32>
    %192 = vector.shape_cast %191 : vector<16x16x64xf32> to vector<256x64xf32>
    %193 = arith.truncf %192 : vector<256x64xf32> to vector<256x64xbf16>
    %c1_215 = arith.constant 1 : index
    %c2_216 = arith.constant 2 : index
    %c0_217 = arith.constant 0 : index
    %c0_218 = arith.constant 0 : index
    %194 = vector.load %arg6[%c1_215, %c2_216, %c0_217, %c0_218] : memref<3x3x64x64xbf16, #tpu.memory_space<vmem>>, vector<1x1x64x64xbf16>
    %195 = vector.shape_cast %194 : vector<1x1x64x64xbf16> to vector<64x64xbf16>
    %cst_219 = arith.constant dense<0.000000e+00> : vector<256x64xf32>
    %196 = tpu.matmul %193, %195, %cst_219 {dimension_numbers = #tpu.dot_dimension_numbers<[1], [0], [0], [1], [0, 0, 1, 1], [], []>} : vector<256x64xbf16>, vector<64x64xbf16>, vector<256x64xf32> -> vector<256x64xf32>
    %197 = arith.addf %190, %196 : vector<256x64xf32>
    %c2_220 = arith.constant 2 : index
    %c0_221 = arith.constant 0 : index
    %c0_222 = arith.constant 0 : index
    %198 = vector.load %arg9[%c2_220, %c0_221, %c0_222] : memref<18x18x64xf32, #tpu.memory_space<vmem>>, vector<16x16x64xf32>
    %199 = vector.shape_cast %198 : vector<16x16x64xf32> to vector<256x64xf32>
    %200 = arith.truncf %199 : vector<256x64xf32> to vector<256x64xbf16>
    %c2_223 = arith.constant 2 : index
    %c0_224 = arith.constant 0 : index
    %c0_225 = arith.constant 0 : index
    %c0_226 = arith.constant 0 : index
    %201 = vector.load %arg6[%c2_223, %c0_224, %c0_225, %c0_226] : memref<3x3x64x64xbf16, #tpu.memory_space<vmem>>, vector<1x1x64x64xbf16>
    %202 = vector.shape_cast %201 : vector<1x1x64x64xbf16> to vector<64x64xbf16>
    %cst_227 = arith.constant dense<0.000000e+00> : vector<256x64xf32>
    %203 = tpu.matmul %200, %202, %cst_227 {dimension_numbers = #tpu.dot_dimension_numbers<[1], [0], [0], [1], [0, 0, 1, 1], [], []>} : vector<256x64xbf16>, vector<64x64xbf16>, vector<256x64xf32> -> vector<256x64xf32>
    %204 = arith.addf %197, %203 : vector<256x64xf32>
    %c2_228 = arith.constant 2 : index
    %c1_229 = arith.constant 1 : index
    %c0_230 = arith.constant 0 : index
    %205 = vector.load %arg9[%c2_228, %c1_229, %c0_230] : memref<18x18x64xf32, #tpu.memory_space<vmem>>, vector<16x16x64xf32>
    %206 = vector.shape_cast %205 : vector<16x16x64xf32> to vector<256x64xf32>
    %207 = arith.truncf %206 : vector<256x64xf32> to vector<256x64xbf16>
    %c2_231 = arith.constant 2 : index
    %c1_232 = arith.constant 1 : index
    %c0_233 = arith.constant 0 : index
    %c0_234 = arith.constant 0 : index
    %208 = vector.load %arg6[%c2_231, %c1_232, %c0_233, %c0_234] : memref<3x3x64x64xbf16, #tpu.memory_space<vmem>>, vector<1x1x64x64xbf16>
    %209 = vector.shape_cast %208 : vector<1x1x64x64xbf16> to vector<64x64xbf16>
    %cst_235 = arith.constant dense<0.000000e+00> : vector<256x64xf32>
    %210 = tpu.matmul %207, %209, %cst_235 {dimension_numbers = #tpu.dot_dimension_numbers<[1], [0], [0], [1], [0, 0, 1, 1], [], []>} : vector<256x64xbf16>, vector<64x64xbf16>, vector<256x64xf32> -> vector<256x64xf32>
    %211 = arith.addf %204, %210 : vector<256x64xf32>
    %c2_236 = arith.constant 2 : index
    %c2_237 = arith.constant 2 : index
    %c0_238 = arith.constant 0 : index
    %212 = vector.load %arg9[%c2_236, %c2_237, %c0_238] : memref<18x18x64xf32, #tpu.memory_space<vmem>>, vector<16x16x64xf32>
    %213 = vector.shape_cast %212 : vector<16x16x64xf32> to vector<256x64xf32>
    %214 = arith.truncf %213 : vector<256x64xf32> to vector<256x64xbf16>
    %c2_239 = arith.constant 2 : index
    %c2_240 = arith.constant 2 : index
    %c0_241 = arith.constant 0 : index
    %c0_242 = arith.constant 0 : index
    %215 = vector.load %arg6[%c2_239, %c2_240, %c0_241, %c0_242] : memref<3x3x64x64xbf16, #tpu.memory_space<vmem>>, vector<1x1x64x64xbf16>
    %216 = vector.shape_cast %215 : vector<1x1x64x64xbf16> to vector<64x64xbf16>
    %cst_243 = arith.constant dense<0.000000e+00> : vector<256x64xf32>
    %217 = tpu.matmul %214, %216, %cst_243 {dimension_numbers = #tpu.dot_dimension_numbers<[1], [0], [0], [1], [0, 0, 1, 1], [], []>} : vector<256x64xbf16>, vector<64x64xbf16>, vector<256x64xf32> -> vector<256x64xf32>
    %218 = arith.addf %211, %217 : vector<256x64xf32>
    %c0_244 = arith.constant 0 : index
    %c0_245 = arith.constant 0 : index
    %219 = vector.load %arg7[%c0_244, %c0_245] : memref<1x64xf32, #tpu.memory_space<vmem>>, vector<1x64xf32>
    %220 = vector.broadcast %219 : vector<1x64xf32> to vector<256x64xf32>
    %221 = arith.addf %218, %220 : vector<256x64xf32>
    %222 = vector.shape_cast %221 : vector<256x64xf32> to vector<16x16x64xf32>
    %223 = arith.addf %5, %222 : vector<16x16x64xf32>
    %c0_246 = arith.constant 0 : index
    %c0_247 = arith.constant 0 : index
    %c0_248 = arith.constant 0 : index
    %c0_249 = arith.constant 0 : index
    %224 = vector.load %arg8[%c0_246, %c0_247, %c0_248, %c0_249] : memref<1x16x16x64xf32, #tpu.memory_space<vmem>>, vector<1x16x16x64xf32>
    %225 = vector.shape_cast %224 : vector<1x16x16x64xf32> to vector<16x16x64xf32>
    %226 = vector.shape_cast %223 : vector<16x16x64xf32> to vector<1x16x16x64xf32>
    tpu.vector_store %arg8[%c0_246, %c0_247, %c0_248, %c0_249], %226 {strides = array<i32>} : memref<1x16x16x64xf32, #tpu.memory_space<vmem>>, vector<1x16x16x64xf32>,
    return
  }
  func.func @transform_0(%arg0: i32) -> (i32, i32, i32, i32) {
    %c0_i32 = arith.constant 0 : i32
    %c0_i32_0 = arith.constant 0 : i32
    %c0_i32_1 = arith.constant 0 : i32
    %c0_i32_2 = arith.constant 0 : i32
    return %arg0, %c0_i32, %c0_i32_0, %c0_i32_1 : i32, i32, i32, i32
  }
  func.func @transform_1(%arg0: i32) -> (i32, i32, i32, i32) {
    %c0_i32 = arith.constant 0 : i32
    %c0_i32_0 = arith.constant 0 : i32
    %c0_i32_1 = arith.constant 0 : i32
    %c0_i32_2 = arith.constant 0 : i32
    %c0_i32_3 = arith.constant 0 : i32
    return %c0_i32, %c0_i32_0, %c0_i32_1, %c0_i32_2 : i32, i32, i32, i32
  }
  func.func @transform_2(%arg0: i32) -> (i32, i32) {
    %c0_i32 = arith.constant 0 : i32
    %c0_i32_0 = arith.constant 0 : i32
    %c0_i32_1 = arith.constant 0 : i32
    return %c0_i32, %c0_i32_0 : i32, i32
  }
  func.func @transform_3(%arg0: i32) -> (i32, i32, i32, i32) {
    %c0_i32 = arith.constant 0 : i32
    %c0_i32_0 = arith.constant 0 : i32
    %c0_i32_1 = arith.constant 0 : i32
    %c0_i32_2 = arith.constant 0 : i32
    %c0_i32_3 = arith.constant 0 : i32
    return %c0_i32, %c0_i32_0, %c0_i32_1, %c0_i32_2 : i32, i32, i32, i32
  }
  func.func @transform_4(%arg0: i32) -> (i32, i32) {
    %c0_i32 = arith.constant 0 : i32
    %c0_i32_0 = arith.constant 0 : i32
    %c0_i32_1 = arith.constant 0 : i32
    return %c0_i32, %c0_i32_0 : i32, i32
  }
  func.func @transform_5(%arg0: i32) -> (i32, i32, i32, i32) {
    %c0_i32 = arith.constant 0 : i32
    %c0_i32_0 = arith.constant 0 : i32
    %c0_i32_1 = arith.constant 0 : i32
    %c0_i32_2 = arith.constant 0 : i32
    %c0_i32_3 = arith.constant 0 : i32
    return %c0_i32, %c0_i32_0, %c0_i32_1, %c0_i32_2 : i32, i32, i32, i32
  }
  func.func @transform_6(%arg0: i32) -> (i32, i32) {
    %c0_i32 = arith.constant 0 : i32
    %c0_i32_0 = arith.constant 0 : i32
    %c0_i32_1 = arith.constant 0 : i32
    return %c0_i32, %c0_i32_0 : i32, i32
  }
  func.func @transform_7(%arg0: i32) -> (i32, i32, i32, i32) {
    %c0_i32 = arith.constant 0 : i32
    %c0_i32_0 = arith.constant 0 : i32
    %c0_i32_1 = arith.constant 0 : i32
    %c0_i32_2 = arith.constant 0 : i32
    return %arg0, %c0_i32, %c0_i32_0, %c0_i32_1 : i32, i32, i32, i32
  }
}

module attributes {stable_mosaic.version = 11 : i64} {
  func.func @_conv_layer_kernel(%arg0: i32, %arg1: memref<1x16x16x64xf32, #tpu.memory_space<vmem>>, %arg2: memref<3x3x64x8xbf16, #tpu.memory_space<vmem>>, %arg3: memref<1x8xf32, #tpu.memory_space<vmem>>, %arg4: memref<1x16x16x8xf32, #tpu.memory_space<vmem>>, %arg5: memref<18x18x64xf32, #tpu.memory_space<vmem>>) attributes {dimension_semantics = [#tpu.dimension_semantics<parallel>], iteration_bounds = array<i64: 2>, scalar_prefetch = 0 : i64, scratch_operands = 1 : i64, tpu.core_type = #tpu.core_type<tc>, window_params = [{transform_indices = @transform_0, window_bounds = array<i64: 1, 16, 16, 64>}, {pipeline_mode = #tpu.pipeline_mode<synchronous>, transform_indices = @transform_1, window_bounds = array<i64: 3, 3, 64, 8>}, {pipeline_mode = #tpu.pipeline_mode<synchronous>, transform_indices = @transform_2, window_bounds = array<i64: 1, 8>}, {transform_indices = @transform_3, window_bounds = array<i64: 1, 16, 16, 8>}]} {
    %cst = arith.constant 0.000000e+00 : f32
    %0 = vector.broadcast %cst : f32 to vector<18x18x64xf32>
    %c0 = arith.constant 0 : index
    %c0_0 = arith.constant 0 : index
    %c0_1 = arith.constant 0 : index
    %1 = vector.load %arg5[%c0, %c0_0, %c0_1] : memref<18x18x64xf32, #tpu.memory_space<vmem>>, vector<18x18x64xf32>
    tpu.vector_store %arg5[%c0, %c0_0, %c0_1], %0 {strides = array<i32>} : memref<18x18x64xf32, #tpu.memory_space<vmem>>, vector<18x18x64xf32>,
    %c0_2 = arith.constant 0 : index
    %c0_3 = arith.constant 0 : index
    %c0_4 = arith.constant 0 : index
    %c0_5 = arith.constant 0 : index
    %2 = vector.load %arg1[%c0_2, %c0_3, %c0_4, %c0_5] : memref<1x16x16x64xf32, #tpu.memory_space<vmem>>, vector<1x16x16x64xf32>
    %3 = vector.shape_cast %2 : vector<1x16x16x64xf32> to vector<16x16x64xf32>
    %c1 = arith.constant 1 : index
    %c1_6 = arith.constant 1 : index
    %c0_7 = arith.constant 0 : index
    %4 = vector.load %arg5[%c1, %c1_6, %c0_7] : memref<18x18x64xf32, #tpu.memory_space<vmem>>, vector<16x16x64xf32>
    tpu.vector_store %arg5[%c1, %c1_6, %c0_7], %3 {strides = array<i32>} : memref<18x18x64xf32, #tpu.memory_space<vmem>>, vector<16x16x64xf32>,
    %cst_8 = arith.constant 0.000000e+00 : f32
    %5 = vector.broadcast %cst_8 : f32 to vector<256x8xf32>
    %c0_9 = arith.constant 0 : index
    %c0_10 = arith.constant 0 : index
    %c0_11 = arith.constant 0 : index
    %6 = vector.load %arg5[%c0_9, %c0_10, %c0_11] : memref<18x18x64xf32, #tpu.memory_space<vmem>>, vector<16x16x64xf32>
    %7 = vector.shape_cast %6 : vector<16x16x64xf32> to vector<256x64xf32>
    %8 = arith.truncf %7 : vector<256x64xf32> to vector<256x64xbf16>
    %c0_12 = arith.constant 0 : index
    %c0_13 = arith.constant 0 : index
    %c0_14 = arith.constant 0 : index
    %c0_15 = arith.constant 0 : index
    %9 = vector.load %arg2[%c0_12, %c0_13, %c0_14, %c0_15] : memref<3x3x64x8xbf16, #tpu.memory_space<vmem>>, vector<1x1x64x8xbf16>
    %10 = vector.shape_cast %9 : vector<1x1x64x8xbf16> to vector<64x8xbf16>
    %cst_16 = arith.constant dense<0.000000e+00> : vector<256x8xf32>
    %11 = tpu.matmul %8, %10, %cst_16 {dimension_numbers = #tpu.dot_dimension_numbers<[1], [0], [0], [1], [0, 0, 1, 1], [], []>} : vector<256x64xbf16>, vector<64x8xbf16>, vector<256x8xf32> -> vector<256x8xf32>
    %12 = arith.addf %5, %11 : vector<256x8xf32>
    %c0_17 = arith.constant 0 : index
    %c1_18 = arith.constant 1 : index
    %c0_19 = arith.constant 0 : index
    %13 = vector.load %arg5[%c0_17, %c1_18, %c0_19] : memref<18x18x64xf32, #tpu.memory_space<vmem>>, vector<16x16x64xf32>
    %14 = vector.shape_cast %13 : vector<16x16x64xf32> to vector<256x64xf32>
    %15 = arith.truncf %14 : vector<256x64xf32> to vector<256x64xbf16>
    %c0_20 = arith.constant 0 : index
    %c1_21 = arith.constant 1 : index
    %c0_22 = arith.constant 0 : index
    %c0_23 = arith.constant 0 : index
    %16 = vector.load %arg2[%c0_20, %c1_21, %c0_22, %c0_23] : memref<3x3x64x8xbf16, #tpu.memory_space<vmem>>, vector<1x1x64x8xbf16>
    %17 = vector.shape_cast %16 : vector<1x1x64x8xbf16> to vector<64x8xbf16>
    %cst_24 = arith.constant dense<0.000000e+00> : vector<256x8xf32>
    %18 = tpu.matmul %15, %17, %cst_24 {dimension_numbers = #tpu.dot_dimension_numbers<[1], [0], [0], [1], [0, 0, 1, 1], [], []>} : vector<256x64xbf16>, vector<64x8xbf16>, vector<256x8xf32> -> vector<256x8xf32>
    %19 = arith.addf %12, %18 : vector<256x8xf32>
    %c0_25 = arith.constant 0 : index
    %c2 = arith.constant 2 : index
    %c0_26 = arith.constant 0 : index
    %20 = vector.load %arg5[%c0_25, %c2, %c0_26] : memref<18x18x64xf32, #tpu.memory_space<vmem>>, vector<16x16x64xf32>
    %21 = vector.shape_cast %20 : vector<16x16x64xf32> to vector<256x64xf32>
    %22 = arith.truncf %21 : vector<256x64xf32> to vector<256x64xbf16>
    %c0_27 = arith.constant 0 : index
    %c2_28 = arith.constant 2 : index
    %c0_29 = arith.constant 0 : index
    %c0_30 = arith.constant 0 : index
    %23 = vector.load %arg2[%c0_27, %c2_28, %c0_29, %c0_30] : memref<3x3x64x8xbf16, #tpu.memory_space<vmem>>, vector<1x1x64x8xbf16>
    %24 = vector.shape_cast %23 : vector<1x1x64x8xbf16> to vector<64x8xbf16>
    %cst_31 = arith.constant dense<0.000000e+00> : vector<256x8xf32>
    %25 = tpu.matmul %22, %24, %cst_31 {dimension_numbers = #tpu.dot_dimension_numbers<[1], [0], [0], [1], [0, 0, 1, 1], [], []>} : vector<256x64xbf16>, vector<64x8xbf16>, vector<256x8xf32> -> vector<256x8xf32>
    %26 = arith.addf %19, %25 : vector<256x8xf32>
    %c1_32 = arith.constant 1 : index
    %c0_33 = arith.constant 0 : index
    %c0_34 = arith.constant 0 : index
    %27 = vector.load %arg5[%c1_32, %c0_33, %c0_34] : memref<18x18x64xf32, #tpu.memory_space<vmem>>, vector<16x16x64xf32>
    %28 = vector.shape_cast %27 : vector<16x16x64xf32> to vector<256x64xf32>
    %29 = arith.truncf %28 : vector<256x64xf32> to vector<256x64xbf16>
    %c1_35 = arith.constant 1 : index
    %c0_36 = arith.constant 0 : index
    %c0_37 = arith.constant 0 : index
    %c0_38 = arith.constant 0 : index
    %30 = vector.load %arg2[%c1_35, %c0_36, %c0_37, %c0_38] : memref<3x3x64x8xbf16, #tpu.memory_space<vmem>>, vector<1x1x64x8xbf16>
    %31 = vector.shape_cast %30 : vector<1x1x64x8xbf16> to vector<64x8xbf16>
    %cst_39 = arith.constant dense<0.000000e+00> : vector<256x8xf32>
    %32 = tpu.matmul %29, %31, %cst_39 {dimension_numbers = #tpu.dot_dimension_numbers<[1], [0], [0], [1], [0, 0, 1, 1], [], []>} : vector<256x64xbf16>, vector<64x8xbf16>, vector<256x8xf32> -> vector<256x8xf32>
    %33 = arith.addf %26, %32 : vector<256x8xf32>
    %c1_40 = arith.constant 1 : index
    %c1_41 = arith.constant 1 : index
    %c0_42 = arith.constant 0 : index
    %34 = vector.load %arg5[%c1_40, %c1_41, %c0_42] : memref<18x18x64xf32, #tpu.memory_space<vmem>>, vector<16x16x64xf32>
    %35 = vector.shape_cast %34 : vector<16x16x64xf32> to vector<256x64xf32>
    %36 = arith.truncf %35 : vector<256x64xf32> to vector<256x64xbf16>
    %c1_43 = arith.constant 1 : index
    %c1_44 = arith.constant 1 : index
    %c0_45 = arith.constant 0 : index
    %c0_46 = arith.constant 0 : index
    %37 = vector.load %arg2[%c1_43, %c1_44, %c0_45, %c0_46] : memref<3x3x64x8xbf16, #tpu.memory_space<vmem>>, vector<1x1x64x8xbf16>
    %38 = vector.shape_cast %37 : vector<1x1x64x8xbf16> to vector<64x8xbf16>
    %cst_47 = arith.constant dense<0.000000e+00> : vector<256x8xf32>
    %39 = tpu.matmul %36, %38, %cst_47 {dimension_numbers = #tpu.dot_dimension_numbers<[1], [0], [0], [1], [0, 0, 1, 1], [], []>} : vector<256x64xbf16>, vector<64x8xbf16>, vector<256x8xf32> -> vector<256x8xf32>
    %40 = arith.addf %33, %39 : vector<256x8xf32>
    %c1_48 = arith.constant 1 : index
    %c2_49 = arith.constant 2 : index
    %c0_50 = arith.constant 0 : index
    %41 = vector.load %arg5[%c1_48, %c2_49, %c0_50] : memref<18x18x64xf32, #tpu.memory_space<vmem>>, vector<16x16x64xf32>
    %42 = vector.shape_cast %41 : vector<16x16x64xf32> to vector<256x64xf32>
    %43 = arith.truncf %42 : vector<256x64xf32> to vector<256x64xbf16>
    %c1_51 = arith.constant 1 : index
    %c2_52 = arith.constant 2 : index
    %c0_53 = arith.constant 0 : index
    %c0_54 = arith.constant 0 : index
    %44 = vector.load %arg2[%c1_51, %c2_52, %c0_53, %c0_54] : memref<3x3x64x8xbf16, #tpu.memory_space<vmem>>, vector<1x1x64x8xbf16>
    %45 = vector.shape_cast %44 : vector<1x1x64x8xbf16> to vector<64x8xbf16>
    %cst_55 = arith.constant dense<0.000000e+00> : vector<256x8xf32>
    %46 = tpu.matmul %43, %45, %cst_55 {dimension_numbers = #tpu.dot_dimension_numbers<[1], [0], [0], [1], [0, 0, 1, 1], [], []>} : vector<256x64xbf16>, vector<64x8xbf16>, vector<256x8xf32> -> vector<256x8xf32>
    %47 = arith.addf %40, %46 : vector<256x8xf32>
    %c2_56 = arith.constant 2 : index
    %c0_57 = arith.constant 0 : index
    %c0_58 = arith.constant 0 : index
    %48 = vector.load %arg5[%c2_56, %c0_57, %c0_58] : memref<18x18x64xf32, #tpu.memory_space<vmem>>, vector<16x16x64xf32>
    %49 = vector.shape_cast %48 : vector<16x16x64xf32> to vector<256x64xf32>
    %50 = arith.truncf %49 : vector<256x64xf32> to vector<256x64xbf16>
    %c2_59 = arith.constant 2 : index
    %c0_60 = arith.constant 0 : index
    %c0_61 = arith.constant 0 : index
    %c0_62 = arith.constant 0 : index
    %51 = vector.load %arg2[%c2_59, %c0_60, %c0_61, %c0_62] : memref<3x3x64x8xbf16, #tpu.memory_space<vmem>>, vector<1x1x64x8xbf16>
    %52 = vector.shape_cast %51 : vector<1x1x64x8xbf16> to vector<64x8xbf16>
    %cst_63 = arith.constant dense<0.000000e+00> : vector<256x8xf32>
    %53 = tpu.matmul %50, %52, %cst_63 {dimension_numbers = #tpu.dot_dimension_numbers<[1], [0], [0], [1], [0, 0, 1, 1], [], []>} : vector<256x64xbf16>, vector<64x8xbf16>, vector<256x8xf32> -> vector<256x8xf32>
    %54 = arith.addf %47, %53 : vector<256x8xf32>
    %c2_64 = arith.constant 2 : index
    %c1_65 = arith.constant 1 : index
    %c0_66 = arith.constant 0 : index
    %55 = vector.load %arg5[%c2_64, %c1_65, %c0_66] : memref<18x18x64xf32, #tpu.memory_space<vmem>>, vector<16x16x64xf32>
    %56 = vector.shape_cast %55 : vector<16x16x64xf32> to vector<256x64xf32>
    %57 = arith.truncf %56 : vector<256x64xf32> to vector<256x64xbf16>
    %c2_67 = arith.constant 2 : index
    %c1_68 = arith.constant 1 : index
    %c0_69 = arith.constant 0 : index
    %c0_70 = arith.constant 0 : index
    %58 = vector.load %arg2[%c2_67, %c1_68, %c0_69, %c0_70] : memref<3x3x64x8xbf16, #tpu.memory_space<vmem>>, vector<1x1x64x8xbf16>
    %59 = vector.shape_cast %58 : vector<1x1x64x8xbf16> to vector<64x8xbf16>
    %cst_71 = arith.constant dense<0.000000e+00> : vector<256x8xf32>
    %60 = tpu.matmul %57, %59, %cst_71 {dimension_numbers = #tpu.dot_dimension_numbers<[1], [0], [0], [1], [0, 0, 1, 1], [], []>} : vector<256x64xbf16>, vector<64x8xbf16>, vector<256x8xf32> -> vector<256x8xf32>
    %61 = arith.addf %54, %60 : vector<256x8xf32>
    %c2_72 = arith.constant 2 : index
    %c2_73 = arith.constant 2 : index
    %c0_74 = arith.constant 0 : index
    %62 = vector.load %arg5[%c2_72, %c2_73, %c0_74] : memref<18x18x64xf32, #tpu.memory_space<vmem>>, vector<16x16x64xf32>
    %63 = vector.shape_cast %62 : vector<16x16x64xf32> to vector<256x64xf32>
    %64 = arith.truncf %63 : vector<256x64xf32> to vector<256x64xbf16>
    %c2_75 = arith.constant 2 : index
    %c2_76 = arith.constant 2 : index
    %c0_77 = arith.constant 0 : index
    %c0_78 = arith.constant 0 : index
    %65 = vector.load %arg2[%c2_75, %c2_76, %c0_77, %c0_78] : memref<3x3x64x8xbf16, #tpu.memory_space<vmem>>, vector<1x1x64x8xbf16>
    %66 = vector.shape_cast %65 : vector<1x1x64x8xbf16> to vector<64x8xbf16>
    %cst_79 = arith.constant dense<0.000000e+00> : vector<256x8xf32>
    %67 = tpu.matmul %64, %66, %cst_79 {dimension_numbers = #tpu.dot_dimension_numbers<[1], [0], [0], [1], [0, 0, 1, 1], [], []>} : vector<256x64xbf16>, vector<64x8xbf16>, vector<256x8xf32> -> vector<256x8xf32>
    %68 = arith.addf %61, %67 : vector<256x8xf32>
    %c0_80 = arith.constant 0 : index
    %c0_81 = arith.constant 0 : index
    %69 = vector.load %arg3[%c0_80, %c0_81] : memref<1x8xf32, #tpu.memory_space<vmem>>, vector<1x8xf32>
    %70 = vector.broadcast %69 : vector<1x8xf32> to vector<256x8xf32>
    %71 = arith.addf %68, %70 : vector<256x8xf32>
    %72 = vector.shape_cast %71 : vector<256x8xf32> to vector<16x16x8xf32>
    %c0_82 = arith.constant 0 : index
    %c0_83 = arith.constant 0 : index
    %c0_84 = arith.constant 0 : index
    %c0_85 = arith.constant 0 : index
    %73 = vector.load %arg4[%c0_82, %c0_83, %c0_84, %c0_85] : memref<1x16x16x8xf32, #tpu.memory_space<vmem>>, vector<1x16x16x8xf32>
    %74 = vector.shape_cast %73 : vector<1x16x16x8xf32> to vector<16x16x8xf32>
    %75 = vector.shape_cast %72 : vector<16x16x8xf32> to vector<1x16x16x8xf32>
    tpu.vector_store %arg4[%c0_82, %c0_83, %c0_84, %c0_85], %75 {strides = array<i32>} : memref<1x16x16x8xf32, #tpu.memory_space<vmem>>, vector<1x16x16x8xf32>,
    return
  }
  func.func @transform_0(%arg0: i32) -> (i32, i32, i32, i32) {
    %c0_i32 = arith.constant 0 : i32
    %c0_i32_0 = arith.constant 0 : i32
    %c0_i32_1 = arith.constant 0 : i32
    %c0_i32_2 = arith.constant 0 : i32
    return %arg0, %c0_i32, %c0_i32_0, %c0_i32_1 : i32, i32, i32, i32
  }
  func.func @transform_1(%arg0: i32) -> (i32, i32, i32, i32) {
    %c0_i32 = arith.constant 0 : i32
    %c0_i32_0 = arith.constant 0 : i32
    %c0_i32_1 = arith.constant 0 : i32
    %c0_i32_2 = arith.constant 0 : i32
    %c0_i32_3 = arith.constant 0 : i32
    return %c0_i32, %c0_i32_0, %c0_i32_1, %c0_i32_2 : i32, i32, i32, i32
  }
  func.func @transform_2(%arg0: i32) -> (i32, i32) {
    %c0_i32 = arith.constant 0 : i32
    %c0_i32_0 = arith.constant 0 : i32
    %c0_i32_1 = arith.constant 0 : i32
    return %c0_i32, %c0_i32_0 : i32, i32
  }
  func.func @transform_3(%arg0: i32) -> (i32, i32, i32, i32) {
    %c0_i32 = arith.constant 0 : i32
    %c0_i32_0 = arith.constant 0 : i32
    %c0_i32_1 = arith.constant 0 : i32
    %c0_i32_2 = arith.constant 0 : i32
    return %arg0, %c0_i32, %c0_i32_0, %c0_i32_1 : i32, i32, i32, i32
  }
}

</mosaic_0001>

<bundles_post_ra>
// kernel: generator_forward.5
= control target key start
LH: loop header
LB: loop body
LE: loop exit
PB: predicated region body
PF: predicated region fallthrough
CT: control target
= control target key end

     0   :  { %s3934_s12 = smov 0   ;;  %s4636_s0 = inlined_call_operand.vmem [shape: f32[2,16,16,8], index: 0, kind: input, shape index: {}]   ;;  %s4637_s1 = inlined_call_operand.vmem [shape: bf16[3,3,8,64], index: 1, kind: input, shape index: {}]   ;;  %s4638_s2 = inlined_call_operand.vmem [shape: f32[1,64], index: 2, kind: input, shape index: {}]   ;;  %s4639_s3 = inlined_call_operand.vmem [shape: f32[2,16,16,64], index: 3, kind: output, shape index: {}]  }
   0x1 LB: > { %s3003_s13 = sadd.s32 4294967295, %s3911_s12   ;;  %p3007_p0 = scmp.ge.s32.totalorder %s3911_s12, 1  ;;  %s3911_s12 = sphi %s3934_s12, %s13_s12  }
   0x2   : > { %p137_p1 = scmp.lt.s32.totalorder %s3911_s12, 3 }
   0x4   : > { %p138_p2 = pnand %p3007_p0, %p137_p1 }
   0x5   : > { %v3012_v0 = vld [vmem:[%s4637_s1 + $0x4] sm:$0xf] (!%p138_p2)  ;;  %vm440_vm0 = vcmask (!%p138_p2), 1043456   ;;  %v3948_v1 = vld [vmem:[%s4637_s1 + $0x10] sm:$0xf] (!%p138_p2)  ;;  %vm172_vm1 = vcmask (!%p138_p2), 64512  }
   0x6   : > { %141 = sbr.rel (%p138_p2) target bundleno = 545 (0x221), region = 32  ;;  %3886 = vmatprep.subr.msk.bf16.mxu1 (!%p138_p2), %vm440_vm0, %v3012_v0  ;;  %3890 = vmatprep.subr.msk.bf16.mxu0 (!%p138_p2), %vm440_vm0, %v3948_v1  ;;  %v442_v2 = vsel (!%p138_p2), %vm440_vm0, %v3012_v0, 0  ;;  %v3956_v3 = vsel (!%p138_p2), %vm440_vm0, %v3948_v1, 0  ;;  %vm175_vm2 = vcmask (!%p138_p2), 58368   ;;  %p3960_p3 = scmp.lt.s32.totalorder (!%p138_p2), %s3003_s13, 1  ;;  %v3913_v4 = vmov (!%p138_p2), 0.0  }
   0x7   : > { %3323 = vmatpush3.bf16.msra.mxu1 (!%p138_p2), %v442_v2  ;;  %3459 = vmatpush3.bf16.msra.mxu0 (!%p138_p2), %v3956_v3  ;;  %173 = vst.msk [vmem:[#allocation2] sm:$0xff] (!%p138_p2), %vm172_vm1, %v3913_v4  ;;  %174 = vst.msk [vmem:[#allocation2 + $0x8] sm:$0xff] (!%p138_p2), %vm172_vm1, %v3913_v4  ;;  %v341_v5 = vld [vmem:[%s4637_s1] sm:$0xf] (!%p138_p2)  ;;  %v4025_v6 = vld [vmem:[%s4637_s1 + $0x14] sm:$0xf] (!%p138_p2) }
   0x8   : > { %176 = vst.msk [vmem:[#allocation2 + $0x10] sm:$0x3] (!%p138_p2), %vm175_vm2, %v3913_v4  ;;  %179 = vst.msk [vmem:[#allocation2 + $0x28] sm:$0x3] (!%p138_p2), %vm175_vm2, %v3913_v4  ;;  %3887 = vmatprep.subr.msk.bf16.mxu1 (!%p138_p2), %vm440_vm0, %v341_v5  ;;  %3892 = vmatprep.subr.msk.bf16.mxu0 (!%p138_p2), %vm440_vm0, %v4025_v6  ;;  %v654_v36 = vsel (!%p138_p2), %vm440_vm0, %v341_v5, 0  ;;  %v1798_v41 = vsel (!%p138_p2), %vm440_vm0, %v4025_v6, 0 }
   0x9   : > { %177 = vst.msk [vmem:[#allocation2 + $0x18] sm:$0xff] (!%p138_p2), %vm172_vm1, %v3913_v4  ;;  %178 = vst.msk [vmem:[#allocation2 + $0x20] sm:$0xff] (!%p138_p2), %vm172_vm1, %v3913_v4  ;;  %v4101_v43 = vld [vmem:[%s4637_s1 + $0x18] sm:$0xf] (!%p138_p2)  ;;  %v4108_v44 = vld [vmem:[%s4637_s1 + $0x8] sm:$0xf] (!%p138_p2) }
   0xa   : > { %180 = vst.msk [vmem:[#allocation2 + $0x30] sm:$0xff] (!%p138_p2), %vm172_vm1, %v3913_v4  ;;  %181 = vst.msk [vmem:[#allocation2 + $0x38] sm:$0xff] (!%p138_p2), %vm172_vm1, %v3913_v4  ;;  %vm2915_vm3 = vcmask (!%p138_p2), 523264  }
   0xb   : > { %182 = vst.msk [vmem:[#allocation2 + $0x40] sm:$0x3] (!%p138_p2), %vm175_vm2, %v3913_v4  ;;  %185 = vst.msk [vmem:[#allocation2 + $0x58] sm:$0x3] (!%p138_p2), %vm175_vm2, %v3913_v4 }
   0xc   : > { %183 = vst.msk [vmem:[#allocation2 + $0x48] sm:$0xff] (!%p138_p2), %vm172_vm1, %v3913_v4  ;;  %184 = vst.msk [vmem:[#allocation2 + $0x50] sm:$0xff] (!%p138_p2), %vm172_vm1, %v3913_v4 }
   0xd   : > { %186 = vst.msk [vmem:[#allocation2 + $0x60] sm:$0xff] %vm172_vm1, %v3913_v4  ;;  %187 = vst.msk [vmem:[#allocation2 + $0x68] sm:$0xff] %vm172_vm1, %v3913_v4  ;;  %s4642_s13 = smov (!%p3960_p3, %s3003_s13), 1 }
   0xe   : > { %188 = vst.msk [vmem:[#allocation2 + $0x70] sm:$0x3] %vm175_vm2, %v3913_v4  ;;  %191 = vst.msk [vmem:[#allocation2 + $0x88] sm:$0x3] %vm175_vm2, %v3913_v4  ;;  %s3167_s23 = sshll.u32 %s4642_s13, 8  ;;  %v342_v13 = vld [vmem:[#allocation2 + $0x1] sm:$0xff] }
   0xf   : > { %189 = vst.msk [vmem:[#allocation2 + $0x78] sm:$0xff] %vm172_vm1, %v3913_v4  ;;  %190 = vst.msk [vmem:[#allocation2 + $0x80] sm:$0xff] %vm172_vm1, %v3913_v4  ;;  %s4042_s26 = scalar_lea.vmem %s4636_s0, %s3167_s23  ;;  %v343_v14 = vld [vmem:[#allocation2 + $0x9] sm:$0xff]  ;;  %s4535_s16 = scalar_lea.vmem %s4639_s3, %s3167_s23 }
  0x10   : > { %192 = vst.msk [vmem:[#allocation2 + $0x90] sm:$0xff] %vm172_vm1, %v3913_v4  ;;  %193 = vst.msk [vmem:[#allocation2 + $0x98] sm:$0xff] %vm172_vm1, %v3913_v4  ;;  %v228_v7 = vld [vmem:[%s4042_s26] sm:$0xff]  ;;  %v229_v8 = vld [vmem:[%s4042_s26 + $0x8] sm:$0xff]  ;;  %v374_v16 = vpack.c.bf16 %v343_v14, %v342_v13 }
  0x11   : > { %194 = vst.msk [vmem:[#allocation2 + $0xa0] sm:$0x3] %vm175_vm2, %v3913_v4  ;;  %197 = vst.msk [vmem:[#allocation2 + $0xb8] sm:$0x3] %vm175_vm2, %v3913_v4  ;;  %v230_v9 = vld [vmem:[%s4042_s26 + $0x10] sm:$0xff]  ;;  %v231_v10 = vld [vmem:[%s4042_s26 + $0x18] sm:$0xff] }
  0x12   : > { %195 = vst.msk [vmem:[#allocation2 + $0xa8] sm:$0xff] %vm172_vm1, %v3913_v4  ;;  %196 = vst.msk [vmem:[#allocation2 + $0xb0] sm:$0xff] %vm172_vm1, %v3913_v4  ;;  %v232_v11 = vld [vmem:[%s4042_s26 + $0x20] sm:$0xff]  ;;  %v233_v12 = vld [vmem:[%s4042_s26 + $0x28] sm:$0xff]  ;;  %3324 = vmatprep.mubr.msk.bf16.mxu1 %vm172_vm1, %v374_v16 }
  0x13   : > { %198 = vst.msk [vmem:[#allocation2 + $0xc0] sm:$0xff] %vm172_vm1, %v3913_v4  ;;  %199 = vst.msk [vmem:[#allocation2 + $0xc8] sm:$0xff] %vm172_vm1, %v3913_v4  ;;  %v234_v15 = vld [vmem:[%s4042_s26 + $0x30] sm:$0xff]  ;;  %v235_v17 = vld [vmem:[%s4042_s26 + $0x38] sm:$0xff] }
  0x14   : > { %200 = vst.msk [vmem:[#allocation2 + $0xd0] sm:$0x3] %vm175_vm2, %v3913_v4  ;;  %203 = vst.msk [vmem:[#allocation2 + $0xe8] sm:$0x3] %vm175_vm2, %v3913_v4  ;;  %v236_v18 = vld [vmem:[%s4042_s26 + $0x40] sm:$0xff]  ;;  %v237_v19 = vld [vmem:[%s4042_s26 + $0x48] sm:$0xff] }
  0x15   : > { %201 = vst.msk [vmem:[#allocation2 + $0xd8] sm:$0xff] %vm172_vm1, %v3913_v4  ;;  %202 = vst.msk [vmem:[#allocation2 + $0xe0] sm:$0xff] %vm172_vm1, %v3913_v4  ;;  %v238_v20 = vld [vmem:[%s4042_s26 + $0x50] sm:$0xff]  ;;  %v239_v21 = vld [vmem:[%s4042_s26 + $0x58] sm:$0xff] }
  0x16   : > { %204 = vst.msk [vmem:[#allocation2 + $0xf0] sm:$0xff] %vm172_vm1, %v3913_v4  ;;  %205 = vst.msk [vmem:[#allocation2 + $0xf8] sm:$0xff] %vm172_vm1, %v3913_v4  ;;  %v240_v22 = vld [vmem:[%s4042_s26 + $0x60] sm:$0xff]  ;;  %v241_v23 = vld [vmem:[%s4042_s26 + $0x68] sm:$0xff] }
  0x17   : > { %206 = vst.msk [vmem:[#allocation2 + $0x100] sm:$0x3] %vm175_vm2, %v3913_v4  ;;  %209 = vst.msk [vmem:[#allocation2 + $0x118] sm:$0x3] %vm175_vm2, %v3913_v4  ;;  %v242_v24 = vld [vmem:[%s4042_s26 + $0x70] sm:$0xff]  ;;  %v243_v25 = vld [vmem:[%s4042_s26 + $0x78] sm:$0xff] }
  0x18   : > { %207 = vst.msk [vmem:[#allocation2 + $0x108] sm:$0xff] %vm172_vm1, %v3913_v4  ;;  %208 = vst.msk [vmem:[#allocation2 + $0x110] sm:$0xff] %vm172_vm1, %v3913_v4  ;;  %v244_v26 = vld [vmem:[%s4042_s26 + $0x80] sm:$0xff]  ;;  %v245_v27 = vld [vmem:[%s4042_s26 + $0x88] sm:$0xff] }
  0x19   : > { %210 = vst.msk [vmem:[#allocation2 + $0x120] sm:$0xff] %vm172_vm1, %v3913_v4  ;;  %211 = vst.msk [vmem:[#allocation2 + $0x128] sm:$0xff] %vm172_vm1, %v3913_v4  ;;  %v246_v28 = vld [vmem:[%s4042_s26 + $0x90] sm:$0xff]  ;;  %v247_v29 = vld [vmem:[%s4042_s26 + $0x98] sm:$0xff] }
  0x1a   : > { %212 = vst.msk [vmem:[#allocation2 + $0x130] sm:$0x3] %vm175_vm2, %v3913_v4  ;;  %215 = vst.msk [vmem:[#allocation2 + $0x148] sm:$0x3] %vm175_vm2, %v3913_v4  ;;  %v248_v30 = vld [vmem:[%s4042_s26 + $0xa0] sm:$0xff]  ;;  %v249_v31 = vld [vmem:[%s4042_s26 + $0xa8] sm:$0xff] }
  0x1b   : > { %213 = vst.msk [vmem:[#allocation2 + $0x138] sm:$0xff] %vm172_vm1, %v3913_v4  ;;  %214 = vst.msk [vmem:[#allocation2 + $0x140] sm:$0xff] %vm172_vm1, %v3913_v4  ;;  %v250_v51 = vld [vmem:[%s4042_s26 + $0xb0] sm:$0xff]  ;;  %v251_v52 = vld [vmem:[%s4042_s26 + $0xb8] sm:$0xff] }
  0x1c   : > { %216 = vst.msk [vmem:[#allocation2 + $0x150] sm:$0xff] %vm172_vm1, %v3913_v4  ;;  %217 = vst.msk [vmem:[#allocation2 + $0x158] sm:$0xff] %vm172_vm1, %v3913_v4  ;;  %v252_v53 = vld [vmem:[%s4042_s26 + $0xc0] sm:$0xff]  ;;  %v253_v54 = vld [vmem:[%s4042_s26 + $0xc8] sm:$0xff] }
  0x1d   : > { %218 = vst.msk [vmem:[#allocation2 + $0x160] sm:$0x3] %vm175_vm2, %v3913_v4  ;;  %221 = vst.msk [vmem:[#allocation2 + $0x178] sm:$0x3] %vm175_vm2, %v3913_v4  ;;  %v254_v57 = vld [vmem:[%s4042_s26 + $0xd0] sm:$0xff]  ;;  %v255_v58 = vld [vmem:[%s4042_s26 + $0xd8] sm:$0xff] }
  0x1e   : > { %219 = vst.msk [vmem:[#allocation2 + $0x168] sm:$0xff] %vm172_vm1, %v3913_v4  ;;  %220 = vst.msk [vmem:[#allocation2 + $0x170] sm:$0xff] %vm172_vm1, %v3913_v4  ;;  %v256_v59 = vld [vmem:[%s4042_s26 + $0xe0] sm:$0xff]  ;;  %v257_v60 = vld [vmem:[%s4042_s26 + $0xe8] sm:$0xff] }
  0x1f   : > { %222 = vst.msk [vmem:[#allocation2 + $0x180] sm:$0xff] %vm172_vm1, %v3913_v4  ;;  %223 = vst.msk [vmem:[#allocation2 + $0x188] sm:$0xff] %vm172_vm1, %v3913_v4  ;;  %v259_v13 = vld [vmem:[%s4042_s26 + $0xf8] sm:$0xff] }
  0x20   : > { %224 = vst.msk [vmem:[#allocation2 + $0x190] sm:$0x3] %vm175_vm2, %v3913_v4  ;;  %227 = vst.msk [vmem:[#allocation2 + $0x1a8] sm:$0x3] %vm175_vm2, %v3913_v4 }
  0x21   : > { %225 = vst.msk [vmem:[#allocation2 + $0x198] sm:$0xff] %vm172_vm1, %v3913_v4  ;;  %226 = vst.msk [vmem:[#allocation2 + $0x1a0] sm:$0xff] %vm172_vm1, %v3913_v4 }
  0x22   : > { %261 = vst.msk [vmem:[#allocation2 + $0x19] sm:$0xff] %vm172_vm1, %v228_v7  ;;  %262 = vst.msk [vmem:[#allocation2 + $0x21] sm:$0xff] %vm172_vm1, %v229_v8 }
  0x23   : > { %263 = vst.msk [vmem:[#allocation2 + $0x31] sm:$0xff] %vm172_vm1, %v230_v9  ;;  %264 = vst.msk [vmem:[#allocation2 + $0x39] sm:$0xff] %vm172_vm1, %v231_v10 }
  0x24   : > { %265 = vst.msk [vmem:[#allocation2 + $0x49] sm:$0xff] %vm172_vm1, %v232_v11  ;;  %266 = vst.msk [vmem:[#allocation2 + $0x51] sm:$0xff] %vm172_vm1, %v233_v12  ;;  %v258_v12 = vld [vmem:[%s4042_s26 + $0xf0] sm:$0xff] }
  0x25   : > { %267 = vst.msk [vmem:[#allocation2 + $0x61] sm:$0xff] %vm172_vm1, %v234_v15  ;;  %268 = vst.msk [vmem:[#allocation2 + $0x69] sm:$0xff] %vm172_vm1, %v235_v17 }
  0x26   : > { %269 = vst.msk [vmem:[#allocation2 + $0x79] sm:$0xff] %vm172_vm1, %v236_v18  ;;  %270 = vst.msk [vmem:[#allocation2 + $0x81] sm:$0xff] %vm172_vm1, %v237_v19 }
  0x27   : > { %271 = vst.msk [vmem:[#allocation2 + $0x91] sm:$0xff] %vm172_vm1, %v238_v20  ;;  %272 = vst.msk [vmem:[#allocation2 + $0x99] sm:$0xff] %vm172_vm1, %v239_v21 }
  0x28   : > { %273 = vst.msk [vmem:[#allocation2 + $0xa9] sm:$0xff] %vm172_vm1, %v240_v22  ;;  %274 = vst.msk [vmem:[#allocation2 + $0xb1] sm:$0xff] %vm172_vm1, %v241_v23  ;;  %v2093_v23 = vsel %vm440_vm0, %v4101_v43, 0 }
  0x29   : > { %275 = vst.msk [vmem:[#allocation2 + $0xc1] sm:$0xff] %vm172_vm1, %v242_v24  ;;  %276 = vst.msk [vmem:[#allocation2 + $0xc9] sm:$0xff] %vm172_vm1, %v243_v25  ;;  %v344_v32 = vld [vmem:[#allocation2 + $0x19] sm:$0xff]  ;;  %v345_v33 = vld [vmem:[#allocation2 + $0x21] sm:$0xff] }
  0x2a   : > { %277 = vst.msk [vmem:[#allocation2 + $0xd9] sm:$0xff] %vm172_vm1, %v244_v26  ;;  %278 = vst.msk [vmem:[#allocation2 + $0xe1] sm:$0xff] %vm172_vm1, %v245_v27  ;;  %v1407_v34 = vld [vmem:[#allocation2 + $0x31] sm:$0xff]  ;;  %v375_v35 = vpack.c.bf16 %v345_v33, %v344_v32  ;;  %v1408_v37 = vld [vmem:[#allocation2 + $0x39] sm:$0xff] }
  0x2b   : > { %279 = vst.msk [vmem:[#allocation2 + $0xf1] sm:$0xff] %vm172_vm1, %v246_v28  ;;  %280 = vst.msk [vmem:[#allocation2 + $0xf9] sm:$0xff] %vm172_vm1, %v247_v29  ;;  %v348_v38 = vld [vmem:[#allocation2 + $0x49] sm:$0xff]  ;;  %v349_v39 = vld [vmem:[#allocation2 + $0x51] sm:$0xff]  ;;  %v4090_v40 = vpack.c.bf16 %v1408_v37, %v1407_v34 }
  0x2c   : > { %281 = vst.msk [vmem:[#allocation2 + $0x109] sm:$0xff] %vm172_vm1, %v248_v30  ;;  %282 = vst.msk [vmem:[#allocation2 + $0x111] sm:$0xff] %vm172_vm1, %v249_v31  ;;  %v4094_v42 = vpack.c.bf16 %v349_v39, %v348_v38  ;;  %3325 = vmatmul.mubr.msk.bf16.vlgmr.msra.gmra.mrb[0].mxu1 %vm172_vm1, %v375_v35  ;;  %3460 = vmatprep.mubr.msk.bf16.mxu0 %vm172_vm1, %v375_v35  ;;  %v1411_v45 = vld [vmem:[#allocation2 + $0x61] sm:$0xff]  ;;  %v1412_v46 = vld [vmem:[#allocation2 + $0x69] sm:$0xff] }
  0x2d   : > { %3357 = vmatpush3.bf16.msra.mxu1 %v654_v36  ;;  %3461 = vmatmul.mubr.msk.bf16.vlgmr.msra.gmra.mrb[0].mxu0 %vm172_vm1, %v4090_v40  ;;  %v352_v47 = vld [vmem:[#allocation2 + $0x79] sm:$0xff]  ;;  %v353_v48 = vld [vmem:[#allocation2 + $0x81] sm:$0xff]  ;;  %v4118_v49 = vpack.c.bf16 %v1412_v46, %v1411_v45  ;;  %283 = vst.msk [vmem:[#allocation2 + $0x121] sm:$0xff] %vm172_vm1, %v250_v51  ;;  %284 = vst.msk [vmem:[#allocation2 + $0x129] sm:$0xff] %vm172_vm1, %v251_v52 }
  0x2e   : > { %3493 = vmatpush3.bf16.msra.mxu0 %v1798_v41  ;;  %3328 = vmatprep.mubr.msk.bf16.mxu1 %vm172_vm1, %v4090_v40  ;;  %v4120_v50 = vpack.c.bf16 %v353_v48, %v352_v47  ;;  %285 = vst.msk [vmem:[#allocation2 + $0x139] sm:$0xff] %vm172_vm1, %v252_v53  ;;  %v1415_v55 = vld [vmem:[#allocation2 + $0x91] sm:$0xff]  ;;  %v1416_v56 = vld [vmem:[#allocation2 + $0x99] sm:$0xff]  ;;  %286 = vst.msk [vmem:[#allocation2 + $0x141] sm:$0xff] %vm172_vm1, %v253_v54 }
  0x2f   : > { %3464 = vmatprep.mubr.msk.bf16.mxu0 %vm172_vm1, %v4094_v42  ;;  %3893 = vmatprep.subr.msk.bf16.mxu0 %vm440_vm0, %v4101_v43  ;;  %287 = vst.msk [vmem:[#allocation2 + $0x151] sm:$0xff] %vm172_vm1, %v254_v57  ;;  %v356_v61 = vld [vmem:[#allocation2 + $0xa9] sm:$0xff]  ;;  %v357_v62 = vld [vmem:[#allocation2 + $0xb1] sm:$0xff]  ;;  %288 = vst.msk [vmem:[#allocation2 + $0x159] sm:$0xff] %vm172_vm1, %v255_v58  ;;  %v4146_v63 = vpack.c.bf16 %v1416_v56, %v1415_v55 }
  0x30   : > { %3888 = vmatprep.subr.msk.bf16.mxu1 %vm440_vm0, %v4108_v44  ;;  %289 = vst.msk [vmem:[#allocation2 + $0x169] sm:$0xff] %vm172_vm1, %v256_v59  ;;  %290 = vst.msk [vmem:[#allocation2 + $0x171] sm:$0xff] %vm172_vm1, %v257_v60  ;;  %v4148_v0 = vpack.c.bf16 %v357_v62, %v356_v61  ;;  %v1419_v2 = vld [vmem:[#allocation2 + $0xc1] sm:$0xff]  ;;  %v1420_v4 = vld [vmem:[#allocation2 + $0xc9] sm:$0xff] }
  0x31   : > { %v1699_v5 = vld [vmem:[#allocation2 + $0x1a] sm:$0xff]  ;;  %v1700_v6 = vld [vmem:[#allocation2 + $0x22] sm:$0xff]  ;;  %v4158_v7 = vpack.c.bf16 %v1420_v4, %v1419_v2  ;;  %v1701_v11 = vld [vmem:[#allocation2 + $0x32] sm:$0xff]  ;;  %291 = vst.msk [vmem:[#allocation2 + $0x181] sm:$0xff] %vm172_vm1, %v258_v12 }
  0x32   : > { %v4160_v8 = vpack.c.bf16 %v1700_v6, %v1699_v5  ;;  %v360_v9 = vld [vmem:[#allocation2 + $0xd9] sm:$0xff]  ;;  %v361_v10 = vld [vmem:[#allocation2 + $0xe1] sm:$0xff]  ;;  %v362_v15 = vld [vmem:[#allocation2 + $0xf1] sm:$0xff]  ;;  %292 = vst.msk [vmem:[#allocation2 + $0x189] sm:$0xff] %vm172_vm1, %v259_v13 }
  0x33   : > { %v1702_v14 = vld [vmem:[#allocation2 + $0x3a] sm:$0xff]  ;;  %v1703_v17 = vld [vmem:[#allocation2 + $0x4a] sm:$0xff]  ;;  %v1704_v18 = vld [vmem:[#allocation2 + $0x52] sm:$0xff]  ;;  %v4174_v19 = vpack.c.bf16 %v361_v10, %v360_v9 }
  0x34   : > { %3329 = vmatmul.mubr.msk.bf16.gmra.mrb[4].mxu1 %vm172_vm1, %v4094_v42  ;;  %v363_v16 = vld [vmem:[#allocation2 + $0xf9] sm:$0xff]  ;;  %v4176_v20 = vpack.c.bf16 %v1702_v14, %v1701_v11  ;;  %v4180_v22 = vpack.c.bf16 %v1704_v18, %v1703_v17  ;;  %v364_v25 = vld [vmem:[#allocation2 + $0x109] sm:$0xff]  ;;  %v365_v26 = vld [vmem:[#allocation2 + $0x111] sm:$0xff]  ;;  %v916_v18 = vsel %vm440_vm0, %v4108_v44, 0 }
  0x35   : > { %3465 = vmatmul.mubr.msk.bf16.gmra.mrb[4].mxu0 %vm172_vm1, %v4118_v49  ;;  %3332 = vmatprep.mubr.msk.bf16.mxu1 %vm172_vm1, %v4118_v49  ;;  %v4178_v21 = vpack.c.bf16 %v363_v16, %v362_v15  ;;  %v4189_v24 = vld [vmem:[%s4637_s1 + $0x1c] sm:$0xf]  ;;  %v1705_v27 = vld [vmem:[#allocation2 + $0x62] sm:$0xff]  ;;  %v1706_v28 = vld [vmem:[#allocation2 + $0x6a] sm:$0xff]  ;;  %v4199_v33 = vpack.c.bf16 %v365_v26, %v364_v25 }
  0x36   : > { %3468 = vmatprep.mubr.msk.bf16.mxu0 %vm172_vm1, %v4120_v50  ;;  %v366_v29 = vld [vmem:[#allocation2 + $0x121] sm:$0xff]  ;;  %v367_v30 = vld [vmem:[#allocation2 + $0x129] sm:$0xff]  ;;  %v4201_v34 = vpack.c.bf16 %v1706_v28, %v1705_v27  ;;  %v368_v37 = vld [vmem:[#allocation2 + $0x139] sm:$0xff] }
  0x37   : > { %v1707_v31 = vld [vmem:[#allocation2 + $0x7a] sm:$0xff]  ;;  %v1708_v32 = vld [vmem:[#allocation2 + $0x82] sm:$0xff]  ;;  %v4203_v35 = vpack.c.bf16 %v367_v30, %v366_v29  ;;  %v1709_v39 = vld [vmem:[#allocation2 + $0x92] sm:$0xff] }
  0x38   : > { %v4205_v36 = vpack.c.bf16 %v1708_v32, %v1707_v31  ;;  %v369_v38 = vld [vmem:[#allocation2 + $0x141] sm:$0xff]  ;;  %v370_v43 = vld [vmem:[#allocation2 + $0x151] sm:$0xff]  ;;  %v371_v45 = vld [vmem:[#allocation2 + $0x159] sm:$0xff] }
  0x39   : > { %v1710_v41 = vld [vmem:[#allocation2 + $0x9a] sm:$0xff]  ;;  %v1711_v46 = vld [vmem:[#allocation2 + $0xaa] sm:$0xff]  ;;  %v1712_v47 = vld [vmem:[#allocation2 + $0xb2] sm:$0xff]  ;;  %v4215_v48 = vpack.c.bf16 %v369_v38, %v368_v37  ;;  %v4219_v52 = vpack.c.bf16 %v371_v45, %v370_v43 }
  0x3a   : > { %v4217_v51 = vpack.c.bf16 %v1710_v41, %v1709_v39  ;;  %v4221_v53 = vpack.c.bf16 %v1712_v47, %v1711_v46  ;;  %v372_v54 = vld [vmem:[#allocation2 + $0x169] sm:$0xff]  ;;  %v373_v55 = vld [vmem:[#allocation2 + $0x171] sm:$0xff]  ;;  %v293_v58 = vld [vmem:[#allocation2] sm:$0xff] }
  0x3b   : > { %v1713_v56 = vld [vmem:[#allocation2 + $0xc2] sm:$0xff]  ;;  %v1714_v57 = vld [vmem:[#allocation2 + $0xca] sm:$0xff]  ;;  %v1715_v60 = vld [vmem:[#allocation2 + $0xda] sm:$0xff]  ;;  %v4231_v62 = vpack.c.bf16 %v373_v55, %v372_v54 }
  0x3c   : > { %3333 = vmatmul.mubr.msk.bf16.gmra.mrb[8].mxu1 %vm172_vm1, %v4120_v50  ;;  %v294_v59 = vld [vmem:[#allocation2 + $0x8] sm:$0xff]  ;;  %v4233_v2 = vpack.c.bf16 %v1714_v57, %v1713_v56  ;;  %v295_v6 = vld [vmem:[#allocation2 + $0x18] sm:$0xff]  ;;  %v296_v9 = vld [vmem:[#allocation2 + $0x20] sm:$0xff] }
  0x3d   : > { %3469 = vmatmul.mubr.msk.bf16.gmra.mrb[8].mxu0 %vm172_vm1, %v4146_v63  ;;  %3336 = vmatprep.mubr.msk.bf16.mxu1 %vm172_vm1, %v4146_v63  ;;  %v1716_v61 = vld [vmem:[#allocation2 + $0xe2] sm:$0xff]  ;;  %v325_v4 = vpack.c.bf16 %v294_v59, %v293_v58  ;;  %v1717_v10 = vld [vmem:[#allocation2 + $0xf2] sm:$0xff]  ;;  %v1718_v11 = vld [vmem:[#allocation2 + $0xfa] sm:$0xff]  ;;  %v4244_v16 = vpack.c.bf16 %v296_v9, %v295_v6 }
  0x3e   : > { %3472 = vmatprep.mubr.msk.bf16.mxu0 %vm172_vm1, %v4148_v0  ;;  %v4235_v5 = vpack.c.bf16 %v1716_v61, %v1715_v60  ;;  %v297_v12 = vld [vmem:[#allocation2 + $0x30] sm:$0xff]  ;;  %v298_v13 = vld [vmem:[#allocation2 + $0x38] sm:$0xff]  ;;  %v4246_v17 = vpack.c.bf16 %v1718_v11, %v1717_v10  ;;  %v4259_v26 = vld [vmem:[%s4637_s1 + $0xc] sm:$0xf] }
  0x3f   : > { %v1719_v14 = vld [vmem:[#allocation2 + $0x10a] sm:$0xff]  ;;  %v1720_v15 = vld [vmem:[#allocation2 + $0x112] sm:$0xff]  ;;  %v1721_v29 = vld [vmem:[#allocation2 + $0x122] sm:$0xff] }
  0x40   : > { %v4252_v25 = vpack.c.bf16 %v1720_v15, %v1719_v14  ;;  %v299_v27 = vld [vmem:[#allocation2 + $0x48] sm:$0xff]  ;;  %v300_v28 = vld [vmem:[#allocation2 + $0x50] sm:$0xff]  ;;  %v301_v30 = vld [vmem:[#allocation2 + $0x60] sm:$0xff] }
  0x41   : > { %v1722_v44 = vld [vmem:[#allocation2 + $0x12a] sm:$0xff]  ;;  %v1723_v32 = vld [vmem:[#allocation2 + $0x13a] sm:$0xff]  ;;  %v1724_v37 = vld [vmem:[#allocation2 + $0x142] sm:$0xff]  ;;  %v4269_v38 = vpack.c.bf16 %v300_v28, %v299_v27 }
  0x42   : > { %v302_v31 = vld [vmem:[#allocation2 + $0x68] sm:$0xff]  ;;  %v4271_v39 = vpack.c.bf16 %v1722_v44, %v1721_v29  ;;  %v4275_v43 = vpack.c.bf16 %v1724_v37, %v1723_v32  ;;  %v303_v45 = vld [vmem:[#allocation2 + $0x78] sm:$0xff]  ;;  %v304_v46 = vld [vmem:[#allocation2 + $0x80] sm:$0xff]  ;;  %v2387_v32 = vsel %vm440_vm0, %v4189_v24, 0 }
  0x43   : > { %v4273_v41 = vpack.c.bf16 %v302_v31, %v301_v30  ;;  %v1725_v47 = vld [vmem:[#allocation2 + $0x152] sm:$0xff]  ;;  %v1726_v54 = vld [vmem:[#allocation2 + $0x15a] sm:$0xff]  ;;  %v1727_v57 = vld [vmem:[#allocation2 + $0x16a] sm:$0xff]  ;;  %v4285_v59 = vpack.c.bf16 %v304_v46, %v303_v45 }
  0x44   : > { %3337 = vmatmul.mubr.msk.bf16.gmra.mrb[12].mxu1 %vm172_vm1, %v4148_v0  ;;  %v305_v55 = vld [vmem:[#allocation2 + $0x90] sm:$0xff]  ;;  %v306_v56 = vld [vmem:[#allocation2 + $0x98] sm:$0xff]  ;;  %v4287_v60 = vpack.c.bf16 %v1726_v54, %v1725_v47  ;;  %v307_v6 = vld [vmem:[#allocation2 + $0xa8] sm:$0xff] }
  0x45   : > { %3473 = vmatmul.mubr.msk.bf16.gmra.mrb[12].mxu0 %vm172_vm1, %v4158_v7  ;;  %3340 = vmatprep.mubr.msk.bf16.mxu1 %vm172_vm1, %v4158_v7  ;;  %v1728_v58 = vld [vmem:[#allocation2 + $0x172] sm:$0xff]  ;;  %v4289_v61 = vpack.c.bf16 %v306_v56, %v305_v55  ;;  %v309_v10 = vld [vmem:[#allocation2 + $0xc0] sm:$0xff]  ;;  %v315_v45 = vld [vmem:[#allocation2 + $0x108] sm:$0xff] }
  0x46   : > { %3494 = vmatprep.mubr.msk.bf16.mxu0 %vm172_vm1, %v4160_v8  ;;  %v308_v9 = vld [vmem:[#allocation2 + $0xb0] sm:$0xff]  ;;  %v1729_v11 = vld [vmem:[#allocation2 + $0x182] sm:$0xff]  ;;  %v311_v27 = vld [vmem:[#allocation2 + $0xd8] sm:$0xff] }
  0x47   : > { %v4301_v14 = vpack.c.bf16 %v308_v9, %v307_v6  ;;  %v312_v28 = vld [vmem:[#allocation2 + $0xe0] sm:$0xff]  ;;  %v313_v29 = vld [vmem:[#allocation2 + $0xf0] sm:$0xff]  ;;  %v314_v44 = vld [vmem:[#allocation2 + $0xf8] sm:$0xff] }
  0x48   : > { %v4315_v30 = vpack.c.bf16 %v312_v28, %v311_v27  ;;  %v4317_v31 = vpack.c.bf16 %v314_v44, %v313_v29  ;;  %v3147_v37 = vld [vmem:[%s4637_s1 + $0x20] sm:$0xf]  ;;  %v316_v46 = vld [vmem:[#allocation2 + $0x110] sm:$0xff]  ;;  %v318_v47 = vld [vmem:[#allocation2 + $0x128] sm:$0xff]  ;;  %v1210_v44 = vsel %vm440_vm0, %v4259_v26, 0 }
  0x49   : > { %v4333_v54 = vpack.c.bf16 %v316_v46, %v315_v45  ;;  %v319_v56 = vld [vmem:[#allocation2 + $0x138] sm:$0xff]  ;;  %v818_v27 = vld [vmem:[#allocation2 + $0xa] sm:$0xff]  ;;  %v2025_v45 = vld [vmem:[#allocation2 + $0x1a0] sm:$0xff] }
  0x4a   : > { %v322_v6 = vld [vmem:[#allocation2 + $0x158] sm:$0xff] }
  0x4c   : > { %3341 = vmatmul.mubr.msk.bf16.gmra.mrb[16].mxu1 %vm172_vm1, %v4174_v19 }
  0x4d   : > { %3495 = vmatmul.mubr.msk.bf16.vlgmr.msra.gmra.mrb[0].mxu0 %vm172_vm1, %v4176_v20  ;;  %3344 = vmatprep.mubr.msk.bf16.mxu1 %vm172_vm1, %v4178_v21 }
  0x4e   : > { %3527 = vmatpush3.bf16.msra.mxu0 %v2093_v23  ;;  %3498 = vmatprep.mubr.msk.bf16.mxu0 %vm172_vm1, %v4180_v22  ;;  %v4250_v23 = vpack.c.bf16 %v298_v13, %v297_v12  ;;  %v1730_v12 = vld [vmem:[#allocation2 + $0x18a] sm:$0xff] }
  0x4f   : > { %3894 = vmatprep.subr.msk.bf16.mxu0 %vm440_vm0, %v4189_v24  ;;  %v310_v13 = vld [vmem:[#allocation2 + $0xc8] sm:$0xff]  ;;  %v4303_v15 = vpack.c.bf16 %v1730_v12, %v1729_v11  ;;  %v317_v24 = vld [vmem:[#allocation2 + $0x120] sm:$0xff]  ;;  %v324_v12 = vld [vmem:[#allocation2 + $0x170] sm:$0xff] }
  0x50   : > { %v4335_v55 = vpack.c.bf16 %v318_v47, %v317_v24  ;;  %v323_v11 = vld [vmem:[#allocation2 + $0x168] sm:$0xff]  ;;  %v2681_v24 = vsel %vm440_vm0, %v3147_v37, 0 }
  0x51   : > { %v4357_v28 = vpack.c.bf16 %v324_v12, %v323_v11 }
  0x54   : > { %3345 = vmatmul.mubr.msk.bf16.gmra.mrb[20].mxu1 %vm172_vm1, %v4199_v33 }
  0x55   : > { %3499 = vmatmul.mubr.msk.bf16.gmra.mrb[4].mxu0 %vm172_vm1, %v4201_v34  ;;  %3348 = vmatprep.mubr.msk.bf16.mxu1 %vm172_vm1, %v4203_v35 }
  0x56   : > { %3502 = vmatprep.mubr.msk.bf16.mxu0 %vm172_vm1, %v4205_v36 }
  0x5c   : > { %3349 = vmatmul.mubr.msk.bf16.gmra.mrb[24].mxu1 %vm172_vm1, %v4215_v48 }
  0x5d   : > { %3503 = vmatmul.mubr.msk.bf16.gmra.mrb[8].mxu0 %vm172_vm1, %v4217_v51  ;;  %3352 = vmatprep.mubr.msk.bf16.mxu1 %vm172_vm1, %v4219_v52 }
  0x5e   : > { %3506 = vmatprep.mubr.msk.bf16.mxu0 %vm172_vm1, %v4221_v53 }
  0x64   : > { %3353 = vmatmul.mubr.msk.bf16.gmra.mrb[28].mxu1 %vm172_vm1, %v4231_v62 }
  0x65   : > { %3507 = vmatmul.mubr.msk.bf16.gmra.mrb[12].mxu0 %vm172_vm1, %v4233_v2  ;;  %3358 = vmatprep.mubr.msk.bf16.mxu1 %vm172_vm1, %v325_v4  ;;  %v4291_v4 = vpack.c.bf16 %v1728_v58, %v1727_v57  ;;  %v320_v57 = vld [vmem:[#allocation2 + $0x140] sm:$0xff]  ;;  %v321_v58 = vld [vmem:[#allocation2 + $0x150] sm:$0xff] }
  0x66   : > { %3510 = vmatprep.mubr.msk.bf16.mxu0 %vm172_vm1, %v4235_v5  ;;  %v4345_v9 = vpack.c.bf16 %v320_v57, %v319_v56 }
  0x6c   : > { %3359 = vmatmul.mubr.msk.bf16.vlgmr.msra.gmra.mrb[0].mxu1 %vm172_vm1, %v4244_v16 }
  0x6d   : > { %3391 = vmatpush3.bf16.msra.mxu1 %v916_v18  ;;  %3511 = vmatmul.mubr.msk.bf16.gmra.mrb[16].mxu0 %vm172_vm1, %v4246_v17  ;;  %v4305_v18 = vpack.c.bf16 %v310_v13, %v309_v10  ;;  %v4347_v10 = vpack.c.bf16 %v322_v6, %v321_v58  ;;  %v817_v13 = vld [vmem:[#allocation2 + $0x2] sm:$0xff] }
  0x6e   : > { %3362 = vmatprep.mubr.msk.bf16.mxu1 %vm172_vm1, %v4250_v23  ;;  %3514 = vmatprep.mubr.msk.bf16.mxu0 %vm172_vm1, %v4252_v25  ;;  %v849_v29 = vpack.c.bf16 %v818_v27, %v817_v13 }
  0x6f   : > { %3889 = vmatprep.subr.msk.bf16.mxu1 %vm440_vm0, %v4259_v26  ;;  %v2023_v26 = vld [vmem:[#allocation2 + $0x188] sm:$0xff] }
  0x74   : > { %3363 = vmatmul.mubr.msk.bf16.gmra.mrb[4].mxu1 %vm172_vm1, %v4269_v38 }
  0x75   : > { %3515 = vmatmul.mubr.msk.bf16.gmra.mrb[20].mxu0 %vm172_vm1, %v4271_v39  ;;  %3366 = vmatprep.mubr.msk.bf16.mxu1 %vm172_vm1, %v4273_v41 }
  0x76   : > { %3518 = vmatprep.mubr.msk.bf16.mxu0 %vm172_vm1, %v4275_v43 }
  0x7c   : > { %3367 = vmatmul.mubr.msk.bf16.gmra.mrb[8].mxu1 %vm172_vm1, %v4285_v59 }
  0x7d   : > { %3519 = vmatmul.mubr.msk.bf16.gmra.mrb[24].mxu0 %vm172_vm1, %v4287_v60  ;;  %3370 = vmatprep.mubr.msk.bf16.mxu1 %vm172_vm1, %v4289_v61 }
  0x7e   : > { %3522 = vmatprep.mubr.msk.bf16.mxu0 %vm172_vm1, %v4291_v4 }
  0x84   : > { %3371 = vmatmul.mubr.msk.bf16.gmra.mrb[12].mxu1 %vm172_vm1, %v4301_v14 }
  0x85   : > { %3523 = vmatmul.mubr.msk.bf16.gmra.mrb[28].mxu0 %vm172_vm1, %v4303_v15  ;;  %3374 = vmatprep.mubr.msk.bf16.mxu1 %vm172_vm1, %v4305_v18 }
  0x86   : > { %3528 = vmatprep.mubr.msk.bf16.mxu0 %vm172_vm1, %v4250_v23 }
  0x8c   : > { %3375 = vmatmul.mubr.msk.bf16.gmra.mrb[16].mxu1 %vm172_vm1, %v4315_v30 }
  0x8d   : > { %3529 = vmatmul.mubr.msk.bf16.vlgmr.msra.gmra.mrb[0].mxu0 %vm172_vm1, %v4269_v38  ;;  %3378 = vmatprep.mubr.msk.bf16.mxu1 %vm172_vm1, %v4317_v31 }
  0x8e   : > { %3561 = vmatpush3.bf16.msra.mxu0 %v2387_v32  ;;  %3532 = vmatprep.mubr.msk.bf16.mxu0 %vm172_vm1, %v4273_v41 }
  0x8f   : > { %3895 = vmatprep.subr.msk.bf16.mxu0 %vm440_vm0, %v3147_v37 }
  0x94   : > { %3379 = vmatmul.mubr.msk.bf16.gmra.mrb[20].mxu1 %vm172_vm1, %v4333_v54 }
  0x95   : > { %3533 = vmatmul.mubr.msk.bf16.gmra.mrb[4].mxu0 %vm172_vm1, %v4285_v59  ;;  %3382 = vmatprep.mubr.msk.bf16.mxu1 %vm172_vm1, %v4335_v55 }
  0x96   : > { %3536 = vmatprep.mubr.msk.bf16.mxu0 %vm172_vm1, %v4289_v61 }
  0x9c   : > { %3383 = vmatmul.mubr.msk.bf16.gmra.mrb[24].mxu1 %vm172_vm1, %v4345_v9 }
  0x9d   : > { %3537 = vmatmul.mubr.msk.bf16.gmra.mrb[8].mxu0 %vm172_vm1, %v4301_v14  ;;  %3386 = vmatprep.mubr.msk.bf16.mxu1 %vm172_vm1, %v4347_v10 }
  0x9e   : > { %3540 = vmatprep.mubr.msk.bf16.mxu0 %vm172_vm1, %v4305_v18 }
  0xa4   : > { %3387 = vmatmul.mubr.msk.bf16.gmra.mrb[28].mxu1 %vm172_vm1, %v4357_v28 }
  0xa5   : > { %3541 = vmatmul.mubr.msk.bf16.gmra.mrb[12].mxu0 %vm172_vm1, %v4315_v30  ;;  %3392 = vmatprep.mubr.msk.bf16.mxu1 %vm172_vm1, %v849_v29 }
  0xa6   : > { %3544 = vmatprep.mubr.msk.bf16.mxu0 %vm172_vm1, %v4317_v31 }
  0xac   : > { %3393 = vmatmul.mubr.msk.bf16.vlgmr.msra.gmra.mrb[0].mxu1 %vm172_vm1, %v4160_v8  ;;  %v2022_v8 = vld [vmem:[#allocation2 + $0x180] sm:$0xff] }
  0xad   : > { %3425 = vmatpush3.bf16.msra.mxu1 %v1210_v44  ;;  %3545 = vmatmul.mubr.msk.bf16.gmra.mrb[16].mxu0 %vm172_vm1, %v4333_v54  ;;  %v4386_v32 = vpack.c.bf16 %v2023_v26, %v2022_v8 }
  0xae   : > { %3396 = vmatprep.mubr.msk.bf16.mxu1 %vm172_vm1, %v4176_v20  ;;  %3548 = vmatprep.mubr.msk.bf16.mxu0 %vm172_vm1, %v4335_v55 }
  0xaf   : > { %3891 = vmatprep.subr.msk.bf16.mxu1 %vm440_vm0, %v3948_v1  ;;  %v2024_v1 = vld [vmem:[#allocation2 + $0x198] sm:$0xff] }
  0xb0   : > { %v2041_v46 = vpack.c.bf16 %v2025_v45, %v2024_v1 }
  0xb4   : > { %3397 = vmatmul.mubr.msk.bf16.gmra.mrb[4].mxu1 %vm172_vm1, %v4180_v22 }
  0xb5   : > { %3549 = vmatmul.mubr.msk.bf16.gmra.mrb[20].mxu0 %vm172_vm1, %v4345_v9  ;;  %3400 = vmatprep.mubr.msk.bf16.mxu1 %vm172_vm1, %v4201_v34 }
  0xb6   : > { %3552 = vmatprep.mubr.msk.bf16.mxu0 %vm172_vm1, %v4347_v10 }
  0xbc   : > { %3401 = vmatmul.mubr.msk.bf16.gmra.mrb[8].mxu1 %vm172_vm1, %v4205_v36 }
  0xbd   : > { %3553 = vmatmul.mubr.msk.bf16.gmra.mrb[24].mxu0 %vm172_vm1, %v4357_v28  ;;  %3404 = vmatprep.mubr.msk.bf16.mxu1 %vm172_vm1, %v4217_v51 }
  0xbe   : > { %3556 = vmatprep.mubr.msk.bf16.mxu0 %vm172_vm1, %v4386_v32 }
  0xc4   : > { %3405 = vmatmul.mubr.msk.bf16.gmra.mrb[12].mxu1 %vm172_vm1, %v4221_v53 }
  0xc5   : > { %3557 = vmatmul.mubr.msk.bf16.gmra.mrb[28].mxu0 %vm172_vm1, %v2041_v46  ;;  %3408 = vmatprep.mubr.msk.bf16.mxu1 %vm172_vm1, %v4233_v2 }
  0xc6   : > { %3562 = vmatprep.mubr.msk.bf16.mxu0 %vm172_vm1, %v4090_v40  ;;  %v2317_v40 = vld [vmem:[#allocation2 + $0x189] sm:$0xff] }
  0xcc   : > { %3409 = vmatmul.mubr.msk.bf16.gmra.mrb[16].mxu1 %vm172_vm1, %v4235_v5 }
  0xcd   : > { %3563 = vmatmul.mubr.msk.bf16.vlgmr.msra.gmra.mrb[0].mxu0 %vm172_vm1, %v4094_v42  ;;  %3412 = vmatprep.mubr.msk.bf16.mxu1 %vm172_vm1, %v4246_v17 }
  0xce   : > { %3595 = vmatpush3.bf16.msra.mxu0 %v2681_v24  ;;  %3566 = vmatprep.mubr.msk.bf16.mxu0 %vm172_vm1, %v4118_v49  ;;  %v2318_v49 = vld [vmem:[#allocation2 + $0x199] sm:$0xff] }
  0xd4   : > { %3413 = vmatmul.mubr.msk.bf16.gmra.mrb[20].mxu1 %vm172_vm1, %v4252_v25 }
  0xd5   : > { %3567 = vmatmul.mubr.msk.bf16.gmra.mrb[4].mxu0 %vm172_vm1, %v4120_v50  ;;  %3416 = vmatprep.mubr.msk.bf16.mxu1 %vm172_vm1, %v4271_v39  ;;  %v2319_v50 = vld [vmem:[#allocation2 + $0x1a1] sm:$0xff] }
  0xd6   : > { %3570 = vmatprep.mubr.msk.bf16.mxu0 %vm172_vm1, %v4146_v63  ;;  %v2335_v63 = vpack.c.bf16 %v2319_v50, %v2318_v49 }
  0xdc   : > { %3417 = vmatmul.mubr.msk.bf16.gmra.mrb[24].mxu1 %vm172_vm1, %v4275_v43 }
  0xdd   : > { %3571 = vmatmul.mubr.msk.bf16.gmra.mrb[8].mxu0 %vm172_vm1, %v4148_v0  ;;  %3420 = vmatprep.mubr.msk.bf16.mxu1 %vm172_vm1, %v4287_v60  ;;  %v2612_v0 = vld [vmem:[#allocation2 + $0x19a] sm:$0xff] }
  0xde   : > { %3574 = vmatprep.mubr.msk.bf16.mxu0 %vm172_vm1, %v4158_v7  ;;  %v2613_v7 = vld [vmem:[#allocation2 + $0x1a2] sm:$0xff] }
  0xe4   : > { %3421 = vmatmul.mubr.msk.bf16.gmra.mrb[28].mxu1 %vm172_vm1, %v4291_v4 }
  0xe5   : > { %3575 = vmatmul.mubr.msk.bf16.gmra.mrb[12].mxu0 %vm172_vm1, %v4174_v19  ;;  %3426 = vmatprep.mubr.msk.bf16.mxu1 %vm172_vm1, %v4244_v16 }
  0xe6   : > { %3578 = vmatprep.mubr.msk.bf16.mxu0 %vm172_vm1, %v4178_v21 }
  0xec   : > { %3427 = vmatmul.mubr.msk.bf16.vlgmr.msra.gmra.mrb[0].mxu1 %vm172_vm1, %v4250_v23 }
  0xed   : > { %3629 = vmatpush3.bf16.msra.mxu1 %v3956_v3  ;;  %3579 = vmatmul.mubr.msk.bf16.gmra.mrb[16].mxu0 %vm172_vm1, %v4199_v33  ;;  %v2316_v3 = vld [vmem:[#allocation2 + $0x181] sm:$0xff] }
  0xee   : > { %3430 = vmatprep.mubr.msk.bf16.mxu1 %vm172_vm1, %v4269_v38  ;;  %3582 = vmatprep.mubr.msk.bf16.mxu0 %vm172_vm1, %v4203_v35  ;;  %v2334_v42 = vpack.c.bf16 %v2317_v40, %v2316_v3 }
  0xf4   : > { %3431 = vmatmul.mubr.msk.bf16.gmra.mrb[4].mxu1 %vm172_vm1, %v4273_v41 }
  0xf5   : > { %3583 = vmatmul.mubr.msk.bf16.gmra.mrb[20].mxu0 %vm172_vm1, %v4215_v48  ;;  %3434 = vmatprep.mubr.msk.bf16.mxu1 %vm172_vm1, %v4285_v59 }
  0xf6   : > { %3586 = vmatprep.mubr.msk.bf16.mxu0 %vm172_vm1, %v4219_v52 }
  0xfc   : > { %3435 = vmatmul.mubr.msk.bf16.gmra.mrb[8].mxu1 %vm172_vm1, %v4289_v61 }
  0xfd   : > { %3587 = vmatmul.mubr.msk.bf16.gmra.mrb[24].mxu0 %vm172_vm1, %v4231_v62  ;;  %3438 = vmatprep.mubr.msk.bf16.mxu1 %vm172_vm1, %v4301_v14 }
  0xfe   : > { %3590 = vmatprep.mubr.msk.bf16.mxu0 %vm172_vm1, %v2334_v42 }
 0x104   : > { %3439 = vmatmul.mubr.msk.bf16.gmra.mrb[12].mxu1 %vm172_vm1, %v4305_v18 }
 0x105   : > { %3591 = vmatmul.mubr.msk.bf16.gmra.mrb[28].mxu0 %vm172_vm1, %v2335_v63  ;;  %3442 = vmatprep.mubr.msk.bf16.mxu1 %vm172_vm1, %v4315_v30 }
 0x106   : > { %3596 = vmatprep.mubr.msk.bf16.mxu0 %vm172_vm1, %v4176_v20 }
 0x10c   : > { %3443 = vmatmul.mubr.msk.bf16.gmra.mrb[16].mxu1 %vm172_vm1, %v4317_v31 }
 0x10d   : > { %3597 = vmatmul.mubr.msk.bf16.vlgmr.msra.gmra.mrb[0].mxu0 %vm172_vm1, %v4180_v22  ;;  %3446 = vmatprep.mubr.msk.bf16.mxu1 %vm172_vm1, %v4333_v54 }
 0x10e   : > { %3600 = vmatprep.mubr.msk.bf16.mxu0 %vm172_vm1, %v4201_v34 }
 0x114   : > { %3447 = vmatmul.mubr.msk.bf16.gmra.mrb[20].mxu1 %vm172_vm1, %v4335_v55 }
 0x115   : > { %3601 = vmatmul.mubr.msk.bf16.gmra.mrb[4].mxu0 %vm172_vm1, %v4205_v36  ;;  %3450 = vmatprep.mubr.msk.bf16.mxu1 %vm172_vm1, %v4345_v9 }
 0x116   : > { %3604 = vmatprep.mubr.msk.bf16.mxu0 %vm172_vm1, %v4217_v51 }
 0x11c   : > { %3451 = vmatmul.mubr.msk.bf16.gmra.mrb[24].mxu1 %vm172_vm1, %v4347_v10 }
 0x11d   : > { %3605 = vmatmul.mubr.msk.bf16.gmra.mrb[8].mxu0 %vm172_vm1, %v4221_v53  ;;  %3454 = vmatprep.mubr.msk.bf16.mxu1 %vm172_vm1, %v4357_v28 }
 0x11e   : > { %3608 = vmatprep.mubr.msk.bf16.mxu0 %vm172_vm1, %v4233_v2 }
 0x124   : > { %3455 = vmatmul.mubr.msk.bf16.gmra.mrb[28].mxu1 %vm172_vm1, %v4386_v32 }
 0x125   : > { %3609 = vmatmul.mubr.msk.bf16.gmra.mrb[12].mxu0 %vm172_vm1, %v4235_v5  ;;  %3476 = vmatprep.mubr.msk.bf16.mxu1 %vm172_vm1, %v4174_v19  ;;  %v2629_v19 = vpack.c.bf16 %v2613_v7, %v2612_v0 }
 0x126   : > { %3612 = vmatprep.mubr.msk.bf16.mxu0 %vm172_vm1, %v4246_v17 }
 0x12c   : > { %3477 = vmatmul.mubr.msk.bf16.vlgmr.msra.gmra.mrb[16].mxu1 %vm172_vm1, %v4178_v21 }
 0x12d   : > { %3613 = vmatmul.mubr.msk.bf16.gmra.mrb[16].mxu0 %vm172_vm1, %v4252_v25  ;;  %3480 = vmatprep.mubr.msk.bf16.mxu1 %vm172_vm1, %v4199_v33  ;;  %v4528_v25 = vld [vmem:[%s4638_s2] ss:$0 sm:$0xff] }
 0x12e   : > { %3616 = vmatprep.mubr.msk.bf16.mxu0 %vm172_vm1, %v4271_v39 }
 0x134   : > { %3481 = vmatmul.mubr.msk.bf16.gmra.mrb[20].mxu1 %vm172_vm1, %v4203_v35 }
 0x135   : > { %3617 = vmatmul.mubr.msk.bf16.gmra.mrb[20].mxu0 %vm172_vm1, %v4275_v43  ;;  %3484 = vmatprep.mubr.msk.bf16.mxu1 %vm172_vm1, %v4215_v48 }
 0x136   : > { %3620 = vmatprep.mubr.msk.bf16.mxu0 %vm172_vm1, %v4287_v60 }
 0x13c   : > { %3485 = vmatmul.mubr.msk.bf16.gmra.mrb[24].mxu1 %vm172_vm1, %v4219_v52 }
 0x13d   : > { %3621 = vmatmul.mubr.msk.bf16.gmra.mrb[24].mxu0 %vm172_vm1, %v4291_v4  ;;  %3488 = vmatprep.mubr.msk.bf16.mxu1 %vm172_vm1, %v4231_v62 }
 0x13e   : > { %3624 = vmatprep.mubr.msk.bf16.mxu0 %vm172_vm1, %v4303_v15 }
 0x144   : > { %3489 = vmatmul.mubr.msk.bf16.gmra.mrb[28].mxu1 %vm172_vm1, %v2334_v42 }
 0x145   : > { %3625 = vmatmul.mubr.msk.bf16.gmra.mrb[28].mxu0 %vm172_vm1, %v2629_v19 }
 0x1bf   : > { %v3428_v20 = vpop.f32.mrb[0].mxu1 }
 0x1c0   : > { %v1246_v21 = vpop.f32.mrb[1].mxu1 }
 0x1c1   : > { %v3429_v22 = vpop.f32.mrb[2].mxu1 }
 0x1c2   : > { %v1249_v33 = vpop.f32.mrb[3].mxu1 }
 0x1c7   : > { %v3432_v34 = vpop.f32.mrb[4].mxu1 }
 0x1c8   : > { %v1262_v35 = vpop.f32.mrb[5].mxu1 }
 0x1c9   : > { %v3433_v36 = vpop.f32.mrb[6].mxu1 }
 0x1ca   : > { %v1265_v48 = vpop.f32.mrb[7].mxu1 }
 0x1cf   : > { %v3436_v51 = vpop.f32.mrb[8].mxu1 }
 0x1d0   : > { %v1278_v52 = vpop.f32.mrb[9].mxu1 }
 0x1d1   : > { %v3437_v53 = vpop.f32.mrb[10].mxu1 }
 0x1d2   : > { %v1281_v62 = vpop.f32.mrb[11].mxu1 }
 0x1d7   : > { %v3440_v2 = vpop.f32.mrb[12].mxu1 }
 0x1d8   : > { %v1294_v5 = vpop.f32.mrb[13].mxu1 }
 0x1d9   : > { %v3441_v16 = vpop.f32.mrb[14].mxu1 }
 0x1da   : > { %v1297_v17 = vpop.f32.mrb[15].mxu1 }
 0x1e0   : > { %v3598_v23 = vpop.f32.mrb[0].mxu0 }
 0x1e1   : > { %v3630_v38 = vadd.f32 %v3598_v23, %v3428_v20  ;;  %v2717_v39 = vpop.f32.mrb[1].mxu0 }
 0x1e2   : > { %v3631_v41 = vadd.f32 %v2717_v39, %v1246_v21  ;;  %v3599_v43 = vpop.f32.mrb[2].mxu0 }
 0x1e3   : > { %v2885_v59 = vadd.f32 %v3630_v38, %v4528_v25  ;;  %v3632_v60 = vadd.f32 %v3599_v43, %v3429_v22  ;;  %v2720_v61 = vpop.f32.mrb[3].mxu0 }
 0x1e4   : > { %v2883_v4 = vadd.f32 %v3631_v41, %v4528_v25  ;;  %v3633_v14 = vadd.f32 %v2720_v61, %v1249_v33 }
 0x1e5   : > { %2918 = vst.msk [vmem:[%s4535_s16 + $0x10] sm:$0xff] %vm2915_vm3, %v2885_v59  ;;  %v2886_v15 = vadd.f32 %v3632_v60, %v4528_v25 }
 0x1e6   : > { %2916 = vst.msk [vmem:[%s4535_s16] sm:$0xff] %vm2915_vm3, %v2883_v4  ;;  %v2884_v18 = vadd.f32 %v3633_v14, %v4528_v25 }
 0x1e7   : > { %2919 = vst.msk [vmem:[%s4535_s16 + $0x18] sm:$0xff] %vm2915_vm3, %v2886_v15 }
 0x1e8   : > { %2917 = vst.msk [vmem:[%s4535_s16 + $0x8] sm:$0xff] %vm2915_vm3, %v2884_v18  ;;  %v3602_v30 = vpop.f32.mrb[4].mxu0 }
 0x1e9   : > { %v3634_v31 = vadd.f32 %v3602_v30, %v3432_v34  ;;  %v2733_v37 = vpop.f32.mrb[5].mxu0 }
 0x1ea   : > { %v3635_v47 = vadd.f32 %v2733_v37, %v1262_v35  ;;  %v3603_v54 = vpop.f32.mrb[6].mxu0 }
 0x1eb   : > { %v2889_v55 = vadd.f32 %v3634_v31, %v4528_v25  ;;  %v3636_v56 = vadd.f32 %v3603_v54, %v3433_v36  ;;  %v2736_v57 = vpop.f32.mrb[7].mxu0 }
 0x1ec   : > { %v2887_v58 = vadd.f32 %v3635_v47, %v4528_v25  ;;  %v3637_v6 = vadd.f32 %v2736_v57, %v1265_v48 }
 0x1ed   : > { %2922 = vst.msk [vmem:[%s4535_s16 + $0x30] sm:$0xff] %vm2915_vm3, %v2889_v55  ;;  %v2890_v9 = vadd.f32 %v3636_v56, %v4528_v25 }
 0x1ee   : > { %2920 = vst.msk [vmem:[%s4535_s16 + $0x20] sm:$0xff] %vm2915_vm3, %v2887_v58  ;;  %v2888_v10 = vadd.f32 %v3637_v6, %v4528_v25 }
 0x1ef   : > { %2923 = vst.msk [vmem:[%s4535_s16 + $0x38] sm:$0xff] %vm2915_vm3, %v2890_v9 }
 0x1f0   : > { %2921 = vst.msk [vmem:[%s4535_s16 + $0x28] sm:$0xff] %vm2915_vm3, %v2888_v10  ;;  %v3606_v11 = vpop.f32.mrb[8].mxu0 }
 0x1f1   : > { %v3638_v12 = vadd.f32 %v3606_v11, %v3436_v51  ;;  %v2749_v13 = vpop.f32.mrb[9].mxu0 }
 0x1f2   : > { %v3639_v27 = vadd.f32 %v2749_v13, %v1278_v52  ;;  %v3607_v28 = vpop.f32.mrb[10].mxu0 }
 0x1f3   : > { %v2893_v29 = vadd.f32 %v3638_v12, %v4528_v25  ;;  %v3640_v44 = vadd.f32 %v3607_v28, %v3437_v53  ;;  %v2752_v8 = vpop.f32.mrb[11].mxu0 }
 0x1f4   : > { %v2891_v26 = vadd.f32 %v3639_v27, %v4528_v25  ;;  %v3641_v32 = vadd.f32 %v2752_v8, %v1281_v62 }
 0x1f5   : > { %2926 = vst.msk [vmem:[%s4535_s16 + $0x50] sm:$0xff] %vm2915_vm3, %v2893_v29  ;;  %v2894_v1 = vadd.f32 %v3640_v44, %v4528_v25 }
 0x1f6   : > { %2924 = vst.msk [vmem:[%s4535_s16 + $0x40] sm:$0xff] %vm2915_vm3, %v2891_v26  ;;  %v2892_v45 = vadd.f32 %v3641_v32, %v4528_v25 }
 0x1f7   : > { %2927 = vst.msk [vmem:[%s4535_s16 + $0x58] sm:$0xff] %vm2915_vm3, %v2894_v1 }
 0x1f8   : > { %2925 = vst.msk [vmem:[%s4535_s16 + $0x48] sm:$0xff] %vm2915_vm3, %v2892_v45  ;;  %v3610_v46 = vpop.f32.mrb[12].mxu0 }
 0x1f9   : > { %v3642_v24 = vadd.f32 %v3610_v46, %v3440_v2  ;;  %v2765_v3 = vpop.f32.mrb[13].mxu0 }
 0x1fa   : > { %v3643_v40 = vadd.f32 %v2765_v3, %v1294_v5  ;;  %v3611_v42 = vpop.f32.mrb[14].mxu0 }
 0x1fb   : > { %v2897_v49 = vadd.f32 %v3642_v24, %v4528_v25  ;;  %v3644_v50 = vadd.f32 %v3611_v42, %v3441_v16  ;;  %v2768_v63 = vpop.f32.mrb[15].mxu0 }
 0x1fc   : > { %v2895_v0 = vadd.f32 %v3643_v40, %v4528_v25  ;;  %v3645_v7 = vadd.f32 %v2768_v63, %v1297_v17 }
 0x1fd   : > { %2930 = vst.msk [vmem:[%s4535_s16 + $0x70] sm:$0xff] %vm2915_vm3, %v2897_v49  ;;  %v2898_v19 = vadd.f32 %v3644_v50, %v4528_v25 }
 0x1fe   : > { %2928 = vst.msk [vmem:[%s4535_s16 + $0x60] sm:$0xff] %vm2915_vm3, %v2895_v0  ;;  %v2896_v20 = vadd.f32 %v3645_v7, %v4528_v25 }
 0x1ff   : > { %2931 = vst.msk [vmem:[%s4535_s16 + $0x78] sm:$0xff] %vm2915_vm3, %v2898_v19  ;;  %v3478_v21 = vpop.f32.mrb[16].mxu1 }
 0x200   : > { %2929 = vst.msk [vmem:[%s4535_s16 + $0x68] sm:$0xff] %vm2915_vm3, %v2896_v20  ;;  %v1604_v22 = vpop.f32.mrb[17].mxu1  ;;  %v3614_v33 = vpop.f32.mrb[16].mxu0 }
 0x201   : > { %v3646_v34 = vadd.f32 %v3614_v33, %v3478_v21  ;;  %v3479_v35 = vpop.f32.mrb[18].mxu1  ;;  %v2781_v36 = vpop.f32.mrb[17].mxu0 }
 0x202   : > { %v3647_v48 = vadd.f32 %v2781_v36, %v1604_v22  ;;  %v1607_v51 = vpop.f32.mrb[19].mxu1  ;;  %v3615_v52 = vpop.f32.mrb[18].mxu0 }
 0x203   : > { %v2901_v53 = vadd.f32 %v3646_v34, %v4528_v25  ;;  %v3648_v62 = vadd.f32 %v3615_v52, %v3479_v35  ;;  %v2784_v2 = vpop.f32.mrb[19].mxu0 }
 0x204   : > { %v2899_v5 = vadd.f32 %v3647_v48, %v4528_v25  ;;  %v3649_v16 = vadd.f32 %v2784_v2, %v1607_v51 }
 0x205   : > { %2934 = vst.msk [vmem:[%s4535_s16 + $0x90] sm:$0xff] %vm2915_vm3, %v2901_v53  ;;  %v2902_v17 = vadd.f32 %v3648_v62, %v4528_v25 }
 0x206   : > { %2932 = vst.msk [vmem:[%s4535_s16 + $0x80] sm:$0xff] %vm2915_vm3, %v2899_v5  ;;  %v2900_v23 = vadd.f32 %v3649_v16, %v4528_v25 }
 0x207   : > { %2935 = vst.msk [vmem:[%s4535_s16 + $0x98] sm:$0xff] %vm2915_vm3, %v2902_v17  ;;  %v3482_v38 = vpop.f32.mrb[20].mxu1 }
 0x208   : > { %2933 = vst.msk [vmem:[%s4535_s16 + $0x88] sm:$0xff] %vm2915_vm3, %v2900_v23  ;;  %v1620_v39 = vpop.f32.mrb[21].mxu1  ;;  %v3618_v41 = vpop.f32.mrb[20].mxu0 }
 0x209   : > { %v3650_v43 = vadd.f32 %v3618_v41, %v3482_v38  ;;  %v3483_v59 = vpop.f32.mrb[22].mxu1  ;;  %v2797_v60 = vpop.f32.mrb[21].mxu0 }
 0x20a   : > { %v3651_v61 = vadd.f32 %v2797_v60, %v1620_v39  ;;  %v1623_v4 = vpop.f32.mrb[23].mxu1  ;;  %v3619_v14 = vpop.f32.mrb[22].mxu0 }
 0x20b   : > { %v2905_v15 = vadd.f32 %v3650_v43, %v4528_v25  ;;  %v3652_v18 = vadd.f32 %v3619_v14, %v3483_v59  ;;  %v2800_v30 = vpop.f32.mrb[23].mxu0 }
 0x20c   : > { %v2903_v31 = vadd.f32 %v3651_v61, %v4528_v25  ;;  %v3653_v37 = vadd.f32 %v2800_v30, %v1623_v4 }
 0x20d   : > { %2938 = vst.msk [vmem:[%s4535_s16 + $0xb0] sm:$0xff] %vm2915_vm3, %v2905_v15  ;;  %v2906_v47 = vadd.f32 %v3652_v18, %v4528_v25 }
 0x20e   : > { %2936 = vst.msk [vmem:[%s4535_s16 + $0xa0] sm:$0xff] %vm2915_vm3, %v2903_v31  ;;  %v2904_v54 = vadd.f32 %v3653_v37, %v4528_v25 }
 0x20f   : > { %2939 = vst.msk [vmem:[%s4535_s16 + $0xb8] sm:$0xff] %vm2915_vm3, %v2906_v47  ;;  %v3486_v55 = vpop.f32.mrb[24].mxu1 }
 0x210   : > { %2937 = vst.msk [vmem:[%s4535_s16 + $0xa8] sm:$0xff] %vm2915_vm3, %v2904_v54  ;;  %v1636_v56 = vpop.f32.mrb[25].mxu1  ;;  %v3622_v57 = vpop.f32.mrb[24].mxu0 }
 0x211   : > { %v3654_v58 = vadd.f32 %v3622_v57, %v3486_v55  ;;  %v3487_v6 = vpop.f32.mrb[26].mxu1  ;;  %v2813_v9 = vpop.f32.mrb[25].mxu0 }
 0x212   : > { %v3655_v10 = vadd.f32 %v2813_v9, %v1636_v56  ;;  %v1639_v11 = vpop.f32.mrb[27].mxu1  ;;  %v3623_v12 = vpop.f32.mrb[26].mxu0 }
 0x213   : > { %v2909_v13 = vadd.f32 %v3654_v58, %v4528_v25  ;;  %v3656_v27 = vadd.f32 %v3623_v12, %v3487_v6  ;;  %v2816_v28 = vpop.f32.mrb[27].mxu0 }
 0x214   : > { %v2907_v29 = vadd.f32 %v3655_v10, %v4528_v25  ;;  %v3657_v44 = vadd.f32 %v2816_v28, %v1639_v11 }
 0x215   : > { %2942 = vst.msk [vmem:[%s4535_s16 + $0xd0] sm:$0xff] %vm2915_vm3, %v2909_v13  ;;  %v2910_v8 = vadd.f32 %v3656_v27, %v4528_v25 }
 0x216   : > { %2940 = vst.msk [vmem:[%s4535_s16 + $0xc0] sm:$0xff] %vm2915_vm3, %v2907_v29  ;;  %v2908_v26 = vadd.f32 %v3657_v44, %v4528_v25 }
 0x217   : > { %2943 = vst.msk [vmem:[%s4535_s16 + $0xd8] sm:$0xff] %vm2915_vm3, %v2910_v8  ;;  %v3490_v32 = vpop.f32.mrb[28].mxu1 }
 0x218   : > { %2941 = vst.msk [vmem:[%s4535_s16 + $0xc8] sm:$0xff] %vm2915_vm3, %v2908_v26  ;;  %v1652_v1 = vpop.f32.mrb[29].mxu1  ;;  %v3626_v45 = vpop.f32.mrb[28].mxu0 }
 0x219   : > { %v3658_v46 = vadd.f32 %v3626_v45, %v3490_v32  ;;  %v3491_v24 = vpop.f32.mrb[30].mxu1  ;;  %v2829_v3 = vpop.f32.mrb[29].mxu0 }
 0x21a   : > { %v3659_v40 = vadd.f32 %v2829_v3, %v1652_v1  ;;  %v1655_v42 = vpop.f32.mrb[31].mxu1  ;;  %v3627_v49 = vpop.f32.mrb[30].mxu0 }
 0x21b   : > { %v2913_v50 = vadd.f32 %v3658_v46, %v4528_v25  ;;  %v3660_v63 = vadd.f32 %v3627_v49, %v3491_v24  ;;  %v2832_v0 = vpop.f32.mrb[31].mxu0 }
 0x21c   : > { %v2911_v7 = vadd.f32 %v3659_v40, %v4528_v25  ;;  %v3661_v19 = vadd.f32 %v2832_v0, %v1655_v42 }
 0x21d   : > { %2946 = vst.msk [vmem:[%s4535_s16 + $0xf0] sm:$0xff] %vm2915_vm3, %v2913_v50  ;;  %v2914_v20 = vadd.f32 %v3660_v63, %v4528_v25 }
 0x21e   : > { %2944 = vst.msk [vmem:[%s4535_s16 + $0xe0] sm:$0xff] %vm2915_vm3, %v2911_v7  ;;  %v2912_v21 = vadd.f32 %v3661_v19, %v4528_v25 }
 0x21f   : > { %2947 = vst.msk [vmem:[%s4535_s16 + $0xf8] sm:$0xff] %vm2915_vm3, %v2914_v20 }
 0x220   : > { %2945 = vst.msk [vmem:[%s4535_s16 + $0xe8] sm:$0xff] %vm2915_vm3, %v2912_v21 }
 0x221 PF: > { %s13_s12 = sadd.s32 1, %s3911_s12  }
 0x222   : > { %p10_p4 = scmp.ge.s32.totalorder %s13_s12, 4  }
 0x224   :  { %12 = sbr.rel (!%p10_p4) target bundleno = 1 (0x1), region = 72 }

// kernel: generator_forward.9
= control target key start
LH: loop header
LB: loop body
LE: loop exit
PB: predicated region body
PF: predicated region fallthrough
CT: control target
= control target key end

     0   :  { %s4391_s12 = smov 0   ;;  %s5157_s0 = inlined_call_operand.vmem [shape: f32[2,16,16,64], index: 0, kind: input, shape index: {}]   ;;  %s5158_s1 = inlined_call_operand.vmem [shape: bf16[3,3,64,8], index: 1, kind: input, shape index: {}]   ;;  %s5159_s2 = inlined_call_operand.vmem [shape: f32[1,8], index: 2, kind: input, shape index: {}]   ;;  %s5160_s3 = inlined_call_operand.vmem [shape: f32[2,16,16,8], index: 3, kind: output, shape index: {}]  }
   0x1 LB: > { %s3254_s13 = sadd.s32 4294967295, %s4368_s12   ;;  %p3258_p0 = scmp.ge.s32.totalorder %s4368_s12, 1  ;;  %s4368_s12 = sphi %s4391_s12, %s13_s12  }
   0x2   : > { %p137_p1 = scmp.lt.s32.totalorder %s4368_s12, 3 }
   0x4   : > { %p138_p2 = pnand %p3258_p0, %p137_p1 }
   0x5   : > { %v4325_v0 = vld [vmem:[%s5158_s1 + $0x20] sm:$0xff] (!%p138_p2)   ;;  %vm172_vm0 = vcmask (!%p138_p2), 523264   ;;  %v4408_v2 = vld [vmem:[%s5158_s1 + $0x28] sm:$0xff] (!%p138_p2)   ;;  %v4370_v3 = vmov (!%p138_p2), 0.0   ;;  %vm175_vm1 = vcmask (!%p138_p2), 517120   ;;  %p161_p3 = scmp.lt.s32.totalorder (!%p138_p2), %s3254_s13, 1 }
   0x6   : > { %141 = sbr.rel (%p138_p2) target bundleno = 544 (0x220), region = 32  ;;  %v4326_v1 = vld [vmem:[%s5158_s1 + $0x80] sm:$0xff] (!%p138_p2)   ;;  %3692 = vmatprep.subr.bf16.mxu1 (!%p138_p2), %v4325_v0  ;;  %173 = vst.msk [vmem:[#allocation2] sm:$0xff] (!%p138_p2), %vm172_vm0, %v4370_v3  ;;  %174 = vst.msk [vmem:[#allocation2 + $0x8] sm:$0xff] (!%p138_p2), %vm172_vm0, %v4370_v3  ;;  %v4449_v4 = vld [vmem:[%s5158_s1 + $0x88] sm:$0xff] (!%p138_p2)   ;;  %vm3166_vm2 = vcmask (!%p138_p2), 64512  }
   0x7   : > { %177 = vst.msk [vmem:[#allocation2 + $0x18] sm:$0xff] (!%p138_p2), %vm172_vm0, %v4370_v3  ;;  %178 = vst.msk [vmem:[#allocation2 + $0x20] sm:$0xff] (!%p138_p2), %vm172_vm0, %v4370_v3  ;;  %3852 = vmatprep.subr.bf16.mxu0 (!%p138_p2), %v4326_v1  ;;  %3693 = vmatpush3.bf16.msra.mxu1 (!%p138_p2), %v4325_v0  ;;  %v4329_v5 = vld [vmem:[%s5158_s1 + $0x30] sm:$0xff] (!%p138_p2)   ;;  %v4331_v7 = vld [vmem:[%s5158_s1 + $0x38] sm:$0xff] (!%p138_p2)  }
   0x8   : > { %180 = vst.msk [vmem:[#allocation2 + $0x30] sm:$0xff] (!%p138_p2), %vm172_vm0, %v4370_v3  ;;  %181 = vst.msk [vmem:[#allocation2 + $0x38] sm:$0xff] (!%p138_p2), %vm172_vm0, %v4370_v3  ;;  %3853 = vmatpush3.bf16.msra.mxu0 (!%p138_p2), %v4326_v1  ;;  %3694 = vmatprep.subr.bf16.mxu1 (!%p138_p2), %v4408_v2  ;;  %v4479_v6 = vld [vmem:[%s5158_s1 + $0x90] sm:$0xff] (!%p138_p2)   ;;  %v4494_v8 = vld [vmem:[%s5158_s1 + $0x98] sm:$0xff] (!%p138_p2)  }
   0x9   : > { %183 = vst.msk [vmem:[#allocation2 + $0x48] sm:$0xff] (!%p138_p2), %vm172_vm0, %v4370_v3  ;;  %184 = vst.msk [vmem:[#allocation2 + $0x50] sm:$0xff] (!%p138_p2), %vm172_vm0, %v4370_v3  ;;  %3854 = vmatprep.subr.bf16.mxu0 (!%p138_p2), %v4449_v4  ;;  %v4333_v13 = vld [vmem:[%s5158_s1] sm:$0xff] (!%p138_p2)   ;;  %v4335_v31 = vld [vmem:[%s5158_s1 + $0xa8] sm:$0xff] (!%p138_p2)  }
   0xa   : > { %186 = vst.msk [vmem:[#allocation2 + $0x60] sm:$0xff] (!%p138_p2), %vm172_vm0, %v4370_v3  ;;  %187 = vst.msk [vmem:[#allocation2 + $0x68] sm:$0xff] (!%p138_p2), %vm172_vm0, %v4370_v3  ;;  %v4334_v17 = vld [vmem:[%s5158_s1 + $0xa0] sm:$0xff] (!%p138_p2)   ;;  %v4336_v38 = vld [vmem:[%s5158_s1 + $0x8] sm:$0xff] (!%p138_p2)  }
   0xb   : > { %189 = vst.msk [vmem:[#allocation2 + $0x78] sm:$0xff] (!%p138_p2), %vm172_vm0, %v4370_v3  ;;  %190 = vst.msk [vmem:[#allocation2 + $0x80] sm:$0xff] (!%p138_p2), %vm172_vm0, %v4370_v3  ;;  %3695 = vmatpush3.bf16.msra.mxu1 (!%p138_p2), %v4408_v2  ;;  %v4337_v45 = vld [vmem:[%s5158_s1 + $0xb0] sm:$0xff] (!%p138_p2)   ;;  %v4338_v51 = vld [vmem:[%s5158_s1 + $0xb8] sm:$0xff] (!%p138_p2)  }
   0xc   : > { %192 = vst.msk [vmem:[#allocation2 + $0x90] sm:$0xff] (!%p138_p2), %vm172_vm0, %v4370_v3  ;;  %193 = vst.msk [vmem:[#allocation2 + $0x98] sm:$0xff] (!%p138_p2), %vm172_vm0, %v4370_v3  ;;  %3855 = vmatpush3.bf16.msra.mxu0 (!%p138_p2), %v4449_v4  ;;  %3696 = vmatprep.subr.bf16.mxu1 (!%p138_p2), %v4329_v5  ;;  %v4339_v50 = vld [vmem:[%s5158_s1 + $0x10] sm:$0xff] (!%p138_p2)   ;;  %v4597_v59 = vld [vmem:[%s5158_s1 + $0xc0] sm:$0xff] (!%p138_p2)  }
   0xd   : > { %195 = vst.msk [vmem:[#allocation2 + $0xa8] sm:$0xff] %vm172_vm0, %v4370_v3  ;;  %196 = vst.msk [vmem:[#allocation2 + $0xb0] sm:$0xff] %vm172_vm0, %v4370_v3  ;;  %s5162_s13 = smov (!%p161_p3, %s3254_s13), 1  ;;  %3856 = vmatprep.subr.bf16.mxu0 %v4479_v6  ;;  %v349_v9 = vld [vmem:[#allocation2 + $0x1] sm:$0xff] }
   0xe   : > { %198 = vst.msk [vmem:[#allocation2 + $0xc0] sm:$0xff] %vm172_vm0, %v4370_v3  ;;  %199 = vst.msk [vmem:[#allocation2 + $0xc8] sm:$0xff] %vm172_vm0, %v4370_v3  ;;  %s3510_s28 = sshll.u32 %s5162_s13, 8 }
   0xf   : > { %201 = vst.msk [vmem:[#allocation2 + $0xd8] sm:$0xff] %vm172_vm0, %v4370_v3  ;;  %202 = vst.msk [vmem:[#allocation2 + $0xe0] sm:$0xff] %vm172_vm0, %v4370_v3  ;;  %s4501_s6 = scalar_lea.vmem %s5157_s0, %s3510_s28  ;;  %3697 = vmatpush3.bf16.msra.mxu1 %v4329_v5  ;;  %s5056_s23 = scalar_lea.vmem %s5160_s3, %s3510_s28 }
  0x10   : > { %204 = vst.msk [vmem:[#allocation2 + $0xf0] sm:$0xff] %vm172_vm0, %v4370_v3  ;;  %205 = vst.msk [vmem:[#allocation2 + $0xf8] sm:$0xff] %vm172_vm0, %v4370_v3  ;;  %v228_v10 = vld [vmem:[%s4501_s6] sm:$0xff]  ;;  %v229_v11 = vld [vmem:[%s4501_s6 + $0x8] sm:$0xff]  ;;  %3857 = vmatpush3.bf16.msra.mxu0 %v4479_v6  ;;  %3698 = vmatprep.subr.bf16.mxu1 %v4331_v7 }
  0x11   : > { %207 = vst.msk [vmem:[#allocation2 + $0x108] sm:$0xff] %vm172_vm0, %v4370_v3  ;;  %208 = vst.msk [vmem:[#allocation2 + $0x110] sm:$0xff] %vm172_vm0, %v4370_v3  ;;  %v230_v14 = vld [vmem:[%s4501_s6 + $0x10] sm:$0xff]  ;;  %v231_v15 = vld [vmem:[%s4501_s6 + $0x18] sm:$0xff]  ;;  %3858 = vmatprep.subr.bf16.mxu0 %v4494_v8 }
  0x12   : > { %210 = vst.msk [vmem:[#allocation2 + $0x120] sm:$0xff] %vm172_vm0, %v4370_v3  ;;  %211 = vst.msk [vmem:[#allocation2 + $0x128] sm:$0xff] %vm172_vm0, %v4370_v3  ;;  %v232_v18 = vld [vmem:[%s4501_s6 + $0x20] sm:$0xff]  ;;  %v233_v19 = vld [vmem:[%s4501_s6 + $0x28] sm:$0xff] }
  0x13   : > { %213 = vst.msk [vmem:[#allocation2 + $0x138] sm:$0xff] %vm172_vm0, %v4370_v3  ;;  %214 = vst.msk [vmem:[#allocation2 + $0x140] sm:$0xff] %vm172_vm0, %v4370_v3  ;;  %v234_v20 = vld [vmem:[%s4501_s6 + $0x30] sm:$0xff]  ;;  %v235_v21 = vld [vmem:[%s4501_s6 + $0x38] sm:$0xff]  ;;  %3699 = vmatpush3.bf16.msra.mxu1 %v4331_v7 }
  0x14   : > { %216 = vst.msk [vmem:[#allocation2 + $0x150] sm:$0xff] %vm172_vm0, %v4370_v3  ;;  %217 = vst.msk [vmem:[#allocation2 + $0x158] sm:$0xff] %vm172_vm0, %v4370_v3  ;;  %v236_v22 = vld [vmem:[%s4501_s6 + $0x40] sm:$0xff]  ;;  %v237_v23 = vld [vmem:[%s4501_s6 + $0x48] sm:$0xff]  ;;  %3859 = vmatpush3.bf16.msra.mxu0 %v4494_v8  ;;  %3732 = vmatprep.subr.bf16.mxu1 %v4333_v13 }
  0x15   : > { %219 = vst.msk [vmem:[#allocation2 + $0x168] sm:$0xff] %vm172_vm0, %v4370_v3  ;;  %220 = vst.msk [vmem:[#allocation2 + $0x170] sm:$0xff] %vm172_vm0, %v4370_v3  ;;  %v238_v24 = vld [vmem:[%s4501_s6 + $0x50] sm:$0xff]  ;;  %v239_v25 = vld [vmem:[%s4501_s6 + $0x58] sm:$0xff]  ;;  %3892 = vmatprep.subr.bf16.mxu0 %v4334_v17 }
  0x16   : > { %222 = vst.msk [vmem:[#allocation2 + $0x180] sm:$0xff] %vm172_vm0, %v4370_v3  ;;  %223 = vst.msk [vmem:[#allocation2 + $0x188] sm:$0xff] %vm172_vm0, %v4370_v3  ;;  %v240_v33 = vld [vmem:[%s4501_s6 + $0x60] sm:$0xff]  ;;  %v241_v34 = vld [vmem:[%s4501_s6 + $0x68] sm:$0xff] }
  0x17   : > { %225 = vst.msk [vmem:[#allocation2 + $0x198] sm:$0xff] %vm172_vm0, %v4370_v3  ;;  %226 = vst.msk [vmem:[#allocation2 + $0x1a0] sm:$0xff] %vm172_vm0, %v4370_v3  ;;  %v242_v35 = vld [vmem:[%s4501_s6 + $0x70] sm:$0xff]  ;;  %v243_v40 = vld [vmem:[%s4501_s6 + $0x78] sm:$0xff] }
  0x18   : > { %176 = vst.msk [vmem:[#allocation2 + $0x10] sm:$0x3] %vm175_vm1, %v4370_v3  ;;  %179 = vst.msk [vmem:[#allocation2 + $0x28] sm:$0x3] %vm175_vm1, %v4370_v3  ;;  %v244_v46 = vld [vmem:[%s4501_s6 + $0x80] sm:$0xff]  ;;  %v245_v48 = vld [vmem:[%s4501_s6 + $0x88] sm:$0xff] }
  0x19   : > { %182 = vst.msk [vmem:[#allocation2 + $0x40] sm:$0x3] %vm175_vm1, %v4370_v3  ;;  %185 = vst.msk [vmem:[#allocation2 + $0x58] sm:$0x3] %vm175_vm1, %v4370_v3  ;;  %v246_v53 = vld [vmem:[%s4501_s6 + $0x90] sm:$0xff]  ;;  %v247_v54 = vld [vmem:[%s4501_s6 + $0x98] sm:$0xff] }
  0x1a   : > { %188 = vst.msk [vmem:[#allocation2 + $0x70] sm:$0x3] %vm175_vm1, %v4370_v3  ;;  %191 = vst.msk [vmem:[#allocation2 + $0x88] sm:$0x3] %vm175_vm1, %v4370_v3  ;;  %v248_v57 = vld [vmem:[%s4501_s6 + $0xa0] sm:$0xff]  ;;  %v249_v60 = vld [vmem:[%s4501_s6 + $0xa8] sm:$0xff] }
  0x1b   : > { %194 = vst.msk [vmem:[#allocation2 + $0xa0] sm:$0x3] %vm175_vm1, %v4370_v3  ;;  %197 = vst.msk [vmem:[#allocation2 + $0xb8] sm:$0x3] %vm175_vm1, %v4370_v3  ;;  %v250_v61 = vld [vmem:[%s4501_s6 + $0xb0] sm:$0xff]  ;;  %v251_v62 = vld [vmem:[%s4501_s6 + $0xb8] sm:$0xff] }
  0x1c   : > { %200 = vst.msk [vmem:[#allocation2 + $0xd0] sm:$0x3] %vm175_vm1, %v4370_v3  ;;  %203 = vst.msk [vmem:[#allocation2 + $0xe8] sm:$0x3] %vm175_vm1, %v4370_v3  ;;  %v252_v1 = vld [vmem:[%s4501_s6 + $0xc0] sm:$0xff]  ;;  %v253_v2 = vld [vmem:[%s4501_s6 + $0xc8] sm:$0xff] }
  0x1d   : > { %206 = vst.msk [vmem:[#allocation2 + $0x100] sm:$0x3] %vm175_vm1, %v4370_v3  ;;  %209 = vst.msk [vmem:[#allocation2 + $0x118] sm:$0x3] %vm175_vm1, %v4370_v3 }
  0x1e   : > { %212 = vst.msk [vmem:[#allocation2 + $0x130] sm:$0x3] %vm175_vm1, %v4370_v3  ;;  %215 = vst.msk [vmem:[#allocation2 + $0x148] sm:$0x3] %vm175_vm1, %v4370_v3 }
  0x1f   : > { %218 = vst.msk [vmem:[#allocation2 + $0x160] sm:$0x3] %vm175_vm1, %v4370_v3  ;;  %221 = vst.msk [vmem:[#allocation2 + $0x178] sm:$0x3] %vm175_vm1, %v4370_v3  ;;  %v350_v12 = vld [vmem:[#allocation2 + $0x9] sm:$0xff] }
  0x20   : > { %224 = vst.msk [vmem:[#allocation2 + $0x190] sm:$0x3] %vm175_vm1, %v4370_v3  ;;  %227 = vst.msk [vmem:[#allocation2 + $0x1a8] sm:$0x3] %vm175_vm1, %v4370_v3  ;;  %v381_v16 = vpack.c.bf16 %v350_v12, %v349_v9  ;;  %v4341_v3 = vld [vmem:[%s5158_s1 + $0x18] sm:$0xff]   ;;  %v254_v9 = vld [vmem:[%s4501_s6 + $0xd0] sm:$0xff] }
  0x21   : > { %261 = vst.msk [vmem:[#allocation2 + $0x19] sm:$0xff] %vm172_vm0, %v228_v10  ;;  %262 = vst.msk [vmem:[#allocation2 + $0x21] sm:$0xff] %vm172_vm0, %v229_v11  ;;  %v255_v10 = vld [vmem:[%s4501_s6 + $0xd8] sm:$0xff] }
  0x22   : > { %263 = vst.msk [vmem:[#allocation2 + $0x31] sm:$0xff] %vm172_vm0, %v230_v14  ;;  %264 = vst.msk [vmem:[#allocation2 + $0x39] sm:$0xff] %vm172_vm0, %v231_v15  ;;  %3700 = vmatprep.mubr.msk.bf16.mxu1 %vm172_vm0, %v381_v16  ;;  %v257_v15 = vld [vmem:[%s4501_s6 + $0xe8] sm:$0xff] }
  0x23   : > { %265 = vst.msk [vmem:[#allocation2 + $0x49] sm:$0xff] %vm172_vm0, %v232_v18  ;;  %266 = vst.msk [vmem:[#allocation2 + $0x51] sm:$0xff] %vm172_vm0, %v233_v19 }
  0x24   : > { %267 = vst.msk [vmem:[#allocation2 + $0x61] sm:$0xff] %vm172_vm0, %v234_v20  ;;  %268 = vst.msk [vmem:[#allocation2 + $0x69] sm:$0xff] %vm172_vm0, %v235_v21  ;;  %v4647_v21 = vld [vmem:[%s5158_s1 + $0x40] sm:$0xff]  }
  0x25   : > { %269 = vst.msk [vmem:[#allocation2 + $0x79] sm:$0xff] %vm172_vm0, %v236_v22  ;;  %270 = vst.msk [vmem:[#allocation2 + $0x81] sm:$0xff] %vm172_vm0, %v237_v23 }
  0x26   : > { %271 = vst.msk [vmem:[#allocation2 + $0x91] sm:$0xff] %vm172_vm0, %v238_v24  ;;  %272 = vst.msk [vmem:[#allocation2 + $0x99] sm:$0xff] %vm172_vm0, %v239_v25 }
  0x27   : > { %273 = vst.msk [vmem:[#allocation2 + $0xa9] sm:$0xff] %vm172_vm0, %v240_v33  ;;  %274 = vst.msk [vmem:[#allocation2 + $0xb1] sm:$0xff] %vm172_vm0, %v241_v34 }
  0x28   : > { %v1516_v26 = vld [vmem:[#allocation2 + $0x19] sm:$0xff]  ;;  %v1517_v27 = vld [vmem:[#allocation2 + $0x21] sm:$0xff]  ;;  %275 = vst.msk [vmem:[#allocation2 + $0xc1] sm:$0xff] %vm172_vm0, %v242_v35  ;;  %276 = vst.msk [vmem:[#allocation2 + $0xc9] sm:$0xff] %vm172_vm0, %v243_v40 }
  0x29   : > { %v1548_v28 = vpack.c.bf16 %v1517_v27, %v1516_v26  ;;  %v1518_v29 = vld [vmem:[#allocation2 + $0x31] sm:$0xff]  ;;  %v1519_v30 = vld [vmem:[#allocation2 + $0x39] sm:$0xff]  ;;  %277 = vst.msk [vmem:[#allocation2 + $0xd9] sm:$0xff] %vm172_vm0, %v244_v46  ;;  %278 = vst.msk [vmem:[#allocation2 + $0xe1] sm:$0xff] %vm172_vm0, %v245_v48 }
  0x2a   : > { %v4541_v32 = vpack.c.bf16 %v1519_v30, %v1518_v29  ;;  %v1520_v36 = vld [vmem:[#allocation2 + $0x49] sm:$0xff]  ;;  %v1521_v37 = vld [vmem:[#allocation2 + $0x51] sm:$0xff]  ;;  %279 = vst.msk [vmem:[#allocation2 + $0xf1] sm:$0xff] %vm172_vm0, %v246_v53  ;;  %280 = vst.msk [vmem:[#allocation2 + $0xf9] sm:$0xff] %vm172_vm0, %v247_v54 }
  0x2b   : > { %3860 = vmatprep.mubr.msk.bf16.mxu0 %vm172_vm0, %v1548_v28  ;;  %3701 = vmatmul.mubr.msk.bf16.vlgmr.msra.gmra.mrb[0].mxu1 %vm172_vm0, %v1548_v28  ;;  %v4556_v39 = vpack.c.bf16 %v1521_v37, %v1520_v36  ;;  %v1522_v41 = vld [vmem:[#allocation2 + $0x61] sm:$0xff]  ;;  %v1523_v42 = vld [vmem:[#allocation2 + $0x69] sm:$0xff]  ;;  %281 = vst.msk [vmem:[#allocation2 + $0x109] sm:$0xff] %vm172_vm0, %v248_v57  ;;  %282 = vst.msk [vmem:[#allocation2 + $0x111] sm:$0xff] %vm172_vm0, %v249_v60 }
  0x2c   : > { %3861 = vmatmul.mubr.msk.bf16.vlgmr.msra.gmra.mrb[0].mxu0 %vm172_vm0, %v4541_v32  ;;  %3733 = vmatpush3.bf16.msra.mxu1 %v4333_v13  ;;  %v1524_v43 = vld [vmem:[#allocation2 + $0x79] sm:$0xff]  ;;  %v1525_v44 = vld [vmem:[#allocation2 + $0x81] sm:$0xff]  ;;  %v4568_v47 = vpack.c.bf16 %v1523_v42, %v1522_v41  ;;  %283 = vst.msk [vmem:[#allocation2 + $0x121] sm:$0xff] %vm172_vm0, %v250_v61  ;;  %284 = vst.msk [vmem:[#allocation2 + $0x129] sm:$0xff] %vm172_vm0, %v251_v62 }
  0x2d   : > { %3893 = vmatpush3.bf16.msra.mxu0 %v4334_v17  ;;  %3704 = vmatprep.mubr.msk.bf16.mxu1 %vm172_vm0, %v4541_v32  ;;  %v4572_v49 = vpack.c.bf16 %v1525_v44, %v1524_v43  ;;  %v1526_v52 = vld [vmem:[#allocation2 + $0x91] sm:$0xff]  ;;  %v1527_v55 = vld [vmem:[#allocation2 + $0x99] sm:$0xff]  ;;  %285 = vst.msk [vmem:[#allocation2 + $0x139] sm:$0xff] %vm172_vm0, %v252_v1  ;;  %286 = vst.msk [vmem:[#allocation2 + $0x141] sm:$0xff] %vm172_vm0, %v253_v2 }
  0x2e   : > { %3864 = vmatprep.mubr.msk.bf16.mxu0 %vm172_vm0, %v4556_v39  ;;  %3894 = vmatprep.subr.bf16.mxu0 %v4335_v31  ;;  %v1528_v56 = vld [vmem:[#allocation2 + $0xa9] sm:$0xff]  ;;  %v1529_v58 = vld [vmem:[#allocation2 + $0xb1] sm:$0xff]  ;;  %v4604_v63 = vpack.c.bf16 %v1527_v55, %v1526_v52  ;;  %v1838_v11 = vld [vmem:[#allocation2 + $0x1a] sm:$0xff]  ;;  %287 = vst.msk [vmem:[#allocation2 + $0x151] sm:$0xff] %vm172_vm0, %v254_v9 }
  0x2f   : > { %3734 = vmatprep.subr.bf16.mxu1 %v4336_v38  ;;  %v4608_v0 = vpack.c.bf16 %v1529_v58, %v1528_v56  ;;  %v1530_v5 = vld [vmem:[#allocation2 + $0xc1] sm:$0xff]  ;;  %v1531_v7 = vld [vmem:[#allocation2 + $0xc9] sm:$0xff]  ;;  %288 = vst.msk [vmem:[#allocation2 + $0x159] sm:$0xff] %vm172_vm0, %v255_v10  ;;  %290 = vst.msk [vmem:[#allocation2 + $0x171] sm:$0xff] %vm172_vm0, %v257_v15 }
  0x30   : > { %3735 = vmatpush3.bf16.msra.mxu1 %v4336_v38  ;;  %v1839_v12 = vld [vmem:[#allocation2 + $0x22] sm:$0xff]  ;;  %v4631_v14 = vpack.c.bf16 %v1531_v7, %v1530_v5  ;;  %v367_v17 = vld [vmem:[#allocation2 + $0xd9] sm:$0xff]  ;;  %v1842_v24 = vld [vmem:[#allocation2 + $0x4a] sm:$0xff] }
  0x31   : > { %3895 = vmatpush3.bf16.msra.mxu0 %v4335_v31  ;;  %3736 = vmatprep.subr.bf16.mxu1 %v4339_v50  ;;  %v256_v13 = vld [vmem:[%s4501_s6 + $0xe0] sm:$0xff]  ;;  %v4635_v16 = vpack.c.bf16 %v1839_v12, %v1838_v11  ;;  %v1840_v18 = vld [vmem:[#allocation2 + $0x32] sm:$0xff]  ;;  %v4342_v30 = vld [vmem:[%s5158_s1 + $0xc8] sm:$0xff]  }
  0x32   : > { %3896 = vmatprep.subr.bf16.mxu0 %v4337_v45  ;;  %289 = vst.msk [vmem:[#allocation2 + $0x169] sm:$0xff] %vm172_vm0, %v256_v13  ;;  %v1841_v19 = vld [vmem:[#allocation2 + $0x3a] sm:$0xff]  ;;  %v369_v22 = vld [vmem:[#allocation2 + $0xf1] sm:$0xff]  ;;  %v371_v31 = vld [vmem:[#allocation2 + $0x109] sm:$0xff] }
  0x33   : > { %3705 = vmatmul.mubr.msk.bf16.gmra.mrb[4].mxu1 %vm172_vm0, %v4556_v39  ;;  %v368_v20 = vld [vmem:[#allocation2 + $0xe1] sm:$0xff]  ;;  %v370_v23 = vld [vmem:[#allocation2 + $0xf9] sm:$0xff]  ;;  %v4654_v27 = vpack.c.bf16 %v1841_v19, %v1840_v18  ;;  %v1845_v34 = vld [vmem:[#allocation2 + $0x6a] sm:$0xff] }
  0x34   : > { %3865 = vmatmul.mubr.msk.bf16.gmra.mrb[4].mxu0 %vm172_vm0, %v4568_v47  ;;  %3708 = vmatprep.mubr.msk.bf16.mxu1 %vm172_vm0, %v4568_v47  ;;  %v1843_v25 = vld [vmem:[#allocation2 + $0x52] sm:$0xff]  ;;  %v4652_v26 = vpack.c.bf16 %v368_v20, %v367_v17  ;;  %v4656_v28 = vpack.c.bf16 %v370_v23, %v369_v22  ;;  %v1844_v33 = vld [vmem:[#allocation2 + $0x62] sm:$0xff]  ;;  %v1846_v36 = vld [vmem:[#allocation2 + $0x7a] sm:$0xff] }
  0x35   : > { %3868 = vmatprep.mubr.msk.bf16.mxu0 %vm172_vm0, %v4572_v49  ;;  %3897 = vmatpush3.bf16.msra.mxu0 %v4337_v45  ;;  %v4658_v29 = vpack.c.bf16 %v1843_v25, %v1842_v24  ;;  %v372_v35 = vld [vmem:[#allocation2 + $0x111] sm:$0xff]  ;;  %v373_v37 = vld [vmem:[#allocation2 + $0x121] sm:$0xff]  ;;  %v374_v38 = vld [vmem:[#allocation2 + $0x129] sm:$0xff]  ;;  %v4677_v43 = vpack.c.bf16 %v1845_v34, %v1844_v33 }
  0x36   : > { %3898 = vmatprep.subr.bf16.mxu0 %v4338_v51  ;;  %3737 = vmatpush3.bf16.msra.mxu1 %v4339_v50  ;;  %v1847_v40 = vld [vmem:[#allocation2 + $0x82] sm:$0xff]  ;;  %v4344_v41 = vld [vmem:[%s5158_s1 + $0xd0] sm:$0xff]   ;;  %v4675_v42 = vpack.c.bf16 %v372_v35, %v371_v31  ;;  %v4679_v44 = vpack.c.bf16 %v374_v38, %v373_v37  ;;  %v259_v48 = vld [vmem:[%s4501_s6 + $0xf8] sm:$0xff] }
  0x37   : > { %3738 = vmatprep.subr.bf16.mxu1 %v4341_v3  ;;  %v4681_v45 = vpack.c.bf16 %v1847_v40, %v1846_v36  ;;  %v258_v46 = vld [vmem:[%s4501_s6 + $0xf0] sm:$0xff]  ;;  %v4346_v50 = vld [vmem:[%s5158_s1 + $0xd8] sm:$0xff]   ;;  %292 = vst.msk [vmem:[#allocation2 + $0x189] sm:$0xff] %vm172_vm0, %v259_v48  ;;  %v376_v53 = vld [vmem:[#allocation2 + $0x141] sm:$0xff] }
  0x38   : > { %291 = vst.msk [vmem:[#allocation2 + $0x181] sm:$0xff] %vm172_vm0, %v258_v46  ;;  %v1848_v52 = vld [vmem:[#allocation2 + $0x92] sm:$0xff]  ;;  %v1849_v54 = vld [vmem:[#allocation2 + $0x9a] sm:$0xff]  ;;  %v1850_v57 = vld [vmem:[#allocation2 + $0xaa] sm:$0xff] }
  0x39   : > { %3899 = vmatpush3.bf16.msra.mxu0 %v4338_v51  ;;  %v375_v51 = vld [vmem:[#allocation2 + $0x139] sm:$0xff]  ;;  %v377_v55 = vld [vmem:[#allocation2 + $0x151] sm:$0xff]  ;;  %v4705_v61 = vpack.c.bf16 %v1849_v54, %v1848_v52  ;;  %v379_v2 = vld [vmem:[#allocation2 + $0x169] sm:$0xff] }
  0x3a   : > { %3932 = vmatprep.subr.bf16.mxu0 %v4597_v59  ;;  %3739 = vmatpush3.bf16.msra.mxu1 %v4341_v3  ;;  %v378_v56 = vld [vmem:[#allocation2 + $0x159] sm:$0xff]  ;;  %v4703_v60 = vpack.c.bf16 %v376_v53, %v375_v51  ;;  %v1852_v3 = vld [vmem:[#allocation2 + $0xc2] sm:$0xff]  ;;  %v1853_v5 = vld [vmem:[#allocation2 + $0xca] sm:$0xff] }
  0x3b   : > { %3709 = vmatmul.mubr.msk.bf16.gmra.mrb[8].mxu1 %vm172_vm0, %v4572_v49  ;;  %3772 = vmatprep.subr.bf16.mxu1 %v4647_v21  ;;  %v1851_v58 = vld [vmem:[#allocation2 + $0xb2] sm:$0xff]  ;;  %v4707_v62 = vpack.c.bf16 %v378_v56, %v377_v55  ;;  %v293_v7 = vld [vmem:[#allocation2] sm:$0xff]  ;;  %v294_v9 = vld [vmem:[#allocation2 + $0x8] sm:$0xff]  ;;  %v4722_v15 = vpack.c.bf16 %v1853_v5, %v1852_v3 }
  0x3c   : > { %3869 = vmatmul.mubr.msk.bf16.gmra.mrb[8].mxu0 %vm172_vm0, %v4604_v63  ;;  %3712 = vmatprep.mubr.msk.bf16.mxu1 %vm172_vm0, %v4604_v63  ;;  %v4709_v1 = vpack.c.bf16 %v1851_v58, %v1850_v57  ;;  %v380_v10 = vld [vmem:[#allocation2 + $0x171] sm:$0xff]  ;;  %v1854_v11 = vld [vmem:[#allocation2 + $0xda] sm:$0xff]  ;;  %v1855_v12 = vld [vmem:[#allocation2 + $0xe2] sm:$0xff]  ;;  %v325_v17 = vpack.c.bf16 %v294_v9, %v293_v7 }
  0x3d   : > { %3872 = vmatprep.mubr.msk.bf16.mxu0 %vm172_vm0, %v4608_v0  ;;  %v4720_v13 = vpack.c.bf16 %v380_v10, %v379_v2  ;;  %v4724_v18 = vpack.c.bf16 %v1855_v12, %v1854_v11  ;;  %v295_v19 = vld [vmem:[#allocation2 + $0x18] sm:$0xff]  ;;  %v296_v20 = vld [vmem:[#allocation2 + $0x20] sm:$0xff]  ;;  %v297_v24 = vld [vmem:[#allocation2 + $0x30] sm:$0xff] }
  0x3e   : > { %v1856_v22 = vld [vmem:[#allocation2 + $0xf2] sm:$0xff]  ;;  %v1857_v23 = vld [vmem:[#allocation2 + $0xfa] sm:$0xff]  ;;  %v4733_v33 = vpack.c.bf16 %v296_v20, %v295_v19  ;;  %v4345_v37 = vld [vmem:[%s5158_s1 + $0x48] sm:$0xff]  }
  0x3f   : > { %v298_v25 = vld [vmem:[#allocation2 + $0x38] sm:$0xff]  ;;  %v4735_v34 = vpack.c.bf16 %v1857_v23, %v1856_v22  ;;  %v299_v38 = vld [vmem:[#allocation2 + $0x48] sm:$0xff]  ;;  %v300_v40 = vld [vmem:[#allocation2 + $0x50] sm:$0xff] }
  0x40   : > { %v1859_v31 = vld [vmem:[#allocation2 + $0x112] sm:$0xff]  ;;  %v4737_v35 = vpack.c.bf16 %v298_v25, %v297_v24  ;;  %v1861_v46 = vld [vmem:[#allocation2 + $0x12a] sm:$0xff]  ;;  %v301_v48 = vld [vmem:[#allocation2 + $0x60] sm:$0xff]  ;;  %v4756_v54 = vpack.c.bf16 %v300_v40, %v299_v38 }
  0x41   : > { %v4347_v51 = vld [vmem:[%s5158_s1 + $0x50] sm:$0xff]   ;;  %v1862_v52 = vld [vmem:[#allocation2 + $0x13a] sm:$0xff]  ;;  %v1863_v53 = vld [vmem:[#allocation2 + $0x142] sm:$0xff] }
  0x42   : > { %v4762_v56 = vpack.c.bf16 %v1863_v53, %v1862_v52  ;;  %v4349_v57 = vld [vmem:[%s5158_s1 + $0x58] sm:$0xff]   ;;  %v304_v2 = vld [vmem:[#allocation2 + $0x80] sm:$0xff]  ;;  %v305_v7 = vld [vmem:[#allocation2 + $0x90] sm:$0xff] }
  0x43   : > { %3713 = vmatmul.mubr.msk.bf16.gmra.mrb[12].mxu1 %vm172_vm0, %v4608_v0  ;;  %v303_v58 = vld [vmem:[#allocation2 + $0x78] sm:$0xff]  ;;  %v1866_v10 = vld [vmem:[#allocation2 + $0x16a] sm:$0xff]  ;;  %v4778_v12 = vld [vmem:[%s5158_s1 + $0x60] sm:$0xff]  }
  0x44   : > { %3873 = vmatmul.mubr.msk.bf16.gmra.mrb[12].mxu0 %vm172_vm0, %v4631_v14  ;;  %3716 = vmatprep.mubr.msk.bf16.mxu1 %vm172_vm0, %v4631_v14  ;;  %v1864_v3 = vld [vmem:[#allocation2 + $0x152] sm:$0xff]  ;;  %v1865_v5 = vld [vmem:[#allocation2 + $0x15a] sm:$0xff]  ;;  %v307_v23 = vld [vmem:[#allocation2 + $0xa8] sm:$0xff] }
  0x45   : > { %3900 = vmatprep.mubr.msk.bf16.mxu0 %vm172_vm0, %v4635_v16  ;;  %v306_v9 = vld [vmem:[#allocation2 + $0x98] sm:$0xff]  ;;  %v4782_v19 = vpack.c.bf16 %v1865_v5, %v1864_v3  ;;  %v308_v24 = vld [vmem:[#allocation2 + $0xb0] sm:$0xff]  ;;  %v309_v25 = vld [vmem:[#allocation2 + $0xc0] sm:$0xff] }
  0x46   : > { %v1867_v11 = vld [vmem:[#allocation2 + $0x172] sm:$0xff]  ;;  %v4784_v20 = vpack.c.bf16 %v306_v9, %v305_v7  ;;  %v4797_v38 = vpack.c.bf16 %v308_v24, %v307_v23  ;;  %v317_v3 = vld [vmem:[#allocation2 + $0x120] sm:$0xff]  ;;  %v318_v5 = vld [vmem:[#allocation2 + $0x128] sm:$0xff] }
  0x47   : > { %v4786_v22 = vpack.c.bf16 %v1867_v11, %v1866_v10  ;;  %v4352_v7 = vld [vmem:[%s5158_s1 + $0xf0] sm:$0xff]   ;;  %v4832_v10 = vpack.c.bf16 %v318_v5, %v317_v3  ;;  %v319_v11 = vld [vmem:[#allocation2 + $0x138] sm:$0xff]  ;;  %v320_v23 = vld [vmem:[#allocation2 + $0x140] sm:$0xff] }
  0x48   : > { %v321_v24 = vld [vmem:[#allocation2 + $0x150] sm:$0xff] }
  0x49   : > { %v4355_v3 = vld [vmem:[%s5158_s1 + $0x70] sm:$0xff]  }
  0x4b   : > { %3717 = vmatmul.mubr.msk.bf16.gmra.mrb[16].mxu1 %vm172_vm0, %v4652_v26 }
  0x4c   : > { %3901 = vmatmul.mubr.msk.bf16.vlgmr.msra.gmra.mrb[0].mxu0 %vm172_vm0, %v4654_v27  ;;  %3720 = vmatprep.mubr.msk.bf16.mxu1 %vm172_vm0, %v4656_v28 }
  0x4d   : > { %3933 = vmatpush3.bf16.msra.mxu0 %v4597_v59  ;;  %3904 = vmatprep.mubr.msk.bf16.mxu0 %vm172_vm0, %v4658_v29  ;;  %v4701_v59 = vld [vmem:[%s5158_s1 + $0xe0] sm:$0xff]  }
  0x4e   : > { %3934 = vmatprep.subr.bf16.mxu0 %v4342_v30 }
  0x51   : > { %3935 = vmatpush3.bf16.msra.mxu0 %v4342_v30  ;;  %v1858_v30 = vld [vmem:[#allocation2 + $0x10a] sm:$0xff] }
  0x52   : > { %3936 = vmatprep.subr.bf16.mxu0 %v4344_v41  ;;  %v4739_v36 = vpack.c.bf16 %v1859_v31, %v1858_v30  ;;  %v1868_v30 = vld [vmem:[#allocation2 + $0x182] sm:$0xff]  ;;  %v1869_v31 = vld [vmem:[#allocation2 + $0x18a] sm:$0xff] }
  0x53   : > { %3721 = vmatmul.mubr.msk.bf16.gmra.mrb[20].mxu1 %vm172_vm0, %v4675_v42  ;;  %v4799_v40 = vpack.c.bf16 %v1869_v31, %v1868_v30  ;;  %v4356_v30 = vld [vmem:[%s5158_s1 + $0x100] sm:$0xff]   ;;  %v4848_v31 = vpack.c.bf16 %v320_v23, %v319_v11 }
  0x54   : > { %3905 = vmatmul.mubr.msk.bf16.gmra.mrb[4].mxu0 %vm172_vm0, %v4677_v43  ;;  %3724 = vmatprep.mubr.msk.bf16.mxu1 %vm172_vm0, %v4679_v44  ;;  %v2192_v11 = vld [vmem:[#allocation2 + $0x1a0] sm:$0xff] }
  0x55   : > { %3908 = vmatprep.mubr.msk.bf16.mxu0 %vm172_vm0, %v4681_v45  ;;  %3937 = vmatpush3.bf16.msra.mxu0 %v4344_v41  ;;  %v1860_v41 = vld [vmem:[#allocation2 + $0x122] sm:$0xff] }
  0x56   : > { %3938 = vmatprep.subr.bf16.mxu0 %v4346_v50 }
  0x59   : > { %3939 = vmatpush3.bf16.msra.mxu0 %v4346_v50  ;;  %v302_v50 = vld [vmem:[#allocation2 + $0x68] sm:$0xff] }
  0x5a   : > { %3972 = vmatprep.subr.bf16.mxu0 %v4701_v59  ;;  %v4760_v55 = vpack.c.bf16 %v302_v50, %v301_v48  ;;  %v312_v48 = vld [vmem:[#allocation2 + $0xe0] sm:$0xff]  ;;  %v313_v50 = vld [vmem:[#allocation2 + $0xf0] sm:$0xff] }
  0x5b   : > { %3725 = vmatmul.mubr.msk.bf16.gmra.mrb[24].mxu1 %vm172_vm0, %v4703_v60 }
  0x5c   : > { %3909 = vmatmul.mubr.msk.bf16.gmra.mrb[8].mxu0 %vm172_vm0, %v4705_v61  ;;  %3728 = vmatprep.mubr.msk.bf16.mxu1 %vm172_vm0, %v4707_v62 }
  0x5d   : > { %3912 = vmatprep.mubr.msk.bf16.mxu0 %vm172_vm0, %v4709_v1 }
  0x63   : > { %3729 = vmatmul.mubr.msk.bf16.gmra.mrb[28].mxu1 %vm172_vm0, %v4720_v13 }
  0x64   : > { %3913 = vmatmul.mubr.msk.bf16.gmra.mrb[12].mxu0 %vm172_vm0, %v4722_v15  ;;  %3740 = vmatprep.mubr.msk.bf16.mxu1 %vm172_vm0, %v325_v17  ;;  %v4780_v17 = vpack.c.bf16 %v304_v2, %v303_v58  ;;  %v315_v58 = vld [vmem:[#allocation2 + $0x108] sm:$0xff]  ;;  %v316_v2 = vld [vmem:[#allocation2 + $0x110] sm:$0xff] }
  0x65   : > { %3916 = vmatprep.mubr.msk.bf16.mxu0 %vm172_vm0, %v4724_v18  ;;  %v4830_v9 = vpack.c.bf16 %v316_v2, %v315_v58  ;;  %v4353_v2 = vld [vmem:[%s5158_s1 + $0x68] sm:$0xff]  }
  0x6b   : > { %3741 = vmatmul.mubr.msk.bf16.vlgmr.msra.gmra.mrb[0].mxu1 %vm172_vm0, %v4733_v33 }
  0x6c   : > { %3917 = vmatmul.mubr.msk.bf16.gmra.mrb[16].mxu0 %vm172_vm0, %v4735_v34  ;;  %3773 = vmatpush3.bf16.msra.mxu1 %v4647_v21  ;;  %v4758_v21 = vpack.c.bf16 %v1861_v46, %v1860_v41  ;;  %v311_v46 = vld [vmem:[#allocation2 + $0xd8] sm:$0xff] }
  0x6d   : > { %3744 = vmatprep.mubr.msk.bf16.mxu1 %vm172_vm0, %v4737_v35  ;;  %3920 = vmatprep.mubr.msk.bf16.mxu0 %vm172_vm0, %v4739_v36  ;;  %v4811_v52 = vpack.c.bf16 %v312_v48, %v311_v46  ;;  %v323_v46 = vld [vmem:[#allocation2 + $0x168] sm:$0xff]  ;;  %v324_v48 = vld [vmem:[#allocation2 + $0x170] sm:$0xff] }
  0x6e   : > { %3774 = vmatprep.subr.bf16.mxu1 %v4345_v37 }
  0x70   : > { %3775 = vmatpush3.bf16.msra.mxu1 %v4345_v37  ;;  %v310_v37 = vld [vmem:[#allocation2 + $0xc8] sm:$0xff] }
  0x71   : > { %3776 = vmatprep.subr.bf16.mxu1 %v4347_v51  ;;  %v4801_v41 = vpack.c.bf16 %v310_v37, %v309_v25  ;;  %v322_v25 = vld [vmem:[#allocation2 + $0x158] sm:$0xff] }
  0x72   : > { %v4850_v37 = vpack.c.bf16 %v322_v25, %v321_v24  ;;  %v4358_v24 = vld [vmem:[%s5158_s1 + $0x108] sm:$0xff]   ;;  %v4360_v25 = vld [vmem:[%s5158_s1 + $0x118] sm:$0xff]  }
  0x73   : > { %3745 = vmatmul.mubr.msk.bf16.gmra.mrb[4].mxu1 %vm172_vm0, %v4756_v54 }
  0x74   : > { %3921 = vmatmul.mubr.msk.bf16.gmra.mrb[20].mxu0 %vm172_vm0, %v4758_v21  ;;  %3748 = vmatprep.mubr.msk.bf16.mxu1 %vm172_vm0, %v4760_v55 }
  0x75   : > { %3924 = vmatprep.mubr.msk.bf16.mxu0 %vm172_vm0, %v4762_v56  ;;  %3777 = vmatpush3.bf16.msra.mxu1 %v4347_v51  ;;  %v314_v51 = vld [vmem:[#allocation2 + $0xf8] sm:$0xff] }
  0x76   : > { %3778 = vmatprep.subr.bf16.mxu1 %v4349_v57  ;;  %v4813_v53 = vpack.c.bf16 %v314_v51, %v313_v50  ;;  %v872_v50 = vld [vmem:[#allocation2 + $0x2] sm:$0xff]  ;;  %v873_v51 = vld [vmem:[#allocation2 + $0xa] sm:$0xff] }
  0x77   : > { %v904_v58 = vpack.c.bf16 %v873_v51, %v872_v50 }
  0x79   : > { %3779 = vmatpush3.bf16.msra.mxu1 %v4349_v57  ;;  %v4350_v57 = vld [vmem:[%s5158_s1 + $0xe8] sm:$0xff]  }
  0x7a   : > { %3812 = vmatprep.subr.bf16.mxu1 %v4778_v12 }
  0x7b   : > { %3749 = vmatmul.mubr.msk.bf16.gmra.mrb[8].mxu1 %vm172_vm0, %v4780_v17 }
  0x7c   : > { %3925 = vmatmul.mubr.msk.bf16.gmra.mrb[24].mxu0 %vm172_vm0, %v4782_v19  ;;  %3752 = vmatprep.mubr.msk.bf16.mxu1 %vm172_vm0, %v4784_v20 }
  0x7d   : > { %3928 = vmatprep.mubr.msk.bf16.mxu0 %vm172_vm0, %v4786_v22 }
  0x83   : > { %3753 = vmatmul.mubr.msk.bf16.gmra.mrb[12].mxu1 %vm172_vm0, %v4797_v38 }
  0x84   : > { %3929 = vmatmul.mubr.msk.bf16.gmra.mrb[28].mxu0 %vm172_vm0, %v4799_v40  ;;  %3756 = vmatprep.mubr.msk.bf16.mxu1 %vm172_vm0, %v4801_v41 }
  0x85   : > { %3940 = vmatprep.mubr.msk.bf16.mxu0 %vm172_vm0, %v4737_v35 }
  0x8b   : > { %3757 = vmatmul.mubr.msk.bf16.gmra.mrb[16].mxu1 %vm172_vm0, %v4811_v52 }
  0x8c   : > { %3941 = vmatmul.mubr.msk.bf16.vlgmr.msra.gmra.mrb[0].mxu0 %vm172_vm0, %v4756_v54  ;;  %3760 = vmatprep.mubr.msk.bf16.mxu1 %vm172_vm0, %v4813_v53 }
  0x8d   : > { %3973 = vmatpush3.bf16.msra.mxu0 %v4701_v59  ;;  %3944 = vmatprep.mubr.msk.bf16.mxu0 %vm172_vm0, %v4760_v55  ;;  %v4354_v59 = vld [vmem:[%s5158_s1 + $0xf8] sm:$0xff]  }
  0x8e   : > { %3974 = vmatprep.subr.bf16.mxu0 %v4350_v57 }
  0x91   : > { %3975 = vmatpush3.bf16.msra.mxu0 %v4350_v57  ;;  %v4860_v57 = vpack.c.bf16 %v324_v48, %v323_v46 }
  0x92   : > { %3976 = vmatprep.subr.bf16.mxu0 %v4352_v7 }
  0x93   : > { %3761 = vmatmul.mubr.msk.bf16.gmra.mrb[20].mxu1 %vm172_vm0, %v4830_v9 }
  0x94   : > { %3945 = vmatmul.mubr.msk.bf16.gmra.mrb[4].mxu0 %vm172_vm0, %v4780_v17  ;;  %3764 = vmatprep.mubr.msk.bf16.mxu1 %vm172_vm0, %v4832_v10 }
  0x95   : > { %3948 = vmatprep.mubr.msk.bf16.mxu0 %vm172_vm0, %v4784_v20  ;;  %3977 = vmatpush3.bf16.msra.mxu0 %v4352_v7  ;;  %v4361_v7 = vld [vmem:[%s5158_s1 + $0x80] sm:$0xff]  }
  0x96   : > { %3978 = vmatprep.subr.bf16.mxu0 %v4354_v59 }
  0x99   : > { %3979 = vmatpush3.bf16.msra.mxu0 %v4354_v59  ;;  %v2191_v59 = vld [vmem:[#allocation2 + $0x198] sm:$0xff] }
  0x9a   : > { %4012 = vmatprep.subr.bf16.mxu0 %v4356_v30  ;;  %v2208_v23 = vpack.c.bf16 %v2192_v11, %v2191_v59 }
  0x9b   : > { %3765 = vmatmul.mubr.msk.bf16.gmra.mrb[24].mxu1 %vm172_vm0, %v4848_v31 }
  0x9c   : > { %3949 = vmatmul.mubr.msk.bf16.gmra.mrb[8].mxu0 %vm172_vm0, %v4797_v38  ;;  %3768 = vmatprep.mubr.msk.bf16.mxu1 %vm172_vm0, %v4850_v37 }
  0x9d   : > { %3952 = vmatprep.mubr.msk.bf16.mxu0 %vm172_vm0, %v4801_v41 }
  0xa3   : > { %3769 = vmatmul.mubr.msk.bf16.gmra.mrb[28].mxu1 %vm172_vm0, %v4860_v57 }
  0xa4   : > { %3953 = vmatmul.mubr.msk.bf16.gmra.mrb[12].mxu0 %vm172_vm0, %v4811_v52  ;;  %3780 = vmatprep.mubr.msk.bf16.mxu1 %vm172_vm0, %v904_v58  ;;  %v5049_v58 = vld [vmem:[%s5159_s2] ss:$0 sm:$0xff] }
  0xa5   : > { %3956 = vmatprep.mubr.msk.bf16.mxu0 %vm172_vm0, %v4813_v53 }
  0xab   : > { %3781 = vmatmul.mubr.msk.bf16.vlgmr.msra.gmra.mrb[0].mxu1 %vm172_vm0, %v4635_v16  ;;  %v4357_v16 = vld [vmem:[%s5158_s1 + $0x78] sm:$0xff]  }
  0xac   : > { %3957 = vmatmul.mubr.msk.bf16.gmra.mrb[16].mxu0 %vm172_vm0, %v4830_v9  ;;  %3813 = vmatpush3.bf16.msra.mxu1 %v4778_v12  ;;  %v2190_v12 = vld [vmem:[#allocation2 + $0x188] sm:$0xff] }
  0xad   : > { %3784 = vmatprep.mubr.msk.bf16.mxu1 %vm172_vm0, %v4654_v27  ;;  %3960 = vmatprep.mubr.msk.bf16.mxu0 %vm172_vm0, %v4832_v10  ;;  %v2189_v27 = vld [vmem:[#allocation2 + $0x180] sm:$0xff] }
  0xae   : > { %3814 = vmatprep.subr.bf16.mxu1 %v4353_v2  ;;  %v4895_v5 = vpack.c.bf16 %v2190_v12, %v2189_v27 }
  0xb0   : > { %3815 = vmatpush3.bf16.msra.mxu1 %v4353_v2 }
  0xb1   : > { %3816 = vmatprep.subr.bf16.mxu1 %v4355_v3 }
  0xb3   : > { %3785 = vmatmul.mubr.msk.bf16.gmra.mrb[4].mxu1 %vm172_vm0, %v4658_v29 }
  0xb4   : > { %3961 = vmatmul.mubr.msk.bf16.gmra.mrb[20].mxu0 %vm172_vm0, %v4848_v31  ;;  %3788 = vmatprep.mubr.msk.bf16.mxu1 %vm172_vm0, %v4677_v43 }
  0xb5   : > { %3964 = vmatprep.mubr.msk.bf16.mxu0 %vm172_vm0, %v4850_v37  ;;  %3817 = vmatpush3.bf16.msra.mxu1 %v4355_v3 }
  0xb6   : > { %3818 = vmatprep.subr.bf16.mxu1 %v4357_v16 }
  0xb9   : > { %3819 = vmatpush3.bf16.msra.mxu1 %v4357_v16 }
  0xba   : > { %4052 = vmatprep.subr.bf16.mxu1 %v4361_v7 }
  0xbb   : > { %3789 = vmatmul.mubr.msk.bf16.gmra.mrb[8].mxu1 %vm172_vm0, %v4681_v45 }
  0xbc   : > { %3965 = vmatmul.mubr.msk.bf16.gmra.mrb[24].mxu0 %vm172_vm0, %v4860_v57  ;;  %3792 = vmatprep.mubr.msk.bf16.mxu1 %vm172_vm0, %v4705_v61 }
  0xbd   : > { %3968 = vmatprep.mubr.msk.bf16.mxu0 %vm172_vm0, %v4895_v5 }
  0xc3   : > { %3793 = vmatmul.mubr.msk.bf16.gmra.mrb[12].mxu1 %vm172_vm0, %v4709_v1 }
  0xc4   : > { %3969 = vmatmul.mubr.msk.bf16.gmra.mrb[28].mxu0 %vm172_vm0, %v2208_v23  ;;  %3796 = vmatprep.mubr.msk.bf16.mxu1 %vm172_vm0, %v4722_v15 }
  0xc5   : > { %3980 = vmatprep.mubr.msk.bf16.mxu0 %vm172_vm0, %v4541_v32  ;;  %v4359_v32 = vld [vmem:[%s5158_s1 + $0x110] sm:$0xff]  }
  0xcb   : > { %3797 = vmatmul.mubr.msk.bf16.gmra.mrb[16].mxu1 %vm172_vm0, %v4724_v18 }
  0xcc   : > { %3981 = vmatmul.mubr.msk.bf16.vlgmr.msra.gmra.mrb[0].mxu0 %vm172_vm0, %v4556_v39  ;;  %3800 = vmatprep.mubr.msk.bf16.mxu1 %vm172_vm0, %v4735_v34  ;;  %v2511_v39 = vld [vmem:[#allocation2 + $0x181] sm:$0xff] }
  0xcd   : > { %4013 = vmatpush3.bf16.msra.mxu0 %v4356_v30  ;;  %3984 = vmatprep.mubr.msk.bf16.mxu0 %vm172_vm0, %v4568_v47  ;;  %v2512_v47 = vld [vmem:[#allocation2 + $0x189] sm:$0xff] }
  0xce   : > { %4014 = vmatprep.subr.bf16.mxu0 %v4358_v24 }
  0xd1   : > { %4015 = vmatpush3.bf16.msra.mxu0 %v4358_v24 }
  0xd2   : > { %4016 = vmatprep.subr.bf16.mxu0 %v4359_v32 }
  0xd3   : > { %3801 = vmatmul.mubr.msk.bf16.gmra.mrb[20].mxu1 %vm172_vm0, %v4739_v36 }
  0xd4   : > { %3985 = vmatmul.mubr.msk.bf16.gmra.mrb[4].mxu0 %vm172_vm0, %v4572_v49  ;;  %3804 = vmatprep.mubr.msk.bf16.mxu1 %vm172_vm0, %v4758_v21  ;;  %v2514_v49 = vld [vmem:[#allocation2 + $0x1a1] sm:$0xff] }
  0xd5   : > { %3988 = vmatprep.mubr.msk.bf16.mxu0 %vm172_vm0, %v4604_v63  ;;  %4017 = vmatpush3.bf16.msra.mxu0 %v4359_v32  ;;  %v2805_v63 = vld [vmem:[#allocation2 + $0x32] sm:$0xff] }
  0xd6   : > { %4018 = vmatprep.subr.bf16.mxu0 %v4360_v25 }
  0xd9   : > { %4019 = vmatpush3.bf16.msra.mxu0 %v4360_v25 }
  0xdb   : > { %3805 = vmatmul.mubr.msk.bf16.gmra.mrb[24].mxu1 %vm172_vm0, %v4762_v56 }
  0xdc   : > { %3989 = vmatmul.mubr.msk.bf16.gmra.mrb[8].mxu0 %vm172_vm0, %v4608_v0  ;;  %3808 = vmatprep.mubr.msk.bf16.mxu1 %vm172_vm0, %v4782_v19  ;;  %v2806_v0 = vld [vmem:[#allocation2 + $0x3a] sm:$0xff] }
  0xdd   : > { %3992 = vmatprep.mubr.msk.bf16.mxu0 %vm172_vm0, %v4631_v14 }
  0xe3   : > { %3809 = vmatmul.mubr.msk.bf16.gmra.mrb[28].mxu1 %vm172_vm0, %v4786_v22 }
  0xe4   : > { %3993 = vmatmul.mubr.msk.bf16.gmra.mrb[12].mxu0 %vm172_vm0, %v4652_v26  ;;  %3820 = vmatprep.mubr.msk.bf16.mxu1 %vm172_vm0, %v4733_v33  ;;  %v2837_v26 = vpack.c.bf16 %v2806_v0, %v2805_v63 }
  0xe5   : > { %3996 = vmatprep.mubr.msk.bf16.mxu0 %vm172_vm0, %v4656_v28  ;;  %v1533_v28 = vld [vmem:[#allocation2 + $0xe1] sm:$0xff] }
  0xeb   : > { %3821 = vmatmul.mubr.msk.bf16.vlgmr.msra.gmra.mrb[0].mxu1 %vm172_vm0, %v4737_v35  ;;  %v1543_v35 = vld [vmem:[#allocation2 + $0x159] sm:$0xff] }
  0xec   : > { %3997 = vmatmul.mubr.msk.bf16.gmra.mrb[16].mxu0 %vm172_vm0, %v4675_v42  ;;  %4056 = vmatpush3.bf16.msra.mxu1 %v4361_v7  ;;  %v1534_v42 = vld [vmem:[#allocation2 + $0xf1] sm:$0xff] }
  0xed   : > { %3824 = vmatprep.mubr.msk.bf16.mxu1 %vm172_vm0, %v4756_v54  ;;  %4000 = vmatprep.mubr.msk.bf16.mxu0 %vm172_vm0, %v4679_v44  ;;  %v1536_v44 = vld [vmem:[#allocation2 + $0x109] sm:$0xff]  ;;  %v1545_v54 = vld [vmem:[#allocation2 + $0x171] sm:$0xff] }
  0xee   : > { %4053 = vmatprep.subr.bf16.mxu1 %v4449_v4 }
  0xf0   : > { %4057 = vmatpush3.bf16.msra.mxu1 %v4449_v4  ;;  %v4977_v4 = vpack.c.bf16 %v2512_v47, %v2511_v39 }
  0xf1   : > { %4054 = vmatprep.subr.bf16.mxu1 %v4479_v6 }
  0xf3   : > { %3825 = vmatmul.mubr.msk.bf16.gmra.mrb[4].mxu1 %vm172_vm0, %v4760_v55 }
  0xf4   : > { %4001 = vmatmul.mubr.msk.bf16.gmra.mrb[20].mxu0 %vm172_vm0, %v4703_v60  ;;  %3828 = vmatprep.mubr.msk.bf16.mxu1 %vm172_vm0, %v4780_v17  ;;  %v2836_v17 = vld [vmem:[#allocation2 + $0x1a2] sm:$0xff] }
  0xf5   : > { %4004 = vmatprep.mubr.msk.bf16.mxu0 %vm172_vm0, %v4707_v62  ;;  %4058 = vmatpush3.bf16.msra.mxu1 %v4479_v6  ;;  %v2513_v6 = vld [vmem:[#allocation2 + $0x199] sm:$0xff]  ;;  %v1538_v62 = vld [vmem:[#allocation2 + $0x121] sm:$0xff] }
  0xf6   : > { %4055 = vmatprep.subr.bf16.mxu1 %v4494_v8  ;;  %v2530_v14 = vpack.c.bf16 %v2514_v49, %v2513_v6 }
  0xf9   : > { %4059 = vmatpush3.bf16.msra.mxu1 %v4494_v8  ;;  %v1532_v8 = vld [vmem:[#allocation2 + $0xd9] sm:$0xff] }
  0xfb   : > { %3829 = vmatmul.mubr.msk.bf16.gmra.mrb[8].mxu1 %vm172_vm0, %v4784_v20 }
  0xfc   : > { %4005 = vmatmul.mubr.msk.bf16.gmra.mrb[24].mxu0 %vm172_vm0, %v4720_v13  ;;  %3832 = vmatprep.mubr.msk.bf16.mxu1 %vm172_vm0, %v4797_v38  ;;  %v1540_v13 = vld [vmem:[#allocation2 + $0x139] sm:$0xff] }
  0xfd   : > { %4008 = vmatprep.mubr.msk.bf16.mxu0 %vm172_vm0, %v4977_v4 }
 0x103   : > { %3833 = vmatmul.mubr.msk.bf16.gmra.mrb[12].mxu1 %vm172_vm0, %v4801_v41 }
 0x104   : > { %4009 = vmatmul.mubr.msk.bf16.gmra.mrb[28].mxu0 %vm172_vm0, %v2530_v14  ;;  %3836 = vmatprep.mubr.msk.bf16.mxu1 %vm172_vm0, %v4811_v52 }
 0x105   : > { %4020 = vmatprep.mubr.msk.bf16.mxu0 %vm172_vm0, %v2837_v26 }
 0x10b   : > { %3837 = vmatmul.mubr.msk.bf16.gmra.mrb[16].mxu1 %vm172_vm0, %v4813_v53 }
 0x10c   : > { %4021 = vmatmul.mubr.msk.bf16.vlgmr.msra.gmra.mrb[0].mxu0 %vm172_vm0, %v4658_v29  ;;  %3840 = vmatprep.mubr.msk.bf16.mxu1 %vm172_vm0, %v4830_v9  ;;  %v1556_v29 = vpack.c.bf16 %v1533_v28, %v1532_v8 }
 0x10d   : > { %4024 = vmatprep.mubr.msk.bf16.mxu0 %vm172_vm0, %v4677_v43  ;;  %v1535_v43 = vld [vmem:[#allocation2 + $0xf9] sm:$0xff] }
 0x10e   : > { %v1557_v60 = vpack.c.bf16 %v1535_v43, %v1534_v42 }
 0x113   : > { %3841 = vmatmul.mubr.msk.bf16.gmra.mrb[20].mxu1 %vm172_vm0, %v4832_v10 }
 0x114   : > { %4025 = vmatmul.mubr.msk.bf16.gmra.mrb[4].mxu0 %vm172_vm0, %v4681_v45  ;;  %3844 = vmatprep.mubr.msk.bf16.mxu1 %vm172_vm0, %v4848_v31  ;;  %v1537_v45 = vld [vmem:[#allocation2 + $0x111] sm:$0xff] }
 0x115   : > { %4028 = vmatprep.mubr.msk.bf16.mxu0 %vm172_vm0, %v4705_v61  ;;  %v1558_v61 = vpack.c.bf16 %v1537_v45, %v1536_v44 }
 0x11b   : > { %3845 = vmatmul.mubr.msk.bf16.gmra.mrb[24].mxu1 %vm172_vm0, %v4850_v37 }
 0x11c   : > { %4029 = vmatmul.mubr.msk.bf16.gmra.mrb[8].mxu0 %vm172_vm0, %v4709_v1  ;;  %3848 = vmatprep.mubr.msk.bf16.mxu1 %vm172_vm0, %v4860_v57  ;;  %v1539_v1 = vld [vmem:[#allocation2 + $0x129] sm:$0xff] }
 0x11d   : > { %4032 = vmatprep.mubr.msk.bf16.mxu0 %vm172_vm0, %v4722_v15  ;;  %v1541_v15 = vld [vmem:[#allocation2 + $0x141] sm:$0xff] }
 0x11e   : > { %v1560_v33 = vpack.c.bf16 %v1541_v15, %v1540_v13 }
 0x123   : > { %3849 = vmatmul.mubr.msk.bf16.gmra.mrb[28].mxu1 %vm172_vm0, %v4895_v5 }
 0x124   : > { %4033 = vmatmul.mubr.msk.bf16.gmra.mrb[12].mxu0 %vm172_vm0, %v4724_v18  ;;  %3876 = vmatprep.mubr.msk.bf16.mxu1 %vm172_vm0, %v1556_v29  ;;  %v1559_v18 = vpack.c.bf16 %v1539_v1, %v1538_v62 }
 0x125   : > { %4036 = vmatprep.mubr.msk.bf16.mxu0 %vm172_vm0, %v4735_v34  ;;  %v1542_v34 = vld [vmem:[#allocation2 + $0x151] sm:$0xff] }
 0x126   : > { %v1561_v55 = vpack.c.bf16 %v1543_v35, %v1542_v34 }
 0x12b   : > { %3877 = vmatmul.mubr.msk.bf16.vlgmr.msra.gmra.mrb[16].mxu1 %vm172_vm0, %v1557_v60 }
 0x12c   : > { %4037 = vmatmul.mubr.msk.bf16.gmra.mrb[16].mxu0 %vm172_vm0, %v4739_v36  ;;  %3880 = vmatprep.mubr.msk.bf16.mxu1 %vm172_vm0, %v1558_v61  ;;  %v1544_v36 = vld [vmem:[#allocation2 + $0x169] sm:$0xff] }
 0x12d   : > { %4040 = vmatprep.mubr.msk.bf16.mxu0 %vm172_vm0, %v4758_v21  ;;  %v1562_v21 = vpack.c.bf16 %v1545_v54, %v1544_v36 }
 0x133   : > { %3881 = vmatmul.mubr.msk.bf16.gmra.mrb[20].mxu1 %vm172_vm0, %v1559_v18 }
 0x134   : > { %4041 = vmatmul.mubr.msk.bf16.gmra.mrb[20].mxu0 %vm172_vm0, %v4762_v56  ;;  %3884 = vmatprep.mubr.msk.bf16.mxu1 %vm172_vm0, %v1560_v33  ;;  %v2835_v56 = vld [vmem:[#allocation2 + $0x19a] sm:$0xff] }
 0x135   : > { %4044 = vmatprep.mubr.msk.bf16.mxu0 %vm172_vm0, %v4782_v19  ;;  %v2852_v20 = vpack.c.bf16 %v2836_v17, %v2835_v56 }
 0x13b   : > { %3885 = vmatmul.mubr.msk.bf16.gmra.mrb[24].mxu1 %vm172_vm0, %v1561_v55 }
 0x13c   : > { %4045 = vmatmul.mubr.msk.bf16.gmra.mrb[24].mxu0 %vm172_vm0, %v4786_v22  ;;  %3888 = vmatprep.mubr.msk.bf16.mxu1 %vm172_vm0, %v1562_v21 }
 0x13d   : > { %4048 = vmatprep.mubr.msk.bf16.mxu0 %vm172_vm0, %v4799_v40 }
 0x143   : > { %3889 = vmatmul.mubr.msk.bf16.gmra.mrb[28].mxu1 %vm172_vm0, %v4977_v4 }
 0x144   : > { %4049 = vmatmul.mubr.msk.bf16.gmra.mrb[28].mxu0 %vm172_vm0, %v2852_v20 }
 0x1be   : > { %v3822_v19 = vpop.f32.mrb[0].mxu1 }
 0x1bf   : > { %v1357_v38 = vpop.f32.mrb[1].mxu1 }
 0x1c0   : > { %v3823_v41 = vpop.f32.mrb[2].mxu1 }
 0x1c1   : > { %v1360_v52 = vpop.f32.mrb[3].mxu1 }
 0x1c6   : > { %v3826_v53 = vpop.f32.mrb[4].mxu1 }
 0x1c7   : > { %v1373_v22 = vpop.f32.mrb[5].mxu1 }
 0x1c8   : > { %v3827_v9 = vpop.f32.mrb[6].mxu1 }
 0x1c9   : > { %v1376_v10 = vpop.f32.mrb[7].mxu1 }
 0x1ce   : > { %v3830_v30 = vpop.f32.mrb[8].mxu1 }
 0x1cf   : > { %v1389_v31 = vpop.f32.mrb[9].mxu1 }
 0x1d0   : > { %v3831_v40 = vpop.f32.mrb[10].mxu1 }
 0x1d1   : > { %v1392_v37 = vpop.f32.mrb[11].mxu1 }
 0x1d6   : > { %v3834_v46 = vpop.f32.mrb[12].mxu1 }
 0x1d7   : > { %v1405_v48 = vpop.f32.mrb[13].mxu1 }
 0x1d8   : > { %v3835_v50 = vpop.f32.mrb[14].mxu1 }
 0x1d9   : > { %v1408_v51 = vpop.f32.mrb[15].mxu1 }
 0x1df   : > { %v4022_v57 = vpop.f32.mrb[0].mxu0 }
 0x1e0   : > { %v4060_v2 = vadd.f32 %v4022_v57, %v3822_v19  ;;  %v2968_v3 = vpop.f32.mrb[1].mxu0 }
 0x1e1   : > { %v4061_v16 = vadd.f32 %v2968_v3, %v1357_v38  ;;  %v4023_v27 = vpop.f32.mrb[2].mxu0 }
 0x1e2   : > { %v3136_v12 = vadd.f32 %v4060_v2, %v5049_v58  ;;  %v4062_v5 = vadd.f32 %v4023_v27, %v3823_v41  ;;  %v2971_v7 = vpop.f32.mrb[3].mxu0 }
 0x1e3   : > { %v3134_v59 = vadd.f32 %v4061_v16, %v5049_v58  ;;  %v4063_v11 = vadd.f32 %v2971_v7, %v1360_v52 }
 0x1e4   : > { %3169 = vst.msk [vmem:[%s5056_s23 + $0x10] sm:$0xff] %vm3166_vm2, %v3136_v12  ;;  %v3137_v23 = vadd.f32 %v4062_v5, %v5049_v58 }
 0x1e5   : > { %3167 = vst.msk [vmem:[%s5056_s23] sm:$0xff] %vm3166_vm2, %v3134_v59  ;;  %v3135_v24 = vadd.f32 %v4063_v11, %v5049_v58 }
 0x1e6   : > { %3170 = vst.msk [vmem:[%s5056_s23 + $0x18] sm:$0xff] %vm3166_vm2, %v3137_v23 }
 0x1e7   : > { %3168 = vst.msk [vmem:[%s5056_s23 + $0x8] sm:$0xff] %vm3166_vm2, %v3135_v24  ;;  %v4026_v32 = vpop.f32.mrb[4].mxu0 }
 0x1e8   : > { %v4064_v25 = vadd.f32 %v4026_v32, %v3826_v53  ;;  %v2984_v39 = vpop.f32.mrb[5].mxu0 }
 0x1e9   : > { %v4065_v47 = vadd.f32 %v2984_v39, %v1373_v22  ;;  %v4027_v4 = vpop.f32.mrb[6].mxu0 }
 0x1ea   : > { %v3140_v6 = vadd.f32 %v4064_v25, %v5049_v58  ;;  %v4066_v49 = vadd.f32 %v4027_v4, %v3827_v9  ;;  %v2987_v63 = vpop.f32.mrb[7].mxu0 }
 0x1eb   : > { %v3138_v0 = vadd.f32 %v4065_v47, %v5049_v58  ;;  %v4067_v14 = vadd.f32 %v2987_v63, %v1376_v10 }
 0x1ec   : > { %3173 = vst.msk [vmem:[%s5056_s23 + $0x30] sm:$0xff] %vm3166_vm2, %v3140_v6  ;;  %v3141_v26 = vadd.f32 %v4066_v49, %v5049_v58 }
 0x1ed   : > { %3171 = vst.msk [vmem:[%s5056_s23 + $0x20] sm:$0xff] %vm3166_vm2, %v3138_v0  ;;  %v3139_v8 = vadd.f32 %v4067_v14, %v5049_v58 }
 0x1ee   : > { %3174 = vst.msk [vmem:[%s5056_s23 + $0x38] sm:$0xff] %vm3166_vm2, %v3141_v26 }
 0x1ef   : > { %3172 = vst.msk [vmem:[%s5056_s23 + $0x28] sm:$0xff] %vm3166_vm2, %v3139_v8  ;;  %v4030_v28 = vpop.f32.mrb[8].mxu0 }
 0x1f0   : > { %v4068_v29 = vadd.f32 %v4030_v28, %v3830_v30  ;;  %v3000_v42 = vpop.f32.mrb[9].mxu0 }
 0x1f1   : > { %v4069_v43 = vadd.f32 %v3000_v42, %v1389_v31  ;;  %v4031_v44 = vpop.f32.mrb[10].mxu0 }
 0x1f2   : > { %v3144_v45 = vadd.f32 %v4068_v29, %v5049_v58  ;;  %v4070_v60 = vadd.f32 %v4031_v44, %v3831_v40  ;;  %v3003_v61 = vpop.f32.mrb[11].mxu0 }
 0x1f3   : > { %v3142_v62 = vadd.f32 %v4069_v43, %v5049_v58  ;;  %v4071_v1 = vadd.f32 %v3003_v61, %v1392_v37 }
 0x1f4   : > { %3177 = vst.msk [vmem:[%s5056_s23 + $0x50] sm:$0xff] %vm3166_vm2, %v3144_v45  ;;  %v3145_v13 = vadd.f32 %v4070_v60, %v5049_v58 }
 0x1f5   : > { %3175 = vst.msk [vmem:[%s5056_s23 + $0x40] sm:$0xff] %vm3166_vm2, %v3142_v62  ;;  %v3143_v15 = vadd.f32 %v4071_v1, %v5049_v58 }
 0x1f6   : > { %3178 = vst.msk [vmem:[%s5056_s23 + $0x58] sm:$0xff] %vm3166_vm2, %v3145_v13 }
 0x1f7   : > { %3176 = vst.msk [vmem:[%s5056_s23 + $0x48] sm:$0xff] %vm3166_vm2, %v3143_v15  ;;  %v4034_v18 = vpop.f32.mrb[12].mxu0 }
 0x1f8   : > { %v4072_v33 = vadd.f32 %v4034_v18, %v3834_v46  ;;  %v3016_v34 = vpop.f32.mrb[13].mxu0 }
 0x1f9   : > { %v4073_v35 = vadd.f32 %v3016_v34, %v1405_v48  ;;  %v4035_v36 = vpop.f32.mrb[14].mxu0 }
 0x1fa   : > { %v3148_v54 = vadd.f32 %v4072_v33, %v5049_v58  ;;  %v4074_v55 = vadd.f32 %v4035_v36, %v3835_v50  ;;  %v3019_v21 = vpop.f32.mrb[15].mxu0 }
 0x1fb   : > { %v3146_v56 = vadd.f32 %v4073_v35, %v5049_v58  ;;  %v4075_v17 = vadd.f32 %v3019_v21, %v1408_v51 }
 0x1fc   : > { %3181 = vst.msk [vmem:[%s5056_s23 + $0x70] sm:$0xff] %vm3166_vm2, %v3148_v54  ;;  %v3149_v20 = vadd.f32 %v4074_v55, %v5049_v58 }
 0x1fd   : > { %3179 = vst.msk [vmem:[%s5056_s23 + $0x60] sm:$0xff] %vm3166_vm2, %v3146_v56  ;;  %v3147_v19 = vadd.f32 %v4075_v17, %v5049_v58 }
 0x1fe   : > { %3182 = vst.msk [vmem:[%s5056_s23 + $0x78] sm:$0xff] %vm3166_vm2, %v3149_v20  ;;  %v3878_v38 = vpop.f32.mrb[16].mxu1 }
 0x1ff   : > { %3180 = vst.msk [vmem:[%s5056_s23 + $0x68] sm:$0xff] %vm3166_vm2, %v3147_v19  ;;  %v4038_v41 = vpop.f32.mrb[16].mxu0  ;;  %v1743_v52 = vpop.f32.mrb[17].mxu1 }
 0x200   : > { %v4076_v53 = vadd.f32 %v4038_v41, %v3878_v38  ;;  %v3032_v22 = vpop.f32.mrb[17].mxu0  ;;  %v3879_v9 = vpop.f32.mrb[18].mxu1 }
 0x201   : > { %v4077_v10 = vadd.f32 %v3032_v22, %v1743_v52  ;;  %v4039_v30 = vpop.f32.mrb[18].mxu0  ;;  %v1746_v31 = vpop.f32.mrb[19].mxu1 }
 0x202   : > { %v3152_v40 = vadd.f32 %v4076_v53, %v5049_v58  ;;  %v4078_v37 = vadd.f32 %v4039_v30, %v3879_v9  ;;  %v3035_v46 = vpop.f32.mrb[19].mxu0 }
 0x203   : > { %v3150_v48 = vadd.f32 %v4077_v10, %v5049_v58  ;;  %v4079_v50 = vadd.f32 %v3035_v46, %v1746_v31 }
 0x204   : > { %3185 = vst.msk [vmem:[%s5056_s23 + $0x90] sm:$0xff] %vm3166_vm2, %v3152_v40  ;;  %v3153_v51 = vadd.f32 %v4078_v37, %v5049_v58 }
 0x205   : > { %3183 = vst.msk [vmem:[%s5056_s23 + $0x80] sm:$0xff] %vm3166_vm2, %v3150_v48  ;;  %v3151_v57 = vadd.f32 %v4079_v50, %v5049_v58 }
 0x206   : > { %3186 = vst.msk [vmem:[%s5056_s23 + $0x98] sm:$0xff] %vm3166_vm2, %v3153_v51  ;;  %v3882_v2 = vpop.f32.mrb[20].mxu1 }
 0x207   : > { %3184 = vst.msk [vmem:[%s5056_s23 + $0x88] sm:$0xff] %vm3166_vm2, %v3151_v57  ;;  %v4042_v3 = vpop.f32.mrb[20].mxu0  ;;  %v1759_v16 = vpop.f32.mrb[21].mxu1 }
 0x208   : > { %v4080_v27 = vadd.f32 %v4042_v3, %v3882_v2  ;;  %v3048_v12 = vpop.f32.mrb[21].mxu0  ;;  %v3883_v5 = vpop.f32.mrb[22].mxu1 }
 0x209   : > { %v4081_v7 = vadd.f32 %v3048_v12, %v1759_v16  ;;  %v4043_v59 = vpop.f32.mrb[22].mxu0  ;;  %v1762_v11 = vpop.f32.mrb[23].mxu1 }
 0x20a   : > { %v3156_v23 = vadd.f32 %v4080_v27, %v5049_v58  ;;  %v4082_v24 = vadd.f32 %v4043_v59, %v3883_v5  ;;  %v3051_v32 = vpop.f32.mrb[23].mxu0 }
 0x20b   : > { %v3154_v25 = vadd.f32 %v4081_v7, %v5049_v58  ;;  %v4083_v39 = vadd.f32 %v3051_v32, %v1762_v11 }
 0x20c   : > { %3189 = vst.msk [vmem:[%s5056_s23 + $0xb0] sm:$0xff] %vm3166_vm2, %v3156_v23  ;;  %v3157_v47 = vadd.f32 %v4082_v24, %v5049_v58 }
 0x20d   : > { %3187 = vst.msk [vmem:[%s5056_s23 + $0xa0] sm:$0xff] %vm3166_vm2, %v3154_v25  ;;  %v3155_v4 = vadd.f32 %v4083_v39, %v5049_v58 }
 0x20e   : > { %3190 = vst.msk [vmem:[%s5056_s23 + $0xb8] sm:$0xff] %vm3166_vm2, %v3157_v47  ;;  %v3886_v6 = vpop.f32.mrb[24].mxu1 }
 0x20f   : > { %3188 = vst.msk [vmem:[%s5056_s23 + $0xa8] sm:$0xff] %vm3166_vm2, %v3155_v4  ;;  %v4046_v49 = vpop.f32.mrb[24].mxu0  ;;  %v1775_v63 = vpop.f32.mrb[25].mxu1 }
 0x210   : > { %v4084_v0 = vadd.f32 %v4046_v49, %v3886_v6  ;;  %v3064_v14 = vpop.f32.mrb[25].mxu0  ;;  %v3887_v26 = vpop.f32.mrb[26].mxu1 }
 0x211   : > { %v4085_v8 = vadd.f32 %v3064_v14, %v1775_v63  ;;  %v4047_v28 = vpop.f32.mrb[26].mxu0  ;;  %v1778_v29 = vpop.f32.mrb[27].mxu1 }
 0x212   : > { %v3160_v42 = vadd.f32 %v4084_v0, %v5049_v58  ;;  %v4086_v43 = vadd.f32 %v4047_v28, %v3887_v26  ;;  %v3067_v44 = vpop.f32.mrb[27].mxu0 }
 0x213   : > { %v3158_v45 = vadd.f32 %v4085_v8, %v5049_v58  ;;  %v4087_v60 = vadd.f32 %v3067_v44, %v1778_v29 }
 0x214   : > { %3193 = vst.msk [vmem:[%s5056_s23 + $0xd0] sm:$0xff] %vm3166_vm2, %v3160_v42  ;;  %v3161_v61 = vadd.f32 %v4086_v43, %v5049_v58 }
 0x215   : > { %3191 = vst.msk [vmem:[%s5056_s23 + $0xc0] sm:$0xff] %vm3166_vm2, %v3158_v45  ;;  %v3159_v62 = vadd.f32 %v4087_v60, %v5049_v58 }
 0x216   : > { %3194 = vst.msk [vmem:[%s5056_s23 + $0xd8] sm:$0xff] %vm3166_vm2, %v3161_v61  ;;  %v3890_v1 = vpop.f32.mrb[28].mxu1 }
 0x217   : > { %3192 = vst.msk [vmem:[%s5056_s23 + $0xc8] sm:$0xff] %vm3166_vm2, %v3159_v62  ;;  %v4050_v13 = vpop.f32.mrb[28].mxu0  ;;  %v1791_v15 = vpop.f32.mrb[29].mxu1 }
 0x218   : > { %v4088_v18 = vadd.f32 %v4050_v13, %v3890_v1  ;;  %v3080_v33 = vpop.f32.mrb[29].mxu0  ;;  %v3891_v34 = vpop.f32.mrb[30].mxu1 }
 0x219   : > { %v4089_v35 = vadd.f32 %v3080_v33, %v1791_v15  ;;  %v4051_v36 = vpop.f32.mrb[30].mxu0  ;;  %v1794_v54 = vpop.f32.mrb[31].mxu1 }
 0x21a   : > { %v3164_v55 = vadd.f32 %v4088_v18, %v5049_v58  ;;  %v4090_v21 = vadd.f32 %v4051_v36, %v3891_v34  ;;  %v3083_v56 = vpop.f32.mrb[31].mxu0 }
 0x21b   : > { %v3162_v17 = vadd.f32 %v4089_v35, %v5049_v58  ;;  %v4091_v20 = vadd.f32 %v3083_v56, %v1794_v54 }
 0x21c   : > { %3197 = vst.msk [vmem:[%s5056_s23 + $0xf0] sm:$0xff] %vm3166_vm2, %v3164_v55  ;;  %v3165_v19 = vadd.f32 %v4090_v21, %v5049_v58 }
 0x21d   : > { %3195 = vst.msk [vmem:[%s5056_s23 + $0xe0] sm:$0xff] %vm3166_vm2, %v3162_v17  ;;  %v3163_v38 = vadd.f32 %v4091_v20, %v5049_v58 }
 0x21e   : > { %3198 = vst.msk [vmem:[%s5056_s23 + $0xf8] sm:$0xff] %vm3166_vm2, %v3165_v19 }
 0x21f   : > { %3196 = vst.msk [vmem:[%s5056_s23 + $0xe8] sm:$0xff] %vm3166_vm2, %v3163_v38 }
 0x220 PF: > { %s13_s12 = sadd.s32 1, %s4368_s12  }
 0x221   : > { %p10_p4 = scmp.ge.s32.totalorder %s13_s12, 4  }
 0x223   :  { %12 = sbr.rel (!%p10_p4) target bundleno = 1 (0x1), region = 72 }

// kernel: generator_forward.6
= control target key start
LH: loop header
LB: loop body
LE: loop exit
PB: predicated region body
PF: predicated region fallthrough
CT: control target
= control target key end

     0   :  { %s12763_s24 = smov 0   ;;  %s14940_s0 = inlined_call_operand.vmem [shape: f32[2,16,16,64], index: 0, kind: input, shape index: {}]   ;;  %s14941_s1 = inlined_call_operand.vmem [shape: bf16[3,3,64,64], index: 1, kind: input, shape index: {}]   ;;  %s14942_s2 = inlined_call_operand.vmem [shape: f32[1,64], index: 2, kind: input, shape index: {}]   ;;  %s14943_s3 = inlined_call_operand.vmem [shape: bf16[3,3,64,64], index: 3, kind: input, shape index: {}]   ;;  %s14944_s4 = inlined_call_operand.vmem [shape: f32[1,64], index: 4, kind: input, shape index: {}]   ;;  %s14945_s5 = inlined_call_operand.vmem [shape: bf16[3,3,64,64], index: 5, kind: input, shape index: {}]   ;;  %s14946_s6 = inlined_call_operand.vmem [shape: f32[1,64], index: 6, kind: input, shape index: {}]   ;;  %s14947_s7 = inlined_call_operand.vmem [shape: f32[2,16,16,64], index: 7, kind: output, shape index: {}]  }
   0x1 LB: > { %s9449_s25 = sadd.s32 4294967295, %s12720_s24   ;;  %p9453_p0 = scmp.ge.s32.totalorder %s12720_s24, 1  ;;  %s12720_s24 = sphi %s12763_s24, %s17_s24  }
   0x2   : > { %p237_p1 = scmp.lt.s32.totalorder %s12720_s24, 3 }
   0x4   : > { %p238_p2 = pnand %p9453_p0, %p237_p1 }
   0x6   : > { %241 = sbr.rel (%p238_p2) target bundleno = 2065 (0x811), region = 48 }
   0xd   : > { %v12774_v0 = vld [vmem:[%s14941_s1 + $0x20] sm:$0xff]   ;;  %vm280_vm0 = vcmask 523264   ;;  %v12785_v2 = vld [vmem:[%s14941_s1 + $0x28] sm:$0xff]   ;;  %v12722_v3 = vmov 0.0   ;;  %vm283_vm1 = vcmask 517120   ;;  %p269_p3 = scmp.lt.s32.totalorder %s9449_s25, 1 }
   0xe   : > { %v12779_v1 = vld [vmem:[%s14941_s1 + $0x80] sm:$0xff]   ;;  %10737 = vmatprep.subr.bf16.mxu1 %v12774_v0  ;;  %281 = vst.msk [vmem:[#allocation2] sm:$0xff] %vm280_vm0, %v12722_v3  ;;  %282 = vst.msk [vmem:[#allocation2 + $0x8] sm:$0xff] %vm280_vm0, %v12722_v3  ;;  %v12605_v4 = vld [vmem:[%s14941_s1 + $0x88] sm:$0xff]  }
   0xf   : > { %285 = vst.msk [vmem:[#allocation2 + $0x18] sm:$0xff] %vm280_vm0, %v12722_v3  ;;  %286 = vst.msk [vmem:[#allocation2 + $0x20] sm:$0xff] %vm280_vm0, %v12722_v3  ;;  %10897 = vmatprep.subr.bf16.mxu0 %v12779_v1  ;;  %10738 = vmatpush3.bf16.msra.mxu1 %v12774_v0  ;;  %v12606_v5 = vld [vmem:[%s14941_s1 + $0x30] sm:$0xff]   ;;  %s15015_s25 = smov (!%p269_p3, %s9449_s25), 1  ;;  %v12608_v7 = vld [vmem:[%s14941_s1 + $0x38] sm:$0xff]  }
  0x10   : > { %288 = vst.msk [vmem:[#allocation2 + $0x30] sm:$0xff] %vm280_vm0, %v12722_v3  ;;  %289 = vst.msk [vmem:[#allocation2 + $0x38] sm:$0xff] %vm280_vm0, %v12722_v3  ;;  %10898 = vmatpush3.bf16.msra.mxu0 %v12779_v1  ;;  %10739 = vmatprep.subr.bf16.mxu1 %v12785_v2  ;;  %v12607_v6 = vld [vmem:[%s14941_s1 + $0x90] sm:$0xff]   ;;  %s10195_s17 = sshll.u32 %s15015_s25, 8  ;;  %v12609_v8 = vld [vmem:[%s14941_s1 + $0x98] sm:$0xff]  }
  0x11   : > { %291 = vst.msk [vmem:[#allocation2 + $0x48] sm:$0xff] %vm280_vm0, %v12722_v3  ;;  %292 = vst.msk [vmem:[#allocation2 + $0x50] sm:$0xff] %vm280_vm0, %v12722_v3  ;;  %10899 = vmatprep.subr.bf16.mxu0 %v12605_v4  ;;  %s13035_s22 = scalar_lea.vmem %s14940_s0, %s10195_s17  ;;  %v12610_v13 = vld [vmem:[%s14941_s1] sm:$0xff]   ;;  %v12612_v31 = vld [vmem:[%s14941_s1 + $0xa8] sm:$0xff]   ;;  %s14808_s19 = scalar_lea.vmem %s14947_s7, %s10195_s17 }
  0x12   : > { %294 = vst.msk [vmem:[#allocation2 + $0x60] sm:$0xff] %vm280_vm0, %v12722_v3  ;;  %295 = vst.msk [vmem:[#allocation2 + $0x68] sm:$0xff] %vm280_vm0, %v12722_v3  ;;  %v13038_v10 = vld [vmem:[%s13035_s22] sm:$0xff]  ;;  %v13041_v11 = vld [vmem:[%s13035_s22 + $0x8] sm:$0xff] }
  0x13   : > { %297 = vst.msk [vmem:[#allocation2 + $0x78] sm:$0xff] %vm280_vm0, %v12722_v3  ;;  %298 = vst.msk [vmem:[#allocation2 + $0x80] sm:$0xff] %vm280_vm0, %v12722_v3  ;;  %10740 = vmatpush3.bf16.msra.mxu1 %v12785_v2  ;;  %v13051_v14 = vld [vmem:[%s13035_s22 + $0x10] sm:$0xff]  ;;  %v13054_v15 = vld [vmem:[%s13035_s22 + $0x18] sm:$0xff] }
  0x14   : > { %300 = vst.msk [vmem:[#allocation2 + $0x90] sm:$0xff] %vm280_vm0, %v12722_v3  ;;  %301 = vst.msk [vmem:[#allocation2 + $0x98] sm:$0xff] %vm280_vm0, %v12722_v3  ;;  %10900 = vmatpush3.bf16.msra.mxu0 %v12605_v4  ;;  %10741 = vmatprep.subr.bf16.mxu1 %v12606_v5  ;;  %v12611_v17 = vld [vmem:[%s14941_s1 + $0xa0] sm:$0xff]   ;;  %v13067_v19 = vld [vmem:[%s13035_s22 + $0x28] sm:$0xff] }
  0x15   : > { %303 = vst.msk [vmem:[#allocation2 + $0xa8] sm:$0xff] %vm280_vm0, %v12722_v3  ;;  %304 = vst.msk [vmem:[#allocation2 + $0xb0] sm:$0xff] %vm280_vm0, %v12722_v3  ;;  %10901 = vmatprep.subr.bf16.mxu0 %v12607_v6  ;;  %v511_v9 = vld [vmem:[#allocation2 + $0x1] sm:$0xff]  ;;  %v13070_v20 = vld [vmem:[%s13035_s22 + $0x30] sm:$0xff] }
  0x16   : > { %306 = vst.msk [vmem:[#allocation2 + $0xc0] sm:$0xff] %vm280_vm0, %v12722_v3  ;;  %307 = vst.msk [vmem:[#allocation2 + $0xc8] sm:$0xff] %vm280_vm0, %v12722_v3  ;;  %v13064_v18 = vld [vmem:[%s13035_s22 + $0x20] sm:$0xff]  ;;  %v13078_v21 = vld [vmem:[%s13035_s22 + $0x38] sm:$0xff] }
  0x17   : > { %309 = vst.msk [vmem:[#allocation2 + $0xd8] sm:$0xff] %vm280_vm0, %v12722_v3  ;;  %310 = vst.msk [vmem:[#allocation2 + $0xe0] sm:$0xff] %vm280_vm0, %v12722_v3  ;;  %10742 = vmatpush3.bf16.msra.mxu1 %v12606_v5  ;;  %v13085_v22 = vld [vmem:[%s13035_s22 + $0x40] sm:$0xff]  ;;  %v13088_v23 = vld [vmem:[%s13035_s22 + $0x48] sm:$0xff] }
  0x18   : > { %312 = vst.msk [vmem:[#allocation2 + $0xf0] sm:$0xff] %vm280_vm0, %v12722_v3  ;;  %313 = vst.msk [vmem:[#allocation2 + $0xf8] sm:$0xff] %vm280_vm0, %v12722_v3  ;;  %10902 = vmatpush3.bf16.msra.mxu0 %v12607_v6  ;;  %10743 = vmatprep.subr.bf16.mxu1 %v12608_v7  ;;  %v13095_v24 = vld [vmem:[%s13035_s22 + $0x50] sm:$0xff]  ;;  %v13098_v25 = vld [vmem:[%s13035_s22 + $0x58] sm:$0xff] }
  0x19   : > { %315 = vst.msk [vmem:[#allocation2 + $0x108] sm:$0xff] %vm280_vm0, %v12722_v3  ;;  %316 = vst.msk [vmem:[#allocation2 + $0x110] sm:$0xff] %vm280_vm0, %v12722_v3  ;;  %10903 = vmatprep.subr.bf16.mxu0 %v12609_v8  ;;  %v13110_v33 = vld [vmem:[%s13035_s22 + $0x60] sm:$0xff]  ;;  %v13113_v34 = vld [vmem:[%s13035_s22 + $0x68] sm:$0xff] }
  0x1a   : > { %318 = vst.msk [vmem:[#allocation2 + $0x120] sm:$0xff] %vm280_vm0, %v12722_v3  ;;  %319 = vst.msk [vmem:[#allocation2 + $0x128] sm:$0xff] %vm280_vm0, %v12722_v3  ;;  %v13116_v35 = vld [vmem:[%s13035_s22 + $0x70] sm:$0xff]  ;;  %v12613_v38 = vld [vmem:[%s14941_s1 + $0x8] sm:$0xff]  }
  0x1b   : > { %321 = vst.msk [vmem:[#allocation2 + $0x138] sm:$0xff] %vm280_vm0, %v12722_v3  ;;  %322 = vst.msk [vmem:[#allocation2 + $0x140] sm:$0xff] %vm280_vm0, %v12722_v3  ;;  %10744 = vmatpush3.bf16.msra.mxu1 %v12608_v7  ;;  %v13134_v40 = vld [vmem:[%s13035_s22 + $0x78] sm:$0xff]  ;;  %v12614_v45 = vld [vmem:[%s14941_s1 + $0xb0] sm:$0xff]  }
  0x1c   : > { %324 = vst.msk [vmem:[#allocation2 + $0x150] sm:$0xff] %vm280_vm0, %v12722_v3  ;;  %325 = vst.msk [vmem:[#allocation2 + $0x158] sm:$0xff] %vm280_vm0, %v12722_v3  ;;  %10904 = vmatpush3.bf16.msra.mxu0 %v12609_v8  ;;  %10777 = vmatprep.subr.bf16.mxu1 %v12610_v13  ;;  %v13146_v46 = vld [vmem:[%s13035_s22 + $0x80] sm:$0xff]  ;;  %v13151_v48 = vld [vmem:[%s13035_s22 + $0x88] sm:$0xff] }
  0x1d   : > { %327 = vst.msk [vmem:[#allocation2 + $0x168] sm:$0xff] %vm280_vm0, %v12722_v3  ;;  %328 = vst.msk [vmem:[#allocation2 + $0x170] sm:$0xff] %vm280_vm0, %v12722_v3  ;;  %10937 = vmatprep.subr.bf16.mxu0 %v12611_v17  ;;  %v12616_v50 = vld [vmem:[%s14941_s1 + $0x10] sm:$0xff]   ;;  %v12615_v51 = vld [vmem:[%s14941_s1 + $0xb8] sm:$0xff]  }
  0x1e   : > { %330 = vst.msk [vmem:[#allocation2 + $0x180] sm:$0xff] %vm280_vm0, %v12722_v3  ;;  %331 = vst.msk [vmem:[#allocation2 + $0x188] sm:$0xff] %vm280_vm0, %v12722_v3  ;;  %v13172_v53 = vld [vmem:[%s13035_s22 + $0x90] sm:$0xff]  ;;  %v13175_v54 = vld [vmem:[%s13035_s22 + $0x98] sm:$0xff] }
  0x1f   : > { %333 = vst.msk [vmem:[#allocation2 + $0x198] sm:$0xff] %vm280_vm0, %v12722_v3  ;;  %334 = vst.msk [vmem:[#allocation2 + $0x1a0] sm:$0xff] %vm280_vm0, %v12722_v3  ;;  %v13184_v57 = vld [vmem:[%s13035_s22 + $0xa0] sm:$0xff]  ;;  %v13192_v60 = vld [vmem:[%s13035_s22 + $0xa8] sm:$0xff] }
  0x20   : > { %336 = vst.msk [vmem:[#allocation3] sm:$0xff] %vm280_vm0, %v12722_v3  ;;  %337 = vst.msk [vmem:[#allocation3 + $0x8] sm:$0xff] %vm280_vm0, %v12722_v3  ;;  %v13189_v59 = vld [vmem:[%s14941_s1 + $0xc0] sm:$0xff]   ;;  %v13199_v61 = vld [vmem:[%s13035_s22 + $0xb0] sm:$0xff] }
  0x21   : > { %339 = vst.msk [vmem:[#allocation3 + $0x18] sm:$0xff] %vm280_vm0, %v12722_v3  ;;  %340 = vst.msk [vmem:[#allocation3 + $0x20] sm:$0xff] %vm280_vm0, %v12722_v3  ;;  %v13202_v62 = vld [vmem:[%s13035_s22 + $0xb8] sm:$0xff]  ;;  %v13213_v1 = vld [vmem:[%s13035_s22 + $0xc0] sm:$0xff] }
  0x22   : > { %342 = vst.msk [vmem:[#allocation3 + $0x30] sm:$0xff] %vm280_vm0, %v12722_v3  ;;  %343 = vst.msk [vmem:[#allocation3 + $0x38] sm:$0xff] %vm280_vm0, %v12722_v3  ;;  %v13216_v2 = vld [vmem:[%s13035_s22 + $0xc8] sm:$0xff]  ;;  %v13235_v6 = vld [vmem:[%s13035_s22 + $0xd0] sm:$0xff] }
  0x23   : > { %345 = vst.msk [vmem:[#allocation3 + $0x48] sm:$0xff] %vm280_vm0, %v12722_v3  ;;  %346 = vst.msk [vmem:[#allocation3 + $0x50] sm:$0xff] %vm280_vm0, %v12722_v3  ;;  %v13238_v7 = vld [vmem:[%s13035_s22 + $0xd8] sm:$0xff] }
  0x24   : > { %348 = vst.msk [vmem:[#allocation3 + $0x60] sm:$0xff] %vm280_vm0, %v12722_v3  ;;  %349 = vst.msk [vmem:[#allocation3 + $0x68] sm:$0xff] %vm280_vm0, %v12722_v3 }
  0x25   : > { %351 = vst.msk [vmem:[#allocation3 + $0x78] sm:$0xff] %vm280_vm0, %v12722_v3  ;;  %352 = vst.msk [vmem:[#allocation3 + $0x80] sm:$0xff] %vm280_vm0, %v12722_v3 }
  0x26   : > { %354 = vst.msk [vmem:[#allocation3 + $0x90] sm:$0xff] %vm280_vm0, %v12722_v3  ;;  %355 = vst.msk [vmem:[#allocation3 + $0x98] sm:$0xff] %vm280_vm0, %v12722_v3 }
  0x27   : > { %357 = vst.msk [vmem:[#allocation3 + $0xa8] sm:$0xff] %vm280_vm0, %v12722_v3  ;;  %358 = vst.msk [vmem:[#allocation3 + $0xb0] sm:$0xff] %vm280_vm0, %v12722_v3 }
  0x28   : > { %360 = vst.msk [vmem:[#allocation3 + $0xc0] sm:$0xff] %vm280_vm0, %v12722_v3  ;;  %361 = vst.msk [vmem:[#allocation3 + $0xc8] sm:$0xff] %vm280_vm0, %v12722_v3 }
  0x29   : > { %363 = vst.msk [vmem:[#allocation3 + $0xd8] sm:$0xff] %vm280_vm0, %v12722_v3  ;;  %364 = vst.msk [vmem:[#allocation3 + $0xe0] sm:$0xff] %vm280_vm0, %v12722_v3 }
  0x2a   : > { %366 = vst.msk [vmem:[#allocation3 + $0xf0] sm:$0xff] %vm280_vm0, %v12722_v3  ;;  %367 = vst.msk [vmem:[#allocation3 + $0xf8] sm:$0xff] %vm280_vm0, %v12722_v3 }
  0x2b   : > { %369 = vst.msk [vmem:[#allocation3 + $0x108] sm:$0xff] %vm280_vm0, %v12722_v3  ;;  %370 = vst.msk [vmem:[#allocation3 + $0x110] sm:$0xff] %vm280_vm0, %v12722_v3 }
  0x2c   : > { %372 = vst.msk [vmem:[#allocation3 + $0x120] sm:$0xff] %vm280_vm0, %v12722_v3  ;;  %373 = vst.msk [vmem:[#allocation3 + $0x128] sm:$0xff] %vm280_vm0, %v12722_v3 }
  0x2d   : > { %375 = vst.msk [vmem:[#allocation3 + $0x138] sm:$0xff] %vm280_vm0, %v12722_v3  ;;  %376 = vst.msk [vmem:[#allocation3 + $0x140] sm:$0xff] %vm280_vm0, %v12722_v3 }
  0x2e   : > { %378 = vst.msk [vmem:[#allocation3 + $0x150] sm:$0xff] %vm280_vm0, %v12722_v3  ;;  %379 = vst.msk [vmem:[#allocation3 + $0x158] sm:$0xff] %vm280_vm0, %v12722_v3 }
  0x2f   : > { %381 = vst.msk [vmem:[#allocation3 + $0x168] sm:$0xff] %vm280_vm0, %v12722_v3  ;;  %382 = vst.msk [vmem:[#allocation3 + $0x170] sm:$0xff] %vm280_vm0, %v12722_v3 }
  0x30   : > { %384 = vst.msk [vmem:[#allocation3 + $0x180] sm:$0xff] %vm280_vm0, %v12722_v3  ;;  %385 = vst.msk [vmem:[#allocation3 + $0x188] sm:$0xff] %vm280_vm0, %v12722_v3 }
  0x31   : > { %387 = vst.msk [vmem:[#allocation3 + $0x198] sm:$0xff] %vm280_vm0, %v12722_v3  ;;  %388 = vst.msk [vmem:[#allocation3 + $0x1a0] sm:$0xff] %vm280_vm0, %v12722_v3 }
  0x32   : > { %284 = vst.msk [vmem:[#allocation2 + $0x10] sm:$0x3] %vm283_vm1, %v12722_v3  ;;  %287 = vst.msk [vmem:[#allocation2 + $0x28] sm:$0x3] %vm283_vm1, %v12722_v3 }
  0x33   : > { %290 = vst.msk [vmem:[#allocation2 + $0x40] sm:$0x3] %vm283_vm1, %v12722_v3  ;;  %293 = vst.msk [vmem:[#allocation2 + $0x58] sm:$0x3] %vm283_vm1, %v12722_v3 }
  0x34   : > { %296 = vst.msk [vmem:[#allocation2 + $0x70] sm:$0x3] %vm283_vm1, %v12722_v3  ;;  %299 = vst.msk [vmem:[#allocation2 + $0x88] sm:$0x3] %vm283_vm1, %v12722_v3 }
  0x35   : > { %302 = vst.msk [vmem:[#allocation2 + $0xa0] sm:$0x3] %vm283_vm1, %v12722_v3  ;;  %305 = vst.msk [vmem:[#allocation2 + $0xb8] sm:$0x3] %vm283_vm1, %v12722_v3 }
  0x36   : > { %308 = vst.msk [vmem:[#allocation2 + $0xd0] sm:$0x3] %vm283_vm1, %v12722_v3  ;;  %311 = vst.msk [vmem:[#allocation2 + $0xe8] sm:$0x3] %vm283_vm1, %v12722_v3 }
  0x37   : > { %314 = vst.msk [vmem:[#allocation2 + $0x100] sm:$0x3] %vm283_vm1, %v12722_v3  ;;  %317 = vst.msk [vmem:[#allocation2 + $0x118] sm:$0x3] %vm283_vm1, %v12722_v3 }
  0x38   : > { %320 = vst.msk [vmem:[#allocation2 + $0x130] sm:$0x3] %vm283_vm1, %v12722_v3  ;;  %323 = vst.msk [vmem:[#allocation2 + $0x148] sm:$0x3] %vm283_vm1, %v12722_v3 }
  0x39   : > { %326 = vst.msk [vmem:[#allocation2 + $0x160] sm:$0x3] %vm283_vm1, %v12722_v3  ;;  %329 = vst.msk [vmem:[#allocation2 + $0x178] sm:$0x3] %vm283_vm1, %v12722_v3  ;;  %v512_v12 = vld [vmem:[#allocation2 + $0x9] sm:$0xff] }
  0x3a   : > { %332 = vst.msk [vmem:[#allocation2 + $0x190] sm:$0x3] %vm283_vm1, %v12722_v3  ;;  %335 = vst.msk [vmem:[#allocation2 + $0x1a8] sm:$0x3] %vm283_vm1, %v12722_v3  ;;  %v543_v16 = vpack.c.bf16 %v512_v12, %v511_v9  ;;  %v13245_v12 = vld [vmem:[%s13035_s22 + $0xe0] sm:$0xff] }
  0x3b   : > { %338 = vst.msk [vmem:[#allocation3 + $0x10] sm:$0x3] %vm283_vm1, %v12722_v3  ;;  %341 = vst.msk [vmem:[#allocation3 + $0x28] sm:$0x3] %vm283_vm1, %v12722_v3 }
  0x3c   : > { %344 = vst.msk [vmem:[#allocation3 + $0x40] sm:$0x3] %vm283_vm1, %v12722_v3  ;;  %347 = vst.msk [vmem:[#allocation3 + $0x58] sm:$0x3] %vm283_vm1, %v12722_v3  ;;  %10745 = vmatprep.mubr.msk.bf16.mxu1 %vm280_vm0, %v543_v16  ;;  %v13250_v16 = vld [vmem:[%s13035_s22 + $0xe8] sm:$0xff] }
  0x3d   : > { %350 = vst.msk [vmem:[#allocation3 + $0x70] sm:$0x3] %vm283_vm1, %v12722_v3  ;;  %353 = vst.msk [vmem:[#allocation3 + $0x88] sm:$0x3] %vm283_vm1, %v12722_v3 }
  0x3e   : > { %356 = vst.msk [vmem:[#allocation3 + $0xa0] sm:$0x3] %vm283_vm1, %v12722_v3  ;;  %359 = vst.msk [vmem:[#allocation3 + $0xb8] sm:$0x3] %vm283_vm1, %v12722_v3 }
  0x3f   : > { %362 = vst.msk [vmem:[#allocation3 + $0xd0] sm:$0x3] %vm283_vm1, %v12722_v3  ;;  %365 = vst.msk [vmem:[#allocation3 + $0xe8] sm:$0x3] %vm283_vm1, %v12722_v3 }
  0x40   : > { %368 = vst.msk [vmem:[#allocation3 + $0x100] sm:$0x3] %vm283_vm1, %v12722_v3  ;;  %371 = vst.msk [vmem:[#allocation3 + $0x118] sm:$0x3] %vm283_vm1, %v12722_v3 }
  0x41   : > { %374 = vst.msk [vmem:[#allocation3 + $0x130] sm:$0x3] %vm283_vm1, %v12722_v3  ;;  %377 = vst.msk [vmem:[#allocation3 + $0x148] sm:$0x3] %vm283_vm1, %v12722_v3 }
  0x42   : > { %380 = vst.msk [vmem:[#allocation3 + $0x160] sm:$0x3] %vm283_vm1, %v12722_v3  ;;  %383 = vst.msk [vmem:[#allocation3 + $0x178] sm:$0x3] %vm283_vm1, %v12722_v3 }
  0x43   : > { %386 = vst.msk [vmem:[#allocation3 + $0x190] sm:$0x3] %vm283_vm1, %v12722_v3  ;;  %389 = vst.msk [vmem:[#allocation3 + $0x1a8] sm:$0x3] %vm283_vm1, %v12722_v3  ;;  %v12618_v3 = vld [vmem:[%s14941_s1 + $0x18] sm:$0xff]  }
  0x44   : > { %423 = vst.msk [vmem:[#allocation2 + $0x19] sm:$0xff] %vm280_vm0, %v13038_v10  ;;  %424 = vst.msk [vmem:[#allocation2 + $0x21] sm:$0xff] %vm280_vm0, %v13041_v11 }
  0x45   : > { %425 = vst.msk [vmem:[#allocation2 + $0x31] sm:$0xff] %vm280_vm0, %v13051_v14  ;;  %426 = vst.msk [vmem:[#allocation2 + $0x39] sm:$0xff] %vm280_vm0, %v13054_v15 }
  0x46   : > { %427 = vst.msk [vmem:[#allocation2 + $0x49] sm:$0xff] %vm280_vm0, %v13064_v18  ;;  %428 = vst.msk [vmem:[#allocation2 + $0x51] sm:$0xff] %vm280_vm0, %v13067_v19 }
  0x47   : > { %429 = vst.msk [vmem:[#allocation2 + $0x61] sm:$0xff] %vm280_vm0, %v13070_v20  ;;  %430 = vst.msk [vmem:[#allocation2 + $0x69] sm:$0xff] %vm280_vm0, %v13078_v21 }
  0x48   : > { %14970 = vst [vmem:[#allocation4_spill] sm:$0xff] %v13088_v23  ;;  %431 = vst.msk [vmem:[#allocation2 + $0x79] sm:$0xff] %vm280_vm0, %v13085_v22 }
  0x49   : > { %432 = vst.msk [vmem:[#allocation2 + $0x81] sm:$0xff] %vm280_vm0, %v13088_v23  ;;  %14971 = vst [vmem:[#allocation5_spill] sm:$0xff] %v13098_v25 }
  0x4a   : > { %433 = vst.msk [vmem:[#allocation2 + $0x91] sm:$0xff] %vm280_vm0, %v13095_v24  ;;  %434 = vst.msk [vmem:[#allocation2 + $0x99] sm:$0xff] %vm280_vm0, %v13098_v25 }
  0x4b   : > { %v1678_v26 = vld [vmem:[#allocation2 + $0x19] sm:$0xff]  ;;  %v1679_v27 = vld [vmem:[#allocation2 + $0x21] sm:$0xff]  ;;  %14972 = vst [vmem:[#allocation6_spill] sm:$0xff] %v13110_v33  ;;  %14973 = vst [vmem:[#allocation7_spill] sm:$0xff] %v13113_v34 }
  0x4c   : > { %v1710_v28 = vpack.c.bf16 %v1679_v27, %v1678_v26  ;;  %v1680_v29 = vld [vmem:[#allocation2 + $0x31] sm:$0xff]  ;;  %v1681_v30 = vld [vmem:[#allocation2 + $0x39] sm:$0xff]  ;;  %14974 = vst [vmem:[#allocation8_spill] sm:$0xff] %v13116_v35  ;;  %435 = vst.msk [vmem:[#allocation2 + $0xa9] sm:$0xff] %vm280_vm0, %v13110_v33 }
  0x4d   : > { %v13107_v32 = vpack.c.bf16 %v1681_v30, %v1680_v29  ;;  %v1682_v36 = vld [vmem:[#allocation2 + $0x49] sm:$0xff]  ;;  %v1683_v37 = vld [vmem:[#allocation2 + $0x51] sm:$0xff]  ;;  %436 = vst.msk [vmem:[#allocation2 + $0xb1] sm:$0xff] %vm280_vm0, %v13113_v34  ;;  %437 = vst.msk [vmem:[#allocation2 + $0xc1] sm:$0xff] %vm280_vm0, %v13116_v35 }
  0x4e   : > { %10905 = vmatprep.mubr.msk.bf16.mxu0 %vm280_vm0, %v1710_v28  ;;  %10746 = vmatmul.mubr.msk.bf16.vlgmr.msra.gmra.mrb[0].mxu1 %vm280_vm0, %v1710_v28  ;;  %v13131_v39 = vpack.c.bf16 %v1683_v37, %v1682_v36  ;;  %14975 = vst [vmem:[#allocation9_spill] sm:$0xff] %v13134_v40  ;;  %v1684_v41 = vld [vmem:[#allocation2 + $0x61] sm:$0xff]  ;;  %v1685_v42 = vld [vmem:[#allocation2 + $0x69] sm:$0xff]  ;;  %438 = vst.msk [vmem:[#allocation2 + $0xc9] sm:$0xff] %vm280_vm0, %v13134_v40 }
  0x4f   : > { %10906 = vmatmul.mubr.msk.bf16.vlgmr.msra.gmra.mrb[0].mxu0 %vm280_vm0, %v13107_v32  ;;  %10778 = vmatpush3.bf16.msra.mxu1 %v12610_v13  ;;  %v1686_v43 = vld [vmem:[#allocation2 + $0x79] sm:$0xff]  ;;  %14976 = vst [vmem:[#allocation10_spill] sm:$0xff] %v13146_v46  ;;  %v13148_v47 = vpack.c.bf16 %v1685_v42, %v1684_v41  ;;  %14977 = vst [vmem:[#allocation11_spill] sm:$0xff] %v13151_v48  ;;  %v2001_v9 = vld [vmem:[#allocation2 + $0x22] sm:$0xff] }
  0x50   : > { %10938 = vmatpush3.bf16.msra.mxu0 %v12611_v17  ;;  %10749 = vmatprep.mubr.msk.bf16.mxu1 %vm280_vm0, %v13107_v32  ;;  %v1687_v44 = vld [vmem:[#allocation2 + $0x81] sm:$0xff]  ;;  %439 = vst.msk [vmem:[#allocation2 + $0xd9] sm:$0xff] %vm280_vm0, %v13146_v46  ;;  %440 = vst.msk [vmem:[#allocation2 + $0xe1] sm:$0xff] %vm280_vm0, %v13151_v48  ;;  %v2002_v27 = vld [vmem:[#allocation2 + $0x32] sm:$0xff] }
  0x51   : > { %10909 = vmatprep.mubr.msk.bf16.mxu0 %vm280_vm0, %v13131_v39  ;;  %10939 = vmatprep.subr.bf16.mxu0 %v12612_v31  ;;  %v13155_v49 = vpack.c.bf16 %v1687_v44, %v1686_v43  ;;  %v1688_v52 = vld [vmem:[#allocation2 + $0x91] sm:$0xff]  ;;  %14978 = vst [vmem:[#allocation12_spill] sm:$0xff] %v13172_v53  ;;  %14979 = vst [vmem:[#allocation13_spill] sm:$0xff] %v13175_v54  ;;  %v1689_v55 = vld [vmem:[#allocation2 + $0x99] sm:$0xff] }
  0x52   : > { %10779 = vmatprep.subr.bf16.mxu1 %v12613_v38  ;;  %441 = vst.msk [vmem:[#allocation2 + $0xf1] sm:$0xff] %vm280_vm0, %v13172_v53  ;;  %442 = vst.msk [vmem:[#allocation2 + $0xf9] sm:$0xff] %vm280_vm0, %v13175_v54  ;;  %v13204_v63 = vpack.c.bf16 %v1689_v55, %v1688_v52  ;;  %v2000_v8 = vld [vmem:[#allocation2 + $0x1a] sm:$0xff]  ;;  %v2004_v37 = vld [vmem:[#allocation2 + $0x4a] sm:$0xff] }
  0x53   : > { %10780 = vmatpush3.bf16.msra.mxu1 %v12613_v38  ;;  %v1690_v56 = vld [vmem:[#allocation2 + $0xa9] sm:$0xff]  ;;  %14980 = vst [vmem:[#allocation14_spill] sm:$0xff] %v13184_v57  ;;  %14981 = vst [vmem:[#allocation15_spill] sm:$0xff] %v13192_v60  ;;  %v13254_v17 = vpack.c.bf16 %v2001_v9, %v2000_v8  ;;  %v2003_v28 = vld [vmem:[#allocation2 + $0x3a] sm:$0xff] }
  0x54   : > { %10940 = vmatpush3.bf16.msra.mxu0 %v12612_v31  ;;  %10781 = vmatprep.subr.bf16.mxu1 %v12616_v50  ;;  %v1691_v58 = vld [vmem:[#allocation2 + $0xb1] sm:$0xff]  ;;  %443 = vst.msk [vmem:[#allocation2 + $0x109] sm:$0xff] %vm280_vm0, %v13184_v57  ;;  %444 = vst.msk [vmem:[#allocation2 + $0x111] sm:$0xff] %vm280_vm0, %v13192_v60  ;;  %v1692_v4 = vld [vmem:[#allocation2 + $0xc1] sm:$0xff]  ;;  %v13274_v42 = vpack.c.bf16 %v2003_v28, %v2002_v27 }
  0x55   : > { %10941 = vmatprep.subr.bf16.mxu0 %v12614_v45  ;;  %14982 = vst [vmem:[#allocation16_spill] sm:$0xff] %v13199_v61  ;;  %14983 = vst [vmem:[#allocation17_spill] sm:$0xff] %v13202_v62  ;;  %v13210_v0 = vpack.c.bf16 %v1691_v58, %v1690_v56  ;;  %v1693_v5 = vld [vmem:[#allocation2 + $0xc9] sm:$0xff]  ;;  %v13267_v30 = vld [vmem:[%s14941_s1 + $0x40] sm:$0xff]  }
  0x56   : > { %10750 = vmatmul.mubr.msk.bf16.gmra.mrb[4].mxu1 %vm280_vm0, %v13131_v39  ;;  %445 = vst.msk [vmem:[#allocation2 + $0x121] sm:$0xff] %vm280_vm0, %v13199_v61  ;;  %446 = vst.msk [vmem:[#allocation2 + $0x129] sm:$0xff] %vm280_vm0, %v13202_v62  ;;  %v13247_v13 = vpack.c.bf16 %v1693_v5, %v1692_v4  ;;  %v2005_v38 = vld [vmem:[#allocation2 + $0x52] sm:$0xff]  ;;  %v2007_v52 = vld [vmem:[#allocation2 + $0x6a] sm:$0xff] }
  0x57   : > { %10910 = vmatmul.mubr.msk.bf16.gmra.mrb[4].mxu0 %vm280_vm0, %v13148_v47  ;;  %10753 = vmatprep.mubr.msk.bf16.mxu1 %vm280_vm0, %v13148_v47  ;;  %14984 = vst [vmem:[#allocation18_spill] sm:$0xff] %v13213_v1  ;;  %14985 = vst [vmem:[#allocation19_spill] sm:$0xff] %v13216_v2  ;;  %v529_v26 = vld [vmem:[#allocation2 + $0xd9] sm:$0xff]  ;;  %v530_v29 = vld [vmem:[#allocation2 + $0xe1] sm:$0xff]  ;;  %v13278_v44 = vpack.c.bf16 %v2005_v38, %v2004_v37 }
  0x58   : > { %10913 = vmatprep.mubr.msk.bf16.mxu0 %vm280_vm0, %v13155_v49  ;;  %10942 = vmatpush3.bf16.msra.mxu0 %v12614_v45  ;;  %447 = vst.msk [vmem:[#allocation2 + $0x139] sm:$0xff] %vm280_vm0, %v13213_v1  ;;  %448 = vst.msk [vmem:[#allocation2 + $0x141] sm:$0xff] %vm280_vm0, %v13216_v2  ;;  %v13272_v41 = vpack.c.bf16 %v530_v29, %v529_v26  ;;  %v12619_v45 = vld [vmem:[%s14941_s1 + $0xc8] sm:$0xff]   ;;  %v2008_v56 = vld [vmem:[#allocation2 + $0x7a] sm:$0xff] }
  0x59   : > { %10943 = vmatprep.subr.bf16.mxu0 %v12615_v51  ;;  %10782 = vmatpush3.bf16.msra.mxu1 %v12616_v50  ;;  %14986 = vst [vmem:[#allocation20_spill] sm:$0xff] %v13235_v6  ;;  %14987 = vst [vmem:[#allocation21_spill] sm:$0xff] %v13238_v7  ;;  %v531_v31 = vld [vmem:[#allocation2 + $0xf1] sm:$0xff]  ;;  %v532_v36 = vld [vmem:[#allocation2 + $0xf9] sm:$0xff] }
  0x5a   : > { %10783 = vmatprep.subr.bf16.mxu1 %v12618_v3  ;;  %449 = vst.msk [vmem:[#allocation2 + $0x151] sm:$0xff] %vm280_vm0, %v13235_v6  ;;  %450 = vst.msk [vmem:[#allocation2 + $0x159] sm:$0xff] %vm280_vm0, %v13238_v7  ;;  %v13276_v43 = vpack.c.bf16 %v532_v36, %v531_v31  ;;  %v2009_v4 = vld [vmem:[#allocation2 + $0x82] sm:$0xff]  ;;  %v12621_v5 = vld [vmem:[%s14941_s1 + $0xd0] sm:$0xff]  }
  0x5b   : > { %14988 = vst [vmem:[#allocation22_spill] sm:$0xff] %v13245_v12  ;;  %14989 = vst [vmem:[#allocation23_spill] sm:$0xff] %v13250_v16  ;;  %v533_v50 = vld [vmem:[#allocation2 + $0x109] sm:$0xff]  ;;  %v534_v55 = vld [vmem:[#allocation2 + $0x111] sm:$0xff]  ;;  %v13301_v27 = vpack.c.bf16 %v2009_v4, %v2008_v56 }
  0x5c   : > { %10944 = vmatpush3.bf16.msra.mxu0 %v12615_v51  ;;  %451 = vst.msk [vmem:[#allocation2 + $0x169] sm:$0xff] %vm280_vm0, %v13245_v12  ;;  %452 = vst.msk [vmem:[#allocation2 + $0x171] sm:$0xff] %vm280_vm0, %v13250_v16  ;;  %v2006_v51 = vld [vmem:[#allocation2 + $0x62] sm:$0xff]  ;;  %v13295_v8 = vpack.c.bf16 %v534_v55, %v533_v50  ;;  %v13307_v28 = vld [vmem:[%s13035_s22 + $0xf8] sm:$0xff] }
  0x5d   : > { %10977 = vmatprep.subr.bf16.mxu0 %v13189_v59  ;;  %10784 = vmatpush3.bf16.msra.mxu1 %v12618_v3  ;;  %v535_v58 = vld [vmem:[#allocation2 + $0x121] sm:$0xff]  ;;  %v536_v3 = vld [vmem:[#allocation2 + $0x129] sm:$0xff]  ;;  %v13297_v9 = vpack.c.bf16 %v2007_v52, %v2006_v51  ;;  %14991 = vst [vmem:[#allocation25_spill] sm:$0xff] %v13307_v28  ;;  %v12623_v29 = vld [vmem:[%s14941_s1 + $0xd8] sm:$0xff]  }
  0x5e   : > { %10754 = vmatmul.mubr.msk.bf16.gmra.mrb[8].mxu1 %vm280_vm0, %v13155_v49  ;;  %10817 = vmatprep.subr.bf16.mxu1 %v13267_v30  ;;  %v13299_v26 = vpack.c.bf16 %v536_v3, %v535_v58  ;;  %454 = vst.msk [vmem:[#allocation2 + $0x189] sm:$0xff] %vm280_vm0, %v13307_v28  ;;  %v2010_v36 = vld [vmem:[#allocation2 + $0x92] sm:$0xff]  ;;  %v2011_v38 = vld [vmem:[#allocation2 + $0x9a] sm:$0xff]  ;;  %v2012_v51 = vld [vmem:[#allocation2 + $0xaa] sm:$0xff] }
  0x5f   : > { %10914 = vmatmul.mubr.msk.bf16.gmra.mrb[8].mxu0 %vm280_vm0, %v13204_v63  ;;  %10757 = vmatprep.mubr.msk.bf16.mxu1 %vm280_vm0, %v13204_v63  ;;  %v537_v31 = vld [vmem:[#allocation2 + $0x139] sm:$0xff]  ;;  %v538_v37 = vld [vmem:[#allocation2 + $0x141] sm:$0xff]  ;;  %v13331_v58 = vpack.c.bf16 %v2011_v38, %v2010_v36  ;;  %v2015_v28 = vld [vmem:[#allocation2 + $0xca] sm:$0xff] }
  0x60   : > { %10917 = vmatprep.mubr.msk.bf16.mxu0 %vm280_vm0, %v13210_v0  ;;  %v2013_v52 = vld [vmem:[#allocation2 + $0xb2] sm:$0xff]  ;;  %v13327_v55 = vld [vmem:[%s14941_s1 + $0xe0] sm:$0xff]   ;;  %v13329_v56 = vpack.c.bf16 %v538_v37, %v537_v31  ;;  %v2023_v62 = vld [vmem:[#allocation2 + $0x12a] sm:$0xff] }
  0x61   : > { %v540_v50 = vld [vmem:[#allocation2 + $0x159] sm:$0xff]  ;;  %v13335_v4 = vpack.c.bf16 %v2013_v52, %v2012_v51  ;;  %v2014_v16 = vld [vmem:[#allocation2 + $0xc2] sm:$0xff]  ;;  %v459_v1 = vld [vmem:[#allocation2 + $0x30] sm:$0xff] }
  0x62   : > { %v455_v12 = vld [vmem:[#allocation2] sm:$0xff]  ;;  %v13348_v38 = vpack.c.bf16 %v2015_v28, %v2014_v16  ;;  %v457_v51 = vld [vmem:[#allocation2 + $0x18] sm:$0xff]  ;;  %v12622_v28 = vld [vmem:[%s14941_s1 + $0x48] sm:$0xff]  }
  0x63   : > { %v542_v31 = vld [vmem:[#allocation2 + $0x171] sm:$0xff]  ;;  %v2017_v36 = vld [vmem:[#allocation2 + $0xe2] sm:$0xff]  ;;  %v2019_v7 = vld [vmem:[#allocation2 + $0xfa] sm:$0xff] }
  0x64   : > { %v458_v52 = vld [vmem:[#allocation2 + $0x20] sm:$0xff]  ;;  %v2018_v2 = vld [vmem:[#allocation2 + $0xf2] sm:$0xff]  ;;  %v469_v53 = vld [vmem:[#allocation2 + $0xa8] sm:$0xff] }
  0x65   : > { %v13359_v16 = vpack.c.bf16 %v458_v52, %v457_v51  ;;  %v462_v6 = vld [vmem:[#allocation2 + $0x50] sm:$0xff]  ;;  %v2022_v60 = vld [vmem:[#allocation2 + $0x122] sm:$0xff]  ;;  %v465_v61 = vld [vmem:[#allocation2 + $0x78] sm:$0xff] }
  0x66   : > { %10758 = vmatmul.mubr.msk.bf16.gmra.mrb[12].mxu1 %vm280_vm0, %v13210_v0  ;;  %v463_v57 = vld [vmem:[#allocation2 + $0x60] sm:$0xff]  ;;  %v464_v51 = vld [vmem:[#allocation2 + $0x68] sm:$0xff]  ;;  %v2026_v54 = vld [vmem:[#allocation2 + $0x152] sm:$0xff] }
  0x67   : > { %10918 = vmatmul.mubr.msk.bf16.gmra.mrb[12].mxu0 %vm280_vm0, %v13247_v13  ;;  %10761 = vmatprep.mubr.msk.bf16.mxu1 %vm280_vm0, %v13247_v13  ;;  %v466_v48 = vld [vmem:[#allocation2 + $0x80] sm:$0xff]  ;;  %v470_v34 = vld [vmem:[#allocation2 + $0xb0] sm:$0xff]  ;;  %v480_v33 = vld [vmem:[#allocation2 + $0x128] sm:$0xff] }
  0x68   : > { %10945 = vmatprep.mubr.msk.bf16.mxu0 %vm280_vm0, %v13254_v17  ;;  %v471_v40 = vld [vmem:[#allocation2 + $0xc0] sm:$0xff]  ;;  %v481_v35 = vld [vmem:[#allocation2 + $0x138] sm:$0xff] }
  0x69   : > { %v482_v23 = vld [vmem:[#allocation2 + $0x140] sm:$0xff]  ;;  %v484_v25 = vld [vmem:[#allocation2 + $0x158] sm:$0xff] }
  0x6e   : > { %10762 = vmatmul.mubr.msk.bf16.gmra.mrb[16].mxu1 %vm280_vm0, %v13272_v41 }
  0x6f   : > { %10946 = vmatmul.mubr.msk.bf16.vlgmr.msra.gmra.mrb[0].mxu0 %vm280_vm0, %v13274_v42  ;;  %10765 = vmatprep.mubr.msk.bf16.mxu1 %vm280_vm0, %v13276_v43 }
  0x70   : > { %10978 = vmatpush3.bf16.msra.mxu0 %v13189_v59  ;;  %10949 = vmatprep.mubr.msk.bf16.mxu0 %vm280_vm0, %v13278_v44  ;;  %v13304_v59 = vld [vmem:[%s13035_s22 + $0xf0] sm:$0xff] }
  0x71   : > { %10979 = vmatprep.subr.bf16.mxu0 %v12619_v45  ;;  %14990 = vst [vmem:[#allocation24_spill] sm:$0xff] %v13304_v59  ;;  %453 = vst.msk [vmem:[#allocation2 + $0x181] sm:$0xff] %vm280_vm0, %v13304_v59  ;;  %v456_v59 = vld [vmem:[#allocation2 + $0x8] sm:$0xff] }
  0x74   : > { %10980 = vmatpush3.bf16.msra.mxu0 %v12619_v45  ;;  %v539_v45 = vld [vmem:[#allocation2 + $0x151] sm:$0xff] }
  0x75   : > { %10981 = vmatprep.subr.bf16.mxu0 %v12621_v5  ;;  %v13333_v3 = vpack.c.bf16 %v540_v50, %v539_v45  ;;  %v487_v45 = vpack.c.bf16 %v456_v59, %v455_v12  ;;  %v2021_v12 = vld [vmem:[#allocation2 + $0x112] sm:$0xff]  ;;  %v13361_v59 = vpack.c.bf16 %v2019_v7, %v2018_v2  ;;  %v2024_v2 = vld [vmem:[#allocation2 + $0x13a] sm:$0xff]  ;;  %v2025_v7 = vld [vmem:[#allocation2 + $0x142] sm:$0xff] }
  0x76   : > { %10766 = vmatmul.mubr.msk.bf16.gmra.mrb[20].mxu1 %vm280_vm0, %v13295_v8 }
  0x77   : > { %10950 = vmatmul.mubr.msk.bf16.gmra.mrb[4].mxu0 %vm280_vm0, %v13297_v9  ;;  %10769 = vmatprep.mubr.msk.bf16.mxu1 %vm280_vm0, %v13299_v26 }
  0x78   : > { %10953 = vmatprep.mubr.msk.bf16.mxu0 %vm280_vm0, %v13301_v27  ;;  %10982 = vmatpush3.bf16.msra.mxu0 %v12621_v5  ;;  %v541_v5 = vld [vmem:[#allocation2 + $0x169] sm:$0xff] }
  0x79   : > { %10983 = vmatprep.subr.bf16.mxu0 %v12623_v29  ;;  %v13346_v37 = vpack.c.bf16 %v542_v31, %v541_v5  ;;  %v460_v5 = vld [vmem:[#allocation2 + $0x38] sm:$0xff]  ;;  %v2020_v31 = vld [vmem:[#allocation2 + $0x10a] sm:$0xff] }
  0x7c   : > { %10984 = vmatpush3.bf16.msra.mxu0 %v12623_v29  ;;  %v2016_v29 = vld [vmem:[#allocation2 + $0xda] sm:$0xff] }
  0x7d   : > { %11017 = vmatprep.subr.bf16.mxu0 %v13327_v55  ;;  %v13350_v50 = vpack.c.bf16 %v2017_v36, %v2016_v29  ;;  %v13366_v29 = vpack.c.bf16 %v460_v5, %v459_v1  ;;  %v13368_v36 = vpack.c.bf16 %v2021_v12, %v2020_v31  ;;  %v12624_v1 = vld [vmem:[%s14941_s1 + $0x50] sm:$0xff]   ;;  %v13384_v5 = vpack.c.bf16 %v2023_v62, %v2022_v60  ;;  %v468_v60 = vld [vmem:[#allocation2 + $0x98] sm:$0xff] }
  0x7e   : > { %10770 = vmatmul.mubr.msk.bf16.gmra.mrb[24].mxu1 %vm280_vm0, %v13329_v56  ;;  %v13386_v31 = vpack.c.bf16 %v464_v51, %v463_v57  ;;  %v13391_v12 = vpack.c.bf16 %v2025_v7, %v2024_v2  ;;  %v2028_v57 = vld [vmem:[#allocation2 + $0x16a] sm:$0xff]  ;;  %v2029_v62 = vld [vmem:[#allocation2 + $0x172] sm:$0xff]  ;;  %v13406_v51 = vpack.c.bf16 %v466_v48, %v465_v61  ;;  %v2030_v48 = vld [vmem:[#allocation2 + $0x182] sm:$0xff] }
  0x7f   : > { %10954 = vmatmul.mubr.msk.bf16.gmra.mrb[8].mxu0 %vm280_vm0, %v13331_v58  ;;  %10773 = vmatprep.mubr.msk.bf16.mxu1 %vm280_vm0, %v13333_v3  ;;  %v13412_v46 = vpack.c.bf16 %v2029_v62, %v2028_v57  ;;  %v472_v61 = vld [vmem:[#allocation2 + $0xc8] sm:$0xff]  ;;  %v475_v57 = vld [vmem:[#allocation2 + $0xf0] sm:$0xff]  ;;  %v476_v62 = vld [vmem:[#allocation2 + $0xf8] sm:$0xff] }
  0x80   : > { %10957 = vmatprep.mubr.msk.bf16.mxu0 %vm280_vm0, %v13335_v4 }
  0x86   : > { %10774 = vmatmul.mubr.msk.bf16.gmra.mrb[28].mxu1 %vm280_vm0, %v13346_v37 }
  0x87   : > { %10958 = vmatmul.mubr.msk.bf16.gmra.mrb[12].mxu0 %vm280_vm0, %v13348_v38  ;;  %10785 = vmatprep.mubr.msk.bf16.mxu1 %vm280_vm0, %v487_v45  ;;  %v461_v45 = vld [vmem:[#allocation2 + $0x48] sm:$0xff] }
  0x88   : > { %10961 = vmatprep.mubr.msk.bf16.mxu0 %vm280_vm0, %v13350_v50  ;;  %v13382_v52 = vpack.c.bf16 %v462_v6, %v461_v45  ;;  %v2027_v6 = vld [vmem:[#allocation2 + $0x15a] sm:$0xff]  ;;  %v467_v45 = vld [vmem:[#allocation2 + $0x90] sm:$0xff] }
  0x89   : > { %v13408_v2 = vpack.c.bf16 %v2027_v6, %v2026_v54  ;;  %v13410_v7 = vpack.c.bf16 %v468_v60, %v467_v45  ;;  %v2031_v54 = vld [vmem:[#allocation2 + $0x18a] sm:$0xff]  ;;  %v13427_v6 = vpack.c.bf16 %v472_v61, %v471_v40  ;;  %v473_v45 = vld [vmem:[#allocation2 + $0xd8] sm:$0xff]  ;;  %v474_v60 = vld [vmem:[#allocation2 + $0xe0] sm:$0xff]  ;;  %v13439_v40 = vpack.c.bf16 %v476_v62, %v475_v57 }
  0x8a   : > { %v479_v61 = vld [vmem:[#allocation2 + $0x120] sm:$0xff]  ;;  %v12631_v62 = vld [vmem:[%s14941_s1 + $0xf8] sm:$0xff]  }
  0x8b   : > { %v13458_v57 = vpack.c.bf16 %v480_v33, %v479_v61  ;;  %v12633_v33 = vld [vmem:[%s14941_s1 + $0x100] sm:$0xff]   ;;  %v486_v61 = vld [vmem:[#allocation2 + $0x170] sm:$0xff] }
  0x8e   : > { %10786 = vmatmul.mubr.msk.bf16.vlgmr.msra.gmra.mrb[0].mxu1 %vm280_vm0, %v13359_v16 }
  0x8f   : > { %10962 = vmatmul.mubr.msk.bf16.gmra.mrb[16].mxu0 %vm280_vm0, %v13361_v59  ;;  %10818 = vmatpush3.bf16.msra.mxu1 %v13267_v30  ;;  %v12626_v30 = vld [vmem:[%s14941_s1 + $0x58] sm:$0xff]  }
  0x90   : > { %10789 = vmatprep.mubr.msk.bf16.mxu1 %vm280_vm0, %v13366_v29  ;;  %10965 = vmatprep.mubr.msk.bf16.mxu0 %vm280_vm0, %v13368_v36 }
  0x91   : > { %10819 = vmatprep.subr.bf16.mxu1 %v12622_v28 }
  0x93   : > { %10820 = vmatpush3.bf16.msra.mxu1 %v12622_v28  ;;  %v13402_v28 = vld [vmem:[%s14941_s1 + $0x60] sm:$0xff]  }
  0x94   : > { %10821 = vmatprep.subr.bf16.mxu1 %v12624_v1 }
  0x96   : > { %10790 = vmatmul.mubr.msk.bf16.gmra.mrb[4].mxu1 %vm280_vm0, %v13382_v52 }
  0x97   : > { %10966 = vmatmul.mubr.msk.bf16.gmra.mrb[20].mxu0 %vm280_vm0, %v13384_v5  ;;  %10793 = vmatprep.mubr.msk.bf16.mxu1 %vm280_vm0, %v13386_v31 }
  0x98   : > { %10969 = vmatprep.mubr.msk.bf16.mxu0 %vm280_vm0, %v13391_v12  ;;  %10822 = vmatpush3.bf16.msra.mxu1 %v12624_v1  ;;  %v13423_v1 = vpack.c.bf16 %v470_v34, %v469_v53  ;;  %v13437_v34 = vpack.c.bf16 %v474_v60, %v473_v45  ;;  %v12627_v53 = vld [vmem:[%s14941_s1 + $0xe8] sm:$0xff]   ;;  %v12629_v45 = vld [vmem:[%s14941_s1 + $0xf0] sm:$0xff]  }
  0x99   : > { %10823 = vmatprep.subr.bf16.mxu1 %v12626_v30 }
  0x9c   : > { %10824 = vmatpush3.bf16.msra.mxu1 %v12626_v30  ;;  %v13425_v30 = vpack.c.bf16 %v2031_v54, %v2030_v48  ;;  %v477_v48 = vld [vmem:[#allocation2 + $0x108] sm:$0xff]  ;;  %v478_v54 = vld [vmem:[#allocation2 + $0x110] sm:$0xff] }
  0x9d   : > { %10857 = vmatprep.subr.bf16.mxu1 %v13402_v28  ;;  %v13456_v60 = vpack.c.bf16 %v478_v54, %v477_v48  ;;  %v485_v54 = vld [vmem:[#allocation2 + $0x168] sm:$0xff] }
  0x9e   : > { %10794 = vmatmul.mubr.msk.bf16.gmra.mrb[8].mxu1 %vm280_vm0, %v13406_v51 }
  0x9f   : > { %10970 = vmatmul.mubr.msk.bf16.gmra.mrb[24].mxu0 %vm280_vm0, %v13408_v2  ;;  %10797 = vmatprep.mubr.msk.bf16.mxu1 %vm280_vm0, %v13410_v7 }
  0xa0   : > { %10973 = vmatprep.mubr.msk.bf16.mxu0 %vm280_vm0, %v13412_v46 }
  0xa6   : > { %10798 = vmatmul.mubr.msk.bf16.gmra.mrb[12].mxu1 %vm280_vm0, %v13423_v1 }
  0xa7   : > { %10974 = vmatmul.mubr.msk.bf16.gmra.mrb[28].mxu0 %vm280_vm0, %v13425_v30  ;;  %10801 = vmatprep.mubr.msk.bf16.mxu1 %vm280_vm0, %v13427_v6 }
  0xa8   : > { %10985 = vmatprep.mubr.msk.bf16.mxu0 %vm280_vm0, %v13366_v29 }
  0xae   : > { %10802 = vmatmul.mubr.msk.bf16.gmra.mrb[16].mxu1 %vm280_vm0, %v13437_v34 }
  0xaf   : > { %10986 = vmatmul.mubr.msk.bf16.vlgmr.msra.gmra.mrb[0].mxu0 %vm280_vm0, %v13382_v52  ;;  %10805 = vmatprep.mubr.msk.bf16.mxu1 %vm280_vm0, %v13439_v40 }
  0xb0   : > { %11018 = vmatpush3.bf16.msra.mxu0 %v13327_v55  ;;  %10989 = vmatprep.mubr.msk.bf16.mxu0 %vm280_vm0, %v13386_v31  ;;  %v483_v55 = vld [vmem:[#allocation2 + $0x150] sm:$0xff] }
  0xb1   : > { %11019 = vmatprep.subr.bf16.mxu0 %v12627_v53  ;;  %v13476_v48 = vpack.c.bf16 %v484_v25, %v483_v55  ;;  %v13486_v25 = vpack.c.bf16 %v486_v61, %v485_v54  ;;  %v12632_v55 = vld [vmem:[%s14941_s1 + $0x70] sm:$0xff]   ;;  %v12710_v61 = vld [vmem:[%s14941_s1 + $0x80] sm:$0xff]  }
  0xb4   : > { %11020 = vmatpush3.bf16.msra.mxu0 %v12627_v53  ;;  %v13474_v53 = vpack.c.bf16 %v482_v23, %v481_v35  ;;  %v1034_v23 = vld [vmem:[#allocation2 + $0x2] sm:$0xff]  ;;  %v1035_v35 = vld [vmem:[#allocation2 + $0xa] sm:$0xff] }
  0xb5   : > { %11021 = vmatprep.subr.bf16.mxu0 %v12629_v45 }
  0xb6   : > { %10806 = vmatmul.mubr.msk.bf16.gmra.mrb[20].mxu1 %vm280_vm0, %v13456_v60 }
  0xb7   : > { %10990 = vmatmul.mubr.msk.bf16.gmra.mrb[4].mxu0 %vm280_vm0, %v13406_v51  ;;  %10809 = vmatprep.mubr.msk.bf16.mxu1 %vm280_vm0, %v13458_v57 }
  0xb8   : > { %10993 = vmatprep.mubr.msk.bf16.mxu0 %vm280_vm0, %v13410_v7  ;;  %11022 = vmatpush3.bf16.msra.mxu0 %v12629_v45  ;;  %v1066_v45 = vpack.c.bf16 %v1035_v35, %v1034_v23  ;;  %v2353_v23 = vld [vmem:[#allocation2 + $0x198] sm:$0xff]  ;;  %v2354_v35 = vld [vmem:[#allocation2 + $0x1a0] sm:$0xff] }
  0xb9   : > { %11023 = vmatprep.subr.bf16.mxu0 %v12631_v62 }
  0xbc   : > { %11024 = vmatpush3.bf16.msra.mxu0 %v12631_v62  ;;  %v12630_v62 = vld [vmem:[%s14941_s1 + $0x68] sm:$0xff]  }
  0xbd   : > { %11057 = vmatprep.subr.bf16.mxu0 %v12633_v33 }
  0xbe   : > { %10810 = vmatmul.mubr.msk.bf16.gmra.mrb[24].mxu1 %vm280_vm0, %v13474_v53 }
  0xbf   : > { %10994 = vmatmul.mubr.msk.bf16.gmra.mrb[8].mxu0 %vm280_vm0, %v13423_v1  ;;  %10813 = vmatprep.mubr.msk.bf16.mxu1 %vm280_vm0, %v13476_v48 }
  0xc0   : > { %10997 = vmatprep.mubr.msk.bf16.mxu0 %vm280_vm0, %v13427_v6 }
  0xc6   : > { %10814 = vmatmul.mubr.msk.bf16.gmra.mrb[28].mxu1 %vm280_vm0, %v13486_v25 }
  0xc7   : > { %10998 = vmatmul.mubr.msk.bf16.gmra.mrb[12].mxu0 %vm280_vm0, %v13437_v34  ;;  %10825 = vmatprep.mubr.msk.bf16.mxu1 %vm280_vm0, %v1066_v45  ;;  %v2370_v45 = vpack.c.bf16 %v2354_v35, %v2353_v23 }
  0xc8   : > { %11001 = vmatprep.mubr.msk.bf16.mxu0 %vm280_vm0, %v13439_v40 }
  0xce   : > { %10826 = vmatmul.mubr.msk.bf16.vlgmr.msra.gmra.mrb[0].mxu1 %vm280_vm0, %v13254_v17  ;;  %v12634_v17 = vld [vmem:[%s14941_s1 + $0x78] sm:$0xff]  }
  0xcf   : > { %11002 = vmatmul.mubr.msk.bf16.gmra.mrb[16].mxu0 %vm280_vm0, %v13456_v60  ;;  %10858 = vmatpush3.bf16.msra.mxu1 %v13402_v28  ;;  %v2352_v28 = vld [vmem:[#allocation2 + $0x188] sm:$0xff] }
  0xd0   : > { %10829 = vmatprep.mubr.msk.bf16.mxu1 %vm280_vm0, %v13274_v42  ;;  %11005 = vmatprep.mubr.msk.bf16.mxu0 %vm280_vm0, %v13458_v57  ;;  %v2351_v42 = vld [vmem:[#allocation2 + $0x180] sm:$0xff] }
  0xd1   : > { %10859 = vmatprep.subr.bf16.mxu1 %v12630_v62  ;;  %v13521_v54 = vpack.c.bf16 %v2352_v28, %v2351_v42 }
  0xd3   : > { %10860 = vmatpush3.bf16.msra.mxu1 %v12630_v62  ;;  %v12635_v62 = vld [vmem:[%s14941_s1 + $0x108] sm:$0xff]  }
  0xd4   : > { %10861 = vmatprep.subr.bf16.mxu1 %v12632_v55 }
  0xd6   : > { %10830 = vmatmul.mubr.msk.bf16.gmra.mrb[4].mxu1 %vm280_vm0, %v13278_v44 }
  0xd7   : > { %11006 = vmatmul.mubr.msk.bf16.gmra.mrb[20].mxu0 %vm280_vm0, %v13474_v53  ;;  %10833 = vmatprep.mubr.msk.bf16.mxu1 %vm280_vm0, %v13297_v9 }
  0xd8   : > { %11009 = vmatprep.mubr.msk.bf16.mxu0 %vm280_vm0, %v13476_v48  ;;  %10862 = vmatpush3.bf16.msra.mxu1 %v12632_v55  ;;  %v12637_v55 = vld [vmem:[%s14941_s1 + $0x118] sm:$0xff]  }
  0xd9   : > { %10863 = vmatprep.subr.bf16.mxu1 %v12634_v17 }
  0xdc   : > { %10864 = vmatpush3.bf16.msra.mxu1 %v12634_v17  ;;  %v13691_v17 = vld [vmem:[%s14943_s3] sm:$0xff]  }
  0xdd   : > { %11817 = vmatprep.subr.bf16.mxu1 %v12710_v61 }
  0xde   : > { %10834 = vmatmul.mubr.msk.bf16.gmra.mrb[8].mxu1 %vm280_vm0, %v13301_v27 }
  0xdf   : > { %11010 = vmatmul.mubr.msk.bf16.gmra.mrb[24].mxu0 %vm280_vm0, %v13486_v25  ;;  %10837 = vmatprep.mubr.msk.bf16.mxu1 %vm280_vm0, %v13331_v58 }
  0xe0   : > { %11013 = vmatprep.mubr.msk.bf16.mxu0 %vm280_vm0, %v13521_v54 }
  0xe6   : > { %10838 = vmatmul.mubr.msk.bf16.gmra.mrb[12].mxu1 %vm280_vm0, %v13335_v4 }
  0xe7   : > { %11014 = vmatmul.mubr.msk.bf16.gmra.mrb[28].mxu0 %vm280_vm0, %v2370_v45  ;;  %10841 = vmatprep.mubr.msk.bf16.mxu1 %vm280_vm0, %v13348_v38 }
  0xe8   : > { %11025 = vmatprep.mubr.msk.bf16.mxu0 %vm280_vm0, %v13107_v32  ;;  %v12636_v32 = vld [vmem:[%s14941_s1 + $0x110] sm:$0xff]  }
  0xee   : > { %10842 = vmatmul.mubr.msk.bf16.gmra.mrb[16].mxu1 %vm280_vm0, %v13350_v50 }
  0xef   : > { %11026 = vmatmul.mubr.msk.bf16.vlgmr.msra.gmra.mrb[0].mxu0 %vm280_vm0, %v13131_v39  ;;  %10845 = vmatprep.mubr.msk.bf16.mxu1 %vm280_vm0, %v13361_v59  ;;  %v12711_v39 = vld [vmem:[%s14941_s1 + $0x88] sm:$0xff]  }
  0xf0   : > { %11058 = vmatpush3.bf16.msra.mxu0 %v12633_v33  ;;  %11029 = vmatprep.mubr.msk.bf16.mxu0 %vm280_vm0, %v13148_v47  ;;  %v12712_v47 = vld [vmem:[%s14941_s1 + $0x90] sm:$0xff]   ;;  %v12641_v33 = vld [vmem:[%s14943_s3 + $0x38] sm:$0xff]  }
  0xf1   : > { %11059 = vmatprep.subr.bf16.mxu0 %v12635_v62 }
  0xf4   : > { %11060 = vmatpush3.bf16.msra.mxu0 %v12635_v62 }
  0xf5   : > { %11061 = vmatprep.subr.bf16.mxu0 %v12636_v32 }
  0xf6   : > { %10846 = vmatmul.mubr.msk.bf16.gmra.mrb[20].mxu1 %vm280_vm0, %v13368_v36 }
  0xf7   : > { %11030 = vmatmul.mubr.msk.bf16.gmra.mrb[4].mxu0 %vm280_vm0, %v13155_v49  ;;  %10849 = vmatprep.mubr.msk.bf16.mxu1 %vm280_vm0, %v13384_v5  ;;  %v2673_v49 = vld [vmem:[#allocation2 + $0x181] sm:$0xff] }
  0xf8   : > { %11033 = vmatprep.mubr.msk.bf16.mxu0 %vm280_vm0, %v13204_v63  ;;  %11062 = vmatpush3.bf16.msra.mxu0 %v12636_v32  ;;  %v2674_v63 = vld [vmem:[#allocation2 + $0x189] sm:$0xff] }
  0xf9   : > { %11063 = vmatprep.subr.bf16.mxu0 %v12637_v55 }
  0xfc   : > { %11064 = vmatpush3.bf16.msra.mxu0 %v12637_v55 }
  0xfe   : > { %10850 = vmatmul.mubr.msk.bf16.gmra.mrb[24].mxu1 %vm280_vm0, %v13391_v12 }
  0xff   : > { %11034 = vmatmul.mubr.msk.bf16.gmra.mrb[8].mxu0 %vm280_vm0, %v13210_v0  ;;  %10853 = vmatprep.mubr.msk.bf16.mxu1 %vm280_vm0, %v13408_v2  ;;  %v12713_v0 = vld [vmem:[%s14941_s1 + $0x98] sm:$0xff]  }
 0x100   : > { %11037 = vmatprep.mubr.msk.bf16.mxu0 %vm280_vm0, %v13247_v13  ;;  %v13607_v13 = vpack.c.bf16 %v2674_v63, %v2673_v49 }
 0x106   : > { %10854 = vmatmul.mubr.msk.bf16.gmra.mrb[28].mxu1 %vm280_vm0, %v13412_v46 }
 0x107   : > { %11038 = vmatmul.mubr.msk.bf16.gmra.mrb[12].mxu0 %vm280_vm0, %v13272_v41  ;;  %10865 = vmatprep.mubr.msk.bf16.mxu1 %vm280_vm0, %v13359_v16  ;;  %v2675_v41 = vld [vmem:[#allocation2 + $0x199] sm:$0xff]  ;;  %v1699_v16 = vld [vmem:[#allocation2 + $0x111] sm:$0xff] }
 0x108   : > { %11041 = vmatprep.mubr.msk.bf16.mxu0 %vm280_vm0, %v13276_v43  ;;  %v2676_v43 = vld [vmem:[#allocation2 + $0x1a1] sm:$0xff] }
 0x10e   : > { %10866 = vmatmul.mubr.msk.bf16.vlgmr.msra.gmra.mrb[0].mxu1 %vm280_vm0, %v13366_v29 }
 0x10f   : > { %11042 = vmatmul.mubr.msk.bf16.gmra.mrb[16].mxu0 %vm280_vm0, %v13295_v8  ;;  %11821 = vmatpush3.bf16.msra.mxu1 %v12710_v61  ;;  %v2967_v8 = vld [vmem:[#allocation2 + $0x32] sm:$0xff] }
 0x110   : > { %10869 = vmatprep.mubr.msk.bf16.mxu1 %vm280_vm0, %v13382_v52  ;;  %11045 = vmatprep.mubr.msk.bf16.mxu0 %vm280_vm0, %v13299_v26  ;;  %v2968_v26 = vld [vmem:[#allocation2 + $0x3a] sm:$0xff] }
 0x111   : > { %11818 = vmatprep.subr.bf16.mxu1 %v12711_v39  ;;  %v1700_v52 = vld [vmem:[#allocation2 + $0x121] sm:$0xff] }
 0x113   : > { %11822 = vmatpush3.bf16.msra.mxu1 %v12711_v39 }
 0x114   : > { %11819 = vmatprep.subr.bf16.mxu1 %v12712_v47 }
 0x116   : > { %10870 = vmatmul.mubr.msk.bf16.gmra.mrb[4].mxu1 %vm280_vm0, %v13386_v31  ;;  %v1702_v31 = vld [vmem:[#allocation2 + $0x139] sm:$0xff] }
 0x117   : > { %11046 = vmatmul.mubr.msk.bf16.gmra.mrb[20].mxu0 %vm280_vm0, %v13329_v56  ;;  %10873 = vmatprep.mubr.msk.bf16.mxu1 %vm280_vm0, %v13406_v51  ;;  %v2692_v56 = vpack.c.bf16 %v2676_v43, %v2675_v41  ;;  %v1703_v51 = vld [vmem:[#allocation2 + $0x141] sm:$0xff]  ;;  %v13713_v43 = vld [vmem:[%s14942_s2] ss:$0 sm:$0xff] }
 0x118   : > { %11049 = vmatprep.mubr.msk.bf16.mxu0 %vm280_vm0, %v13333_v3  ;;  %11823 = vmatpush3.bf16.msra.mxu1 %v12712_v47  ;;  %v2999_v3 = vpack.c.bf16 %v2968_v26, %v2967_v8 }
 0x119   : > { %11820 = vmatprep.subr.bf16.mxu1 %v12713_v0 }
 0x11c   : > { %11824 = vmatpush3.bf16.msra.mxu1 %v12713_v0 }
 0x11e   : > { %10874 = vmatmul.mubr.msk.bf16.gmra.mrb[8].mxu1 %vm280_vm0, %v13410_v7 }
 0x11f   : > { %11050 = vmatmul.mubr.msk.bf16.gmra.mrb[24].mxu0 %vm280_vm0, %v13346_v37  ;;  %10877 = vmatprep.mubr.msk.bf16.mxu1 %vm280_vm0, %v13423_v1  ;;  %v1697_v37 = vld [vmem:[#allocation2 + $0xf9] sm:$0xff]  ;;  %v1704_v1 = vld [vmem:[#allocation2 + $0x151] sm:$0xff] }
 0x120   : > { %11053 = vmatprep.mubr.msk.bf16.mxu0 %vm280_vm0, %v13607_v13 }
 0x126   : > { %10878 = vmatmul.mubr.msk.bf16.gmra.mrb[12].mxu1 %vm280_vm0, %v13427_v6  ;;  %v1706_v6 = vld [vmem:[#allocation2 + $0x169] sm:$0xff] }
 0x127   : > { %11054 = vmatmul.mubr.msk.bf16.gmra.mrb[28].mxu0 %vm280_vm0, %v2692_v56  ;;  %10881 = vmatprep.mubr.msk.bf16.mxu1 %vm280_vm0, %v13437_v34  ;;  %v1707_v34 = vld [vmem:[#allocation2 + $0x171] sm:$0xff] }
 0x128   : > { %11065 = vmatprep.mubr.msk.bf16.mxu0 %vm280_vm0, %v2999_v3 }
 0x12e   : > { %10882 = vmatmul.mubr.msk.bf16.gmra.mrb[16].mxu1 %vm280_vm0, %v13439_v40 }
 0x12f   : > { %11066 = vmatmul.mubr.msk.bf16.vlgmr.msra.gmra.mrb[0].mxu0 %vm280_vm0, %v13278_v44  ;;  %10885 = vmatprep.mubr.msk.bf16.mxu1 %vm280_vm0, %v13456_v60  ;;  %v1694_v44 = vld [vmem:[#allocation2 + $0xd9] sm:$0xff]  ;;  %v2998_v60 = vld [vmem:[#allocation2 + $0x1a2] sm:$0xff] }
 0x130   : > { %11069 = vmatprep.mubr.msk.bf16.mxu0 %vm280_vm0, %v13297_v9  ;;  %v1695_v9 = vld [vmem:[#allocation2 + $0xe1] sm:$0xff] }
 0x136   : > { %10886 = vmatmul.mubr.msk.bf16.gmra.mrb[20].mxu1 %vm280_vm0, %v13458_v57 }
 0x137   : > { %11070 = vmatmul.mubr.msk.bf16.gmra.mrb[4].mxu0 %vm280_vm0, %v13301_v27  ;;  %10889 = vmatprep.mubr.msk.bf16.mxu1 %vm280_vm0, %v13474_v53  ;;  %v1718_v27 = vpack.c.bf16 %v1695_v9, %v1694_v44  ;;  %v3513_v53 = vld [vmem:[#allocation3 + $0x1] sm:$0xff] }
 0x138   : > { %11073 = vmatprep.mubr.msk.bf16.mxu0 %vm280_vm0, %v13331_v58  ;;  %v1696_v58 = vld [vmem:[#allocation2 + $0xf1] sm:$0xff] }
 0x139   : > { %v1719_v29 = vpack.c.bf16 %v1697_v37, %v1696_v58 }
 0x13e   : > { %10890 = vmatmul.mubr.msk.bf16.gmra.mrb[24].mxu1 %vm280_vm0, %v13476_v48  ;;  %v3514_v48 = vld [vmem:[#allocation3 + $0x9] sm:$0xff] }
 0x13f   : > { %11074 = vmatmul.mubr.msk.bf16.gmra.mrb[8].mxu0 %vm280_vm0, %v13335_v4  ;;  %10893 = vmatprep.mubr.msk.bf16.mxu1 %vm280_vm0, %v13486_v25  ;;  %v1698_v4 = vld [vmem:[#allocation2 + $0x109] sm:$0xff]  ;;  %v3545_v25 = vpack.c.bf16 %v3514_v48, %v3513_v53 }
 0x140   : > { %11077 = vmatprep.mubr.msk.bf16.mxu0 %vm280_vm0, %v13348_v38  ;;  %v1720_v38 = vpack.c.bf16 %v1699_v16, %v1698_v4 }
 0x146   : > { %10894 = vmatmul.mubr.msk.bf16.gmra.mrb[28].mxu1 %vm280_vm0, %v13521_v54 }
 0x147   : > { %11078 = vmatmul.mubr.msk.bf16.gmra.mrb[12].mxu0 %vm280_vm0, %v13350_v50  ;;  %10921 = vmatprep.mubr.msk.bf16.mxu1 %vm280_vm0, %v1718_v27  ;;  %v1701_v50 = vld [vmem:[#allocation2 + $0x129] sm:$0xff] }
 0x148   : > { %11081 = vmatprep.mubr.msk.bf16.mxu0 %vm280_vm0, %v13361_v59  ;;  %v1721_v7 = vpack.c.bf16 %v1701_v50, %v1700_v52  ;;  %v1722_v59 = vpack.c.bf16 %v1703_v51, %v1702_v31 }
 0x14e   : > { %10922 = vmatmul.mubr.msk.bf16.vlgmr.msra.gmra.mrb[16].mxu1 %vm280_vm0, %v1719_v29 }
 0x14f   : > { %11082 = vmatmul.mubr.msk.bf16.gmra.mrb[16].mxu0 %vm280_vm0, %v13368_v36  ;;  %10925 = vmatprep.mubr.msk.bf16.mxu1 %vm280_vm0, %v1720_v38  ;;  %v1705_v36 = vld [vmem:[#allocation2 + $0x159] sm:$0xff] }
 0x150   : > { %11085 = vmatprep.mubr.msk.bf16.mxu0 %vm280_vm0, %v13384_v5  ;;  %v1723_v40 = vpack.c.bf16 %v1705_v36, %v1704_v1  ;;  %v1724_v5 = vpack.c.bf16 %v1707_v34, %v1706_v6 }
 0x156   : > { %10926 = vmatmul.mubr.msk.bf16.gmra.mrb[20].mxu1 %vm280_vm0, %v1721_v7 }
 0x157   : > { %11086 = vmatmul.mubr.msk.bf16.gmra.mrb[20].mxu0 %vm280_vm0, %v13391_v12  ;;  %10929 = vmatprep.mubr.msk.bf16.mxu1 %vm280_vm0, %v1722_v59  ;;  %v2997_v12 = vld [vmem:[#allocation2 + $0x19a] sm:$0xff] }
 0x158   : > { %11089 = vmatprep.mubr.msk.bf16.mxu0 %vm280_vm0, %v13408_v2  ;;  %v3014_v57 = vpack.c.bf16 %v2998_v60, %v2997_v12  ;;  %v12638_v2 = vld [vmem:[%s14943_s3 + $0x20] sm:$0xff]  }
 0x159   : > { %11097 = vmatprep.subr.bf16.mxu1 %v12638_v2 }
 0x15a   : > { %11098 = vmatpush3.bf16.msra.mxu1 %v12638_v2 }
 0x15e   : > { %10930 = vmatmul.mubr.msk.bf16.gmra.mrb[24].mxu1 %vm280_vm0, %v1723_v40 }
 0x15f   : > { %11090 = vmatmul.mubr.msk.bf16.gmra.mrb[24].mxu0 %vm280_vm0, %v13412_v46  ;;  %10933 = vmatprep.mubr.msk.bf16.mxu1 %vm280_vm0, %v1724_v5  ;;  %v12639_v46 = vld [vmem:[%s14943_s3 + $0x28] sm:$0xff]  }
 0x160   : > { %11093 = vmatprep.mubr.msk.bf16.mxu0 %vm280_vm0, %v13425_v30  ;;  %11099 = vmatprep.subr.bf16.mxu1 %v12639_v46  ;;  %v12640_v30 = vld [vmem:[%s14943_s3 + $0x30] sm:$0xff]  }
 0x161   : > { %11100 = vmatpush3.bf16.msra.mxu1 %v12639_v46 }
 0x162   : > { %11101 = vmatprep.subr.bf16.mxu1 %v12640_v30 }
 0x165   : > { %11102 = vmatpush3.bf16.msra.mxu1 %v12640_v30 }
 0x166   : > { %10934 = vmatmul.mubr.msk.bf16.gmra.mrb[28].mxu1 %vm280_vm0, %v13607_v13  ;;  %11103 = vmatprep.subr.bf16.mxu1 %v12641_v33 }
 0x167   : > { %11094 = vmatmul.mubr.msk.bf16.gmra.mrb[28].mxu0 %vm280_vm0, %v3014_v57  ;;  %11105 = vmatprep.mubr.msk.bf16.mxu1 %vm280_vm0, %v3545_v25 }
 0x169   : > { %11104 = vmatpush3.bf16.msra.mxu1 %v12641_v33 }
 0x16a   : > { %11137 = vmatprep.subr.bf16.mxu1 %v13691_v17 }
 0x1e1   : > { %v10867_v42 = vpop.f32.mrb[0].mxu1 }
 0x1e2   : > { %v1519_v28 = vpop.f32.mrb[1].mxu1 }
 0x1e3   : > { %v10868_v54 = vpop.f32.mrb[2].mxu1 }
 0x1e4   : > { %v1522_v61 = vpop.f32.mrb[3].mxu1 }
 0x1e9   : > { %v10871_v23 = vpop.f32.mrb[4].mxu1 }
 0x1ea   : > { %v1535_v35 = vpop.f32.mrb[5].mxu1 }
 0x1eb   : > { %v10872_v45 = vpop.f32.mrb[6].mxu1 }
 0x1ec   : > { %v1538_v62 = vpop.f32.mrb[7].mxu1 }
 0x1f1   : > { %v13694_v32 = vpop.f32.mrb[8].mxu1 }
 0x1f2   : > { %v13696_v55 = vpop.f32.mrb[9].mxu1 }
 0x1f3   : > { %v13698_v39 = vpop.f32.mrb[10].mxu1 }
 0x1f4   : > { %v13700_v47 = vpop.f32.mrb[11].mxu1 }
 0x1f9   : > { %v13702_v49 = vpop.f32.mrb[12].mxu1 }
 0x1fa   : > { %v13704_v63 = vpop.f32.mrb[13].mxu1 }
 0x1fb   : > { %v13706_v0 = vpop.f32.mrb[14].mxu1 }
 0x1fc   : > { %v13708_v13 = vpop.f32.mrb[15].mxu1 }
 0x202   : > { %v11067_v41 = vpop.f32.mrb[0].mxu0 }
 0x203   : > { %v11825_v8 = vadd.f32 %v11067_v41, %v10867_v42  ;;  %v3130_v26 = vpop.f32.mrb[1].mxu0 }
 0x204   : > { %v11826_v56 = vadd.f32 %v3130_v26, %v1519_v28  ;;  %v11068_v3 = vpop.f32.mrb[2].mxu0 }
 0x205   : > { %v3298_v44 = vadd.f32 %v11825_v8, %v13713_v43  ;;  %v11827_v9 = vadd.f32 %v11068_v3, %v10868_v54  ;;  %v3133_v27 = vpop.f32.mrb[3].mxu0 }
 0x206   : > { %v3296_v58 = vadd.f32 %v11826_v56, %v13713_v43  ;;  %v11828_v37 = vadd.f32 %v3133_v27, %v1522_v61 }
 0x207   : > { %vm3330_vm2 = vcmp.gt.f32.partialorder %v3298_v44, 0.0  ;;  %v3362_v4 = vmul.f32 0.2, %v3298_v44  ;;  %v3299_v16 = vadd.f32 %v11827_v9, %v13713_v43 }
 0x208   : > { %vm3328_vm3 = vcmp.gt.f32.partialorder %v3296_v58, 0.0  ;;  %v3360_v29 = vmul.f32 0.2, %v3296_v58  ;;  %v3297_v38 = vadd.f32 %v11828_v37, %v13713_v43 }
 0x209   : > { %v3394_v52 = vsel %vm3330_vm2, %v3298_v44, %v3362_v4  ;;  %vm3331_vm4 = vcmp.gt.f32.partialorder %v3299_v16, 0.0  ;;  %v3363_v50 = vmul.f32 0.2, %v3299_v16 }
 0x20a   : > { %3427 = vst.msk [vmem:[#allocation3 + $0x31] sm:$0xff] %vm280_vm0, %v3394_v52  ;;  %v3392_v31 = vsel %vm3328_vm3, %v3296_v58, %v3360_v29  ;;  %vm3329_vm5 = vcmp.gt.f32.partialorder %v3297_v38, 0.0  ;;  %v3361_v51 = vmul.f32 0.2, %v3297_v38  ;;  %v11071_v7 = vpop.f32.mrb[4].mxu0  ;;  %v12643_v58 = vld [vmem:[%s14943_s3 + $0x8] sm:$0xff]  }
 0x20b   : > { %3425 = vst.msk [vmem:[#allocation3 + $0x19] sm:$0xff] %vm280_vm0, %v3392_v31  ;;  %v3395_v59 = vsel %vm3331_vm4, %v3299_v16, %v3363_v50  ;;  %v11829_v1 = vadd.f32 %v11071_v7, %v10871_v23  ;;  %v3146_v36 = vpop.f32.mrb[5].mxu0  ;;  %v12644_v50 = vld [vmem:[%s14943_s3 + $0x10] sm:$0xff]  }
 0x20c   : > { %3428 = vst.msk [vmem:[#allocation3 + $0x39] sm:$0xff] %vm280_vm0, %v3395_v59  ;;  %v3393_v6 = vsel %vm3329_vm5, %v3297_v38, %v3361_v51  ;;  %v11830_v34 = vadd.f32 %v3146_v36, %v1535_v35  ;;  %v11072_v40 = vpop.f32.mrb[6].mxu0 }
 0x20d   : > { %3426 = vst.msk [vmem:[#allocation3 + $0x21] sm:$0xff] %vm280_vm0, %v3393_v6  ;;  %v3302_v5 = vadd.f32 %v11829_v1, %v13713_v43  ;;  %v11831_v12 = vadd.f32 %v11072_v40, %v10872_v45  ;;  %v3149_v60 = vpop.f32.mrb[7].mxu0 }
 0x20e   : > { %v3300_v57 = vadd.f32 %v11830_v34, %v13713_v43  ;;  %v11832_v2 = vadd.f32 %v3149_v60, %v1538_v62 }
 0x20f   : > { %vm3334_vm6 = vcmp.gt.f32.partialorder %v3302_v5, 0.0  ;;  %v3366_v46 = vmul.f32 0.2, %v3302_v5  ;;  %v3303_v30 = vadd.f32 %v11831_v12, %v13713_v43 }
 0x210   : > { %vm3332_vm7 = vcmp.gt.f32.partialorder %v3300_v57, 0.0  ;;  %v3364_v33 = vmul.f32 0.2, %v3300_v57  ;;  %v3301_v53 = vadd.f32 %v11832_v2, %v13713_v43 }
 0x211   : > { %v3398_v48 = vsel %vm3334_vm6, %v3302_v5, %v3366_v46  ;;  %vm3335_vm8 = vcmp.gt.f32.partialorder %v3303_v30, 0.0  ;;  %v3367_v25 = vmul.f32 0.2, %v3303_v30 }
 0x212   : > { %3431 = vst.msk [vmem:[#allocation3 + $0x61] sm:$0xff] %vm280_vm0, %v3398_v48  ;;  %v3396_v42 = vsel %vm3332_vm7, %v3300_v57, %v3364_v33  ;;  %vm3333_vm9 = vcmp.gt.f32.partialorder %v3301_v53, 0.0  ;;  %v3365_v28 = vmul.f32 0.2, %v3301_v53  ;;  %v11075_v54 = vpop.f32.mrb[8].mxu0  ;;  %v3515_v26 = vld [vmem:[#allocation3 + $0x19] sm:$0xff] }
 0x213   : > { %3429 = vst.msk [vmem:[#allocation3 + $0x49] sm:$0xff] %vm280_vm0, %v3396_v42  ;;  %v3399_v61 = vsel %vm3335_vm8, %v3303_v30, %v3367_v25  ;;  %v11833_v23 = vadd.f32 %v11075_v54, %v13694_v32  ;;  %v3162_v35 = vpop.f32.mrb[9].mxu0  ;;  %v3518_v45 = vld [vmem:[#allocation3 + $0x39] sm:$0xff]  ;;  %v3517_v32 = vld [vmem:[#allocation3 + $0x31] sm:$0xff]  ;;  %v12645_v30 = vld [vmem:[%s14943_s3 + $0x18] sm:$0xff]  }
 0x214   : > { %3432 = vst.msk [vmem:[#allocation3 + $0x69] sm:$0xff] %vm280_vm0, %v3399_v61  ;;  %v3397_v62 = vsel %vm3333_vm9, %v3301_v53, %v3365_v28  ;;  %v11834_v41 = vadd.f32 %v3162_v35, %v13696_v55  ;;  %v11076_v8 = vpop.f32.mrb[10].mxu0  ;;  %v3516_v56 = vld [vmem:[#allocation3 + $0x21] sm:$0xff]  ;;  %v13742_v4 = vpack.c.bf16 %v3518_v45, %v3517_v32  ;;  %v13780_v61 = vld [vmem:[%s14943_s3 + $0x40] sm:$0xff]  }
 0x215   : > { %3430 = vst.msk [vmem:[#allocation3 + $0x51] sm:$0xff] %vm280_vm0, %v3397_v62  ;;  %v3306_v3 = vadd.f32 %v11833_v23, %v13713_v43  ;;  %v11835_v44 = vadd.f32 %v11076_v8, %v13698_v39  ;;  %v3165_v9 = vpop.f32.mrb[11].mxu0  ;;  %v13735_v27 = vpack.c.bf16 %v3516_v56, %v3515_v26 }
 0x216   : > { %v3304_v37 = vadd.f32 %v11834_v41, %v13713_v43  ;;  %v11836_v55 = vadd.f32 %v3165_v9, %v13700_v47 }
 0x217   : > { %vm3338_vm10 = vcmp.gt.f32.partialorder %v3306_v3, 0.0  ;;  %v3370_v16 = vmul.f32 0.2, %v3306_v3  ;;  %v3307_v29 = vadd.f32 %v11835_v44, %v13713_v43  ;;  %11106 = vmatmul.mubr.msk.bf16.vlgmr.msra.gmra.mrb[32].mxu1 %vm280_vm0, %v13735_v27 }
 0x218   : > { %vm3336_vm11 = vcmp.gt.f32.partialorder %v3304_v37, 0.0  ;;  %v3368_v39 = vmul.f32 0.2, %v3304_v37  ;;  %v3305_v38 = vadd.f32 %v11836_v55, %v13713_v43  ;;  %11109 = vmatprep.mubr.msk.bf16.mxu1 %vm280_vm0, %v13742_v4  ;;  %11138 = vmatpush3.bf16.msra.mxu1 %v13691_v17 }
 0x219   : > { %v3402_v52 = vsel %vm3338_vm10, %v3306_v3, %v3370_v16  ;;  %vm3339_vm12 = vcmp.gt.f32.partialorder %v3307_v29, 0.0  ;;  %v3371_v47 = vmul.f32 0.2, %v3307_v29  ;;  %11139 = vmatprep.subr.bf16.mxu1 %v12643_v58 }
 0x21a   : > { %3435 = vst.msk [vmem:[#allocation3 + $0x91] sm:$0xff] %vm280_vm0, %v3402_v52  ;;  %v3400_v31 = vsel %vm3336_vm11, %v3304_v37, %v3368_v39  ;;  %vm3337_vm13 = vcmp.gt.f32.partialorder %v3305_v38, 0.0  ;;  %v3369_v51 = vmul.f32 0.2, %v3305_v38  ;;  %v11079_v7 = vpop.f32.mrb[12].mxu0  ;;  %v3519_v5 = vld [vmem:[#allocation3 + $0x49] sm:$0xff] }
 0x21b   : > { %3433 = vst.msk [vmem:[#allocation3 + $0x79] sm:$0xff] %vm280_vm0, %v3400_v31  ;;  %v3403_v59 = vsel %vm3339_vm12, %v3307_v29, %v3371_v47  ;;  %v11837_v1 = vadd.f32 %v11079_v7, %v13702_v49  ;;  %v3178_v17 = vpop.f32.mrb[13].mxu0  ;;  %v3522_v36 = vld [vmem:[#allocation3 + $0x69] sm:$0xff]  ;;  %v3521_v49 = vld [vmem:[#allocation3 + $0x61] sm:$0xff] }
 0x21c   : > { %3436 = vst.msk [vmem:[#allocation3 + $0x99] sm:$0xff] %vm280_vm0, %v3403_v59  ;;  %v3401_v6 = vsel %vm3337_vm13, %v3305_v38, %v3369_v51  ;;  %v11838_v34 = vadd.f32 %v3178_v17, %v13704_v63  ;;  %v11080_v40 = vpop.f32.mrb[14].mxu0  ;;  %v3520_v12 = vld [vmem:[#allocation3 + $0x51] sm:$0xff]  ;;  %11140 = vmatpush3.bf16.msra.mxu1 %v12643_v58  ;;  %v13769_v53 = vpack.c.bf16 %v3522_v36, %v3521_v49 }
 0x21d   : > { %3434 = vst.msk [vmem:[#allocation3 + $0x81] sm:$0xff] %vm280_vm0, %v3401_v6  ;;  %v3310_v60 = vadd.f32 %v11837_v1, %v13713_v43  ;;  %v11839_v57 = vadd.f32 %v11080_v40, %v13706_v0  ;;  %v3181_v2 = vpop.f32.mrb[15].mxu0  ;;  %v13762_v46 = vpack.c.bf16 %v3520_v12, %v3519_v5  ;;  %11141 = vmatprep.subr.bf16.mxu1 %v12644_v50 }
 0x21e   : > { %v3308_v63 = vadd.f32 %v11838_v34, %v13713_v43  ;;  %v11840_v33 = vadd.f32 %v3181_v2, %v13708_v13 }
 0x21f   : > { %vm3342_vm14 = vcmp.gt.f32.partialorder %v3310_v60, 0.0  ;;  %v3374_v48 = vmul.f32 0.2, %v3310_v60  ;;  %v3311_v25 = vadd.f32 %v11839_v57, %v13713_v43  ;;  %11110 = vmatmul.mubr.msk.bf16.gmra.mrb[36].mxu1 %vm280_vm0, %v13762_v46 }
 0x220   : > { %vm3340_vm15 = vcmp.gt.f32.partialorder %v3308_v63, 0.0  ;;  %v3372_v0 = vmul.f32 0.2, %v3308_v63  ;;  %v3309_v42 = vadd.f32 %v11840_v33, %v13713_v43  ;;  %11113 = vmatprep.mubr.msk.bf16.mxu1 %vm280_vm0, %v13769_v53  ;;  %11142 = vmatpush3.bf16.msra.mxu1 %v12644_v50 }
 0x221   : > { %v3406_v28 = vsel %vm3342_vm14, %v3310_v60, %v3374_v48  ;;  %vm3343_vm1 = vcmp.gt.f32.partialorder %v3311_v25, 0.0  ;;  %v3375_v13 = vmul.f32 0.2, %v3311_v25  ;;  %v10923_v54 = vpop.f32.mrb[16].mxu1  ;;  %11143 = vmatprep.subr.bf16.mxu1 %v12645_v30  ;;  %v3525_v52 = vld [vmem:[#allocation3 + $0x91] sm:$0xff] }
 0x222   : > { %3439 = vst.msk [vmem:[#allocation3 + $0xc1] sm:$0xff] %vm280_vm0, %v3406_v28  ;;  %v3404_v23 = vsel %vm3340_vm15, %v3308_v63, %v3372_v0  ;;  %vm3341_vm2 = vcmp.gt.f32.partialorder %v3309_v42, 0.0  ;;  %v3373_v35 = vmul.f32 0.2, %v3309_v42  ;;  %v11083_v45 = vpop.f32.mrb[16].mxu0  ;;  %v1905_v62 = vpop.f32.mrb[17].mxu1 }
 0x223   : > { %3437 = vst.msk [vmem:[#allocation3 + $0xa9] sm:$0xff] %vm280_vm0, %v3404_v23  ;;  %v3407_v41 = vsel %vm3343_vm1, %v3311_v25, %v3375_v13  ;;  %v11841_v8 = vadd.f32 %v11083_v45, %v10923_v54  ;;  %v3194_v26 = vpop.f32.mrb[17].mxu0  ;;  %v10924_v56 = vpop.f32.mrb[18].mxu1  ;;  %v3526_v3 = vld [vmem:[#allocation3 + $0x99] sm:$0xff] }
 0x224   : > { %3440 = vst.msk [vmem:[#allocation3 + $0xc9] sm:$0xff] %vm280_vm0, %v3407_v41  ;;  %v3405_v44 = vsel %vm3341_vm2, %v3309_v42, %v3373_v35  ;;  %v11842_v9 = vadd.f32 %v3194_v26, %v1905_v62  ;;  %v11084_v32 = vpop.f32.mrb[18].mxu0  ;;  %v1908_v58 = vpop.f32.mrb[19].mxu1  ;;  %v3523_v37 = vld [vmem:[#allocation3 + $0x79] sm:$0xff]  ;;  %v3524_v55 = vld [vmem:[#allocation3 + $0x81] sm:$0xff]  ;;  %11144 = vmatpush3.bf16.msra.mxu1 %v12645_v30  ;;  %v13791_v31 = vpack.c.bf16 %v3526_v3, %v3525_v52 }
 0x225   : > { %3438 = vst.msk [vmem:[#allocation3 + $0xb1] sm:$0xff] %vm280_vm0, %v3405_v44  ;;  %v3314_v16 = vadd.f32 %v11841_v8, %v13713_v43  ;;  %v11843_v29 = vadd.f32 %v11084_v32, %v10924_v56  ;;  %v3197_v39 = vpop.f32.mrb[19].mxu0  ;;  %v13787_v38 = vpack.c.bf16 %v3524_v55, %v3523_v37  ;;  %11177 = vmatprep.subr.bf16.mxu1 %v13780_v61 }
 0x226   : > { %v3312_v47 = vadd.f32 %v11842_v9, %v13713_v43  ;;  %v11844_v50 = vadd.f32 %v3197_v39, %v1908_v58 }
 0x227   : > { %vm3346_vm3 = vcmp.gt.f32.partialorder %v3314_v16, 0.0  ;;  %v3378_v51 = vmul.f32 0.2, %v3314_v16  ;;  %v3315_v7 = vadd.f32 %v11843_v29, %v13713_v43  ;;  %11114 = vmatmul.mubr.msk.bf16.gmra.mrb[40].mxu1 %vm280_vm0, %v13787_v38 }
 0x228   : > { %vm3344_vm4 = vcmp.gt.f32.partialorder %v3312_v47, 0.0  ;;  %v3376_v59 = vmul.f32 0.2, %v3312_v47  ;;  %v3313_v1 = vadd.f32 %v11844_v50, %v13713_v43  ;;  %11117 = vmatprep.mubr.msk.bf16.mxu1 %vm280_vm0, %v13791_v31 }
 0x229   : > { %v3410_v17 = vsel %vm3346_vm3, %v3314_v16, %v3378_v51  ;;  %vm3347_vm5 = vcmp.gt.f32.partialorder %v3315_v7, 0.0  ;;  %v3379_v36 = vmul.f32 0.2, %v3315_v7  ;;  %v10927_v6 = vpop.f32.mrb[20].mxu1  ;;  %v3529_v35 = vld [vmem:[#allocation3 + $0xc1] sm:$0xff] }
 0x22a   : > { %3443 = vst.msk [vmem:[#allocation3 + $0xf1] sm:$0xff] %vm280_vm0, %v3410_v17  ;;  %v3408_v34 = vsel %vm3344_vm4, %v3312_v47, %v3376_v59  ;;  %vm3345_vm6 = vcmp.gt.f32.partialorder %v3313_v1, 0.0  ;;  %v3377_v40 = vmul.f32 0.2, %v3313_v1  ;;  %v11087_v5 = vpop.f32.mrb[20].mxu0  ;;  %v1921_v12 = vpop.f32.mrb[21].mxu1 }
 0x22b   : > { %3441 = vst.msk [vmem:[#allocation3 + $0xd9] sm:$0xff] %vm280_vm0, %v3408_v34  ;;  %v3411_v60 = vsel %vm3347_vm5, %v3315_v7, %v3379_v36  ;;  %v11845_v57 = vadd.f32 %v11087_v5, %v10927_v6  ;;  %v3210_v2 = vpop.f32.mrb[21].mxu0  ;;  %v10928_v49 = vpop.f32.mrb[22].mxu1  ;;  %v3530_v30 = vld [vmem:[#allocation3 + $0xc9] sm:$0xff] }
 0x22c   : > { %3444 = vst.msk [vmem:[#allocation3 + $0xf9] sm:$0xff] %vm280_vm0, %v3411_v60  ;;  %v3409_v63 = vsel %vm3345_vm6, %v3313_v1, %v3377_v40  ;;  %v11846_v33 = vadd.f32 %v3210_v2, %v1921_v12  ;;  %v11088_v48 = vpop.f32.mrb[22].mxu0  ;;  %v1924_v25 = vpop.f32.mrb[23].mxu1  ;;  %v3527_v0 = vld [vmem:[#allocation3 + $0xa9] sm:$0xff]  ;;  %v3528_v42 = vld [vmem:[#allocation3 + $0xb1] sm:$0xff]  ;;  %v13807_v41 = vpack.c.bf16 %v3530_v30, %v3529_v35 }
 0x22d   : > { %3442 = vst.msk [vmem:[#allocation3 + $0xe1] sm:$0xff] %vm280_vm0, %v3409_v63  ;;  %v3318_v28 = vadd.f32 %v11845_v57, %v13713_v43  ;;  %v11847_v13 = vadd.f32 %v11088_v48, %v10928_v49  ;;  %v3213_v54 = vpop.f32.mrb[23].mxu0  ;;  %v13804_v23 = vpack.c.bf16 %v3528_v42, %v3527_v0 }
 0x22e   : > { %v3316_v45 = vadd.f32 %v11846_v33, %v13713_v43  ;;  %v11848_v62 = vadd.f32 %v3213_v54, %v1924_v25 }
 0x22f   : > { %vm3350_vm7 = vcmp.gt.f32.partialorder %v3318_v28, 0.0  ;;  %v3382_v8 = vmul.f32 0.2, %v3318_v28  ;;  %v3319_v26 = vadd.f32 %v11847_v13, %v13713_v43  ;;  %11118 = vmatmul.mubr.msk.bf16.gmra.mrb[44].mxu1 %vm280_vm0, %v13804_v23 }
 0x230   : > { %vm3348_vm8 = vcmp.gt.f32.partialorder %v3316_v45, 0.0  ;;  %v3380_v56 = vmul.f32 0.2, %v3316_v45  ;;  %v3317_v3 = vadd.f32 %v11848_v62, %v13713_v43  ;;  %11121 = vmatprep.mubr.msk.bf16.mxu1 %vm280_vm0, %v13807_v41 }
 0x231   : > { %v3414_v44 = vsel %vm3350_vm7, %v3318_v28, %v3382_v8  ;;  %vm3351_vm9 = vcmp.gt.f32.partialorder %v3319_v26, 0.0  ;;  %v3383_v9 = vmul.f32 0.2, %v3319_v26  ;;  %v10931_v32 = vpop.f32.mrb[24].mxu1  ;;  %v3533_v12 = vld [vmem:[#allocation3 + $0xf1] sm:$0xff] }
 0x232   : > { %3447 = vst.msk [vmem:[#allocation3 + $0x121] sm:$0xff] %vm280_vm0, %v3414_v44  ;;  %v3412_v58 = vsel %vm3348_vm8, %v3316_v45, %v3380_v56  ;;  %vm3349_vm10 = vcmp.gt.f32.partialorder %v3317_v3, 0.0  ;;  %v3381_v37 = vmul.f32 0.2, %v3317_v3  ;;  %v11091_v55 = vpop.f32.mrb[24].mxu0  ;;  %v1937_v16 = vpop.f32.mrb[25].mxu1 }
 0x233   : > { %3445 = vst.msk [vmem:[#allocation3 + $0x109] sm:$0xff] %vm280_vm0, %v3412_v58  ;;  %v3415_v29 = vsel %vm3351_vm9, %v3319_v26, %v3383_v9  ;;  %v11849_v39 = vadd.f32 %v11091_v55, %v10931_v32  ;;  %v3226_v52 = vpop.f32.mrb[25].mxu0  ;;  %v10932_v47 = vpop.f32.mrb[26].mxu1  ;;  %v3534_v50 = vld [vmem:[#allocation3 + $0xf9] sm:$0xff] }
 0x234   : > { %3448 = vst.msk [vmem:[#allocation3 + $0x129] sm:$0xff] %vm280_vm0, %v3415_v29  ;;  %v3413_v51 = vsel %vm3349_vm10, %v3317_v3, %v3381_v37  ;;  %v11850_v7 = vadd.f32 %v3226_v52, %v1937_v16  ;;  %v11092_v59 = vpop.f32.mrb[26].mxu0  ;;  %v1940_v1 = vpop.f32.mrb[27].mxu1  ;;  %v3531_v17 = vld [vmem:[#allocation3 + $0xd9] sm:$0xff]  ;;  %v3532_v36 = vld [vmem:[#allocation3 + $0xe1] sm:$0xff]  ;;  %v13823_v2 = vpack.c.bf16 %v3534_v50, %v3533_v12 }
 0x235   : > { %3446 = vst.msk [vmem:[#allocation3 + $0x111] sm:$0xff] %vm280_vm0, %v3413_v51  ;;  %v3322_v6 = vadd.f32 %v11849_v39, %v13713_v43  ;;  %v11851_v34 = vadd.f32 %v11092_v59, %v10932_v47  ;;  %v3229_v40 = vpop.f32.mrb[27].mxu0  ;;  %v13820_v5 = vpack.c.bf16 %v3532_v36, %v3531_v17 }
 0x236   : > { %v3320_v60 = vadd.f32 %v11850_v7, %v13713_v43  ;;  %v11852_v57 = vadd.f32 %v3229_v40, %v1940_v1 }
 0x237   : > { %vm3354_vm11 = vcmp.gt.f32.partialorder %v3322_v6, 0.0  ;;  %v3386_v49 = vmul.f32 0.2, %v3322_v6  ;;  %v3323_v30 = vadd.f32 %v11851_v34, %v13713_v43  ;;  %11122 = vmatmul.mubr.msk.bf16.gmra.mrb[48].mxu1 %vm280_vm0, %v13820_v5 }
 0x238   : > { %vm3352_vm12 = vcmp.gt.f32.partialorder %v3320_v60, 0.0  ;;  %v3384_v63 = vmul.f32 0.2, %v3320_v60  ;;  %v3321_v33 = vadd.f32 %v11852_v57, %v13713_v43  ;;  %11125 = vmatprep.mubr.msk.bf16.mxu1 %vm280_vm0, %v13823_v2 }
 0x239   : > { %v3418_v48 = vsel %vm3354_vm11, %v3322_v6, %v3386_v49  ;;  %vm3355_vm13 = vcmp.gt.f32.partialorder %v3323_v30, 0.0  ;;  %v3387_v25 = vmul.f32 0.2, %v3323_v30  ;;  %v10935_v0 = vpop.f32.mrb[28].mxu1  ;;  %v3537_v39 = vld [vmem:[#allocation3 + $0x121] sm:$0xff] }
 0x23a   : > { %3451 = vst.msk [vmem:[#allocation3 + $0x151] sm:$0xff] %vm280_vm0, %v3418_v48  ;;  %v3416_v42 = vsel %vm3352_vm12, %v3320_v60, %v3384_v63  ;;  %vm3353_vm14 = vcmp.gt.f32.partialorder %v3321_v33, 0.0  ;;  %v3385_v28 = vmul.f32 0.2, %v3321_v33  ;;  %v11095_v13 = vpop.f32.mrb[28].mxu0  ;;  %v1953_v54 = vpop.f32.mrb[29].mxu1 }
 0x23b   : > { %3449 = vst.msk [vmem:[#allocation3 + $0x139] sm:$0xff] %vm280_vm0, %v3416_v42  ;;  %v3419_v35 = vsel %vm3355_vm13, %v3323_v30, %v3387_v25  ;;  %v11853_v45 = vadd.f32 %v11095_v13, %v10935_v0  ;;  %v3242_v62 = vpop.f32.mrb[29].mxu0  ;;  %v10936_v8 = vpop.f32.mrb[30].mxu1  ;;  %v3538_v26 = vld [vmem:[#allocation3 + $0x129] sm:$0xff]  ;;  %v3460_v13 = vld [vmem:[#allocation3 + $0x20] sm:$0xff] }
 0x23c   : > { %3452 = vst.msk [vmem:[#allocation3 + $0x159] sm:$0xff] %vm280_vm0, %v3419_v35  ;;  %v3417_v56 = vsel %vm3353_vm14, %v3321_v33, %v3385_v28  ;;  %v11854_v3 = vadd.f32 %v3242_v62, %v1953_v54  ;;  %v11096_v44 = vpop.f32.mrb[30].mxu0  ;;  %v1956_v9 = vpop.f32.mrb[31].mxu1  ;;  %v3535_v32 = vld [vmem:[#allocation3 + $0x109] sm:$0xff]  ;;  %v3536_v58 = vld [vmem:[#allocation3 + $0x111] sm:$0xff]  ;;  %v13839_v50 = vpack.c.bf16 %v3538_v26, %v3537_v39  ;;  %v3457_v33 = vld [vmem:[#allocation3] sm:$0xff] }
 0x23d   : > { %3450 = vst.msk [vmem:[#allocation3 + $0x141] sm:$0xff] %vm280_vm0, %v3417_v56  ;;  %v3326_v37 = vadd.f32 %v11853_v45, %v13713_v43  ;;  %v11855_v55 = vadd.f32 %v11096_v44, %v10936_v8  ;;  %v3245_v16 = vpop.f32.mrb[31].mxu0  ;;  %v13836_v29 = vpack.c.bf16 %v3536_v58, %v3535_v32  ;;  %v3458_v48 = vld [vmem:[#allocation3 + $0x8] sm:$0xff]  ;;  %v3462_v54 = vld [vmem:[#allocation3 + $0x38] sm:$0xff]  ;;  %v3461_v62 = vld [vmem:[#allocation3 + $0x30] sm:$0xff] }
 0x23e   : > { %v3324_v52 = vadd.f32 %v11854_v3, %v13713_v43  ;;  %v11856_v47 = vadd.f32 %v3245_v16, %v1956_v9  ;;  %v3489_v42 = vpack.c.bf16 %v3458_v48, %v3457_v33  ;;  %v3459_v35 = vld [vmem:[#allocation3 + $0x18] sm:$0xff]  ;;  %v13869_v26 = vpack.c.bf16 %v3462_v54, %v3461_v62  ;;  %v12648_v56 = vld [vmem:[%s14943_s3 + $0x50] sm:$0xff]   ;;  %v3464_v3 = vld [vmem:[#allocation3 + $0x50] sm:$0xff] }
 0x23f   : > { %vm3358_vm15 = vcmp.gt.f32.partialorder %v3326_v37, 0.0  ;;  %v3390_v51 = vmul.f32 0.2, %v3326_v37  ;;  %v3327_v7 = vadd.f32 %v11855_v55, %v13713_v43  ;;  %11126 = vmatmul.mubr.msk.bf16.gmra.mrb[52].mxu1 %vm280_vm0, %v13836_v29  ;;  %v13864_v45 = vpack.c.bf16 %v3460_v13, %v3459_v35  ;;  %v12647_v8 = vld [vmem:[%s14943_s3 + $0x48] sm:$0xff]   ;;  %v3466_v44 = vld [vmem:[#allocation3 + $0x68] sm:$0xff]  ;;  %v3465_v58 = vld [vmem:[#allocation3 + $0x60] sm:$0xff] }
 0x240   : > { %vm3356_vm1 = vcmp.gt.f32.partialorder %v3324_v52, 0.0  ;;  %v3388_v59 = vmul.f32 0.2, %v3324_v52  ;;  %v3325_v1 = vadd.f32 %v11856_v47, %v13713_v43  ;;  %11129 = vmatprep.mubr.msk.bf16.mxu1 %vm280_vm0, %v13839_v50  ;;  %v3463_v9 = vld [vmem:[#allocation3 + $0x48] sm:$0xff]  ;;  %v13884_v55 = vpack.c.bf16 %v3466_v44, %v3465_v58  ;;  %v3468_v16 = vld [vmem:[#allocation3 + $0x80] sm:$0xff]  ;;  %v3470_v39 = vld [vmem:[#allocation3 + $0x98] sm:$0xff] }
 0x241   : > { %v3422_v17 = vsel %vm3358_vm15, %v3326_v37, %v3390_v51  ;;  %vm3359_vm2 = vcmp.gt.f32.partialorder %v3327_v7, 0.0  ;;  %v3391_v36 = vmul.f32 0.2, %v3327_v7  ;;  %v3541_v30 = vld [vmem:[#allocation3 + $0x151] sm:$0xff]  ;;  %v13879_v32 = vpack.c.bf16 %v3464_v3, %v3463_v9  ;;  %v12649_v37 = vld [vmem:[%s14943_s3 + $0x58] sm:$0xff]  }
 0x242   : > { %3455 = vst.msk [vmem:[#allocation3 + $0x181] sm:$0xff] %vm280_vm0, %v3422_v17  ;;  %v3420_v6 = vsel %vm3356_vm1, %v3324_v52, %v3388_v59  ;;  %vm3357_vm3 = vcmp.gt.f32.partialorder %v3325_v1, 0.0  ;;  %v3389_v34 = vmul.f32 0.2, %v3325_v1  ;;  %v3539_v57 = vld [vmem:[#allocation3 + $0x139] sm:$0xff]  ;;  %v3469_v51 = vld [vmem:[#allocation3 + $0x90] sm:$0xff] }
 0x243   : > { %3453 = vst.msk [vmem:[#allocation3 + $0x169] sm:$0xff] %vm280_vm0, %v3420_v6  ;;  %v3423_v40 = vsel %vm3359_vm2, %v3327_v7, %v3391_v36  ;;  %v3542_v12 = vld [vmem:[#allocation3 + $0x159] sm:$0xff]  ;;  %v13895_v7 = vpack.c.bf16 %v3470_v39, %v3469_v51  ;;  %v3472_v59 = vld [vmem:[#allocation3 + $0xb0] sm:$0xff]  ;;  %v3471_v17 = vld [vmem:[#allocation3 + $0xa8] sm:$0xff] }
 0x244   : > { %3456 = vst.msk [vmem:[#allocation3 + $0x189] sm:$0xff] %vm280_vm0, %v3423_v40  ;;  %v3421_v60 = vsel %vm3357_vm3, %v3325_v1, %v3389_v34  ;;  %v3540_v43 = vld [vmem:[#allocation3 + $0x141] sm:$0xff]  ;;  %v13853_v63 = vpack.c.bf16 %v3542_v12, %v3541_v30  ;;  %v3467_v52 = vld [vmem:[#allocation3 + $0x78] sm:$0xff]  ;;  %v13901_v36 = vpack.c.bf16 %v3472_v59, %v3471_v17  ;;  %v3480_v33 = vld [vmem:[#allocation3 + $0x110] sm:$0xff] }
 0x245   : > { %3454 = vst.msk [vmem:[#allocation3 + $0x171] sm:$0xff] %vm280_vm0, %v3421_v60  ;;  %v13851_v49 = vpack.c.bf16 %v3540_v43, %v3539_v57  ;;  %v13893_v47 = vpack.c.bf16 %v3468_v16, %v3467_v52  ;;  %v3474_v1 = vld [vmem:[#allocation3 + $0xc8] sm:$0xff]  ;;  %v3473_v6 = vld [vmem:[#allocation3 + $0xc0] sm:$0xff]  ;;  %v3478_v12 = vld [vmem:[#allocation3 + $0xf8] sm:$0xff] }
 0x246   : > { %v13903_v34 = vpack.c.bf16 %v3474_v1, %v3473_v6  ;;  %v3476_v40 = vld [vmem:[#allocation3 + $0xe0] sm:$0xff]  ;;  %v3475_v60 = vld [vmem:[#allocation3 + $0xd8] sm:$0xff]  ;;  %v3477_v43 = vld [vmem:[#allocation3 + $0xf0] sm:$0xff] }
 0x247   : > { %11130 = vmatmul.mubr.msk.bf16.gmra.mrb[56].mxu1 %vm280_vm0, %v13851_v49  ;;  %v13909_v57 = vpack.c.bf16 %v3476_v40, %v3475_v60  ;;  %v13911_v30 = vpack.c.bf16 %v3478_v12, %v3477_v43  ;;  %v3482_v48 = vld [vmem:[#allocation3 + $0x128] sm:$0xff]  ;;  %v3484_v54 = vld [vmem:[#allocation3 + $0x140] sm:$0xff]  ;;  %v3486_v35 = vld [vmem:[#allocation3 + $0x158] sm:$0xff] }
 0x248   : > { %11133 = vmatprep.mubr.msk.bf16.mxu1 %vm280_vm0, %v13853_v63  ;;  %v3483_v62 = vld [vmem:[#allocation3 + $0x138] sm:$0xff]  ;;  %v4036_v44 = vld [vmem:[#allocation3 + $0x2] sm:$0xff]  ;;  %v4037_v9 = vld [vmem:[#allocation3 + $0xa] sm:$0xff] }
 0x249   : > { %v4068_v16 = vpack.c.bf16 %v4037_v9, %v4036_v44  ;;  %v4038_v52 = vld [vmem:[#allocation3 + $0x1a] sm:$0xff]  ;;  %v4039_v51 = vld [vmem:[#allocation3 + $0x22] sm:$0xff]  ;;  %v4040_v59 = vld [vmem:[#allocation3 + $0x32] sm:$0xff] }
 0x24a   : > { %v3543_v25 = vld [vmem:[#allocation3 + $0x169] sm:$0xff]  ;;  %v4041_v1 = vld [vmem:[#allocation3 + $0x3a] sm:$0xff]  ;;  %v13938_v17 = vpack.c.bf16 %v4039_v51, %v4038_v52  ;;  %v4043_v43 = vld [vmem:[#allocation3 + $0x52] sm:$0xff] }
 0x24b   : > { %v12651_v6 = vld [vmem:[%s14943_s3 + $0x68] sm:$0xff]   ;;  %v13943_v40 = vpack.c.bf16 %v4041_v1, %v4040_v59  ;;  %v12652_v12 = vld [vmem:[%s14943_s3 + $0x70] sm:$0xff]   ;;  %v4042_v60 = vld [vmem:[#allocation3 + $0x4a] sm:$0xff] }
 0x24c   : > { %v3544_v0 = vld [vmem:[#allocation3 + $0x171] sm:$0xff]  ;;  %v4049_v44 = vld [vmem:[#allocation3 + $0x9a] sm:$0xff]  ;;  %v4052_v52 = vld [vmem:[#allocation3 + $0xc2] sm:$0xff] }
 0x24d   : > { %v13859_v28 = vpack.c.bf16 %v3544_v0, %v3543_v25  ;;  %v3479_v25 = vld [vmem:[#allocation3 + $0x108] sm:$0xff]  ;;  %v3488_v58 = vld [vmem:[#allocation3 + $0x170] sm:$0xff] }
 0x24e   : > { %v13917_v0 = vpack.c.bf16 %v3480_v33, %v3479_v25  ;;  %v4044_v33 = vld [vmem:[#allocation3 + $0x62] sm:$0xff]  ;;  %v13952_v25 = vpack.c.bf16 %v4043_v43, %v4042_v60  ;;  %v4053_v51 = vld [vmem:[#allocation3 + $0xca] sm:$0xff]  ;;  %v4056_v60 = vld [vmem:[#allocation3 + $0xf2] sm:$0xff] }
 0x24f   : > { %11134 = vmatmul.mubr.msk.bf16.gmra.mrb[60].mxu1 %vm280_vm0, %v13859_v28  ;;  %v13976_v1 = vpack.c.bf16 %v4053_v51, %v4052_v52  ;;  %v4057_v43 = vld [vmem:[#allocation3 + $0xfa] sm:$0xff]  ;;  %v4063_v52 = vld [vmem:[#allocation3 + $0x142] sm:$0xff]  ;;  %v4064_v51 = vld [vmem:[#allocation3 + $0x152] sm:$0xff] }
 0x250   : > { %11145 = vmatprep.mubr.msk.bf16.mxu1 %vm280_vm0, %v3489_v42  ;;  %v3481_v42 = vld [vmem:[#allocation3 + $0x120] sm:$0xff] }
 0x251   : > { %v13919_v13 = vpack.c.bf16 %v3482_v48, %v3481_v42  ;;  %v4045_v48 = vld [vmem:[#allocation3 + $0x6a] sm:$0xff] }
 0x252   : > { %v12653_v42 = vld [vmem:[%s14943_s3 + $0x78] sm:$0xff]  }
 0x257   : > { %11146 = vmatmul.mubr.msk.bf16.vlgmr.msra.gmra.mrb[32].mxu1 %vm280_vm0, %v13864_v45 }
 0x258   : > { %11149 = vmatprep.mubr.msk.bf16.mxu1 %vm280_vm0, %v13869_v26  ;;  %11178 = vmatpush3.bf16.msra.mxu1 %v13780_v61  ;;  %v12650_v61 = vld [vmem:[%s14943_s3 + $0x60] sm:$0xff]  }
 0x259   : > { %11179 = vmatprep.subr.bf16.mxu1 %v12647_v8 }
 0x25c   : > { %11180 = vmatpush3.bf16.msra.mxu1 %v12647_v8  ;;  %v13925_v8 = vpack.c.bf16 %v3484_v54, %v3483_v62  ;;  %v13957_v54 = vpack.c.bf16 %v4045_v48, %v4044_v33  ;;  %v4047_v62 = vld [vmem:[#allocation3 + $0x82] sm:$0xff]  ;;  %v13984_v48 = vpack.c.bf16 %v4057_v43, %v4056_v60  ;;  %v4066_v43 = vld [vmem:[#allocation3 + $0x16a] sm:$0xff] }
 0x25d   : > { %11181 = vmatprep.subr.bf16.mxu1 %v12648_v56 }
 0x25f   : > { %11150 = vmatmul.mubr.msk.bf16.gmra.mrb[36].mxu1 %vm280_vm0, %v13879_v32 }
 0x260   : > { %11153 = vmatprep.mubr.msk.bf16.mxu1 %vm280_vm0, %v13884_v55  ;;  %11182 = vmatpush3.bf16.msra.mxu1 %v12648_v56  ;;  %v3485_v56 = vld [vmem:[#allocation3 + $0x150] sm:$0xff] }
 0x261   : > { %11183 = vmatprep.subr.bf16.mxu1 %v12649_v37  ;;  %v13927_v3 = vpack.c.bf16 %v3486_v35, %v3485_v56  ;;  %v4046_v35 = vld [vmem:[#allocation3 + $0x7a] sm:$0xff]  ;;  %v4048_v56 = vld [vmem:[#allocation3 + $0x92] sm:$0xff] }
 0x262   : > { %v13966_v9 = vpack.c.bf16 %v4047_v62, %v4046_v35  ;;  %v4059_v35 = vld [vmem:[#allocation3 + $0x112] sm:$0xff]  ;;  %v4060_v62 = vld [vmem:[#allocation3 + $0x122] sm:$0xff] }
 0x264   : > { %11184 = vmatpush3.bf16.msra.mxu1 %v12649_v37  ;;  %v3487_v37 = vld [vmem:[#allocation3 + $0x168] sm:$0xff] }
 0x265   : > { %11217 = vmatprep.subr.bf16.mxu1 %v12650_v61  ;;  %v13933_v39 = vpack.c.bf16 %v3488_v58, %v3487_v37  ;;  %v13968_v58 = vpack.c.bf16 %v4049_v44, %v4048_v56  ;;  %v4050_v37 = vld [vmem:[#allocation3 + $0xaa] sm:$0xff] }
 0x266   : > { %v4061_v56 = vld [vmem:[#allocation3 + $0x12a] sm:$0xff] }
 0x267   : > { %11154 = vmatmul.mubr.msk.bf16.gmra.mrb[40].mxu1 %vm280_vm0, %v13893_v47 }
 0x268   : > { %11157 = vmatprep.mubr.msk.bf16.mxu1 %vm280_vm0, %v13895_v7 }
 0x26f   : > { %11158 = vmatmul.mubr.msk.bf16.gmra.mrb[44].mxu1 %vm280_vm0, %v13901_v36 }
 0x270   : > { %11161 = vmatprep.mubr.msk.bf16.mxu1 %vm280_vm0, %v13903_v34 }
 0x277   : > { %11162 = vmatmul.mubr.msk.bf16.gmra.mrb[48].mxu1 %vm280_vm0, %v13909_v57 }
 0x278   : > { %11165 = vmatprep.mubr.msk.bf16.mxu1 %vm280_vm0, %v13911_v30 }
 0x27f   : > { %11166 = vmatmul.mubr.msk.bf16.gmra.mrb[52].mxu1 %vm280_vm0, %v13917_v0 }
 0x280   : > { %11169 = vmatprep.mubr.msk.bf16.mxu1 %vm280_vm0, %v13919_v13 }
 0x287   : > { %11170 = vmatmul.mubr.msk.bf16.gmra.mrb[56].mxu1 %vm280_vm0, %v13925_v8 }
 0x288   : > { %11173 = vmatprep.mubr.msk.bf16.mxu1 %vm280_vm0, %v13927_v3 }
 0x28f   : > { %11174 = vmatmul.mubr.msk.bf16.gmra.mrb[60].mxu1 %vm280_vm0, %v13933_v39 }
 0x290   : > { %11185 = vmatprep.mubr.msk.bf16.mxu1 %vm280_vm0, %v4068_v16  ;;  %v4051_v16 = vld [vmem:[#allocation3 + $0xb2] sm:$0xff] }
 0x291   : > { %v13974_v59 = vpack.c.bf16 %v4051_v16, %v4050_v37  ;;  %v13992_v37 = vpack.c.bf16 %v4061_v56, %v4060_v62  ;;  %v4062_v16 = vld [vmem:[#allocation3 + $0x13a] sm:$0xff] }
 0x292   : > { %v12655_v62 = vld [vmem:[%s14943_s3 + $0x88] sm:$0xff]   ;;  %v12656_v56 = vld [vmem:[%s14943_s3 + $0x90] sm:$0xff]  }
 0x297   : > { %11186 = vmatmul.mubr.msk.bf16.vlgmr.msra.gmra.mrb[32].mxu1 %vm280_vm0, %v13938_v17 }
 0x298   : > { %11189 = vmatprep.mubr.msk.bf16.mxu1 %vm280_vm0, %v13943_v40  ;;  %11218 = vmatpush3.bf16.msra.mxu1 %v12650_v61  ;;  %v12654_v61 = vld [vmem:[%s14943_s3 + $0x80] sm:$0xff]  }
 0x299   : > { %11219 = vmatprep.subr.bf16.mxu1 %v12651_v6 }
 0x29c   : > { %11220 = vmatpush3.bf16.msra.mxu1 %v12651_v6  ;;  %v4054_v6 = vld [vmem:[#allocation3 + $0xda] sm:$0xff] }
 0x29d   : > { %11221 = vmatprep.subr.bf16.mxu1 %v12652_v12 }
 0x29f   : > { %11190 = vmatmul.mubr.msk.bf16.gmra.mrb[36].mxu1 %vm280_vm0, %v13952_v25 }
 0x2a0   : > { %11193 = vmatprep.mubr.msk.bf16.mxu1 %vm280_vm0, %v13957_v54  ;;  %11222 = vmatpush3.bf16.msra.mxu1 %v12652_v12  ;;  %v4055_v12 = vld [vmem:[#allocation3 + $0xe2] sm:$0xff] }
 0x2a1   : > { %11223 = vmatprep.subr.bf16.mxu1 %v12653_v42  ;;  %v13982_v33 = vpack.c.bf16 %v4055_v12, %v4054_v6  ;;  %v4065_v6 = vld [vmem:[#allocation3 + $0x15a] sm:$0xff]  ;;  %v13998_v12 = vpack.c.bf16 %v4063_v52, %v4062_v16  ;;  %v4389_v16 = vld [vmem:[#allocation3 + $0x188] sm:$0xff] }
 0x2a2   : > { %v14000_v60 = vpack.c.bf16 %v4065_v6, %v4064_v51  ;;  %v4388_v52 = vld [vmem:[#allocation3 + $0x180] sm:$0xff]  ;;  %v12659_v6 = vld [vmem:[%s14943_s3 + $0xa8] sm:$0xff]  }
 0x2a3   : > { %v14052_v51 = vpack.c.bf16 %v4389_v16, %v4388_v52  ;;  %v5653_v16 = vld [vmem:[#allocation3 + $0x79] sm:$0xff] }
 0x2a4   : > { %11224 = vmatpush3.bf16.msra.mxu1 %v12653_v42  ;;  %v4058_v42 = vld [vmem:[#allocation3 + $0x10a] sm:$0xff] }
 0x2a5   : > { %11257 = vmatprep.subr.bf16.mxu1 %v12654_v61  ;;  %v13990_v44 = vpack.c.bf16 %v4059_v35, %v4058_v42  ;;  %v4067_v42 = vld [vmem:[#allocation3 + $0x172] sm:$0xff] }
 0x2a6   : > { %v14006_v35 = vpack.c.bf16 %v4067_v42, %v4066_v43  ;;  %v12660_v43 = vld [vmem:[%s14943_s3 + $0xb0] sm:$0xff]   ;;  %v12671_v42 = vld [vmem:[%s14943_s3 + $0x108] sm:$0xff]  }
 0x2a7   : > { %11194 = vmatmul.mubr.msk.bf16.gmra.mrb[40].mxu1 %vm280_vm0, %v13966_v9 }
 0x2a8   : > { %11197 = vmatprep.mubr.msk.bf16.mxu1 %vm280_vm0, %v13968_v58 }
 0x2af   : > { %11198 = vmatmul.mubr.msk.bf16.gmra.mrb[44].mxu1 %vm280_vm0, %v13974_v59 }
 0x2b0   : > { %11201 = vmatprep.mubr.msk.bf16.mxu1 %vm280_vm0, %v13976_v1 }
 0x2b7   : > { %11202 = vmatmul.mubr.msk.bf16.gmra.mrb[48].mxu1 %vm280_vm0, %v13982_v33 }
 0x2b8   : > { %11205 = vmatprep.mubr.msk.bf16.mxu1 %vm280_vm0, %v13984_v48 }
 0x2bf   : > { %11206 = vmatmul.mubr.msk.bf16.gmra.mrb[52].mxu1 %vm280_vm0, %v13990_v44 }
 0x2c0   : > { %11209 = vmatprep.mubr.msk.bf16.mxu1 %vm280_vm0, %v13992_v37 }
 0x2c7   : > { %11210 = vmatmul.mubr.msk.bf16.gmra.mrb[56].mxu1 %vm280_vm0, %v13998_v12 }
 0x2c8   : > { %11213 = vmatprep.mubr.msk.bf16.mxu1 %vm280_vm0, %v14000_v60 }
 0x2cf   : > { %11214 = vmatmul.mubr.msk.bf16.gmra.mrb[60].mxu1 %vm280_vm0, %v14006_v35 }
 0x2d0   : > { %11225 = vmatprep.mubr.msk.bf16.mxu1 %vm280_vm0, %v13864_v45  ;;  %v12657_v45 = vld [vmem:[%s14943_s3 + $0x98] sm:$0xff]  }
 0x2d7   : > { %11226 = vmatmul.mubr.msk.bf16.vlgmr.msra.gmra.mrb[32].mxu1 %vm280_vm0, %v13869_v26 }
 0x2d8   : > { %11229 = vmatprep.mubr.msk.bf16.mxu1 %vm280_vm0, %v13879_v32  ;;  %11258 = vmatpush3.bf16.msra.mxu1 %v12654_v61  ;;  %v12658_v61 = vld [vmem:[%s14943_s3 + $0xa0] sm:$0xff]  }
 0x2d9   : > { %11259 = vmatprep.subr.bf16.mxu1 %v12655_v62 }
 0x2dc   : > { %11260 = vmatpush3.bf16.msra.mxu1 %v12655_v62 }
 0x2dd   : > { %11261 = vmatprep.subr.bf16.mxu1 %v12656_v56 }
 0x2df   : > { %11230 = vmatmul.mubr.msk.bf16.gmra.mrb[36].mxu1 %vm280_vm0, %v13884_v55 }
 0x2e0   : > { %11233 = vmatprep.mubr.msk.bf16.mxu1 %vm280_vm0, %v13893_v47  ;;  %11262 = vmatpush3.bf16.msra.mxu1 %v12656_v56  ;;  %v12672_v56 = vld [vmem:[%s14943_s3 + $0x110] sm:$0xff]  }
 0x2e1   : > { %11263 = vmatprep.subr.bf16.mxu1 %v12657_v45 }
 0x2e4   : > { %11264 = vmatpush3.bf16.msra.mxu1 %v12657_v45  ;;  %v5654_v45 = vld [vmem:[#allocation3 + $0x81] sm:$0xff] }
 0x2e5   : > { %11297 = vmatprep.subr.bf16.mxu1 %v12658_v61  ;;  %v5682_v52 = vpack.c.bf16 %v5654_v45, %v5653_v16 }
 0x2e7   : > { %11234 = vmatmul.mubr.msk.bf16.gmra.mrb[40].mxu1 %vm280_vm0, %v13895_v7 }
 0x2e8   : > { %11237 = vmatprep.mubr.msk.bf16.mxu1 %vm280_vm0, %v13901_v36 }
 0x2ef   : > { %11238 = vmatmul.mubr.msk.bf16.gmra.mrb[44].mxu1 %vm280_vm0, %v13903_v34 }
 0x2f0   : > { %11241 = vmatprep.mubr.msk.bf16.mxu1 %vm280_vm0, %v13909_v57 }
 0x2f7   : > { %11242 = vmatmul.mubr.msk.bf16.gmra.mrb[48].mxu1 %vm280_vm0, %v13911_v30 }
 0x2f8   : > { %11245 = vmatprep.mubr.msk.bf16.mxu1 %vm280_vm0, %v13917_v0 }
 0x2ff   : > { %11246 = vmatmul.mubr.msk.bf16.gmra.mrb[52].mxu1 %vm280_vm0, %v13919_v13 }
 0x300   : > { %11249 = vmatprep.mubr.msk.bf16.mxu1 %vm280_vm0, %v13925_v8 }
 0x307   : > { %11250 = vmatmul.mubr.msk.bf16.gmra.mrb[56].mxu1 %vm280_vm0, %v13927_v3 }
 0x308   : > { %11253 = vmatprep.mubr.msk.bf16.mxu1 %vm280_vm0, %v13933_v39 }
 0x30f   : > { %11254 = vmatmul.mubr.msk.bf16.gmra.mrb[60].mxu1 %vm280_vm0, %v14052_v51 }
 0x310   : > { %11265 = vmatprep.mubr.msk.bf16.mxu1 %vm280_vm0, %v13735_v27  ;;  %v12661_v27 = vld [vmem:[%s14943_s3 + $0xb8] sm:$0xff]  }
 0x317   : > { %11266 = vmatmul.mubr.msk.bf16.vlgmr.msra.gmra.mrb[32].mxu1 %vm280_vm0, %v13742_v4  ;;  %v12662_v4 = vld [vmem:[%s14943_s3 + $0xc0] sm:$0xff]  }
 0x318   : > { %11269 = vmatprep.mubr.msk.bf16.mxu1 %vm280_vm0, %v13762_v46  ;;  %11298 = vmatpush3.bf16.msra.mxu1 %v12658_v61  ;;  %v4711_v46 = vld [vmem:[#allocation3 + $0x189] sm:$0xff]  ;;  %v5656_v61 = vld [vmem:[#allocation3 + $0x99] sm:$0xff] }
 0x319   : > { %11299 = vmatprep.subr.bf16.mxu1 %v12659_v6 }
 0x31c   : > { %11300 = vmatpush3.bf16.msra.mxu1 %v12659_v6  ;;  %v12673_v6 = vld [vmem:[%s14943_s3 + $0x118] sm:$0xff]  }
 0x31d   : > { %11301 = vmatprep.subr.bf16.mxu1 %v12660_v43 }
 0x31f   : > { %11270 = vmatmul.mubr.msk.bf16.gmra.mrb[36].mxu1 %vm280_vm0, %v13769_v53  ;;  %v4710_v53 = vld [vmem:[#allocation3 + $0x181] sm:$0xff] }
 0x320   : > { %11273 = vmatprep.mubr.msk.bf16.mxu1 %vm280_vm0, %v13787_v38  ;;  %11302 = vmatpush3.bf16.msra.mxu1 %v12660_v43  ;;  %v14098_v38 = vpack.c.bf16 %v4711_v46, %v4710_v53  ;;  %v5657_v46 = vld [vmem:[#allocation3 + $0xa9] sm:$0xff] }
 0x321   : > { %11303 = vmatprep.subr.bf16.mxu1 %v12661_v27 }
 0x324   : > { %11304 = vmatpush3.bf16.msra.mxu1 %v12661_v27  ;;  %v5658_v27 = vld [vmem:[#allocation3 + $0xb1] sm:$0xff] }
 0x325   : > { %11337 = vmatprep.subr.bf16.mxu1 %v12662_v4  ;;  %v5684_v53 = vpack.c.bf16 %v5658_v27, %v5657_v46 }
 0x327   : > { %11274 = vmatmul.mubr.msk.bf16.gmra.mrb[40].mxu1 %vm280_vm0, %v13791_v31  ;;  %v12663_v31 = vld [vmem:[%s14943_s3 + $0xc8] sm:$0xff]  }
 0x328   : > { %11277 = vmatprep.mubr.msk.bf16.mxu1 %vm280_vm0, %v13804_v23  ;;  %v12664_v23 = vld [vmem:[%s14943_s3 + $0xd0] sm:$0xff]  }
 0x32f   : > { %11278 = vmatmul.mubr.msk.bf16.gmra.mrb[44].mxu1 %vm280_vm0, %v13807_v41  ;;  %v12665_v41 = vld [vmem:[%s14943_s3 + $0xd8] sm:$0xff]  }
 0x330   : > { %11281 = vmatprep.mubr.msk.bf16.mxu1 %vm280_vm0, %v13820_v5  ;;  %v12666_v5 = vld [vmem:[%s14943_s3 + $0xe0] sm:$0xff]  }
 0x337   : > { %11282 = vmatmul.mubr.msk.bf16.gmra.mrb[48].mxu1 %vm280_vm0, %v13823_v2  ;;  %v5032_v2 = vld [vmem:[#allocation3 + $0x182] sm:$0xff] }
 0x338   : > { %11285 = vmatprep.mubr.msk.bf16.mxu1 %vm280_vm0, %v13836_v29  ;;  %v5033_v29 = vld [vmem:[#allocation3 + $0x18a] sm:$0xff] }
 0x33f   : > { %11286 = vmatmul.mubr.msk.bf16.gmra.mrb[52].mxu1 %vm280_vm0, %v13839_v50  ;;  %v14144_v50 = vpack.c.bf16 %v5033_v29, %v5032_v2  ;;  %v5661_v2 = vld [vmem:[#allocation3 + $0xd9] sm:$0xff] }
 0x340   : > { %11289 = vmatprep.mubr.msk.bf16.mxu1 %vm280_vm0, %v13851_v49  ;;  %v12667_v49 = vld [vmem:[%s14943_s3 + $0xe8] sm:$0xff]  }
 0x347   : > { %11290 = vmatmul.mubr.msk.bf16.gmra.mrb[56].mxu1 %vm280_vm0, %v13853_v63  ;;  %v12668_v63 = vld [vmem:[%s14943_s3 + $0xf0] sm:$0xff]  }
 0x348   : > { %11293 = vmatprep.mubr.msk.bf16.mxu1 %vm280_vm0, %v13859_v28  ;;  %v12669_v28 = vld [vmem:[%s14943_s3 + $0xf8] sm:$0xff]  }
 0x34f   : > { %11294 = vmatmul.mubr.msk.bf16.gmra.mrb[60].mxu1 %vm280_vm0, %v14098_v38 }
 0x350   : > { %11305 = vmatprep.mubr.msk.bf16.mxu1 %vm280_vm0, %v13938_v17  ;;  %v5651_v17 = vld [vmem:[#allocation3 + $0x61] sm:$0xff] }
 0x357   : > { %11306 = vmatmul.mubr.msk.bf16.vlgmr.msra.gmra.mrb[32].mxu1 %vm280_vm0, %v13943_v40 }
 0x358   : > { %11309 = vmatprep.mubr.msk.bf16.mxu1 %vm280_vm0, %v13952_v25  ;;  %11338 = vmatpush3.bf16.msra.mxu1 %v12662_v4  ;;  %v5660_v4 = vld [vmem:[#allocation3 + $0xc9] sm:$0xff] }
 0x359   : > { %11339 = vmatprep.subr.bf16.mxu1 %v12663_v31 }
 0x35c   : > { %11340 = vmatpush3.bf16.msra.mxu1 %v12663_v31  ;;  %v5659_v31 = vld [vmem:[#allocation3 + $0xc1] sm:$0xff] }
 0x35d   : > { %11341 = vmatprep.subr.bf16.mxu1 %v12664_v23 }
 0x35f   : > { %11310 = vmatmul.mubr.msk.bf16.gmra.mrb[36].mxu1 %vm280_vm0, %v13957_v54 }
 0x360   : > { %11313 = vmatprep.mubr.msk.bf16.mxu1 %vm280_vm0, %v13966_v9  ;;  %11342 = vmatpush3.bf16.msra.mxu1 %v12664_v23  ;;  %v5685_v23 = vpack.c.bf16 %v5660_v4, %v5659_v31 }
 0x361   : > { %11343 = vmatprep.subr.bf16.mxu1 %v12665_v41 }
 0x364   : > { %11344 = vmatpush3.bf16.msra.mxu1 %v12665_v41  ;;  %v5662_v41 = vld [vmem:[#allocation3 + $0xe1] sm:$0xff] }
 0x365   : > { %11377 = vmatprep.subr.bf16.mxu1 %v12666_v5  ;;  %v5686_v29 = vpack.c.bf16 %v5662_v41, %v5661_v2 }
 0x367   : > { %11314 = vmatmul.mubr.msk.bf16.gmra.mrb[40].mxu1 %vm280_vm0, %v13968_v58 }
 0x368   : > { %11317 = vmatprep.mubr.msk.bf16.mxu1 %vm280_vm0, %v13974_v59 }
 0x36f   : > { %11318 = vmatmul.mubr.msk.bf16.gmra.mrb[44].mxu1 %vm280_vm0, %v13976_v1 }
 0x370   : > { %11321 = vmatprep.mubr.msk.bf16.mxu1 %vm280_vm0, %v13982_v33 }
 0x377   : > { %11322 = vmatmul.mubr.msk.bf16.gmra.mrb[48].mxu1 %vm280_vm0, %v13984_v48 }
 0x378   : > { %11325 = vmatprep.mubr.msk.bf16.mxu1 %vm280_vm0, %v13990_v44 }
 0x37f   : > { %11326 = vmatmul.mubr.msk.bf16.gmra.mrb[52].mxu1 %vm280_vm0, %v13992_v37 }
 0x380   : > { %11329 = vmatprep.mubr.msk.bf16.mxu1 %vm280_vm0, %v13998_v12 }
 0x387   : > { %11330 = vmatmul.mubr.msk.bf16.gmra.mrb[56].mxu1 %vm280_vm0, %v14000_v60 }
 0x388   : > { %11333 = vmatprep.mubr.msk.bf16.mxu1 %vm280_vm0, %v14006_v35 }
 0x38f   : > { %11334 = vmatmul.mubr.msk.bf16.gmra.mrb[60].mxu1 %vm280_vm0, %v14144_v50 }
 0x390   : > { %11345 = vmatprep.mubr.msk.bf16.mxu1 %vm280_vm0, %v13869_v26  ;;  %v12670_v26 = vld [vmem:[%s14943_s3 + $0x100] sm:$0xff]  }
 0x397   : > { %11346 = vmatmul.mubr.msk.bf16.vlgmr.msra.gmra.mrb[32].mxu1 %vm280_vm0, %v13879_v32  ;;  %v5355_v32 = vld [vmem:[#allocation3 + $0x198] sm:$0xff] }
 0x398   : > { %11349 = vmatprep.mubr.msk.bf16.mxu1 %vm280_vm0, %v13884_v55  ;;  %11378 = vmatpush3.bf16.msra.mxu1 %v12666_v5  ;;  %v5356_v55 = vld [vmem:[#allocation3 + $0x1a0] sm:$0xff] }
 0x399   : > { %11379 = vmatprep.subr.bf16.mxu1 %v12667_v49  ;;  %v5664_v5 = vld [vmem:[#allocation3 + $0xf9] sm:$0xff] }
 0x39c   : > { %11380 = vmatpush3.bf16.msra.mxu1 %v12667_v49  ;;  %v5663_v49 = vld [vmem:[#allocation3 + $0xf1] sm:$0xff] }
 0x39d   : > { %11381 = vmatprep.subr.bf16.mxu1 %v12668_v63 }
 0x39f   : > { %11350 = vmatmul.mubr.msk.bf16.gmra.mrb[36].mxu1 %vm280_vm0, %v13893_v47  ;;  %v5372_v47 = vpack.c.bf16 %v5356_v55, %v5355_v32  ;;  %v5665_v32 = vld [vmem:[#allocation3 + $0x109] sm:$0xff] }
 0x3a0   : > { %11353 = vmatprep.mubr.msk.bf16.mxu1 %vm280_vm0, %v13895_v7  ;;  %11382 = vmatpush3.bf16.msra.mxu1 %v12668_v63  ;;  %v5648_v7 = vld [vmem:[#allocation3 + $0x39] sm:$0xff]  ;;  %v5687_v63 = vpack.c.bf16 %v5664_v5, %v5663_v49 }
 0x3a1   : > { %11383 = vmatprep.subr.bf16.mxu1 %v12669_v28 }
 0x3a4   : > { %11384 = vmatpush3.bf16.msra.mxu1 %v12669_v28  ;;  %v5666_v28 = vld [vmem:[#allocation3 + $0x111] sm:$0xff] }
 0x3a5   : > { %11417 = vmatprep.subr.bf16.mxu1 %v12670_v26  ;;  %v5688_v55 = vpack.c.bf16 %v5666_v28, %v5665_v32 }
 0x3a7   : > { %11354 = vmatmul.mubr.msk.bf16.gmra.mrb[40].mxu1 %vm280_vm0, %v13901_v36  ;;  %v5647_v36 = vld [vmem:[#allocation3 + $0x31] sm:$0xff] }
 0x3a8   : > { %11357 = vmatprep.mubr.msk.bf16.mxu1 %vm280_vm0, %v13903_v34  ;;  %v5679_v34 = vpack.c.bf16 %v5648_v7, %v5647_v36  ;;  %v5670_v36 = vld [vmem:[#allocation3 + $0x141] sm:$0xff] }
 0x3af   : > { %11358 = vmatmul.mubr.msk.bf16.gmra.mrb[44].mxu1 %vm280_vm0, %v13909_v57  ;;  %v12674_v57 = vld [vmem:[%s14945_s5 + $0x20] sm:$0xff]  }
 0x3b0   : > { %11361 = vmatprep.mubr.msk.bf16.mxu1 %vm280_vm0, %v13911_v30  ;;  %v12675_v30 = vld [vmem:[%s14945_s5 + $0x28] sm:$0xff]   ;;  %11457 = vmatprep.subr.bf16.mxu0 %v12674_v57 }
 0x3b1   : > { %11458 = vmatpush3.bf16.msra.mxu0 %v12674_v57  ;;  %v5669_v57 = vld [vmem:[#allocation3 + $0x139] sm:$0xff] }
 0x3b2   : > { %11459 = vmatprep.subr.bf16.mxu0 %v12675_v30 }
 0x3b5   : > { %11460 = vmatpush3.bf16.msra.mxu0 %v12675_v30  ;;  %v5690_v30 = vpack.c.bf16 %v5670_v36, %v5669_v57 }
 0x3b7   : > { %11362 = vmatmul.mubr.msk.bf16.gmra.mrb[48].mxu1 %vm280_vm0, %v13917_v0  ;;  %v5650_v0 = vld [vmem:[#allocation3 + $0x51] sm:$0xff] }
 0x3b8   : > { %11365 = vmatprep.mubr.msk.bf16.mxu1 %vm280_vm0, %v13919_v13  ;;  %v5652_v13 = vld [vmem:[#allocation3 + $0x69] sm:$0xff] }
 0x3b9   : > { %v5681_v62 = vpack.c.bf16 %v5652_v13, %v5651_v17  ;;  %v5677_v17 = vld [vmem:[#allocation3 + $0x199] sm:$0xff] }
 0x3bf   : > { %11366 = vmatmul.mubr.msk.bf16.gmra.mrb[52].mxu1 %vm280_vm0, %v13925_v8  ;;  %v12676_v8 = vld [vmem:[%s14945_s5 + $0x30] sm:$0xff]  }
 0x3c0   : > { %11369 = vmatprep.mubr.msk.bf16.mxu1 %vm280_vm0, %v13927_v3  ;;  %v5649_v3 = vld [vmem:[#allocation3 + $0x49] sm:$0xff]  ;;  %11461 = vmatprep.subr.bf16.mxu0 %v12676_v8 }
 0x3c1   : > { %11462 = vmatpush3.bf16.msra.mxu0 %v12676_v8  ;;  %v5674_v8 = vld [vmem:[#allocation3 + $0x171] sm:$0xff] }
 0x3c7   : > { %11370 = vmatmul.mubr.msk.bf16.gmra.mrb[56].mxu1 %vm280_vm0, %v13933_v39  ;;  %v5680_v39 = vpack.c.bf16 %v5650_v0, %v5649_v3  ;;  %v5671_v0 = vld [vmem:[#allocation3 + $0x151] sm:$0xff]  ;;  %v5673_v3 = vld [vmem:[#allocation3 + $0x169] sm:$0xff] }
 0x3c8   : > { %11373 = vmatprep.mubr.msk.bf16.mxu1 %vm280_vm0, %v14052_v51  ;;  %v5655_v51 = vld [vmem:[#allocation3 + $0x91] sm:$0xff] }
 0x3c9   : > { %v5683_v43 = vpack.c.bf16 %v5656_v61, %v5655_v51 }
 0x3cf   : > { %11374 = vmatmul.mubr.msk.bf16.gmra.mrb[60].mxu1 %vm280_vm0, %v5372_v47  ;;  %v5667_v47 = vld [vmem:[#allocation3 + $0x121] sm:$0xff] }
 0x3d0   : > { %11385 = vmatprep.mubr.msk.bf16.mxu1 %vm280_vm0, %v5679_v34  ;;  %v5672_v34 = vld [vmem:[#allocation3 + $0x159] sm:$0xff] }
 0x3d1   : > { %v5691_v13 = vpack.c.bf16 %v5672_v34, %v5671_v0 }
 0x3d7   : > { %11386 = vmatmul.mubr.msk.bf16.vlgmr.msra.gmra.mrb[32].mxu1 %vm280_vm0, %v5680_v39  ;;  %v5692_v39 = vpack.c.bf16 %v5674_v8, %v5673_v3  ;;  %v12679_v3 = vld [vmem:[%s14945_s5 + $0x8] sm:$0xff]  }
 0x3d8   : > { %11389 = vmatprep.mubr.msk.bf16.mxu1 %vm280_vm0, %v5681_v62  ;;  %11418 = vmatpush3.bf16.msra.mxu1 %v12670_v26  ;;  %v5668_v26 = vld [vmem:[#allocation3 + $0x129] sm:$0xff] }
 0x3d9   : > { %11419 = vmatprep.subr.bf16.mxu1 %v12671_v42  ;;  %v5689_v7 = vpack.c.bf16 %v5668_v26, %v5667_v47 }
 0x3dc   : > { %11420 = vmatpush3.bf16.msra.mxu1 %v12671_v42  ;;  %v5678_v42 = vld [vmem:[#allocation3 + $0x1a1] sm:$0xff] }
 0x3dd   : > { %11421 = vmatprep.subr.bf16.mxu1 %v12672_v56  ;;  %v5694_v62 = vpack.c.bf16 %v5678_v42, %v5677_v17 }
 0x3df   : > { %11390 = vmatmul.mubr.msk.bf16.gmra.mrb[36].mxu1 %vm280_vm0, %v5682_v52 }
 0x3e0   : > { %11393 = vmatprep.mubr.msk.bf16.mxu1 %vm280_vm0, %v5683_v43  ;;  %11422 = vmatpush3.bf16.msra.mxu1 %v12672_v56 }
 0x3e1   : > { %11423 = vmatprep.subr.bf16.mxu1 %v12673_v6 }
 0x3e4   : > { %11424 = vmatpush3.bf16.msra.mxu1 %v12673_v6 }
 0x3e7   : > { %11394 = vmatmul.mubr.msk.bf16.gmra.mrb[40].mxu1 %vm280_vm0, %v5684_v53 }
 0x3e8   : > { %11397 = vmatprep.mubr.msk.bf16.mxu1 %vm280_vm0, %v5685_v23 }
 0x3ef   : > { %11398 = vmatmul.mubr.msk.bf16.gmra.mrb[44].mxu1 %vm280_vm0, %v5686_v29 }
 0x3f0   : > { %11401 = vmatprep.mubr.msk.bf16.mxu1 %vm280_vm0, %v5687_v63 }
 0x3f7   : > { %11402 = vmatmul.mubr.msk.bf16.gmra.mrb[48].mxu1 %vm280_vm0, %v5688_v55 }
 0x3f8   : > { %11405 = vmatprep.mubr.msk.bf16.mxu1 %vm280_vm0, %v5689_v7 }
 0x3ff   : > { %11406 = vmatmul.mubr.msk.bf16.gmra.mrb[52].mxu1 %vm280_vm0, %v5690_v30 }
 0x400   : > { %11409 = vmatprep.mubr.msk.bf16.mxu1 %vm280_vm0, %v5691_v13 }
 0x407   : > { %11410 = vmatmul.mubr.msk.bf16.gmra.mrb[56].mxu1 %vm280_vm0, %v5692_v39 }
 0x408   : > { %11413 = vmatprep.mubr.msk.bf16.mxu1 %vm280_vm0, %v14098_v38 }
 0x40f   : > { %11414 = vmatmul.mubr.msk.bf16.gmra.mrb[60].mxu1 %vm280_vm0, %v5694_v62 }
 0x410   : > { %11425 = vmatprep.mubr.msk.bf16.mxu1 %vm280_vm0, %v13943_v40  ;;  %v5999_v40 = vld [vmem:[#allocation3 + $0x19a] sm:$0xff] }
 0x417   : > { %11426 = vmatmul.mubr.msk.bf16.vlgmr.msra.gmra.mrb[32].mxu1 %vm280_vm0, %v13952_v25  ;;  %v6000_v25 = vld [vmem:[#allocation3 + $0x1a2] sm:$0xff] }
 0x418   : > { %11429 = vmatprep.mubr.msk.bf16.mxu1 %vm280_vm0, %v13957_v54  ;;  %v6016_v54 = vpack.c.bf16 %v6000_v25, %v5999_v40 }
 0x41f   : > { %11430 = vmatmul.mubr.msk.bf16.gmra.mrb[36].mxu1 %vm280_vm0, %v13966_v9  ;;  %v12677_v9 = vld [vmem:[%s14945_s5 + $0x38] sm:$0xff]  }
 0x420   : > { %11433 = vmatprep.mubr.msk.bf16.mxu1 %vm280_vm0, %v13968_v58  ;;  %11463 = vmatprep.subr.bf16.mxu0 %v12677_v9  ;;  %v6514_v58 = vld [vmem:[#allocation2 + $0x1] sm:$0xff] }
 0x421   : > { %11464 = vmatpush3.bf16.msra.mxu0 %v12677_v9 }
 0x427   : > { %11434 = vmatmul.mubr.msk.bf16.gmra.mrb[40].mxu1 %vm280_vm0, %v13974_v59  ;;  %v6515_v59 = vld [vmem:[#allocation2 + $0x9] sm:$0xff] }
 0x428   : > { %11437 = vmatprep.mubr.msk.bf16.mxu1 %vm280_vm0, %v13976_v1  ;;  %v6546_v1 = vpack.c.bf16 %v6515_v59, %v6514_v58 }
 0x42a   : > { %11465 = vmatprep.mubr.msk.bf16.mxu0 %vm280_vm0, %v6546_v1  ;;  %v12680_v1 = vld [vmem:[%s14945_s5 + $0x10] sm:$0xff]  }
 0x42f   : > { %11438 = vmatmul.mubr.msk.bf16.gmra.mrb[44].mxu1 %vm280_vm0, %v13982_v33  ;;  %v14264_v33 = vld [vmem:[%s14945_s5] sm:$0xff]  }
 0x430   : > { %11441 = vmatprep.mubr.msk.bf16.mxu1 %vm280_vm0, %v13984_v48  ;;  %11497 = vmatprep.subr.bf16.mxu0 %v14264_v33  ;;  %v14270_v48 = vld [vmem:[%s14944_s4] ss:$0 sm:$0xff] }
 0x437   : > { %11442 = vmatmul.mubr.msk.bf16.gmra.mrb[48].mxu1 %vm280_vm0, %v13990_v44 }
 0x438   : > { %11445 = vmatprep.mubr.msk.bf16.mxu1 %vm280_vm0, %v13992_v37 }
 0x43f   : > { %11446 = vmatmul.mubr.msk.bf16.gmra.mrb[52].mxu1 %vm280_vm0, %v13998_v12 }
 0x440   : > { %11449 = vmatprep.mubr.msk.bf16.mxu1 %vm280_vm0, %v14000_v60 }
 0x447   : > { %11450 = vmatmul.mubr.msk.bf16.gmra.mrb[56].mxu1 %vm280_vm0, %v14006_v35 }
 0x448   : > { %11453 = vmatprep.mubr.msk.bf16.mxu1 %vm280_vm0, %v14144_v50 }
 0x44f   : > { %11454 = vmatmul.mubr.msk.bf16.gmra.mrb[60].mxu1 %vm280_vm0, %v6016_v54 }
 0x4ea   : > { %v11427_v44 = vpop.f32.mrb[32].mxu1 }
 0x4eb   : > { %v6300_v37 = vadd.f32 %v11427_v44, %v14270_v48  ;;  %v6132_v12 = vpop.f32.mrb[33].mxu1 }
 0x4ec   : > { %v6298_v60 = vadd.f32 %v14270_v48, %v6132_v12  ;;  %v11428_v35 = vpop.f32.mrb[34].mxu1 }
 0x4ed   : > { %vm6332_vm4 = vcmp.gt.f32.partialorder %v6300_v37, 0.0  ;;  %v6364_v38 = vmul.f32 0.2, %v6300_v37  ;;  %v6301_v50 = vadd.f32 %v11428_v35, %v14270_v48  ;;  %v6135_v56 = vpop.f32.mrb[35].mxu1 }
 0x4ee   : > { %vm6330_vm5 = vcmp.gt.f32.partialorder %v6298_v60, 0.0  ;;  %v6362_v45 = vmul.f32 0.2, %v6298_v60  ;;  %v6299_v61 = vadd.f32 %v14270_v48, %v6135_v56 }
 0x4ef   : > { %v6396_v16 = vsel %vm6332_vm4, %v6300_v37, %v6364_v38  ;;  %vm6333_vm6 = vcmp.gt.f32.partialorder %v6301_v50, 0.0  ;;  %v6365_v52 = vmul.f32 0.2, %v6301_v50 }
 0x4f0   : > { %6428 = vst.msk [vmem:[#allocation2 + $0x31] sm:$0xff] %vm280_vm0, %v6396_v16  ;;  %v6394_v51 = vsel %vm6330_vm5, %v6298_v60, %v6362_v45  ;;  %vm6331_vm7 = vcmp.gt.f32.partialorder %v6299_v61, 0.0  ;;  %v6363_v6 = vmul.f32 0.2, %v6299_v61 }
 0x4f1   : > { %6426 = vst.msk [vmem:[#allocation2 + $0x19] sm:$0xff] %vm280_vm0, %v6394_v51  ;;  %v6397_v43 = vsel %vm6333_vm6, %v6301_v50, %v6365_v52  ;;  %v12681_v52 = vld [vmem:[%s14945_s5 + $0x18] sm:$0xff]  }
 0x4f2   : > { %6429 = vst.msk [vmem:[#allocation2 + $0x39] sm:$0xff] %vm280_vm0, %v6397_v43  ;;  %v6395_v27 = vsel %vm6331_vm7, %v6299_v61, %v6363_v6  ;;  %v11431_v4 = vpop.f32.mrb[36].mxu1 }
 0x4f3   : > { %6427 = vst.msk [vmem:[#allocation2 + $0x21] sm:$0xff] %vm280_vm0, %v6395_v27  ;;  %v6304_v46 = vadd.f32 %v11431_v4, %v14270_v48  ;;  %v6148_v53 = vpop.f32.mrb[37].mxu1 }
 0x4f4   : > { %v6302_v31 = vadd.f32 %v14270_v48, %v6148_v53  ;;  %v11432_v23 = vpop.f32.mrb[38].mxu1 }
 0x4f5   : > { %vm6336_vm8 = vcmp.gt.f32.partialorder %v6304_v46, 0.0  ;;  %v6368_v41 = vmul.f32 0.2, %v6304_v46  ;;  %v6305_v5 = vadd.f32 %v11432_v23, %v14270_v48  ;;  %v6151_v2 = vpop.f32.mrb[39].mxu1 }
 0x4f6   : > { %vm6334_vm9 = vcmp.gt.f32.partialorder %v6302_v31, 0.0  ;;  %v6366_v29 = vmul.f32 0.2, %v6302_v31  ;;  %v6303_v49 = vadd.f32 %v14270_v48, %v6151_v2 }
 0x4f7   : > { %v6400_v63 = vsel %vm6336_vm8, %v6304_v46, %v6368_v41  ;;  %vm6337_vm10 = vcmp.gt.f32.partialorder %v6305_v5, 0.0  ;;  %v6369_v28 = vmul.f32 0.2, %v6305_v5  ;;  %v6518_v8 = vld [vmem:[#allocation2 + $0x31] sm:$0xff] }
 0x4f8   : > { %6432 = vst.msk [vmem:[#allocation2 + $0x61] sm:$0xff] %vm280_vm0, %v6400_v63  ;;  %v6398_v26 = vsel %vm6334_vm9, %v6302_v31, %v6366_v29  ;;  %vm6335_vm11 = vcmp.gt.f32.partialorder %v6303_v49, 0.0  ;;  %v6367_v32 = vmul.f32 0.2, %v6303_v49  ;;  %v6516_v34 = vld [vmem:[#allocation2 + $0x19] sm:$0xff] }
 0x4f9   : > { %6430 = vst.msk [vmem:[#allocation2 + $0x49] sm:$0xff] %vm280_vm0, %v6398_v26  ;;  %v6401_v55 = vsel %vm6337_vm10, %v6305_v5, %v6369_v28  ;;  %v6519_v47 = vld [vmem:[#allocation2 + $0x39] sm:$0xff] }
 0x4fa   : > { %6433 = vst.msk [vmem:[#allocation2 + $0x69] sm:$0xff] %vm280_vm0, %v6401_v55  ;;  %v6399_v7 = vsel %vm6335_vm11, %v6303_v49, %v6367_v32  ;;  %v11435_v36 = vpop.f32.mrb[40].mxu1  ;;  %v6517_v57 = vld [vmem:[#allocation2 + $0x21] sm:$0xff]  ;;  %v14295_v42 = vpack.c.bf16 %v6519_v47, %v6518_v8 }
 0x4fb   : > { %6431 = vst.msk [vmem:[#allocation2 + $0x51] sm:$0xff] %vm280_vm0, %v6399_v7  ;;  %v6308_v30 = vadd.f32 %v11435_v36, %v14270_v48  ;;  %v6164_v0 = vpop.f32.mrb[41].mxu1  ;;  %v14289_v13 = vpack.c.bf16 %v6517_v57, %v6516_v34  ;;  %v14329_v5 = vld [vmem:[%s14945_s5 + $0x40] sm:$0xff]  }
 0x4fc   : > { %v6306_v39 = vadd.f32 %v14270_v48, %v6164_v0  ;;  %v11436_v17 = vpop.f32.mrb[42].mxu1 }
 0x4fd   : > { %vm6340_vm12 = vcmp.gt.f32.partialorder %v6308_v30, 0.0  ;;  %v6372_v62 = vmul.f32 0.2, %v6308_v30  ;;  %v6309_v40 = vadd.f32 %v11436_v17, %v14270_v48  ;;  %v6167_v25 = vpop.f32.mrb[43].mxu1  ;;  %11466 = vmatmul.mubr.msk.bf16.vlgmr.msra.gmra.mrb[32].mxu0 %vm280_vm0, %v14289_v13 }
 0x4fe   : > { %vm6338_vm13 = vcmp.gt.f32.partialorder %v6306_v39, 0.0  ;;  %v6370_v54 = vmul.f32 0.2, %v6306_v39  ;;  %v6307_v9 = vadd.f32 %v14270_v48, %v6167_v25  ;;  %11469 = vmatprep.mubr.msk.bf16.mxu0 %vm280_vm0, %v14295_v42  ;;  %11498 = vmatpush3.bf16.msra.mxu0 %v14264_v33 }
 0x4ff   : > { %v6404_v58 = vsel %vm6340_vm12, %v6308_v30, %v6372_v62  ;;  %vm6341_vm14 = vcmp.gt.f32.partialorder %v6309_v40, 0.0  ;;  %v6373_v59 = vmul.f32 0.2, %v6309_v40  ;;  %11499 = vmatprep.subr.bf16.mxu0 %v12679_v3  ;;  %v6522_v16 = vld [vmem:[#allocation2 + $0x61] sm:$0xff] }
 0x500   : > { %6436 = vst.msk [vmem:[#allocation2 + $0x91] sm:$0xff] %vm280_vm0, %v6404_v58  ;;  %v6402_v44 = vsel %vm6338_vm13, %v6306_v39, %v6370_v54  ;;  %vm6339_vm15 = vcmp.gt.f32.partialorder %v6307_v9, 0.0  ;;  %v6371_v37 = vmul.f32 0.2, %v6307_v9  ;;  %v6520_v38 = vld [vmem:[#allocation2 + $0x49] sm:$0xff] }
 0x501   : > { %6434 = vst.msk [vmem:[#allocation2 + $0x79] sm:$0xff] %vm280_vm0, %v6402_v44  ;;  %v6405_v12 = vsel %vm6341_vm14, %v6309_v40, %v6373_v59  ;;  %v6523_v60 = vld [vmem:[#allocation2 + $0x69] sm:$0xff] }
 0x502   : > { %6437 = vst.msk [vmem:[#allocation2 + $0x99] sm:$0xff] %vm280_vm0, %v6405_v12  ;;  %v6403_v33 = vsel %vm6339_vm15, %v6307_v9, %v6371_v37  ;;  %v11439_v35 = vpop.f32.mrb[44].mxu1  ;;  %v6521_v50 = vld [vmem:[#allocation2 + $0x51] sm:$0xff]  ;;  %11500 = vmatpush3.bf16.msra.mxu0 %v12679_v3  ;;  %v14318_v43 = vpack.c.bf16 %v6523_v60, %v6522_v16 }
 0x503   : > { %6435 = vst.msk [vmem:[#allocation2 + $0x81] sm:$0xff] %vm280_vm0, %v6403_v33  ;;  %v6312_v56 = vadd.f32 %v11439_v35, %v14270_v48  ;;  %v6180_v45 = vpop.f32.mrb[45].mxu1  ;;  %v14312_v61 = vpack.c.bf16 %v6521_v50, %v6520_v38  ;;  %11501 = vmatprep.subr.bf16.mxu0 %v12680_v1 }
 0x504   : > { %v6310_v51 = vadd.f32 %v14270_v48, %v6180_v45  ;;  %v11440_v6 = vpop.f32.mrb[46].mxu1 }
 0x505   : > { %vm6344_vm1 = vcmp.gt.f32.partialorder %v6312_v56, 0.0  ;;  %v6376_v27 = vmul.f32 0.2, %v6312_v56  ;;  %v6313_v4 = vadd.f32 %v11440_v6, %v14270_v48  ;;  %v6183_v46 = vpop.f32.mrb[47].mxu1  ;;  %11470 = vmatmul.mubr.msk.bf16.gmra.mrb[36].mxu0 %vm280_vm0, %v14312_v61 }
 0x506   : > { %vm6342_vm2 = vcmp.gt.f32.partialorder %v6310_v51, 0.0  ;;  %v6374_v53 = vmul.f32 0.2, %v6310_v51  ;;  %v6311_v31 = vadd.f32 %v14270_v48, %v6183_v46  ;;  %11473 = vmatprep.mubr.msk.bf16.mxu0 %vm280_vm0, %v14318_v43  ;;  %11502 = vmatpush3.bf16.msra.mxu0 %v12680_v1 }
 0x507   : > { %v6408_v23 = vsel %vm6344_vm1, %v6312_v56, %v6376_v27  ;;  %vm6345_vm3 = vcmp.gt.f32.partialorder %v6313_v4, 0.0  ;;  %v6377_v41 = vmul.f32 0.2, %v6313_v4  ;;  %11503 = vmatprep.subr.bf16.mxu0 %v12681_v52  ;;  %v6526_v34 = vld [vmem:[#allocation2 + $0x91] sm:$0xff] }
 0x508   : > { %6440 = vst.msk [vmem:[#allocation2 + $0xc1] sm:$0xff] %vm280_vm0, %v6408_v23  ;;  %v6406_v2 = vsel %vm6342_vm2, %v6310_v51, %v6374_v53  ;;  %vm6343_vm4 = vcmp.gt.f32.partialorder %v6311_v31, 0.0  ;;  %v6375_v29 = vmul.f32 0.2, %v6311_v31  ;;  %v6524_v32 = vld [vmem:[#allocation2 + $0x79] sm:$0xff] }
 0x509   : > { %6438 = vst.msk [vmem:[#allocation2 + $0xa9] sm:$0xff] %vm280_vm0, %v6406_v2  ;;  %v6409_v49 = vsel %vm6345_vm3, %v6313_v4, %v6377_v41  ;;  %v6527_v63 = vld [vmem:[#allocation2 + $0x99] sm:$0xff] }
 0x50a   : > { %6441 = vst.msk [vmem:[#allocation2 + $0xc9] sm:$0xff] %vm280_vm0, %v6409_v49  ;;  %v6407_v28 = vsel %vm6343_vm4, %v6311_v31, %v6375_v29  ;;  %v11443_v26 = vpop.f32.mrb[48].mxu1  ;;  %v6525_v55 = vld [vmem:[#allocation2 + $0x81] sm:$0xff]  ;;  %11504 = vmatpush3.bf16.msra.mxu0 %v12681_v52  ;;  %v14340_v0 = vpack.c.bf16 %v6527_v63, %v6526_v34 }
 0x50b   : > { %6439 = vst.msk [vmem:[#allocation2 + $0xb1] sm:$0xff] %vm280_vm0, %v6407_v28  ;;  %v6316_v47 = vadd.f32 %v11443_v26, %v14270_v48  ;;  %v6196_v7 = vpop.f32.mrb[49].mxu1  ;;  %v14336_v36 = vpack.c.bf16 %v6525_v55, %v6524_v32  ;;  %11537 = vmatprep.subr.bf16.mxu0 %v14329_v5 }
 0x50c   : > { %v6314_v57 = vadd.f32 %v14270_v48, %v6196_v7  ;;  %v11444_v30 = vpop.f32.mrb[50].mxu1 }
 0x50d   : > { %vm6348_vm5 = vcmp.gt.f32.partialorder %v6316_v47, 0.0  ;;  %v6380_v8 = vmul.f32 0.2, %v6316_v47  ;;  %v6317_v3 = vadd.f32 %v11444_v30, %v14270_v48  ;;  %v6199_v39 = vpop.f32.mrb[51].mxu1  ;;  %11474 = vmatmul.mubr.msk.bf16.gmra.mrb[40].mxu0 %vm280_vm0, %v14336_v36 }
 0x50e   : > { %vm6346_vm6 = vcmp.gt.f32.partialorder %v6314_v57, 0.0  ;;  %v6378_v17 = vmul.f32 0.2, %v6314_v57  ;;  %v6315_v62 = vadd.f32 %v14270_v48, %v6199_v39  ;;  %11477 = vmatprep.mubr.msk.bf16.mxu0 %vm280_vm0, %v14340_v0 }
 0x50f   : > { %v6412_v40 = vsel %vm6348_vm5, %v6316_v47, %v6380_v8  ;;  %vm6349_vm7 = vcmp.gt.f32.partialorder %v6317_v3, 0.0  ;;  %v6381_v25 = vmul.f32 0.2, %v6317_v3  ;;  %v6530_v38 = vld [vmem:[#allocation2 + $0xc1] sm:$0xff] }
 0x510   : > { %6444 = vst.msk [vmem:[#allocation2 + $0xf1] sm:$0xff] %vm280_vm0, %v6412_v40  ;;  %v6410_v54 = vsel %vm6346_vm6, %v6314_v57, %v6378_v17  ;;  %vm6347_vm8 = vcmp.gt.f32.partialorder %v6315_v62, 0.0  ;;  %v6379_v9 = vmul.f32 0.2, %v6315_v62  ;;  %v6528_v37 = vld [vmem:[#allocation2 + $0xa9] sm:$0xff] }
 0x511   : > { %6442 = vst.msk [vmem:[#allocation2 + $0xd9] sm:$0xff] %vm280_vm0, %v6410_v54  ;;  %v6413_v58 = vsel %vm6349_vm7, %v6317_v3, %v6381_v25  ;;  %v6531_v59 = vld [vmem:[#allocation2 + $0xc9] sm:$0xff] }
 0x512   : > { %6445 = vst.msk [vmem:[#allocation2 + $0xf9] sm:$0xff] %vm280_vm0, %v6413_v58  ;;  %v6411_v1 = vsel %vm6347_vm8, %v6315_v62, %v6379_v9  ;;  %v11447_v44 = vpop.f32.mrb[52].mxu1  ;;  %v6529_v12 = vld [vmem:[#allocation2 + $0xb1] sm:$0xff]  ;;  %v14356_v45 = vpack.c.bf16 %v6531_v59, %v6530_v38 }
 0x513   : > { %6443 = vst.msk [vmem:[#allocation2 + $0xe1] sm:$0xff] %vm280_vm0, %v6411_v1  ;;  %v6320_v60 = vadd.f32 %v11447_v44, %v14270_v48  ;;  %v6212_v33 = vpop.f32.mrb[53].mxu1  ;;  %v14353_v35 = vpack.c.bf16 %v6529_v12, %v6528_v37 }
 0x514   : > { %v6318_v50 = vadd.f32 %v14270_v48, %v6212_v33  ;;  %v11448_v56 = vpop.f32.mrb[54].mxu1 }
 0x515   : > { %vm6352_vm9 = vcmp.gt.f32.partialorder %v6320_v60, 0.0  ;;  %v6384_v16 = vmul.f32 0.2, %v6320_v60  ;;  %v6321_v52 = vadd.f32 %v11448_v56, %v14270_v48  ;;  %v6215_v51 = vpop.f32.mrb[55].mxu1  ;;  %11478 = vmatmul.mubr.msk.bf16.gmra.mrb[44].mxu0 %vm280_vm0, %v14353_v35 }
 0x516   : > { %vm6350_vm10 = vcmp.gt.f32.partialorder %v6318_v50, 0.0  ;;  %v6382_v6 = vmul.f32 0.2, %v6318_v50  ;;  %v6319_v27 = vadd.f32 %v14270_v48, %v6215_v51  ;;  %11481 = vmatprep.mubr.msk.bf16.mxu0 %vm280_vm0, %v14356_v45 }
 0x517   : > { %v6416_v4 = vsel %vm6352_vm9, %v6320_v60, %v6384_v16  ;;  %vm6353_vm11 = vcmp.gt.f32.partialorder %v6321_v52, 0.0  ;;  %v6385_v46 = vmul.f32 0.2, %v6321_v52  ;;  %v6534_v55 = vld [vmem:[#allocation2 + $0xf1] sm:$0xff] }
 0x518   : > { %6448 = vst.msk [vmem:[#allocation2 + $0x121] sm:$0xff] %vm280_vm0, %v6416_v4  ;;  %v6414_v53 = vsel %vm6350_vm10, %v6318_v50, %v6382_v6  ;;  %vm6351_vm12 = vcmp.gt.f32.partialorder %v6319_v27, 0.0  ;;  %v6383_v31 = vmul.f32 0.2, %v6319_v27  ;;  %v6532_v49 = vld [vmem:[#allocation2 + $0xd9] sm:$0xff] }
 0x519   : > { %6446 = vst.msk [vmem:[#allocation2 + $0x109] sm:$0xff] %vm280_vm0, %v6414_v53  ;;  %v6417_v23 = vsel %vm6353_vm11, %v6321_v52, %v6385_v46  ;;  %v6535_v41 = vld [vmem:[#allocation2 + $0xf9] sm:$0xff] }
 0x51a   : > { %6449 = vst.msk [vmem:[#allocation2 + $0x129] sm:$0xff] %vm280_vm0, %v6417_v23  ;;  %v6415_v2 = vsel %vm6351_vm12, %v6319_v27, %v6383_v31  ;;  %v11451_v29 = vpop.f32.mrb[56].mxu1  ;;  %v6533_v63 = vld [vmem:[#allocation2 + $0xe1] sm:$0xff]  ;;  %v14372_v34 = vpack.c.bf16 %v6535_v41, %v6534_v55 }
 0x51b   : > { %6447 = vst.msk [vmem:[#allocation2 + $0x111] sm:$0xff] %vm280_vm0, %v6415_v2  ;;  %v6324_v28 = vadd.f32 %v11451_v29, %v14270_v48  ;;  %v6228_v26 = vpop.f32.mrb[57].mxu1  ;;  %v14369_v32 = vpack.c.bf16 %v6533_v63, %v6532_v49  ;;  %v6459_v55 = vld [vmem:[#allocation2 + $0x8] sm:$0xff] }
 0x51c   : > { %v6322_v47 = vadd.f32 %v14270_v48, %v6228_v26  ;;  %v11452_v7 = vpop.f32.mrb[58].mxu1  ;;  %v6458_v26 = vld [vmem:[#allocation2] sm:$0xff] }
 0x51d   : > { %vm6356_vm13 = vcmp.gt.f32.partialorder %v6324_v28, 0.0  ;;  %v6388_v57 = vmul.f32 0.2, %v6324_v28  ;;  %v6325_v30 = vadd.f32 %v11452_v7, %v14270_v48  ;;  %v6231_v8 = vpop.f32.mrb[59].mxu1  ;;  %11482 = vmatmul.mubr.msk.bf16.gmra.mrb[48].mxu0 %vm280_vm0, %v14369_v32 }
 0x51e   : > { %vm6354_vm14 = vcmp.gt.f32.partialorder %v6322_v47, 0.0  ;;  %v6386_v3 = vmul.f32 0.2, %v6322_v47  ;;  %v6323_v39 = vadd.f32 %v14270_v48, %v6231_v8  ;;  %11485 = vmatprep.mubr.msk.bf16.mxu0 %vm280_vm0, %v14372_v34  ;;  %v6461_v8 = vld [vmem:[#allocation2 + $0x20] sm:$0xff] }
 0x51f   : > { %v6420_v17 = vsel %vm6356_vm13, %v6324_v28, %v6388_v57  ;;  %vm6357_vm15 = vcmp.gt.f32.partialorder %v6325_v30, 0.0  ;;  %v6389_v62 = vmul.f32 0.2, %v6325_v30  ;;  %v6538_v33 = vld [vmem:[#allocation2 + $0x121] sm:$0xff]  ;;  %v6490_v57 = vpack.c.bf16 %v6459_v55, %v6458_v26 }
 0x520   : > { %6452 = vst.msk [vmem:[#allocation2 + $0x151] sm:$0xff] %vm280_vm0, %v6420_v17  ;;  %v6418_v40 = vsel %vm6354_vm14, %v6322_v47, %v6386_v3  ;;  %vm6355_vm1 = vcmp.gt.f32.partialorder %v6323_v39, 0.0  ;;  %v6387_v25 = vmul.f32 0.2, %v6323_v39  ;;  %v6536_v1 = vld [vmem:[#allocation2 + $0x109] sm:$0xff]  ;;  %v6463_v3 = vld [vmem:[#allocation2 + $0x38] sm:$0xff] }
 0x521   : > { %6450 = vst.msk [vmem:[#allocation2 + $0x139] sm:$0xff] %vm280_vm0, %v6418_v40  ;;  %v6421_v54 = vsel %vm6357_vm15, %v6325_v30, %v6389_v62  ;;  %v6539_v9 = vld [vmem:[#allocation2 + $0x129] sm:$0xff] }
 0x522   : > { %6453 = vst.msk [vmem:[#allocation2 + $0x159] sm:$0xff] %vm280_vm0, %v6421_v54  ;;  %v6419_v58 = vsel %vm6355_vm1, %v6323_v39, %v6387_v25  ;;  %v11455_v59 = vpop.f32.mrb[60].mxu1  ;;  %v6537_v44 = vld [vmem:[#allocation2 + $0x111] sm:$0xff]  ;;  %v14388_v56 = vpack.c.bf16 %v6539_v9, %v6538_v33  ;;  %v12683_v40 = vld [vmem:[%s14945_s5 + $0x48] sm:$0xff]   ;;  %v6469_v33 = vld [vmem:[#allocation2 + $0x80] sm:$0xff] }
 0x523   : > { %6451 = vst.msk [vmem:[#allocation2 + $0x141] sm:$0xff] %vm280_vm0, %v6419_v58  ;;  %v6328_v37 = vadd.f32 %v11455_v59, %v14270_v48  ;;  %v6244_v12 = vpop.f32.mrb[61].mxu1  ;;  %v14385_v60 = vpack.c.bf16 %v6537_v44, %v6536_v1  ;;  %v6460_v39 = vld [vmem:[#allocation2 + $0x18] sm:$0xff]  ;;  %v6462_v62 = vld [vmem:[#allocation2 + $0x30] sm:$0xff]  ;;  %v6467_v58 = vld [vmem:[#allocation2 + $0x68] sm:$0xff] }
 0x524   : > { %v6326_v38 = vadd.f32 %v14270_v48, %v6244_v12  ;;  %v11456_v50 = vpop.f32.mrb[62].mxu1  ;;  %v14413_v17 = vpack.c.bf16 %v6461_v8, %v6460_v39  ;;  %v14418_v25 = vpack.c.bf16 %v6463_v3, %v6462_v62  ;;  %v12684_v54 = vld [vmem:[%s14945_s5 + $0x50] sm:$0xff]   ;;  %v6464_v59 = vld [vmem:[#allocation2 + $0x48] sm:$0xff]  ;;  %v6466_v44 = vld [vmem:[#allocation2 + $0x60] sm:$0xff] }
 0x525   : > { %vm6360_vm2 = vcmp.gt.f32.partialorder %v6328_v37, 0.0  ;;  %v6392_v16 = vmul.f32 0.2, %v6328_v37  ;;  %v6329_v52 = vadd.f32 %v11456_v50, %v14270_v48  ;;  %v6247_v51 = vpop.f32.mrb[63].mxu1  ;;  %11486 = vmatmul.mubr.msk.bf16.gmra.mrb[52].mxu0 %vm280_vm0, %v14385_v60  ;;  %v6465_v9 = vld [vmem:[#allocation2 + $0x50] sm:$0xff]  ;;  %v14433_v12 = vpack.c.bf16 %v6467_v58, %v6466_v44  ;;  %v6468_v50 = vld [vmem:[#allocation2 + $0x78] sm:$0xff] }
 0x526   : > { %vm6358_vm3 = vcmp.gt.f32.partialorder %v6326_v38, 0.0  ;;  %v6390_v6 = vmul.f32 0.2, %v6326_v38  ;;  %v6327_v27 = vadd.f32 %v14270_v48, %v6247_v51  ;;  %11489 = vmatprep.mubr.msk.bf16.mxu0 %vm280_vm0, %v14388_v56  ;;  %v14428_v1 = vpack.c.bf16 %v6465_v9, %v6464_v59  ;;  %v6481_v26 = vld [vmem:[#allocation2 + $0x110] sm:$0xff]  ;;  %v6483_v55 = vld [vmem:[#allocation2 + $0x128] sm:$0xff] }
 0x527   : > { %v6424_v4 = vsel %vm6360_vm2, %v6328_v37, %v6392_v16  ;;  %vm6361_vm4 = vcmp.gt.f32.partialorder %v6329_v52, 0.0  ;;  %v6393_v46 = vmul.f32 0.2, %v6329_v52  ;;  %v6542_v63 = vld [vmem:[#allocation2 + $0x151] sm:$0xff]  ;;  %v14442_v16 = vpack.c.bf16 %v6469_v33, %v6468_v50  ;;  %v7037_v58 = vld [vmem:[#allocation2 + $0x2] sm:$0xff]  ;;  %v7039_v50 = vld [vmem:[#allocation2 + $0x1a] sm:$0xff] }
 0x528   : > { %6456 = vst.msk [vmem:[#allocation2 + $0x181] sm:$0xff] %vm280_vm0, %v6424_v4  ;;  %v6422_v53 = vsel %vm6358_vm3, %v6326_v38, %v6390_v6  ;;  %vm6359_vm5 = vcmp.gt.f32.partialorder %v6327_v27, 0.0  ;;  %v6391_v31 = vmul.f32 0.2, %v6327_v27  ;;  %v6540_v29 = vld [vmem:[#allocation2 + $0x139] sm:$0xff]  ;;  %v6473_v6 = vld [vmem:[#allocation2 + $0xb0] sm:$0xff] }
 0x529   : > { %6454 = vst.msk [vmem:[#allocation2 + $0x169] sm:$0xff] %vm280_vm0, %v6422_v53  ;;  %v6425_v23 = vsel %vm6361_vm4, %v6329_v52, %v6393_v46  ;;  %v6543_v41 = vld [vmem:[#allocation2 + $0x159] sm:$0xff]  ;;  %v6470_v52 = vld [vmem:[#allocation2 + $0x90] sm:$0xff]  ;;  %v6472_v4 = vld [vmem:[#allocation2 + $0xa8] sm:$0xff] }
 0x52a   : > { %6457 = vst.msk [vmem:[#allocation2 + $0x189] sm:$0xff] %vm280_vm0, %v6425_v23  ;;  %v6423_v2 = vsel %vm6359_vm5, %v6327_v27, %v6391_v31  ;;  %v6541_v48 = vld [vmem:[#allocation2 + $0x141] sm:$0xff]  ;;  %v14402_v28 = vpack.c.bf16 %v6543_v41, %v6542_v63  ;;  %v12685_v37 = vld [vmem:[%s14945_s5 + $0x58] sm:$0xff]   ;;  %v14450_v46 = vpack.c.bf16 %v6473_v6, %v6472_v4  ;;  %v7038_v59 = vld [vmem:[#allocation2 + $0xa] sm:$0xff] }
 0x52b   : > { %6455 = vst.msk [vmem:[#allocation2 + $0x171] sm:$0xff] %vm280_vm0, %v6423_v2  ;;  %v14400_v49 = vpack.c.bf16 %v6541_v48, %v6540_v29  ;;  %v6471_v38 = vld [vmem:[#allocation2 + $0x98] sm:$0xff]  ;;  %v6475_v27 = vld [vmem:[#allocation2 + $0xc8] sm:$0xff]  ;;  %v6474_v53 = vld [vmem:[#allocation2 + $0xc0] sm:$0xff]  ;;  %v7069_v33 = vpack.c.bf16 %v7038_v59, %v7037_v58 }
 0x52c   : > { %v14444_v51 = vpack.c.bf16 %v6471_v38, %v6470_v52  ;;  %v14452_v31 = vpack.c.bf16 %v6475_v27, %v6474_v53  ;;  %v6477_v23 = vld [vmem:[#allocation2 + $0xe0] sm:$0xff]  ;;  %v6479_v41 = vld [vmem:[#allocation2 + $0xf8] sm:$0xff]  ;;  %v6478_v48 = vld [vmem:[#allocation2 + $0xf0] sm:$0xff] }
 0x52d   : > { %11490 = vmatmul.mubr.msk.bf16.gmra.mrb[56].mxu0 %vm280_vm0, %v14400_v49  ;;  %v6476_v2 = vld [vmem:[#allocation2 + $0xd8] sm:$0xff]  ;;  %v14460_v63 = vpack.c.bf16 %v6479_v41, %v6478_v48  ;;  %v6485_v3 = vld [vmem:[#allocation2 + $0x140] sm:$0xff]  ;;  %v12687_v53 = vld [vmem:[%s14945_s5 + $0x68] sm:$0xff]  }
 0x52e   : > { %11493 = vmatprep.mubr.msk.bf16.mxu0 %vm280_vm0, %v14402_v28  ;;  %v14458_v29 = vpack.c.bf16 %v6477_v23, %v6476_v2  ;;  %v6487_v39 = vld [vmem:[#allocation2 + $0x158] sm:$0xff]  ;;  %v7040_v52 = vld [vmem:[#allocation2 + $0x22] sm:$0xff]  ;;  %v12688_v41 = vld [vmem:[%s14945_s5 + $0x70] sm:$0xff]  }
 0x52f   : > { %v6484_v62 = vld [vmem:[#allocation2 + $0x138] sm:$0xff]  ;;  %v14487_v4 = vpack.c.bf16 %v7040_v52, %v7039_v50  ;;  %v7043_v2 = vld [vmem:[#allocation2 + $0x4a] sm:$0xff]  ;;  %v7053_v50 = vld [vmem:[#allocation2 + $0xc2] sm:$0xff] }
 0x530   : > { %v6544_v47 = vld [vmem:[#allocation2 + $0x169] sm:$0xff]  ;;  %v7041_v6 = vld [vmem:[#allocation2 + $0x32] sm:$0xff]  ;;  %v7042_v27 = vld [vmem:[#allocation2 + $0x3a] sm:$0xff] }
 0x531   : > { %v14492_v23 = vpack.c.bf16 %v7042_v27, %v7041_v6  ;;  %v7044_v48 = vld [vmem:[#allocation2 + $0x52] sm:$0xff]  ;;  %v7050_v58 = vld [vmem:[#allocation2 + $0x9a] sm:$0xff]  ;;  %v7054_v52 = vld [vmem:[#allocation2 + $0xca] sm:$0xff] }
 0x532   : > { %v6545_v7 = vld [vmem:[#allocation2 + $0x171] sm:$0xff]  ;;  %v14525_v27 = vpack.c.bf16 %v7054_v52, %v7053_v50  ;;  %v7064_v50 = vld [vmem:[#allocation2 + $0x142] sm:$0xff] }
 0x533   : > { %v14408_v30 = vpack.c.bf16 %v6545_v7, %v6544_v47  ;;  %v6480_v47 = vld [vmem:[#allocation2 + $0x108] sm:$0xff]  ;;  %v6489_v44 = vld [vmem:[#allocation2 + $0x170] sm:$0xff] }
 0x534   : > { %v14466_v7 = vpack.c.bf16 %v6481_v26, %v6480_v47  ;;  %v7045_v26 = vld [vmem:[#allocation2 + $0x62] sm:$0xff]  ;;  %v14501_v47 = vpack.c.bf16 %v7044_v48, %v7043_v2  ;;  %v7057_v2 = vld [vmem:[#allocation2 + $0xf2] sm:$0xff]  ;;  %v7058_v48 = vld [vmem:[#allocation2 + $0xfa] sm:$0xff] }
 0x535   : > { %11494 = vmatmul.mubr.msk.bf16.gmra.mrb[60].mxu0 %vm280_vm0, %v14408_v30  ;;  %v7065_v52 = vld [vmem:[#allocation2 + $0x152] sm:$0xff] }
 0x536   : > { %11505 = vmatprep.mubr.msk.bf16.mxu0 %vm280_vm0, %v6490_v57  ;;  %v6482_v57 = vld [vmem:[#allocation2 + $0x120] sm:$0xff] }
 0x537   : > { %v14468_v8 = vpack.c.bf16 %v6483_v55, %v6482_v57  ;;  %v7046_v55 = vld [vmem:[#allocation2 + $0x6a] sm:$0xff]  ;;  %v12689_v57 = vld [vmem:[%s14945_s5 + $0x78] sm:$0xff]  }
 0x53d   : > { %11506 = vmatmul.mubr.msk.bf16.vlgmr.msra.gmra.mrb[32].mxu0 %vm280_vm0, %v14413_v17 }
 0x53e   : > { %11509 = vmatprep.mubr.msk.bf16.mxu0 %vm280_vm0, %v14418_v25  ;;  %11538 = vmatpush3.bf16.msra.mxu0 %v14329_v5  ;;  %v12686_v5 = vld [vmem:[%s14945_s5 + $0x60] sm:$0xff]  }
 0x53f   : > { %11539 = vmatprep.subr.bf16.mxu0 %v12683_v40 }
 0x542   : > { %11540 = vmatpush3.bf16.msra.mxu0 %v12683_v40  ;;  %v14474_v40 = vpack.c.bf16 %v6485_v3, %v6484_v62  ;;  %v14506_v3 = vpack.c.bf16 %v7046_v55, %v7045_v26  ;;  %v7048_v62 = vld [vmem:[#allocation2 + $0x82] sm:$0xff]  ;;  %v14533_v55 = vpack.c.bf16 %v7058_v48, %v7057_v2  ;;  %v7067_v48 = vld [vmem:[#allocation2 + $0x16a] sm:$0xff] }
 0x543   : > { %11541 = vmatprep.subr.bf16.mxu0 %v12684_v54 }
 0x545   : > { %11510 = vmatmul.mubr.msk.bf16.gmra.mrb[36].mxu0 %vm280_vm0, %v14428_v1 }
 0x546   : > { %11513 = vmatprep.mubr.msk.bf16.mxu0 %vm280_vm0, %v14433_v12  ;;  %11542 = vmatpush3.bf16.msra.mxu0 %v12684_v54  ;;  %v6486_v54 = vld [vmem:[#allocation2 + $0x150] sm:$0xff] }
 0x547   : > { %11543 = vmatprep.subr.bf16.mxu0 %v12685_v37  ;;  %v14476_v9 = vpack.c.bf16 %v6487_v39, %v6486_v54  ;;  %v7047_v39 = vld [vmem:[#allocation2 + $0x7a] sm:$0xff]  ;;  %v7049_v54 = vld [vmem:[#allocation2 + $0x92] sm:$0xff] }
 0x548   : > { %v14515_v59 = vpack.c.bf16 %v7048_v62, %v7047_v39  ;;  %v7060_v39 = vld [vmem:[#allocation2 + $0x112] sm:$0xff]  ;;  %v7061_v62 = vld [vmem:[#allocation2 + $0x122] sm:$0xff] }
 0x54a   : > { %11544 = vmatpush3.bf16.msra.mxu0 %v12685_v37  ;;  %v6488_v37 = vld [vmem:[#allocation2 + $0x168] sm:$0xff] }
 0x54b   : > { %11577 = vmatprep.subr.bf16.mxu0 %v12686_v5  ;;  %v14482_v38 = vpack.c.bf16 %v6489_v44, %v6488_v37  ;;  %v14517_v44 = vpack.c.bf16 %v7050_v58, %v7049_v54  ;;  %v7051_v37 = vld [vmem:[#allocation2 + $0xaa] sm:$0xff] }
 0x54c   : > { %v7062_v54 = vld [vmem:[#allocation2 + $0x12a] sm:$0xff] }
 0x54d   : > { %11514 = vmatmul.mubr.msk.bf16.gmra.mrb[40].mxu0 %vm280_vm0, %v14442_v16 }
 0x54e   : > { %11517 = vmatprep.mubr.msk.bf16.mxu0 %vm280_vm0, %v14444_v51 }
 0x555   : > { %11518 = vmatmul.mubr.msk.bf16.gmra.mrb[44].mxu0 %vm280_vm0, %v14450_v46 }
 0x556   : > { %11521 = vmatprep.mubr.msk.bf16.mxu0 %vm280_vm0, %v14452_v31 }
 0x55d   : > { %11522 = vmatmul.mubr.msk.bf16.gmra.mrb[48].mxu0 %vm280_vm0, %v14458_v29 }
 0x55e   : > { %11525 = vmatprep.mubr.msk.bf16.mxu0 %vm280_vm0, %v14460_v63 }
 0x565   : > { %11526 = vmatmul.mubr.msk.bf16.gmra.mrb[52].mxu0 %vm280_vm0, %v14466_v7 }
 0x566   : > { %11529 = vmatprep.mubr.msk.bf16.mxu0 %vm280_vm0, %v14468_v8 }
 0x56d   : > { %11530 = vmatmul.mubr.msk.bf16.gmra.mrb[56].mxu0 %vm280_vm0, %v14474_v40 }
 0x56e   : > { %11533 = vmatprep.mubr.msk.bf16.mxu0 %vm280_vm0, %v14476_v9 }
 0x575   : > { %11534 = vmatmul.mubr.msk.bf16.gmra.mrb[60].mxu0 %vm280_vm0, %v14482_v38 }
 0x576   : > { %11545 = vmatprep.mubr.msk.bf16.mxu0 %vm280_vm0, %v7069_v33  ;;  %v7052_v33 = vld [vmem:[#allocation2 + $0xb2] sm:$0xff] }
 0x577   : > { %v14523_v6 = vpack.c.bf16 %v7052_v33, %v7051_v37  ;;  %v14541_v37 = vpack.c.bf16 %v7062_v54, %v7061_v62  ;;  %v7063_v33 = vld [vmem:[#allocation2 + $0x13a] sm:$0xff]  ;;  %v12691_v62 = vld [vmem:[%s14945_s5 + $0x88] sm:$0xff]   ;;  %v12692_v54 = vld [vmem:[%s14945_s5 + $0x90] sm:$0xff]  }
 0x57d   : > { %11546 = vmatmul.mubr.msk.bf16.vlgmr.msra.gmra.mrb[32].mxu0 %vm280_vm0, %v14487_v4 }
 0x57e   : > { %11549 = vmatprep.mubr.msk.bf16.mxu0 %vm280_vm0, %v14492_v23  ;;  %11578 = vmatpush3.bf16.msra.mxu0 %v12686_v5  ;;  %v12690_v5 = vld [vmem:[%s14945_s5 + $0x80] sm:$0xff]  }
 0x57f   : > { %11579 = vmatprep.subr.bf16.mxu0 %v12687_v53 }
 0x582   : > { %11580 = vmatpush3.bf16.msra.mxu0 %v12687_v53  ;;  %v7055_v53 = vld [vmem:[#allocation2 + $0xda] sm:$0xff] }
 0x583   : > { %11581 = vmatprep.subr.bf16.mxu0 %v12688_v41 }
 0x585   : > { %11550 = vmatmul.mubr.msk.bf16.gmra.mrb[36].mxu0 %vm280_vm0, %v14501_v47 }
 0x586   : > { %11553 = vmatprep.mubr.msk.bf16.mxu0 %vm280_vm0, %v14506_v3  ;;  %11582 = vmatpush3.bf16.msra.mxu0 %v12688_v41  ;;  %v7056_v41 = vld [vmem:[#allocation2 + $0xe2] sm:$0xff] }
 0x587   : > { %11583 = vmatprep.subr.bf16.mxu0 %v12689_v57  ;;  %v14531_v26 = vpack.c.bf16 %v7056_v41, %v7055_v53  ;;  %v7066_v53 = vld [vmem:[#allocation2 + $0x15a] sm:$0xff]  ;;  %v14547_v41 = vpack.c.bf16 %v7064_v50, %v7063_v33  ;;  %v7390_v33 = vld [vmem:[#allocation2 + $0x188] sm:$0xff] }
 0x588   : > { %v14549_v2 = vpack.c.bf16 %v7066_v53, %v7065_v52  ;;  %v7389_v50 = vld [vmem:[#allocation2 + $0x180] sm:$0xff]  ;;  %v12695_v53 = vld [vmem:[%s14945_s5 + $0xa8] sm:$0xff]  }
 0x589   : > { %v14601_v52 = vpack.c.bf16 %v7390_v33, %v7389_v50  ;;  %v12709_v33 = vld [vmem:[%s14945_s5 + $0x118] sm:$0xff]  }
 0x58a   : > { %11584 = vmatpush3.bf16.msra.mxu0 %v12689_v57  ;;  %v7059_v57 = vld [vmem:[#allocation2 + $0x10a] sm:$0xff] }
 0x58b   : > { %11617 = vmatprep.subr.bf16.mxu0 %v12690_v5  ;;  %v14539_v58 = vpack.c.bf16 %v7060_v39, %v7059_v57  ;;  %v7068_v57 = vld [vmem:[#allocation2 + $0x172] sm:$0xff] }
 0x58c   : > { %v14555_v39 = vpack.c.bf16 %v7068_v57, %v7067_v48  ;;  %v12696_v48 = vld [vmem:[%s14945_s5 + $0xb0] sm:$0xff]   ;;  %v8654_v57 = vld [vmem:[#allocation2 + $0x81] sm:$0xff] }
 0x58d   : > { %11554 = vmatmul.mubr.msk.bf16.gmra.mrb[40].mxu0 %vm280_vm0, %v14515_v59 }
 0x58e   : > { %11557 = vmatprep.mubr.msk.bf16.mxu0 %vm280_vm0, %v14517_v44 }
 0x595   : > { %11558 = vmatmul.mubr.msk.bf16.gmra.mrb[44].mxu0 %vm280_vm0, %v14523_v6 }
 0x596   : > { %11561 = vmatprep.mubr.msk.bf16.mxu0 %vm280_vm0, %v14525_v27 }
 0x59d   : > { %11562 = vmatmul.mubr.msk.bf16.gmra.mrb[48].mxu0 %vm280_vm0, %v14531_v26 }
 0x59e   : > { %11565 = vmatprep.mubr.msk.bf16.mxu0 %vm280_vm0, %v14533_v55 }
 0x5a5   : > { %11566 = vmatmul.mubr.msk.bf16.gmra.mrb[52].mxu0 %vm280_vm0, %v14539_v58 }
 0x5a6   : > { %11569 = vmatprep.mubr.msk.bf16.mxu0 %vm280_vm0, %v14541_v37 }
 0x5ad   : > { %11570 = vmatmul.mubr.msk.bf16.gmra.mrb[56].mxu0 %vm280_vm0, %v14547_v41 }
 0x5ae   : > { %11573 = vmatprep.mubr.msk.bf16.mxu0 %vm280_vm0, %v14549_v2 }
 0x5b5   : > { %11574 = vmatmul.mubr.msk.bf16.gmra.mrb[60].mxu0 %vm280_vm0, %v14555_v39 }
 0x5b6   : > { %11585 = vmatprep.mubr.msk.bf16.mxu0 %vm280_vm0, %v14413_v17  ;;  %v12693_v17 = vld [vmem:[%s14945_s5 + $0x98] sm:$0xff]  }
 0x5bd   : > { %11586 = vmatmul.mubr.msk.bf16.vlgmr.msra.gmra.mrb[32].mxu0 %vm280_vm0, %v14418_v25 }
 0x5be   : > { %11589 = vmatprep.mubr.msk.bf16.mxu0 %vm280_vm0, %v14428_v1  ;;  %11618 = vmatpush3.bf16.msra.mxu0 %v12690_v5  ;;  %v12694_v5 = vld [vmem:[%s14945_s5 + $0xa0] sm:$0xff]  }
 0x5bf   : > { %11619 = vmatprep.subr.bf16.mxu0 %v12691_v62 }
 0x5c2   : > { %11620 = vmatpush3.bf16.msra.mxu0 %v12691_v62  ;;  %v8656_v62 = vld [vmem:[#allocation2 + $0x99] sm:$0xff] }
 0x5c3   : > { %11621 = vmatprep.subr.bf16.mxu0 %v12692_v54 }
 0x5c5   : > { %11590 = vmatmul.mubr.msk.bf16.gmra.mrb[36].mxu0 %vm280_vm0, %v14433_v12 }
 0x5c6   : > { %11593 = vmatprep.mubr.msk.bf16.mxu0 %vm280_vm0, %v14442_v16  ;;  %11622 = vmatpush3.bf16.msra.mxu0 %v12692_v54  ;;  %v8653_v54 = vld [vmem:[#allocation2 + $0x79] sm:$0xff] }
 0x5c7   : > { %11623 = vmatprep.subr.bf16.mxu0 %v12693_v17 }
 0x5ca   : > { %11624 = vmatpush3.bf16.msra.mxu0 %v12693_v17  ;;  %v8682_v17 = vpack.c.bf16 %v8654_v57, %v8653_v54 }
 0x5cb   : > { %11657 = vmatprep.subr.bf16.mxu0 %v12694_v5 }
 0x5cd   : > { %11594 = vmatmul.mubr.msk.bf16.gmra.mrb[40].mxu0 %vm280_vm0, %v14444_v51 }
 0x5ce   : > { %11597 = vmatprep.mubr.msk.bf16.mxu0 %vm280_vm0, %v14450_v46 }
 0x5d5   : > { %11598 = vmatmul.mubr.msk.bf16.gmra.mrb[44].mxu0 %vm280_vm0, %v14452_v31 }
 0x5d6   : > { %11601 = vmatprep.mubr.msk.bf16.mxu0 %vm280_vm0, %v14458_v29 }
 0x5dd   : > { %11602 = vmatmul.mubr.msk.bf16.gmra.mrb[48].mxu0 %vm280_vm0, %v14460_v63 }
 0x5de   : > { %11605 = vmatprep.mubr.msk.bf16.mxu0 %vm280_vm0, %v14466_v7 }
 0x5e5   : > { %11606 = vmatmul.mubr.msk.bf16.gmra.mrb[52].mxu0 %vm280_vm0, %v14468_v8 }
 0x5e6   : > { %11609 = vmatprep.mubr.msk.bf16.mxu0 %vm280_vm0, %v14474_v40 }
 0x5ed   : > { %11610 = vmatmul.mubr.msk.bf16.gmra.mrb[56].mxu0 %vm280_vm0, %v14476_v9 }
 0x5ee   : > { %11613 = vmatprep.mubr.msk.bf16.mxu0 %vm280_vm0, %v14482_v38 }
 0x5f5   : > { %11614 = vmatmul.mubr.msk.bf16.gmra.mrb[60].mxu0 %vm280_vm0, %v14601_v52 }
 0x5f6   : > { %11625 = vmatprep.mubr.msk.bf16.mxu0 %vm280_vm0, %v14289_v13  ;;  %v12697_v13 = vld [vmem:[%s14945_s5 + $0xb8] sm:$0xff]  }
 0x5fd   : > { %11626 = vmatmul.mubr.msk.bf16.vlgmr.msra.gmra.mrb[32].mxu0 %vm280_vm0, %v14295_v42  ;;  %v12698_v42 = vld [vmem:[%s14945_s5 + $0xc0] sm:$0xff]  }
 0x5fe   : > { %11629 = vmatprep.mubr.msk.bf16.mxu0 %vm280_vm0, %v14312_v61  ;;  %11658 = vmatpush3.bf16.msra.mxu0 %v12694_v5  ;;  %v7712_v61 = vld [vmem:[#allocation2 + $0x189] sm:$0xff]  ;;  %v8655_v5 = vld [vmem:[#allocation2 + $0x91] sm:$0xff] }
 0x5ff   : > { %11659 = vmatprep.subr.bf16.mxu0 %v12695_v53  ;;  %v8683_v50 = vpack.c.bf16 %v8656_v62, %v8655_v5 }
 0x602   : > { %11660 = vmatpush3.bf16.msra.mxu0 %v12695_v53  ;;  %v8660_v53 = vld [vmem:[#allocation2 + $0xc9] sm:$0xff] }
 0x603   : > { %11661 = vmatprep.subr.bf16.mxu0 %v12696_v48 }
 0x605   : > { %11630 = vmatmul.mubr.msk.bf16.gmra.mrb[36].mxu0 %vm280_vm0, %v14318_v43  ;;  %v7711_v43 = vld [vmem:[#allocation2 + $0x181] sm:$0xff] }
 0x606   : > { %11633 = vmatprep.mubr.msk.bf16.mxu0 %vm280_vm0, %v14336_v36  ;;  %11662 = vmatpush3.bf16.msra.mxu0 %v12696_v48  ;;  %v14647_v36 = vpack.c.bf16 %v7712_v61, %v7711_v43  ;;  %v8657_v48 = vld [vmem:[#allocation2 + $0xa9] sm:$0xff]  ;;  %v8662_v43 = vld [vmem:[#allocation2 + $0xe1] sm:$0xff] }
 0x607   : > { %11663 = vmatprep.subr.bf16.mxu0 %v12697_v13 }
 0x60a   : > { %11664 = vmatpush3.bf16.msra.mxu0 %v12697_v13 }
 0x60b   : > { %11697 = vmatprep.subr.bf16.mxu0 %v12698_v42 }
 0x60d   : > { %11634 = vmatmul.mubr.msk.bf16.gmra.mrb[40].mxu0 %vm280_vm0, %v14340_v0  ;;  %v12699_v0 = vld [vmem:[%s14945_s5 + $0xc8] sm:$0xff]  }
 0x60e   : > { %11637 = vmatprep.mubr.msk.bf16.mxu0 %vm280_vm0, %v14353_v35  ;;  %v12700_v35 = vld [vmem:[%s14945_s5 + $0xd0] sm:$0xff]  }
 0x615   : > { %11638 = vmatmul.mubr.msk.bf16.gmra.mrb[44].mxu0 %vm280_vm0, %v14356_v45  ;;  %v12701_v45 = vld [vmem:[%s14945_s5 + $0xd8] sm:$0xff]  }
 0x616   : > { %11641 = vmatprep.mubr.msk.bf16.mxu0 %vm280_vm0, %v14369_v32  ;;  %v12702_v32 = vld [vmem:[%s14945_s5 + $0xe0] sm:$0xff]  }
 0x61d   : > { %11642 = vmatmul.mubr.msk.bf16.gmra.mrb[48].mxu0 %vm280_vm0, %v14372_v34  ;;  %v8033_v34 = vld [vmem:[#allocation2 + $0x182] sm:$0xff] }
 0x61e   : > { %11645 = vmatprep.mubr.msk.bf16.mxu0 %vm280_vm0, %v14385_v60  ;;  %v8034_v60 = vld [vmem:[#allocation2 + $0x18a] sm:$0xff] }
 0x625   : > { %11646 = vmatmul.mubr.msk.bf16.gmra.mrb[52].mxu0 %vm280_vm0, %v14388_v56  ;;  %v14693_v56 = vpack.c.bf16 %v8034_v60, %v8033_v34  ;;  %v8666_v60 = vld [vmem:[#allocation2 + $0x111] sm:$0xff] }
 0x626   : > { %11649 = vmatprep.mubr.msk.bf16.mxu0 %vm280_vm0, %v14400_v49  ;;  %v12703_v49 = vld [vmem:[%s14945_s5 + $0xe8] sm:$0xff]  }
 0x62d   : > { %11650 = vmatmul.mubr.msk.bf16.gmra.mrb[56].mxu0 %vm280_vm0, %v14402_v28  ;;  %v12704_v28 = vld [vmem:[%s14945_s5 + $0xf0] sm:$0xff]  }
 0x62e   : > { %11653 = vmatprep.mubr.msk.bf16.mxu0 %vm280_vm0, %v14408_v30  ;;  %v12705_v30 = vld [vmem:[%s14945_s5 + $0xf8] sm:$0xff]  }
 0x635   : > { %11654 = vmatmul.mubr.msk.bf16.gmra.mrb[60].mxu0 %vm280_vm0, %v14647_v36 }
 0x636   : > { %11665 = vmatprep.mubr.msk.bf16.mxu0 %vm280_vm0, %v14487_v4  ;;  %v12708_v4 = vld [vmem:[%s14945_s5 + $0x110] sm:$0xff]  }
 0x63d   : > { %11666 = vmatmul.mubr.msk.bf16.vlgmr.msra.gmra.mrb[32].mxu0 %vm280_vm0, %v14492_v23 }
 0x63e   : > { %11669 = vmatprep.mubr.msk.bf16.mxu0 %vm280_vm0, %v14501_v47  ;;  %11698 = vmatpush3.bf16.msra.mxu0 %v12698_v42  ;;  %v8659_v42 = vld [vmem:[#allocation2 + $0xc1] sm:$0xff] }
 0x63f   : > { %11699 = vmatprep.subr.bf16.mxu0 %v12699_v0  ;;  %v8685_v61 = vpack.c.bf16 %v8660_v53, %v8659_v42 }
 0x642   : > { %11700 = vmatpush3.bf16.msra.mxu0 %v12699_v0  ;;  %v8664_v0 = vld [vmem:[#allocation2 + $0xf9] sm:$0xff] }
 0x643   : > { %11701 = vmatprep.subr.bf16.mxu0 %v12700_v35 }
 0x645   : > { %11670 = vmatmul.mubr.msk.bf16.gmra.mrb[36].mxu0 %vm280_vm0, %v14506_v3 }
 0x646   : > { %11673 = vmatprep.mubr.msk.bf16.mxu0 %vm280_vm0, %v14515_v59  ;;  %11702 = vmatpush3.bf16.msra.mxu0 %v12700_v35  ;;  %v8661_v35 = vld [vmem:[#allocation2 + $0xd9] sm:$0xff] }
 0x647   : > { %11703 = vmatprep.subr.bf16.mxu0 %v12701_v45 }
 0x64a   : > { %11704 = vmatpush3.bf16.msra.mxu0 %v12701_v45  ;;  %v8686_v45 = vpack.c.bf16 %v8662_v43, %v8661_v35  ;;  %v14992_v43 = vld [vmem:[#allocation5_spill] sm:$0xff]  ;;  %v14993_v35 = vld [vmem:[#allocation4_spill] sm:$0xff] }
 0x64b   : > { %11737 = vmatprep.subr.bf16.mxu0 %v12702_v32 }
 0x64d   : > { %11674 = vmatmul.mubr.msk.bf16.gmra.mrb[40].mxu0 %vm280_vm0, %v14517_v44 }
 0x64e   : > { %11677 = vmatprep.mubr.msk.bf16.mxu0 %vm280_vm0, %v14523_v6 }
 0x655   : > { %11678 = vmatmul.mubr.msk.bf16.gmra.mrb[44].mxu0 %vm280_vm0, %v14525_v27 }
 0x656   : > { %11681 = vmatprep.mubr.msk.bf16.mxu0 %vm280_vm0, %v14531_v26 }
 0x65d   : > { %11682 = vmatmul.mubr.msk.bf16.gmra.mrb[48].mxu0 %vm280_vm0, %v14533_v55 }
 0x65e   : > { %11685 = vmatprep.mubr.msk.bf16.mxu0 %vm280_vm0, %v14539_v58 }
 0x665   : > { %11686 = vmatmul.mubr.msk.bf16.gmra.mrb[52].mxu0 %vm280_vm0, %v14541_v37 }
 0x666   : > { %11689 = vmatprep.mubr.msk.bf16.mxu0 %vm280_vm0, %v14547_v41 }
 0x66d   : > { %11690 = vmatmul.mubr.msk.bf16.gmra.mrb[56].mxu0 %vm280_vm0, %v14549_v2 }
 0x66e   : > { %11693 = vmatprep.mubr.msk.bf16.mxu0 %vm280_vm0, %v14555_v39 }
 0x675   : > { %11694 = vmatmul.mubr.msk.bf16.gmra.mrb[60].mxu0 %vm280_vm0, %v14693_v56 }
 0x676   : > { %11705 = vmatprep.mubr.msk.bf16.mxu0 %vm280_vm0, %v14418_v25  ;;  %v12706_v25 = vld [vmem:[%s14945_s5 + $0x100] sm:$0xff]  }
 0x67d   : > { %11706 = vmatmul.mubr.msk.bf16.vlgmr.msra.gmra.mrb[32].mxu0 %vm280_vm0, %v14428_v1  ;;  %v8355_v1 = vld [vmem:[#allocation2 + $0x198] sm:$0xff] }
 0x67e   : > { %11709 = vmatprep.mubr.msk.bf16.mxu0 %vm280_vm0, %v14433_v12  ;;  %11738 = vmatpush3.bf16.msra.mxu0 %v12702_v32  ;;  %v8356_v12 = vld [vmem:[#allocation2 + $0x1a0] sm:$0xff]  ;;  %v8663_v32 = vld [vmem:[#allocation2 + $0xf1] sm:$0xff] }
 0x67f   : > { %11739 = vmatprep.subr.bf16.mxu0 %v12703_v49  ;;  %v8687_v34 = vpack.c.bf16 %v8664_v0, %v8663_v32 }
 0x682   : > { %11740 = vmatpush3.bf16.msra.mxu0 %v12703_v49  ;;  %v8668_v49 = vld [vmem:[#allocation2 + $0x129] sm:$0xff] }
 0x683   : > { %11741 = vmatprep.subr.bf16.mxu0 %v12704_v28 }
 0x685   : > { %11710 = vmatmul.mubr.msk.bf16.gmra.mrb[36].mxu0 %vm280_vm0, %v14442_v16  ;;  %v8372_v16 = vpack.c.bf16 %v8356_v12, %v8355_v1  ;;  %v8670_v12 = vld [vmem:[#allocation2 + $0x141] sm:$0xff] }
 0x686   : > { %11713 = vmatprep.mubr.msk.bf16.mxu0 %vm280_vm0, %v14444_v51  ;;  %11742 = vmatpush3.bf16.msra.mxu0 %v12704_v28  ;;  %v8648_v51 = vld [vmem:[#allocation2 + $0x39] sm:$0xff]  ;;  %v8665_v28 = vld [vmem:[#allocation2 + $0x109] sm:$0xff] }
 0x687   : > { %11743 = vmatprep.subr.bf16.mxu0 %v12705_v30 }
 0x68a   : > { %11744 = vmatpush3.bf16.msra.mxu0 %v12705_v30  ;;  %v8688_v30 = vpack.c.bf16 %v8666_v60, %v8665_v28 }
 0x68b   : > { %11777 = vmatprep.subr.bf16.mxu0 %v12706_v25 }
 0x68d   : > { %11714 = vmatmul.mubr.msk.bf16.gmra.mrb[40].mxu0 %vm280_vm0, %v14450_v46  ;;  %v8647_v46 = vld [vmem:[#allocation2 + $0x31] sm:$0xff] }
 0x68e   : > { %11717 = vmatprep.mubr.msk.bf16.mxu0 %vm280_vm0, %v14452_v31  ;;  %v8679_v31 = vpack.c.bf16 %v8648_v51, %v8647_v46  ;;  %v8669_v51 = vld [vmem:[#allocation2 + $0x139] sm:$0xff] }
 0x68f   : > { %v8690_v46 = vpack.c.bf16 %v8670_v12, %v8669_v51  ;;  %v14996_v51 = vld [vmem:[#allocation9_spill] sm:$0xff] }
 0x695   : > { %11718 = vmatmul.mubr.msk.bf16.gmra.mrb[44].mxu0 %vm280_vm0, %v14458_v29  ;;  %v8650_v29 = vld [vmem:[#allocation2 + $0x51] sm:$0xff] }
 0x696   : > { %11721 = vmatprep.mubr.msk.bf16.mxu0 %vm280_vm0, %v14460_v63  ;;  %v8652_v63 = vld [vmem:[#allocation2 + $0x69] sm:$0xff] }
 0x69d   : > { %11722 = vmatmul.mubr.msk.bf16.gmra.mrb[48].mxu0 %vm280_vm0, %v14466_v7  ;;  %v8649_v7 = vld [vmem:[#allocation2 + $0x49] sm:$0xff] }
 0x69e   : > { %11725 = vmatprep.mubr.msk.bf16.mxu0 %vm280_vm0, %v14468_v8  ;;  %v8680_v8 = vpack.c.bf16 %v8650_v29, %v8649_v7  ;;  %v8673_v7 = vld [vmem:[#allocation2 + $0x169] sm:$0xff] }
 0x6a5   : > { %11726 = vmatmul.mubr.msk.bf16.gmra.mrb[52].mxu0 %vm280_vm0, %v14474_v40  ;;  %v8651_v40 = vld [vmem:[#allocation2 + $0x61] sm:$0xff] }
 0x6a6   : > { %11729 = vmatprep.mubr.msk.bf16.mxu0 %vm280_vm0, %v14476_v9  ;;  %v12707_v9 = vld [vmem:[%s14945_s5 + $0x108] sm:$0xff]  }
 0x6ad   : > { %11730 = vmatmul.mubr.msk.bf16.gmra.mrb[56].mxu0 %vm280_vm0, %v14482_v38  ;;  %v8681_v38 = vpack.c.bf16 %v8652_v63, %v8651_v40  ;;  %v8674_v63 = vld [vmem:[#allocation2 + $0x171] sm:$0xff]  ;;  %v8677_v40 = vld [vmem:[#allocation2 + $0x199] sm:$0xff] }
 0x6ae   : > { %11733 = vmatprep.mubr.msk.bf16.mxu0 %vm280_vm0, %v14601_v52  ;;  %v8658_v52 = vld [vmem:[#allocation2 + $0xb1] sm:$0xff] }
 0x6af   : > { %v8684_v13 = vpack.c.bf16 %v8658_v52, %v8657_v48 }
 0x6b5   : > { %11734 = vmatmul.mubr.msk.bf16.gmra.mrb[60].mxu0 %vm280_vm0, %v8372_v16  ;;  %v8672_v16 = vld [vmem:[#allocation2 + $0x159] sm:$0xff] }
 0x6b6   : > { %11745 = vmatprep.mubr.msk.bf16.mxu0 %vm280_vm0, %v8679_v31  ;;  %v8671_v31 = vld [vmem:[#allocation2 + $0x151] sm:$0xff] }
 0x6b7   : > { %v8691_v29 = vpack.c.bf16 %v8672_v16, %v8671_v31  ;;  %v14997_v31 = vld [vmem:[#allocation7_spill] sm:$0xff] }
 0x6bd   : > { %11746 = vmatmul.mubr.msk.bf16.vlgmr.msra.gmra.mrb[32].mxu0 %vm280_vm0, %v8680_v8  ;;  %v8692_v8 = vpack.c.bf16 %v8674_v63, %v8673_v7 }
 0x6be   : > { %11749 = vmatprep.mubr.msk.bf16.mxu0 %vm280_vm0, %v8681_v38  ;;  %11778 = vmatpush3.bf16.msra.mxu0 %v12706_v25  ;;  %v8667_v25 = vld [vmem:[#allocation2 + $0x121] sm:$0xff] }
 0x6bf   : > { %11779 = vmatprep.subr.bf16.mxu0 %v12707_v9  ;;  %v8689_v1 = vpack.c.bf16 %v8668_v49, %v8667_v25  ;;  %v14994_v49 = vld [vmem:[#allocation8_spill] sm:$0xff] }
 0x6c2   : > { %11780 = vmatpush3.bf16.msra.mxu0 %v12707_v9  ;;  %v8678_v9 = vld [vmem:[#allocation2 + $0x1a1] sm:$0xff] }
 0x6c3   : > { %11781 = vmatprep.subr.bf16.mxu0 %v12708_v4  ;;  %v8694_v38 = vpack.c.bf16 %v8678_v9, %v8677_v40 }
 0x6c5   : > { %11750 = vmatmul.mubr.msk.bf16.gmra.mrb[36].mxu0 %vm280_vm0, %v8682_v17 }
 0x6c6   : > { %11753 = vmatprep.mubr.msk.bf16.mxu0 %vm280_vm0, %v8683_v50  ;;  %11782 = vmatpush3.bf16.msra.mxu0 %v12708_v4 }
 0x6c7   : > { %11783 = vmatprep.subr.bf16.mxu0 %v12709_v33 }
 0x6ca   : > { %11784 = vmatpush3.bf16.msra.mxu0 %v12709_v33 }
 0x6cd   : > { %11754 = vmatmul.mubr.msk.bf16.gmra.mrb[40].mxu0 %vm280_vm0, %v8684_v13 }
 0x6ce   : > { %11757 = vmatprep.mubr.msk.bf16.mxu0 %vm280_vm0, %v8685_v61 }
 0x6d5   : > { %11758 = vmatmul.mubr.msk.bf16.gmra.mrb[44].mxu0 %vm280_vm0, %v8686_v45 }
 0x6d6   : > { %11761 = vmatprep.mubr.msk.bf16.mxu0 %vm280_vm0, %v8687_v34 }
 0x6dd   : > { %11762 = vmatmul.mubr.msk.bf16.gmra.mrb[48].mxu0 %vm280_vm0, %v8688_v30 }
 0x6de   : > { %11765 = vmatprep.mubr.msk.bf16.mxu0 %vm280_vm0, %v8689_v1  ;;  %v14995_v1 = vld [vmem:[#allocation6_spill] sm:$0xff] }
 0x6e5   : > { %11766 = vmatmul.mubr.msk.bf16.gmra.mrb[52].mxu0 %vm280_vm0, %v8690_v46 }
 0x6e6   : > { %11769 = vmatprep.mubr.msk.bf16.mxu0 %vm280_vm0, %v8691_v29 }
 0x6ed   : > { %11770 = vmatmul.mubr.msk.bf16.gmra.mrb[56].mxu0 %vm280_vm0, %v8692_v8 }
 0x6ee   : > { %11773 = vmatprep.mubr.msk.bf16.mxu0 %vm280_vm0, %v14647_v36 }
 0x6f5   : > { %11774 = vmatmul.mubr.msk.bf16.gmra.mrb[60].mxu0 %vm280_vm0, %v8694_v38  ;;  %v14998_v38 = vld [vmem:[#allocation12_spill] sm:$0xff] }
 0x6f6   : > { %11785 = vmatprep.mubr.msk.bf16.mxu0 %vm280_vm0, %v14492_v23  ;;  %v8999_v23 = vld [vmem:[#allocation2 + $0x19a] sm:$0xff] }
 0x6fd   : > { %11786 = vmatmul.mubr.msk.bf16.vlgmr.msra.gmra.mrb[32].mxu0 %vm280_vm0, %v14501_v47  ;;  %v9000_v47 = vld [vmem:[#allocation2 + $0x1a2] sm:$0xff] }
 0x6fe   : > { %11789 = vmatprep.mubr.msk.bf16.mxu0 %vm280_vm0, %v14506_v3  ;;  %v9016_v3 = vpack.c.bf16 %v9000_v47, %v8999_v23 }
 0x705   : > { %11790 = vmatmul.mubr.msk.bf16.gmra.mrb[36].mxu0 %vm280_vm0, %v14515_v59  ;;  %v14800_v59 = vld [vmem:[%s14946_s6] ss:$0 sm:$0xff] }
 0x706   : > { %11793 = vmatprep.mubr.msk.bf16.mxu0 %vm280_vm0, %v14517_v44 }
 0x70d   : > { %11794 = vmatmul.mubr.msk.bf16.gmra.mrb[40].mxu0 %vm280_vm0, %v14523_v6 }
 0x70e   : > { %11797 = vmatprep.mubr.msk.bf16.mxu0 %vm280_vm0, %v14525_v27 }
 0x715   : > { %11798 = vmatmul.mubr.msk.bf16.gmra.mrb[44].mxu0 %vm280_vm0, %v14531_v26 }
 0x716   : > { %11801 = vmatprep.mubr.msk.bf16.mxu0 %vm280_vm0, %v14533_v55 }
 0x71d   : > { %11802 = vmatmul.mubr.msk.bf16.gmra.mrb[48].mxu0 %vm280_vm0, %v14539_v58 }
 0x71e   : > { %11805 = vmatprep.mubr.msk.bf16.mxu0 %vm280_vm0, %v14541_v37 }
 0x725   : > { %11806 = vmatmul.mubr.msk.bf16.gmra.mrb[52].mxu0 %vm280_vm0, %v14547_v41 }
 0x726   : > { %11809 = vmatprep.mubr.msk.bf16.mxu0 %vm280_vm0, %v14549_v2 }
 0x72d   : > { %11810 = vmatmul.mubr.msk.bf16.gmra.mrb[56].mxu0 %vm280_vm0, %v14555_v39 }
 0x72e   : > { %11813 = vmatprep.mubr.msk.bf16.mxu0 %vm280_vm0, %v14693_v56 }
 0x735   : > { %11814 = vmatmul.mubr.msk.bf16.gmra.mrb[60].mxu0 %vm280_vm0, %v9016_v3 }
 0x7d0   : > { %v11787_v44 = vpop.f32.mrb[32].mxu0 }
 0x7d1   : > { %v9300_v6 = vadd.f32 %v11787_v44, %v14800_v59  ;;  %v9132_v27 = vpop.f32.mrb[33].mxu0  ;;  %v14999_v44 = vld [vmem:[#allocation10_spill] sm:$0xff] }
 0x7d2   : > { %v9298_v26 = vadd.f32 %v14800_v59, %v9132_v27  ;;  %v11788_v55 = vpop.f32.mrb[34].mxu0 }
 0x7d3   : > { %v9332_v58 = vadd.f32 %v9300_v6, %v13051_v14  ;;  %v9301_v37 = vadd.f32 %v11788_v55, %v14800_v59  ;;  %v9135_v41 = vpop.f32.mrb[35].mxu0 }
 0x7d4   : > { %v9330_v2 = vadd.f32 %v9298_v26, %v13038_v10  ;;  %v9299_v39 = vadd.f32 %v14800_v59, %v9135_v41  ;;  %v15000_v26 = vld [vmem:[#allocation13_spill] sm:$0xff] }
 0x7d5   : > { %9364 = vst.msk [vmem:[%s14808_s19 + $0x10] sm:$0xff] %vm280_vm0, %v9332_v58  ;;  %v9333_v36 = vadd.f32 %v9301_v37, %v13054_v15  ;;  %v15001_v58 = vld [vmem:[#allocation11_spill] sm:$0xff] }
 0x7d6   : > { %9362 = vst.msk [vmem:[%s14808_s19] sm:$0xff] %vm280_vm0, %v9330_v2  ;;  %v9331_v56 = vadd.f32 %v9299_v39, %v13041_v11 }
 0x7d7   : > { %9365 = vst.msk [vmem:[%s14808_s19 + $0x18] sm:$0xff] %vm280_vm0, %v9333_v36 }
 0x7d8   : > { %9363 = vst.msk [vmem:[%s14808_s19 + $0x8] sm:$0xff] %vm280_vm0, %v9331_v56  ;;  %v11791_v14 = vpop.f32.mrb[36].mxu0 }
 0x7d9   : > { %v9304_v10 = vadd.f32 %v11791_v14, %v14800_v59  ;;  %v9148_v4 = vpop.f32.mrb[37].mxu0  ;;  %v15002_v14 = vld [vmem:[#allocation16_spill] sm:$0xff] }
 0x7da   : > { %v9302_v57 = vadd.f32 %v14800_v59, %v9148_v4  ;;  %v11792_v62 = vpop.f32.mrb[38].mxu0 }
 0x7db   : > { %v9336_v15 = vadd.f32 %v9304_v10, %v13070_v20  ;;  %v9305_v54 = vadd.f32 %v11792_v62, %v14800_v59  ;;  %v9151_v17 = vpop.f32.mrb[39].mxu0  ;;  %v15003_v62 = vld [vmem:[#allocation14_spill] sm:$0xff] }
 0x7dc   : > { %v9334_v11 = vadd.f32 %v9302_v57, %v13064_v18  ;;  %v9303_v5 = vadd.f32 %v14800_v59, %v9151_v17  ;;  %v15004_v17 = vld [vmem:[#allocation17_spill] sm:$0xff] }
 0x7dd   : > { %9368 = vst.msk [vmem:[%s14808_s19 + $0x30] sm:$0xff] %vm280_vm0, %v9336_v15  ;;  %v9337_v33 = vadd.f32 %v9305_v54, %v13078_v21 }
 0x7de   : > { %9366 = vst.msk [vmem:[%s14808_s19 + $0x20] sm:$0xff] %vm280_vm0, %v9334_v11  ;;  %v9335_v50 = vadd.f32 %v9303_v5, %v13067_v19  ;;  %v15005_v5 = vld [vmem:[#allocation15_spill] sm:$0xff] }
 0x7df   : > { %9369 = vst.msk [vmem:[%s14808_s19 + $0x38] sm:$0xff] %vm280_vm0, %v9337_v33 }
 0x7e0   : > { %9367 = vst.msk [vmem:[%s14808_s19 + $0x28] sm:$0xff] %vm280_vm0, %v9335_v50  ;;  %v11795_v20 = vpop.f32.mrb[40].mxu0 }
 0x7e1   : > { %v9308_v18 = vadd.f32 %v11795_v20, %v14800_v59  ;;  %v9164_v52 = vpop.f32.mrb[41].mxu0 }
 0x7e2   : > { %v9306_v53 = vadd.f32 %v14800_v59, %v9164_v52  ;;  %v11796_v48 = vpop.f32.mrb[42].mxu0 }
 0x7e3   : > { %v9340_v21 = vadd.f32 %v9308_v18, %v13095_v24  ;;  %v9309_v13 = vadd.f32 %v11796_v48, %v14800_v59  ;;  %v9167_v42 = vpop.f32.mrb[43].mxu0  ;;  %v15006_v48 = vld [vmem:[#allocation20_spill] sm:$0xff] }
 0x7e4   : > { %v9338_v19 = vadd.f32 %v9306_v53, %v13085_v22  ;;  %v9307_v61 = vadd.f32 %v14800_v59, %v9167_v42 }
 0x7e5   : > { %9372 = vst.msk [vmem:[%s14808_s19 + $0x50] sm:$0xff] %vm280_vm0, %v9340_v21  ;;  %v9341_v0 = vadd.f32 %v9309_v13, %v14992_v43 }
 0x7e6   : > { %9370 = vst.msk [vmem:[%s14808_s19 + $0x40] sm:$0xff] %vm280_vm0, %v9338_v19  ;;  %v9339_v45 = vadd.f32 %v9307_v61, %v14993_v35  ;;  %v15007_v19 = vld [vmem:[#allocation18_spill] sm:$0xff] }
 0x7e7   : > { %9373 = vst.msk [vmem:[%s14808_s19 + $0x58] sm:$0xff] %vm280_vm0, %v9341_v0  ;;  %v15008_v0 = vld [vmem:[#allocation21_spill] sm:$0xff] }
 0x7e8   : > { %9371 = vst.msk [vmem:[%s14808_s19 + $0x48] sm:$0xff] %vm280_vm0, %v9339_v45  ;;  %v11799_v24 = vpop.f32.mrb[44].mxu0  ;;  %v15009_v45 = vld [vmem:[#allocation19_spill] sm:$0xff] }
 0x7e9   : > { %v9312_v22 = vadd.f32 %v11799_v24, %v14800_v59  ;;  %v9180_v32 = vpop.f32.mrb[45].mxu0 }
 0x7ea   : > { %v9310_v34 = vadd.f32 %v14800_v59, %v9180_v32  ;;  %v11800_v60 = vpop.f32.mrb[46].mxu0 }
 0x7eb   : > { %v9344_v28 = vadd.f32 %v9312_v22, %v14994_v49  ;;  %v9313_v30 = vadd.f32 %v11800_v60, %v14800_v59  ;;  %v9183_v25 = vpop.f32.mrb[47].mxu0 }
 0x7ec   : > { %v9342_v12 = vadd.f32 %v9310_v34, %v14995_v1  ;;  %v9311_v16 = vadd.f32 %v14800_v59, %v9183_v25 }
 0x7ed   : > { %9376 = vst.msk [vmem:[%s14808_s19 + $0x70] sm:$0xff] %vm280_vm0, %v9344_v28  ;;  %v9345_v46 = vadd.f32 %v9313_v30, %v14996_v51  ;;  %v15010_v28 = vld [vmem:[#allocation24_spill] sm:$0xff] }
 0x7ee   : > { %9374 = vst.msk [vmem:[%s14808_s19 + $0x60] sm:$0xff] %vm280_vm0, %v9342_v12  ;;  %v9343_v29 = vadd.f32 %v9311_v16, %v14997_v31  ;;  %v15011_v12 = vld [vmem:[#allocation22_spill] sm:$0xff] }
 0x7ef   : > { %9377 = vst.msk [vmem:[%s14808_s19 + $0x78] sm:$0xff] %vm280_vm0, %v9345_v46  ;;  %v15012_v46 = vld [vmem:[#allocation25_spill] sm:$0xff] }
 0x7f0   : > { %9375 = vst.msk [vmem:[%s14808_s19 + $0x68] sm:$0xff] %vm280_vm0, %v9343_v29  ;;  %v11803_v63 = vpop.f32.mrb[48].mxu0  ;;  %v15013_v29 = vld [vmem:[#allocation23_spill] sm:$0xff] }
 0x7f1   : > { %v9316_v7 = vadd.f32 %v11803_v63, %v14800_v59  ;;  %v9196_v8 = vpop.f32.mrb[49].mxu0 }
 0x7f2   : > { %v9314_v40 = vadd.f32 %v14800_v59, %v9196_v8  ;;  %v11804_v9 = vpop.f32.mrb[50].mxu0 }
 0x7f3   : > { %v9348_v23 = vadd.f32 %v9316_v7, %v14998_v38  ;;  %v9317_v47 = vadd.f32 %v11804_v9, %v14800_v59  ;;  %v9199_v3 = vpop.f32.mrb[51].mxu0 }
 0x7f4   : > { %v9346_v6 = vadd.f32 %v9314_v40, %v14999_v44  ;;  %v9315_v27 = vadd.f32 %v14800_v59, %v9199_v3 }
 0x7f5   : > { %9380 = vst.msk [vmem:[%s14808_s19 + $0x90] sm:$0xff] %vm280_vm0, %v9348_v23  ;;  %v9349_v55 = vadd.f32 %v9317_v47, %v15000_v26 }
 0x7f6   : > { %9378 = vst.msk [vmem:[%s14808_s19 + $0x80] sm:$0xff] %vm280_vm0, %v9346_v6  ;;  %v9347_v37 = vadd.f32 %v9315_v27, %v15001_v58 }
 0x7f7   : > { %9381 = vst.msk [vmem:[%s14808_s19 + $0x98] sm:$0xff] %vm280_vm0, %v9349_v55 }
 0x7f8   : > { %9379 = vst.msk [vmem:[%s14808_s19 + $0x88] sm:$0xff] %vm280_vm0, %v9347_v37  ;;  %v11807_v41 = vpop.f32.mrb[52].mxu0 }
 0x7f9   : > { %v9320_v2 = vadd.f32 %v11807_v41, %v14800_v59  ;;  %v9212_v39 = vpop.f32.mrb[53].mxu0 }
 0x7fa   : > { %v9318_v36 = vadd.f32 %v14800_v59, %v9212_v39  ;;  %v11808_v56 = vpop.f32.mrb[54].mxu0 }
 0x7fb   : > { %v9352_v10 = vadd.f32 %v9320_v2, %v15002_v14  ;;  %v9321_v4 = vadd.f32 %v11808_v56, %v14800_v59  ;;  %v9215_v57 = vpop.f32.mrb[55].mxu0 }
 0x7fc   : > { %v9350_v15 = vadd.f32 %v9318_v36, %v15003_v62  ;;  %v9319_v54 = vadd.f32 %v14800_v59, %v9215_v57 }
 0x7fd   : > { %9384 = vst.msk [vmem:[%s14808_s19 + $0xb0] sm:$0xff] %vm280_vm0, %v9352_v10  ;;  %v9353_v11 = vadd.f32 %v9321_v4, %v15004_v17 }
 0x7fe   : > { %9382 = vst.msk [vmem:[%s14808_s19 + $0xa0] sm:$0xff] %vm280_vm0, %v9350_v15  ;;  %v9351_v33 = vadd.f32 %v9319_v54, %v15005_v5 }
 0x7ff   : > { %9385 = vst.msk [vmem:[%s14808_s19 + $0xb8] sm:$0xff] %vm280_vm0, %v9353_v11 }
 0x800   : > { %9383 = vst.msk [vmem:[%s14808_s19 + $0xa8] sm:$0xff] %vm280_vm0, %v9351_v33  ;;  %v11811_v50 = vpop.f32.mrb[56].mxu0 }
 0x801   : > { %v9324_v20 = vadd.f32 %v11811_v50, %v14800_v59  ;;  %v9228_v18 = vpop.f32.mrb[57].mxu0 }
 0x802   : > { %v9322_v52 = vadd.f32 %v14800_v59, %v9228_v18  ;;  %v11812_v53 = vpop.f32.mrb[58].mxu0 }
 0x803   : > { %v9356_v21 = vadd.f32 %v9324_v20, %v15006_v48  ;;  %v9325_v13 = vadd.f32 %v11812_v53, %v14800_v59  ;;  %v9231_v42 = vpop.f32.mrb[59].mxu0 }
 0x804   : > { %v9354_v61 = vadd.f32 %v9322_v52, %v15007_v19  ;;  %v9323_v43 = vadd.f32 %v14800_v59, %v9231_v42 }
 0x805   : > { %9388 = vst.msk [vmem:[%s14808_s19 + $0xd0] sm:$0xff] %vm280_vm0, %v9356_v21  ;;  %v9357_v35 = vadd.f32 %v9325_v13, %v15008_v0 }
 0x806   : > { %9386 = vst.msk [vmem:[%s14808_s19 + $0xc0] sm:$0xff] %vm280_vm0, %v9354_v61  ;;  %v9355_v24 = vadd.f32 %v9323_v43, %v15009_v45 }
 0x807   : > { %9389 = vst.msk [vmem:[%s14808_s19 + $0xd8] sm:$0xff] %vm280_vm0, %v9357_v35 }
 0x808   : > { %9387 = vst.msk [vmem:[%s14808_s19 + $0xc8] sm:$0xff] %vm280_vm0, %v9355_v24  ;;  %v11815_v22 = vpop.f32.mrb[60].mxu0 }
 0x809   : > { %v9328_v32 = vadd.f32 %v11815_v22, %v14800_v59  ;;  %v9244_v34 = vpop.f32.mrb[61].mxu0 }
 0x80a   : > { %v9326_v60 = vadd.f32 %v14800_v59, %v9244_v34  ;;  %v11816_v49 = vpop.f32.mrb[62].mxu0 }
 0x80b   : > { %v9360_v30 = vadd.f32 %v9328_v32, %v15010_v28  ;;  %v9329_v25 = vadd.f32 %v11816_v49, %v14800_v59  ;;  %v9247_v1 = vpop.f32.mrb[63].mxu0 }
 0x80c   : > { %v9358_v16 = vadd.f32 %v9326_v60, %v15011_v12  ;;  %v9327_v51 = vadd.f32 %v14800_v59, %v9247_v1 }
 0x80d   : > { %9392 = vst.msk [vmem:[%s14808_s19 + $0xf0] sm:$0xff] %vm280_vm0, %v9360_v30  ;;  %v9361_v31 = vadd.f32 %v9329_v25, %v15012_v46 }
 0x80e   : > { %9390 = vst.msk [vmem:[%s14808_s19 + $0xe0] sm:$0xff] %vm280_vm0, %v9358_v16  ;;  %v9359_v63 = vadd.f32 %v9327_v51, %v15013_v29 }
 0x80f   : > { %9393 = vst.msk [vmem:[%s14808_s19 + $0xf8] sm:$0xff] %vm280_vm0, %v9361_v31 }
 0x810   : > { %9391 = vst.msk [vmem:[%s14808_s19 + $0xe8] sm:$0xff] %vm280_vm0, %v9359_v63 }
 0x811 PF: > { %s17_s24 = sadd.s32 1, %s12720_s24  }
 0x812   : > { %p14_p4 = scmp.ge.s32.totalorder %s17_s24, 4  }
 0x814   :  { %16 = sbr.rel (!%p14_p4) target bundleno = 1 (0x1), region = 106 }

</bundles_post_ra>
